<compile_context>
chip_gen: v7x
topology: tpu7x:2x2x1
jax: 0.10.0
libtpu: 0.0.40
codegen_flags: <defaults>
</compile_context>

<pallas_src>
import functools
import math

import jax
import jax.numpy as jnp
from jax.experimental import pallas as pl
from jax.experimental.pallas import tpu as pltpu

# ---------------------------------------------------------------------------
# Model dimensions (faithful to the module's globals, small batch/seq).
# ---------------------------------------------------------------------------
D_MODEL = 512
NUM_HEADS = 8
D_FF = 2048
BATCH = 2
SEQ = 8
LN_EPS = 1e-5   # nn.LayerNorm default


def _layer_norm(v, gamma, beta, eps=LN_EPS):
    mu = jnp.mean(v, axis=-1, keepdims=True)
    var = jnp.mean((v - mu) ** 2, axis=-1, keepdims=True)
    return (v - mu) * jax.lax.rsqrt(var + eps) * gamma + beta


def encoder_kernel(
    x_ref, mask_ref,
    wq_ref, bq_ref, wk_ref, bk_ref, wv_ref, bv_ref, wo_ref, bo_ref,
    g1_ref, be1_ref,
    w1_ref, bf1_ref, w2_ref, bf2_ref,
    g2_ref, be2_ref,
    out_ref,
    *, num_heads: int,
):
    f32 = jnp.float32
    x = x_ref[...]                       # (B*S, D) float32
    mask2d = mask_ref[...]               # (B*S, B*S) float32; 1 = keep, 0 = mask
    BS, D = x.shape
    d_k = D // num_heads
    scale = 1.0 / math.sqrt(d_k)

    # Weights arrive as bf16 (half the HBM/VMEM bytes); compute in f32.
    wq = wq_ref[...].astype(f32)
    wk = wk_ref[...].astype(f32)
    wv = wv_ref[...].astype(f32)
    wo = wo_ref[...].astype(f32)

    # --- QKV projections: single M = B*S, lane-dense matmuls ---
    q = jnp.dot(x, wq, preferred_element_type=f32) + bq_ref[...]
    k = jnp.dot(x, wk, preferred_element_type=f32) + bk_ref[...]
    v = jnp.dot(x, wv, preferred_element_type=f32) + bv_ref[...]

    def split_heads(t):  # (B*S, D) -> (H, B*S, d_k) via static lane slices
        return jnp.stack(
            [t[:, h * d_k:(h + 1) * d_k] for h in range(num_heads)], axis=0)

    qh = split_heads(q)
    kh = split_heads(k)
    vh = split_heads(v)

    # --- heads-batched scaled dot-product attention over flattened rows ---
    # Cross-batch pairs and user-masked key positions are removed by mask2d.
    scores = jnp.einsum("hqd,hkd->hqk", qh, kh,
                        preferred_element_type=f32) * scale      # (H, BS, BS)
    keep = jnp.broadcast_to(mask2d[None, :, :], scores.shape) != 0.0
    scores = jnp.where(keep, scores, jnp.float32(-1e9))          # masked_fill
    scores = scores - jnp.max(scores, axis=-1, keepdims=True)
    p = jnp.exp(scores)
    p = p * pl.reciprocal(jnp.sum(p, axis=-1, keepdims=True), approx=True)
    ctx = jnp.einsum("hqk,hkd->hqd", p, vh,
                     preferred_element_type=f32)                 # (H, BS, d_k)

    # Combine heads back onto the lane dimension: (B*S, D).
    attn = jnp.concatenate([ctx[h] for h in range(num_heads)], axis=-1)

    # --- output projection + residual + LayerNorm 1 ---
    attn_out = jnp.dot(attn, wo, preferred_element_type=f32) + bo_ref[...]
    x1 = _layer_norm(x + attn_out, g1_ref[...], be1_ref[...])

    # --- position-wise feed-forward + residual + LayerNorm 2 ---
    w1 = w1_ref[...].astype(f32)
    w2 = w2_ref[...].astype(f32)
    hid = jnp.maximum(jnp.dot(x1, w1, preferred_element_type=f32) + bf1_ref[...], 0.0)
    ff = jnp.dot(hid, w2, preferred_element_type=f32) + bf2_ref[...]
    out_ref[...] = _layer_norm(x1 + ff, g2_ref[...], be2_ref[...])


def encoder_layer_pallas(x, mask, params, num_heads=NUM_HEADS):
    B, S, D = x.shape
    d_ff = params["w1"].shape[1]
    BS = B * S

    # Flatten batch*seq into one matmul M dimension.
    x2d = x.reshape(BS, D).astype(jnp.float32)

    # Block-diagonal (B*S, B*S) key mask: the user mask inside each batch's
    # block, zeros (masked) across batches.  Head dimension is broadcast.
    m4 = jnp.broadcast_to(mask.astype(jnp.float32), (B, 1, S, S))
    mask_full = jnp.zeros((BS, BS), jnp.float32)
    for b in range(B):
        mask_full = mask_full.at[b * S:(b + 1) * S, b * S:(b + 1) * S].set(m4[b, 0])

    # Store the big weight matrices in bf16 (HBM/VMEM bytes halved).
    bf16 = jnp.bfloat16
    w = {n: params[n].astype(bf16) for n in ("wq", "wk", "wv", "wo", "w1", "w2")}

    full = lambda shape: pl.BlockSpec(shape, lambda i, _s=shape: (0,) * len(_s))

    in_specs = [
        full((BS, D)),                          # x (flattened)
        full((BS, BS)),                         # block-diagonal 0/1 mask
        full((D, D)), full((1, D)),             # W_q, b_q
        full((D, D)), full((1, D)),             # W_k, b_k
        full((D, D)), full((1, D)),             # W_v, b_v
        full((D, D)), full((1, D)),             # W_o, b_o
        full((1, D)), full((1, D)),             # gamma1, beta1
        full((D, d_ff)), full((1, d_ff)),       # W1, b1
        full((d_ff, D)), full((1, D)),          # W2, b2
        full((1, D)), full((1, D)),             # gamma2, beta2
    ]

    kernel = functools.partial(encoder_kernel, num_heads=num_heads)

    out2d = pl.pallas_call(
        kernel,
        out_shape=jax.ShapeDtypeStruct((BS, D), jnp.float32),
        grid_spec=pltpu.PrefetchScalarGridSpec(
            num_scalar_prefetch=0,
            grid=(1,),                          # single fused step
            in_specs=in_specs,
            out_specs=full((BS, D)),
        ),
        compiler_params=pltpu.CompilerParams(
            dimension_semantics=("arbitrary",),
            vmem_limit_bytes=40 << 20,          # fits v7x's 64 MiB physical VMEM
        ),
    )(
        x2d, mask_full,
        w["wq"], params["bq"], w["wk"], params["bk"],
        w["wv"], params["bv"], w["wo"], params["bo"],
        params["g1"], params["be1"],
        w["w1"], params["bf1"], w["w2"], params["bf2"],
        params["g2"], params["be2"],
    )
    return out2d.reshape(B, S, D)


# ---------------------------------------------------------------------------
# Pure-JAX reference (mirrors the PyTorch forward, dropout = identity).
# ---------------------------------------------------------------------------
def encoder_layer_ref(x, mask, params, num_heads=NUM_HEADS):
    B, S, D = x.shape
    d_k = D // num_heads

    def linear(v, w, b):
        return v @ w + b

    q = linear(x, params["wq"], params["bq"])
    k = linear(x, params["wk"], params["bk"])
    v = linear(x, params["wv"], params["bv"])

    def split(t):  # (B,S,D) -> (B,H,S,dk)
        return t.reshape(B, S, num_heads, d_k).transpose(0, 2, 1, 3)

    qh, kh, vh = split(q), split(k), split(v)
    scores = jnp.einsum("bhqd,bhkd->bhqk", qh, kh) / math.sqrt(d_k)
    scores = jnp.where(mask == 0, -1e9, scores)
    probs = jax.nn.softmax(scores, axis=-1)
    attn = jnp.einsum("bhqk,bhkd->bhqd", probs, vh)
    attn = attn.transpose(0, 2, 1, 3).reshape(B, S, D)
    attn_out = linear(attn, params["wo"], params["bo"])

    x1 = _layer_norm(x + attn_out, params["g1"], params["be1"])
    hid = jnp.maximum(linear(x1, params["w1"], params["bf1"]), 0.0)
    ff = linear(hid, params["w2"], params["bf2"])
    return _layer_norm(x1 + ff, params["g2"], params["be2"])


def init_params(key, d_model=D_MODEL, d_ff=D_FF):
    keys = jax.random.split(key, 16)
    n = lambda k, shape, s=0.02: (s * jax.random.normal(k, shape)).astype(jnp.float32)
    return {
        "wq": n(keys[0], (d_model, d_model)), "bq": n(keys[1], (1, d_model)),
        "wk": n(keys[2], (d_model, d_model)), "bk": n(keys[3], (1, d_model)),
        "wv": n(keys[4], (d_model, d_model)), "bv": n(keys[5], (1, d_model)),
        "wo": n(keys[6], (d_model, d_model)), "bo": n(keys[7], (1, d_model)),
        "g1": 1.0 + n(keys[8], (1, d_model), 0.1), "be1": n(keys[9], (1, d_model), 0.1),
        "w1": n(keys[10], (d_model, d_ff)), "bf1": n(keys[11], (1, d_ff)),
        "w2": n(keys[12], (d_ff, d_model)), "bf2": n(keys[13], (1, d_model)),
        "g2": 1.0 + n(keys[14], (1, d_model), 0.1), "be2": n(keys[15], (1, d_model), 0.1),
    }


if __name__ == "__main__":
    key = jax.random.PRNGKey(0)
    k_x, k_p = jax.random.split(key)

    x = jax.random.normal(k_x, (BATCH, SEQ, D_MODEL), dtype=jnp.float32)
    # Padding-style mask: last two key positions are masked out.
    mask = jnp.ones((BATCH, 1, SEQ, SEQ), dtype=jnp.float32)
    mask = mask.at[:, :, :, -2:].set(0.0)

    params = init_params(k_p)

    out = encoder_layer_pallas(x, mask, params)
    out = jax.block_until_ready(out)

    ref = jax.block_until_ready(encoder_layer_ref(x, mask, params))
    assert out.shape == (BATCH, SEQ, D_MODEL)
    assert jnp.allclose(out, ref, atol=2e-2, rtol=2e-2), float(
        jnp.max(jnp.abs(out - ref))
    )
    print("KERNEL_OK")
</pallas_src>

<mosaic_0001>
module attributes {stable_mosaic.version = 11 : i64} {
  func.func @encoder_kernel(%arg0: i32, %arg1: memref<16x512xf32, #tpu.memory_space<vmem>>, %arg2: memref<16x16xf32, #tpu.memory_space<vmem>>, %arg3: memref<512x512xbf16, #tpu.memory_space<vmem>>, %arg4: memref<1x512xf32, #tpu.memory_space<vmem>>, %arg5: memref<512x512xbf16, #tpu.memory_space<vmem>>, %arg6: memref<1x512xf32, #tpu.memory_space<vmem>>, %arg7: memref<512x512xbf16, #tpu.memory_space<vmem>>, %arg8: memref<1x512xf32, #tpu.memory_space<vmem>>, %arg9: memref<512x512xbf16, #tpu.memory_space<vmem>>, %arg10: memref<1x512xf32, #tpu.memory_space<vmem>>, %arg11: memref<1x512xf32, #tpu.memory_space<vmem>>, %arg12: memref<1x512xf32, #tpu.memory_space<vmem>>, %arg13: memref<512x2048xbf16, #tpu.memory_space<vmem>>, %arg14: memref<1x2048xf32, #tpu.memory_space<vmem>>, %arg15: memref<2048x512xbf16, #tpu.memory_space<vmem>>, %arg16: memref<1x512xf32, #tpu.memory_space<vmem>>, %arg17: memref<1x512xf32, #tpu.memory_space<vmem>>, %arg18: memref<1x512xf32, #tpu.memory_space<vmem>>, %arg19: memref<16x512xf32, #tpu.memory_space<vmem>>) attributes {dimension_semantics = [#tpu.dimension_semantics<arbitrary>], iteration_bounds = array<i64: 1>, scalar_prefetch = 0 : i64, scratch_operands = 0 : i64, tpu.core_type = #tpu.core_type<tc>, window_params = [{pipeline_mode = #tpu.pipeline_mode<synchronous>, transform_indices = @transform_0, window_bounds = array<i64: 16, 512>}, {pipeline_mode = #tpu.pipeline_mode<synchronous>, transform_indices = @transform_1, window_bounds = array<i64: 16, 16>}, {pipeline_mode = #tpu.pipeline_mode<synchronous>, transform_indices = @transform_2, window_bounds = array<i64: 512, 512>}, {pipeline_mode = #tpu.pipeline_mode<synchronous>, transform_indices = @transform_3, window_bounds = array<i64: 1, 512>}, {pipeline_mode = #tpu.pipeline_mode<synchronous>, transform_indices = @transform_4, window_bounds = array<i64: 512, 512>}, {pipeline_mode = #tpu.pipeline_mode<synchronous>, transform_indices = @transform_5, window_bounds = array<i64: 1, 512>}, {pipeline_mode = #tpu.pipeline_mode<synchronous>, transform_indices = @transform_6, window_bounds = array<i64: 512, 512>}, {pipeline_mode = #tpu.pipeline_mode<synchronous>, transform_indices = @transform_7, window_bounds = array<i64: 1, 512>}, {pipeline_mode = #tpu.pipeline_mode<synchronous>, transform_indices = @transform_8, window_bounds = array<i64: 512, 512>}, {pipeline_mode = #tpu.pipeline_mode<synchronous>, transform_indices = @transform_9, window_bounds = array<i64: 1, 512>}, {pipeline_mode = #tpu.pipeline_mode<synchronous>, transform_indices = @transform_10, window_bounds = array<i64: 1, 512>}, {pipeline_mode = #tpu.pipeline_mode<synchronous>, transform_indices = @transform_11, window_bounds = array<i64: 1, 512>}, {pipeline_mode = #tpu.pipeline_mode<synchronous>, transform_indices = @transform_12, window_bounds = array<i64: 512, 2048>}, {pipeline_mode = #tpu.pipeline_mode<synchronous>, transform_indices = @transform_13, window_bounds = array<i64: 1, 2048>}, {pipeline_mode = #tpu.pipeline_mode<synchronous>, transform_indices = @transform_14, window_bounds = array<i64: 2048, 512>}, {pipeline_mode = #tpu.pipeline_mode<synchronous>, transform_indices = @transform_15, window_bounds = array<i64: 1, 512>}, {pipeline_mode = #tpu.pipeline_mode<synchronous>, transform_indices = @transform_16, window_bounds = array<i64: 1, 512>}, {pipeline_mode = #tpu.pipeline_mode<synchronous>, transform_indices = @transform_17, window_bounds = array<i64: 1, 512>}, {pipeline_mode = #tpu.pipeline_mode<synchronous>, transform_indices = @transform_18, window_bounds = array<i64: 16, 512>}]} {
    %c0 = arith.constant 0 : index
    %c0_0 = arith.constant 0 : index
    %0 = vector.load %arg1[%c0, %c0_0] : memref<16x512xf32, #tpu.memory_space<vmem>>, vector<16x512xf32>
    %c0_1 = arith.constant 0 : index
    %c0_2 = arith.constant 0 : index
    %1 = vector.load %arg2[%c0_1, %c0_2] : memref<16x16xf32, #tpu.memory_space<vmem>>, vector<16x16xf32>
    %c0_3 = arith.constant 0 : index
    %c0_4 = arith.constant 0 : index
    %2 = vector.load %arg3[%c0_3, %c0_4] : memref<512x512xbf16, #tpu.memory_space<vmem>>, vector<512x512xbf16>
    %3 = arith.extf %2 : vector<512x512xbf16> to vector<512x512xf32>
    %c0_5 = arith.constant 0 : index
    %c0_6 = arith.constant 0 : index
    %4 = vector.load %arg5[%c0_5, %c0_6] : memref<512x512xbf16, #tpu.memory_space<vmem>>, vector<512x512xbf16>
    %5 = arith.extf %4 : vector<512x512xbf16> to vector<512x512xf32>
    %c0_7 = arith.constant 0 : index
    %c0_8 = arith.constant 0 : index
    %6 = vector.load %arg7[%c0_7, %c0_8] : memref<512x512xbf16, #tpu.memory_space<vmem>>, vector<512x512xbf16>
    %7 = arith.extf %6 : vector<512x512xbf16> to vector<512x512xf32>
    %c0_9 = arith.constant 0 : index
    %c0_10 = arith.constant 0 : index
    %8 = vector.load %arg9[%c0_9, %c0_10] : memref<512x512xbf16, #tpu.memory_space<vmem>>, vector<512x512xbf16>
    %9 = arith.extf %8 : vector<512x512xbf16> to vector<512x512xf32>
    %cst = arith.constant dense<0.000000e+00> : vector<16x512xf32>
    %10 = tpu.matmul %0, %3, %cst {dimension_numbers = #tpu.dot_dimension_numbers<[1], [0], [0], [1], [0, 0, 1, 1], [], []>} : vector<16x512xf32>, vector<512x512xf32>, vector<16x512xf32> -> vector<16x512xf32>
    %c0_11 = arith.constant 0 : index
    %c0_12 = arith.constant 0 : index
    %11 = vector.load %arg4[%c0_11, %c0_12] : memref<1x512xf32, #tpu.memory_space<vmem>>, vector<1x512xf32>
    %12 = vector.broadcast %11 : vector<1x512xf32> to vector<16x512xf32>
    %13 = arith.addf %10, %12 : vector<16x512xf32>
    %cst_13 = arith.constant dense<0.000000e+00> : vector<16x512xf32>
    %14 = tpu.matmul %0, %5, %cst_13 {dimension_numbers = #tpu.dot_dimension_numbers<[1], [0], [0], [1], [0, 0, 1, 1], [], []>} : vector<16x512xf32>, vector<512x512xf32>, vector<16x512xf32> -> vector<16x512xf32>
    %c0_14 = arith.constant 0 : index
    %c0_15 = arith.constant 0 : index
    %15 = vector.load %arg6[%c0_14, %c0_15] : memref<1x512xf32, #tpu.memory_space<vmem>>, vector<1x512xf32>
    %16 = vector.broadcast %15 : vector<1x512xf32> to vector<16x512xf32>
    %17 = arith.addf %14, %16 : vector<16x512xf32>
    %cst_16 = arith.constant dense<0.000000e+00> : vector<16x512xf32>
    %18 = tpu.matmul %0, %7, %cst_16 {dimension_numbers = #tpu.dot_dimension_numbers<[1], [0], [0], [1], [0, 0, 1, 1], [], []>} : vector<16x512xf32>, vector<512x512xf32>, vector<16x512xf32> -> vector<16x512xf32>
    %c0_17 = arith.constant 0 : index
    %c0_18 = arith.constant 0 : index
    %19 = vector.load %arg8[%c0_17, %c0_18] : memref<1x512xf32, #tpu.memory_space<vmem>>, vector<1x512xf32>
    %20 = vector.broadcast %19 : vector<1x512xf32> to vector<16x512xf32>
    %21 = arith.addf %18, %20 : vector<16x512xf32>
    %22 = vector.extract_strided_slice %13 {offsets = [0, 0], sizes = [16, 64], strides = [1, 1]} : vector<16x512xf32> to vector<16x64xf32>
    %23 = vector.extract_strided_slice %13 {offsets = [0, 64], sizes = [16, 64], strides = [1, 1]} : vector<16x512xf32> to vector<16x64xf32>
    %24 = vector.extract_strided_slice %13 {offsets = [0, 128], sizes = [16, 64], strides = [1, 1]} : vector<16x512xf32> to vector<16x64xf32>
    %25 = vector.extract_strided_slice %13 {offsets = [0, 192], sizes = [16, 64], strides = [1, 1]} : vector<16x512xf32> to vector<16x64xf32>
    %26 = vector.extract_strided_slice %13 {offsets = [0, 256], sizes = [16, 64], strides = [1, 1]} : vector<16x512xf32> to vector<16x64xf32>
    %27 = vector.extract_strided_slice %13 {offsets = [0, 320], sizes = [16, 64], strides = [1, 1]} : vector<16x512xf32> to vector<16x64xf32>
    %28 = vector.extract_strided_slice %13 {offsets = [0, 384], sizes = [16, 64], strides = [1, 1]} : vector<16x512xf32> to vector<16x64xf32>
    %29 = vector.extract_strided_slice %13 {offsets = [0, 448], sizes = [16, 64], strides = [1, 1]} : vector<16x512xf32> to vector<16x64xf32>
    %30 = vector.shape_cast %22 : vector<16x64xf32> to vector<1x16x64xf32>
    %31 = vector.shape_cast %23 : vector<16x64xf32> to vector<1x16x64xf32>
    %32 = vector.shape_cast %24 : vector<16x64xf32> to vector<1x16x64xf32>
    %33 = vector.shape_cast %25 : vector<16x64xf32> to vector<1x16x64xf32>
    %34 = vector.shape_cast %26 : vector<16x64xf32> to vector<1x16x64xf32>
    %35 = vector.shape_cast %27 : vector<16x64xf32> to vector<1x16x64xf32>
    %36 = vector.shape_cast %28 : vector<16x64xf32> to vector<1x16x64xf32>
    %37 = vector.shape_cast %29 : vector<16x64xf32> to vector<1x16x64xf32>
    %38 = tpu.concatenate %30, %31, %32, %33, %34, %35, %36, %37 in 0 : vector<1x16x64xf32>, vector<1x16x64xf32>, vector<1x16x64xf32>, vector<1x16x64xf32>, vector<1x16x64xf32>, vector<1x16x64xf32>, vector<1x16x64xf32>, vector<1x16x64xf32> -> vector<8x16x64xf32>
    %39 = vector.extract_strided_slice %17 {offsets = [0, 0], sizes = [16, 64], strides = [1, 1]} : vector<16x512xf32> to vector<16x64xf32>
    %40 = vector.extract_strided_slice %17 {offsets = [0, 64], sizes = [16, 64], strides = [1, 1]} : vector<16x512xf32> to vector<16x64xf32>
    %41 = vector.extract_strided_slice %17 {offsets = [0, 128], sizes = [16, 64], strides = [1, 1]} : vector<16x512xf32> to vector<16x64xf32>
    %42 = vector.extract_strided_slice %17 {offsets = [0, 192], sizes = [16, 64], strides = [1, 1]} : vector<16x512xf32> to vector<16x64xf32>
    %43 = vector.extract_strided_slice %17 {offsets = [0, 256], sizes = [16, 64], strides = [1, 1]} : vector<16x512xf32> to vector<16x64xf32>
    %44 = vector.extract_strided_slice %17 {offsets = [0, 320], sizes = [16, 64], strides = [1, 1]} : vector<16x512xf32> to vector<16x64xf32>
    %45 = vector.extract_strided_slice %17 {offsets = [0, 384], sizes = [16, 64], strides = [1, 1]} : vector<16x512xf32> to vector<16x64xf32>
    %46 = vector.extract_strided_slice %17 {offsets = [0, 448], sizes = [16, 64], strides = [1, 1]} : vector<16x512xf32> to vector<16x64xf32>
    %47 = vector.shape_cast %39 : vector<16x64xf32> to vector<1x16x64xf32>
    %48 = vector.shape_cast %40 : vector<16x64xf32> to vector<1x16x64xf32>
    %49 = vector.shape_cast %41 : vector<16x64xf32> to vector<1x16x64xf32>
    %50 = vector.shape_cast %42 : vector<16x64xf32> to vector<1x16x64xf32>
    %51 = vector.shape_cast %43 : vector<16x64xf32> to vector<1x16x64xf32>
    %52 = vector.shape_cast %44 : vector<16x64xf32> to vector<1x16x64xf32>
    %53 = vector.shape_cast %45 : vector<16x64xf32> to vector<1x16x64xf32>
    %54 = vector.shape_cast %46 : vector<16x64xf32> to vector<1x16x64xf32>
    %55 = tpu.concatenate %47, %48, %49, %50, %51, %52, %53, %54 in 0 : vector<1x16x64xf32>, vector<1x16x64xf32>, vector<1x16x64xf32>, vector<1x16x64xf32>, vector<1x16x64xf32>, vector<1x16x64xf32>, vector<1x16x64xf32>, vector<1x16x64xf32> -> vector<8x16x64xf32>
    %56 = vector.extract_strided_slice %21 {offsets = [0, 0], sizes = [16, 64], strides = [1, 1]} : vector<16x512xf32> to vector<16x64xf32>
    %57 = vector.extract_strided_slice %21 {offsets = [0, 64], sizes = [16, 64], strides = [1, 1]} : vector<16x512xf32> to vector<16x64xf32>
    %58 = vector.extract_strided_slice %21 {offsets = [0, 128], sizes = [16, 64], strides = [1, 1]} : vector<16x512xf32> to vector<16x64xf32>
    %59 = vector.extract_strided_slice %21 {offsets = [0, 192], sizes = [16, 64], strides = [1, 1]} : vector<16x512xf32> to vector<16x64xf32>
    %60 = vector.extract_strided_slice %21 {offsets = [0, 256], sizes = [16, 64], strides = [1, 1]} : vector<16x512xf32> to vector<16x64xf32>
    %61 = vector.extract_strided_slice %21 {offsets = [0, 320], sizes = [16, 64], strides = [1, 1]} : vector<16x512xf32> to vector<16x64xf32>
    %62 = vector.extract_strided_slice %21 {offsets = [0, 384], sizes = [16, 64], strides = [1, 1]} : vector<16x512xf32> to vector<16x64xf32>
    %63 = vector.extract_strided_slice %21 {offsets = [0, 448], sizes = [16, 64], strides = [1, 1]} : vector<16x512xf32> to vector<16x64xf32>
    %64 = vector.shape_cast %56 : vector<16x64xf32> to vector<1x16x64xf32>
    %65 = vector.shape_cast %57 : vector<16x64xf32> to vector<1x16x64xf32>
    %66 = vector.shape_cast %58 : vector<16x64xf32> to vector<1x16x64xf32>
    %67 = vector.shape_cast %59 : vector<16x64xf32> to vector<1x16x64xf32>
    %68 = vector.shape_cast %60 : vector<16x64xf32> to vector<1x16x64xf32>
    %69 = vector.shape_cast %61 : vector<16x64xf32> to vector<1x16x64xf32>
    %70 = vector.shape_cast %62 : vector<16x64xf32> to vector<1x16x64xf32>
    %71 = vector.shape_cast %63 : vector<16x64xf32> to vector<1x16x64xf32>
    %72 = tpu.concatenate %64, %65, %66, %67, %68, %69, %70, %71 in 0 : vector<1x16x64xf32>, vector<1x16x64xf32>, vector<1x16x64xf32>, vector<1x16x64xf32>, vector<1x16x64xf32>, vector<1x16x64xf32>, vector<1x16x64xf32>, vector<1x16x64xf32> -> vector<8x16x64xf32>
    "tpu.trace_start"() <{level = 10 : i32, message = "hqd,hkd->hqk"}> : () -> ()
    %cst_19 = arith.constant dense<0.000000e+00> : vector<8x16x16xf32>
    %73 = tpu.matmul %38, %55, %cst_19 {dimension_numbers = #tpu.dot_dimension_numbers<[2], [2], [1], [1], [0, 0, 0, 1, 1, 1], [0], [0]>} : vector<8x16x64xf32>, vector<8x16x64xf32>, vector<8x16x16xf32> -> vector<8x16x16xf32>
    "tpu.trace_stop"() : () -> ()
    %cst_20 = arith.constant 1.250000e-01 : f32
    %74 = vector.broadcast %cst_20 : f32 to vector<8x16x16xf32>
    %75 = arith.mulf %73, %74 : vector<8x16x16xf32>
    %76 = vector.shape_cast %1 : vector<16x16xf32> to vector<1x16x16xf32>
    %77 = vector.shape_cast %76 : vector<1x16x16xf32> to vector<1x16x16xf32>
    %78 = vector.broadcast %77 : vector<1x16x16xf32> to vector<8x16x16xf32>
    %cst_21 = arith.constant 0.000000e+00 : f32
    %79 = vector.broadcast %cst_21 : f32 to vector<8x16x16xf32>
    %80 = arith.cmpf one, %78, %79 : vector<8x16x16xf32>
    %cst_22 = arith.constant -1.000000e+09 : f32
    %81 = vector.broadcast %cst_22 : f32 to vector<8x16x16xf32>
    %82 = arith.select %80, %75, %81 : vector<8x16x16xi1>, vector<8x16x16xf32>
    %cst_23 = arith.constant dense<0xFF800000> : vector<8x16xf32>
    %83 = vector.multi_reduction <maximumf>, %82, %cst_23 [2] : vector<8x16x16xf32> to vector<8x16xf32>
    %84 = vector.shape_cast %83 : vector<8x16xf32> to vector<8x16x1xf32>
    %85 = vector.broadcast %84 : vector<8x16x1xf32> to vector<8x16x16xf32>
    %86 = arith.subf %82, %85 : vector<8x16x16xf32>
    %87 = math.exp %86 : vector<8x16x16xf32>
    %cst_24 = arith.constant dense<0.000000e+00> : vector<8x16xf32>
    %88 = vector.multi_reduction <add>, %87, %cst_24 [2] : vector<8x16x16xf32> to vector<8x16xf32>
    %89 = vector.shape_cast %88 : vector<8x16xf32> to vector<8x16x1xf32>
    %90 = tpu.reciprocal %89 {approx = true} : vector<8x16x1xf32> -> vector<8x16x1xf32>
    %91 = vector.broadcast %90 : vector<8x16x1xf32> to vector<8x16x16xf32>
    %92 = arith.mulf %87, %91 : vector<8x16x16xf32>
    "tpu.trace_start"() <{level = 10 : i32, message = "hqk,hkd->hqd"}> : () -> ()
    %cst_25 = arith.constant dense<0.000000e+00> : vector<8x16x64xf32>
    %93 = tpu.matmul %92, %72, %cst_25 {dimension_numbers = #tpu.dot_dimension_numbers<[2], [1], [1], [2], [0, 0, 0, 1, 1, 2], [0], [0]>} : vector<8x16x16xf32>, vector<8x16x64xf32>, vector<8x16x64xf32> -> vector<8x16x64xf32>
    "tpu.trace_stop"() : () -> ()
    %94 = vector.extract_strided_slice %93 {offsets = [0, 0, 0], sizes = [1, 16, 64], strides = [1, 1, 1]} : vector<8x16x64xf32> to vector<1x16x64xf32>
    %95 = vector.shape_cast %94 : vector<1x16x64xf32> to vector<16x64xf32>
    %96 = vector.extract_strided_slice %93 {offsets = [1, 0, 0], sizes = [1, 16, 64], strides = [1, 1, 1]} : vector<8x16x64xf32> to vector<1x16x64xf32>
    %97 = vector.shape_cast %96 : vector<1x16x64xf32> to vector<16x64xf32>
    %98 = vector.extract_strided_slice %93 {offsets = [2, 0, 0], sizes = [1, 16, 64], strides = [1, 1, 1]} : vector<8x16x64xf32> to vector<1x16x64xf32>
    %99 = vector.shape_cast %98 : vector<1x16x64xf32> to vector<16x64xf32>
    %100 = vector.extract_strided_slice %93 {offsets = [3, 0, 0], sizes = [1, 16, 64], strides = [1, 1, 1]} : vector<8x16x64xf32> to vector<1x16x64xf32>
    %101 = vector.shape_cast %100 : vector<1x16x64xf32> to vector<16x64xf32>
    %102 = vector.extract_strided_slice %93 {offsets = [4, 0, 0], sizes = [1, 16, 64], strides = [1, 1, 1]} : vector<8x16x64xf32> to vector<1x16x64xf32>
    %103 = vector.shape_cast %102 : vector<1x16x64xf32> to vector<16x64xf32>
    %104 = vector.extract_strided_slice %93 {offsets = [5, 0, 0], sizes = [1, 16, 64], strides = [1, 1, 1]} : vector<8x16x64xf32> to vector<1x16x64xf32>
    %105 = vector.shape_cast %104 : vector<1x16x64xf32> to vector<16x64xf32>
    %106 = vector.extract_strided_slice %93 {offsets = [6, 0, 0], sizes = [1, 16, 64], strides = [1, 1, 1]} : vector<8x16x64xf32> to vector<1x16x64xf32>
    %107 = vector.shape_cast %106 : vector<1x16x64xf32> to vector<16x64xf32>
    %108 = vector.extract_strided_slice %93 {offsets = [7, 0, 0], sizes = [1, 16, 64], strides = [1, 1, 1]} : vector<8x16x64xf32> to vector<1x16x64xf32>
    %109 = vector.shape_cast %108 : vector<1x16x64xf32> to vector<16x64xf32>
    %110 = tpu.concatenate %95, %97, %99, %101, %103, %105, %107, %109 in 1 : vector<16x64xf32>, vector<16x64xf32>, vector<16x64xf32>, vector<16x64xf32>, vector<16x64xf32>, vector<16x64xf32>, vector<16x64xf32>, vector<16x64xf32> -> vector<16x512xf32>
    %cst_26 = arith.constant dense<0.000000e+00> : vector<16x512xf32>
    %111 = tpu.matmul %110, %9, %cst_26 {dimension_numbers = #tpu.dot_dimension_numbers<[1], [0], [0], [1], [0, 0, 1, 1], [], []>} : vector<16x512xf32>, vector<512x512xf32>, vector<16x512xf32> -> vector<16x512xf32>
    %c0_27 = arith.constant 0 : index
    %c0_28 = arith.constant 0 : index
    %112 = vector.load %arg10[%c0_27, %c0_28] : memref<1x512xf32, #tpu.memory_space<vmem>>, vector<1x512xf32>
    %113 = vector.broadcast %112 : vector<1x512xf32> to vector<16x512xf32>
    %114 = arith.addf %111, %113 : vector<16x512xf32>
    %115 = arith.addf %0, %114 : vector<16x512xf32>
    %c0_29 = arith.constant 0 : index
    %c0_30 = arith.constant 0 : index
    %116 = vector.load %arg11[%c0_29, %c0_30] : memref<1x512xf32, #tpu.memory_space<vmem>>, vector<1x512xf32>
    %c0_31 = arith.constant 0 : index
    %c0_32 = arith.constant 0 : index
    %117 = vector.load %arg12[%c0_31, %c0_32] : memref<1x512xf32, #tpu.memory_space<vmem>>, vector<1x512xf32>
    %cst_33 = arith.constant dense<0.000000e+00> : vector<16xf32>
    %118 = vector.multi_reduction <add>, %115, %cst_33 [1] : vector<16x512xf32> to vector<16xf32>
    %119 = vector.shape_cast %118 : vector<16xf32> to vector<16x1xf32>
    %cst_34 = arith.constant 5.120000e+02 : f32
    %120 = vector.broadcast %cst_34 : f32 to vector<16x1xf32>
    %121 = arith.divf %119, %120 : vector<16x1xf32>
    %122 = vector.broadcast %121 : vector<16x1xf32> to vector<16x512xf32>
    %123 = arith.subf %115, %122 : vector<16x512xf32>
    %124 = arith.mulf %123, %123 : vector<16x512xf32>
    %cst_35 = arith.constant dense<0.000000e+00> : vector<16xf32>
    %125 = vector.multi_reduction <add>, %124, %cst_35 [1] : vector<16x512xf32> to vector<16xf32>
    %126 = vector.shape_cast %125 : vector<16xf32> to vector<16x1xf32>
    %cst_36 = arith.constant 5.120000e+02 : f32
    %127 = vector.broadcast %cst_36 : f32 to vector<16x1xf32>
    %128 = arith.divf %126, %127 : vector<16x1xf32>
    %129 = vector.broadcast %121 : vector<16x1xf32> to vector<16x512xf32>
    %130 = arith.subf %115, %129 : vector<16x512xf32>
    %cst_37 = arith.constant 9.99999974E-6 : f32
    %131 = vector.broadcast %cst_37 : f32 to vector<16x1xf32>
    %132 = arith.addf %128, %131 : vector<16x1xf32>
    %133 = math.rsqrt %132 : vector<16x1xf32>
    %134 = vector.broadcast %133 : vector<16x1xf32> to vector<16x512xf32>
    %135 = arith.mulf %130, %134 : vector<16x512xf32>
    %136 = vector.broadcast %116 : vector<1x512xf32> to vector<16x512xf32>
    %137 = arith.mulf %135, %136 : vector<16x512xf32>
    %138 = vector.broadcast %117 : vector<1x512xf32> to vector<16x512xf32>
    %139 = arith.addf %137, %138 : vector<16x512xf32>
    %c0_38 = arith.constant 0 : index
    %c0_39 = arith.constant 0 : index
    %140 = vector.load %arg13[%c0_38, %c0_39] : memref<512x2048xbf16, #tpu.memory_space<vmem>>, vector<512x2048xbf16>
    %141 = arith.extf %140 : vector<512x2048xbf16> to vector<512x2048xf32>
    %c0_40 = arith.constant 0 : index
    %c0_41 = arith.constant 0 : index
    %142 = vector.load %arg15[%c0_40, %c0_41] : memref<2048x512xbf16, #tpu.memory_space<vmem>>, vector<2048x512xbf16>
    %143 = arith.extf %142 : vector<2048x512xbf16> to vector<2048x512xf32>
    %cst_42 = arith.constant dense<0.000000e+00> : vector<16x2048xf32>
    %144 = tpu.matmul %139, %141, %cst_42 {dimension_numbers = #tpu.dot_dimension_numbers<[1], [0], [0], [1], [0, 0, 1, 1], [], []>} : vector<16x512xf32>, vector<512x2048xf32>, vector<16x2048xf32> -> vector<16x2048xf32>
    %c0_43 = arith.constant 0 : index
    %c0_44 = arith.constant 0 : index
    %145 = vector.load %arg14[%c0_43, %c0_44] : memref<1x2048xf32, #tpu.memory_space<vmem>>, vector<1x2048xf32>
    %146 = vector.broadcast %145 : vector<1x2048xf32> to vector<16x2048xf32>
    %147 = arith.addf %144, %146 : vector<16x2048xf32>
    %cst_45 = arith.constant 0.000000e+00 : f32
    %148 = vector.broadcast %cst_45 : f32 to vector<16x2048xf32>
    %149 = arith.maximumf %147, %148 : vector<16x2048xf32>
    %cst_46 = arith.constant dense<0.000000e+00> : vector<16x512xf32>
    %150 = tpu.matmul %149, %143, %cst_46 {dimension_numbers = #tpu.dot_dimension_numbers<[1], [0], [0], [1], [0, 0, 1, 1], [], []>} : vector<16x2048xf32>, vector<2048x512xf32>, vector<16x512xf32> -> vector<16x512xf32>
    %c0_47 = arith.constant 0 : index
    %c0_48 = arith.constant 0 : index
    %151 = vector.load %arg16[%c0_47, %c0_48] : memref<1x512xf32, #tpu.memory_space<vmem>>, vector<1x512xf32>
    %152 = vector.broadcast %151 : vector<1x512xf32> to vector<16x512xf32>
    %153 = arith.addf %150, %152 : vector<16x512xf32>
    %154 = arith.addf %139, %153 : vector<16x512xf32>
    %c0_49 = arith.constant 0 : index
    %c0_50 = arith.constant 0 : index
    %155 = vector.load %arg17[%c0_49, %c0_50] : memref<1x512xf32, #tpu.memory_space<vmem>>, vector<1x512xf32>
    %c0_51 = arith.constant 0 : index
    %c0_52 = arith.constant 0 : index
    %156 = vector.load %arg18[%c0_51, %c0_52] : memref<1x512xf32, #tpu.memory_space<vmem>>, vector<1x512xf32>
    %cst_53 = arith.constant dense<0.000000e+00> : vector<16xf32>
    %157 = vector.multi_reduction <add>, %154, %cst_53 [1] : vector<16x512xf32> to vector<16xf32>
    %158 = vector.shape_cast %157 : vector<16xf32> to vector<16x1xf32>
    %cst_54 = arith.constant 5.120000e+02 : f32
    %159 = vector.broadcast %cst_54 : f32 to vector<16x1xf32>
    %160 = arith.divf %158, %159 : vector<16x1xf32>
    %161 = vector.broadcast %160 : vector<16x1xf32> to vector<16x512xf32>
    %162 = arith.subf %154, %161 : vector<16x512xf32>
    %163 = arith.mulf %162, %162 : vector<16x512xf32>
    %cst_55 = arith.constant dense<0.000000e+00> : vector<16xf32>
    %164 = vector.multi_reduction <add>, %163, %cst_55 [1] : vector<16x512xf32> to vector<16xf32>
    %165 = vector.shape_cast %164 : vector<16xf32> to vector<16x1xf32>
    %cst_56 = arith.constant 5.120000e+02 : f32
    %166 = vector.broadcast %cst_56 : f32 to vector<16x1xf32>
    %167 = arith.divf %165, %166 : vector<16x1xf32>
    %168 = vector.broadcast %160 : vector<16x1xf32> to vector<16x512xf32>
    %169 = arith.subf %154, %168 : vector<16x512xf32>
    %cst_57 = arith.constant 9.99999974E-6 : f32
    %170 = vector.broadcast %cst_57 : f32 to vector<16x1xf32>
    %171 = arith.addf %167, %170 : vector<16x1xf32>
    %172 = math.rsqrt %171 : vector<16x1xf32>
    %173 = vector.broadcast %172 : vector<16x1xf32> to vector<16x512xf32>
    %174 = arith.mulf %169, %173 : vector<16x512xf32>
    %175 = vector.broadcast %155 : vector<1x512xf32> to vector<16x512xf32>
    %176 = arith.mulf %174, %175 : vector<16x512xf32>
    %177 = vector.broadcast %156 : vector<1x512xf32> to vector<16x512xf32>
    %178 = arith.addf %176, %177 : vector<16x512xf32>
    %c0_58 = arith.constant 0 : index
    %c0_59 = arith.constant 0 : index
    %179 = vector.load %arg19[%c0_58, %c0_59] : memref<16x512xf32, #tpu.memory_space<vmem>>, vector<16x512xf32>
    tpu.vector_store %arg19[%c0_58, %c0_59], %178 {strides = array<i32>} : memref<16x512xf32, #tpu.memory_space<vmem>>, vector<16x512xf32>,
    return
  }
  func.func @transform_0(%arg0: i32) -> (i32, i32) {
    %c0_i32 = arith.constant 0 : i32
    %c0_i32_0 = arith.constant 0 : i32
    %c0_i32_1 = arith.constant 0 : i32
    return %c0_i32, %c0_i32_0 : i32, i32
  }
  func.func @transform_1(%arg0: i32) -> (i32, i32) {
    %c0_i32 = arith.constant 0 : i32
    %c0_i32_0 = arith.constant 0 : i32
    %c0_i32_1 = arith.constant 0 : i32
    return %c0_i32, %c0_i32_0 : i32, i32
  }
  func.func @transform_2(%arg0: i32) -> (i32, i32) {
    %c0_i32 = arith.constant 0 : i32
    %c0_i32_0 = arith.constant 0 : i32
    %c0_i32_1 = arith.constant 0 : i32
    return %c0_i32, %c0_i32_0 : i32, i32
  }
  func.func @transform_3(%arg0: i32) -> (i32, i32) {
    %c0_i32 = arith.constant 0 : i32
    %c0_i32_0 = arith.constant 0 : i32
    %c0_i32_1 = arith.constant 0 : i32
    return %c0_i32, %c0_i32_0 : i32, i32
  }
  func.func @transform_4(%arg0: i32) -> (i32, i32) {
    %c0_i32 = arith.constant 0 : i32
    %c0_i32_0 = arith.constant 0 : i32
    %c0_i32_1 = arith.constant 0 : i32
    return %c0_i32, %c0_i32_0 : i32, i32
  }
  func.func @transform_5(%arg0: i32) -> (i32, i32) {
    %c0_i32 = arith.constant 0 : i32
    %c0_i32_0 = arith.constant 0 : i32
    %c0_i32_1 = arith.constant 0 : i32
    return %c0_i32, %c0_i32_0 : i32, i32
  }
  func.func @transform_6(%arg0: i32) -> (i32, i32) {
    %c0_i32 = arith.constant 0 : i32
    %c0_i32_0 = arith.constant 0 : i32
    %c0_i32_1 = arith.constant 0 : i32
    return %c0_i32, %c0_i32_0 : i32, i32
  }
  func.func @transform_7(%arg0: i32) -> (i32, i32) {
    %c0_i32 = arith.constant 0 : i32
    %c0_i32_0 = arith.constant 0 : i32
    %c0_i32_1 = arith.constant 0 : i32
    return %c0_i32, %c0_i32_0 : i32, i32
  }
  func.func @transform_8(%arg0: i32) -> (i32, i32) {
    %c0_i32 = arith.constant 0 : i32
    %c0_i32_0 = arith.constant 0 : i32
    %c0_i32_1 = arith.constant 0 : i32
    return %c0_i32, %c0_i32_0 : i32, i32
  }
  func.func @transform_9(%arg0: i32) -> (i32, i32) {
    %c0_i32 = arith.constant 0 : i32
    %c0_i32_0 = arith.constant 0 : i32
    %c0_i32_1 = arith.constant 0 : i32
    return %c0_i32, %c0_i32_0 : i32, i32
  }
  func.func @transform_10(%arg0: i32) -> (i32, i32) {
    %c0_i32 = arith.constant 0 : i32
    %c0_i32_0 = arith.constant 0 : i32
    %c0_i32_1 = arith.constant 0 : i32
    return %c0_i32, %c0_i32_0 : i32, i32
  }
  func.func @transform_11(%arg0: i32) -> (i32, i32) {
    %c0_i32 = arith.constant 0 : i32
    %c0_i32_0 = arith.constant 0 : i32
    %c0_i32_1 = arith.constant 0 : i32
    return %c0_i32, %c0_i32_0 : i32, i32
  }
  func.func @transform_12(%arg0: i32) -> (i32, i32) {
    %c0_i32 = arith.constant 0 : i32
    %c0_i32_0 = arith.constant 0 : i32
    %c0_i32_1 = arith.constant 0 : i32
    return %c0_i32, %c0_i32_0 : i32, i32
  }
  func.func @transform_13(%arg0: i32) -> (i32, i32) {
    %c0_i32 = arith.constant 0 : i32
    %c0_i32_0 = arith.constant 0 : i32
    %c0_i32_1 = arith.constant 0 : i32
    return %c0_i32, %c0_i32_0 : i32, i32
  }
  func.func @transform_14(%arg0: i32) -> (i32, i32) {
    %c0_i32 = arith.constant 0 : i32
    %c0_i32_0 = arith.constant 0 : i32
    %c0_i32_1 = arith.constant 0 : i32
    return %c0_i32, %c0_i32_0 : i32, i32
  }
  func.func @transform_15(%arg0: i32) -> (i32, i32) {
    %c0_i32 = arith.constant 0 : i32
    %c0_i32_0 = arith.constant 0 : i32
    %c0_i32_1 = arith.constant 0 : i32
    return %c0_i32, %c0_i32_0 : i32, i32
  }
  func.func @transform_16(%arg0: i32) -> (i32, i32) {
    %c0_i32 = arith.constant 0 : i32
    %c0_i32_0 = arith.constant 0 : i32
    %c0_i32_1 = arith.constant 0 : i32
    return %c0_i32, %c0_i32_0 : i32, i32
  }
  func.func @transform_17(%arg0: i32) -> (i32, i32) {
    %c0_i32 = arith.constant 0 : i32
    %c0_i32_0 = arith.constant 0 : i32
    %c0_i32_1 = arith.constant 0 : i32
    return %c0_i32, %c0_i32_0 : i32, i32
  }
  func.func @transform_18(%arg0: i32) -> (i32, i32) {
    %c0_i32 = arith.constant 0 : i32
    %c0_i32_0 = arith.constant 0 : i32
    %c0_i32_1 = arith.constant 0 : i32
    return %c0_i32, %c0_i32_0 : i32, i32
  }
}

</mosaic_0001>

<bundles_post_ra>
// kernel: tpu_custom_call.1
= control target key start
LH: loop header
LB: loop body
LE: loop exit
PB: predicated region body
PF: predicated region fallthrough
CT: control target
= control target key end

     0   :  { %s19188_s0 = inlined_call_operand.hbm [shape: f32[16,512], index: 0, kind: input, shape index: {}]   ;;  %s19189_s1 = inlined_call_operand.hbm [shape: f32[16,16], index: 1, kind: input, shape index: {}]   ;;  %s19190_s2 = inlined_call_operand.hbm [shape: bf16[512,512], index: 2, kind: input, shape index: {}]   ;;  %s19191_s3 = inlined_call_operand.hbm [shape: f32[1,512], index: 3, kind: input, shape index: {}]   ;;  %s19192_s4 = inlined_call_operand.hbm [shape: bf16[512,512], index: 4, kind: input, shape index: {}]   ;;  %s19193_s5 = inlined_call_operand.hbm [shape: f32[1,512], index: 5, kind: input, shape index: {}]   ;;  %s19194_s6 = inlined_call_operand.hbm [shape: bf16[512,512], index: 6, kind: input, shape index: {}]   ;;  %s19195_s7 = inlined_call_operand.hbm [shape: f32[1,512], index: 7, kind: input, shape index: {}]   ;;  %s19196_s8 = inlined_call_operand.hbm [shape: bf16[512,512], index: 8, kind: input, shape index: {}]   ;;  %s19197_s9 = inlined_call_operand.hbm [shape: f32[1,512], index: 9, kind: input, shape index: {}]   ;;  %s19198_s10 = inlined_call_operand.hbm [shape: f32[1,512], index: 10, kind: input, shape index: {}]   ;;  %s19199_s11 = inlined_call_operand.hbm [shape: f32[1,512], index: 11, kind: input, shape index: {}]   ;;  %s19200_s12 = inlined_call_operand.hbm [shape: bf16[512,2048], index: 12, kind: input, shape index: {}]   ;;  %s19201_s13 = inlined_call_operand.hbm [shape: f32[1,2048], index: 13, kind: input, shape index: {}]   ;;  %s19202_s14 = inlined_call_operand.hbm [shape: bf16[2048,512], index: 14, kind: input, shape index: {}]   ;;  %s19203_s15 = inlined_call_operand.hbm [shape: f32[1,512], index: 15, kind: input, shape index: {}]   ;;  %s19204_s16 = inlined_call_operand.hbm [shape: f32[1,512], index: 16, kind: input, shape index: {}]   ;;  %s19205_s17 = inlined_call_operand.hbm [shape: f32[1,512], index: 17, kind: input, shape index: {}]   ;;  %s19206_s18 = inlined_call_operand.hbm [shape: f32[16,512], index: 18, kind: output, shape index: {}]  }
   0x1   :  { %19212 = sst [smem:[#allocation43_spill]] %s19188_s0 }
   0x2   :  { %19213 = sst [smem:[#allocation44_spill]] %s19189_s1 }
   0x3   :  { %19214 = sst [smem:[#allocation45_spill]] %s19190_s2 }
   0x4   :  { %19215 = sst [smem:[#allocation46_spill]] %s19205_s17 }
   0x5   :  { %19216 = sst [smem:[#allocation47_spill]] %s19206_s18 }
   0x6   :  { %23 = vsyncpa [#allocation3], 0 }
   0x7   :  { %24 = vsyncpa [#allocation6], 0 }
   0x8   :  { %25 = vsyncpa [#allocation9], 0 }
   0x9   :  { %26 = vsyncpa [#allocation12], 0 }
   0xa   :  { %27 = vsyncpa [#allocation15], 0 }
   0xb   :  { %28 = vsyncpa [#allocation18], 0 }
   0xc   :  { %29 = vsyncpa [#allocation21], 0 }
   0xd   :  { %30 = vsyncpa [#allocation24], 0 }
   0xe   :  { %31 = vsyncpa [#allocation27], 0 }
   0xf   :  { %32 = vsyncpa [#allocation30], 0 }
  0x10   :  { %33 = vsyncpa [#allocation4], 0  ;;  %s18003_s27 = smov [#allocation5]   ;;  %s19217_s0 = sld [smem:[#allocation44_spill]] }
  0x11   :  { %s51_s28 = sshll.u32 %s18003_s27, 4  ;;  %s52_s28 = int_to_ptr.vmem [resolvable:$true] %s51_s28 }
  0x16   :  { %s17563_s19 = scalar_lea.hbm %s19217_s0, 256 }
  0x17   :  { %p17564_p0 = scmp.ne.s32.totalorder %s19217_s0, %s17563_s19  ;;  %p17567_p1 = scmp.lt.u32.totalorder %s17563_s19, %s19217_s0 }
  0x19   :  { %p17569_p2 = pnand %p17567_p1, %p17564_p0 }
  0x1b   :  { %17572 = shalt.err (!%p17569_p2)
}
  0x1c   :  { %s17573_s2 = scalar_lea.vmem %s52_s28, 256  ;;  %p17578_p4 = scmp.lt.s32.totalorder %s52_s28, %s52_s28 }
  0x1d   :  { %p17574_p3 = scmp.ne.s32.totalorder %s52_s28, %s17573_s2  ;;  %p17579_p5 = scmp.lt.s32.totalorder %s17573_s2, %s17573_s2 }
  0x1f   :  { %p17580_p6 = por %p17579_p5, %p17578_p4 }
  0x21   :  { %p17581_p7 = pnand %p17580_p6, %p17574_p3 }
  0x23   :  { %17584 = shalt.err (!%p17581_p7)
}
  0x24   :  { %s18004_s23 = smov 128   ;;  %s18005_s24 = smov 8  }
  0x25   :  { %57 = dma.hbm_to_vmem [thread:$0]  %s19217_s0, 256, %s52_s28, [#allocation6], %s18004_s23, %s18004_s23, %s18005_s24  }
  0x26   :  { %s18006_s27 = smov [#allocation8]   ;;  %s18007_s30 = smov [#allocation11]  }
  0x27   :  { %s76_s29 = sshll.u32 %s18006_s27, 4  ;;  %s98_s19 = sshll.u32 %s18007_s30, 4  ;;  %s77_s29 = int_to_ptr.vmem [resolvable:$true] %s76_s29  ;;  %s99_s19 = int_to_ptr.vmem [resolvable:$true] %s98_s19 }
  0x28   :  { %s17585_s21 = scalar_lea.hbm %s19191_s3, 64 }
  0x29   :  { %p17586_p8 = scmp.ne.s32.totalorder %s19191_s3, %s17585_s21  ;;  %p17589_p9 = scmp.lt.u32.totalorder %s17585_s21, %s19191_s3 }
  0x2b   :  { %p17591_p10 = pnand %p17589_p9, %p17586_p8 }
  0x2d   :  { %17594 = shalt.err (!%p17591_p10)
}
  0x2e   :  { %s17595_s28 = scalar_lea.vmem %s77_s29, 64  ;;  %p17600_p12 = scmp.lt.s32.totalorder %s77_s29, %s77_s29 }
  0x2f   :  { %p17596_p11 = scmp.ne.s32.totalorder %s77_s29, %s17595_s28  ;;  %p17601_p13 = scmp.lt.s32.totalorder %s17595_s28, %s17595_s28 }
  0x31   :  { %p17602_p0 = por %p17601_p13, %p17600_p12 }
  0x33   :  { %p17603_p1 = pnand %p17602_p0, %p17596_p11 }
  0x35   :  { %17606 = shalt.err (!%p17603_p1)
}
  0x36   :  { %79 = dma.hbm_to_vmem [thread:$0]  %s19191_s3, 64, %s77_s29, [#allocation9]  }
  0x37   :  { %s17607_s26 = scalar_lea.hbm %s19193_s5, 64 }
  0x38   :  { %p17608_p2 = scmp.ne.s32.totalorder %s19193_s5, %s17607_s26  ;;  %p17611_p3 = scmp.lt.u32.totalorder %s17607_s26, %s19193_s5 }
  0x3a   :  { %p17613_p4 = pnand %p17611_p3, %p17608_p2 }
  0x3c   :  { %17616 = shalt.err (!%p17613_p4)
}
  0x3d   :  { %s17617_s1 = scalar_lea.vmem %s99_s19, 64  ;;  %p17622_p6 = scmp.lt.s32.totalorder %s99_s19, %s99_s19 }
  0x3e   :  { %p17618_p5 = scmp.ne.s32.totalorder %s99_s19, %s17617_s1  ;;  %p17623_p7 = scmp.lt.s32.totalorder %s17617_s1, %s17617_s1 }
  0x40   :  { %p17624_p8 = por %p17623_p7, %p17622_p6 }
  0x42   :  { %p17625_p9 = pnand %p17624_p8, %p17618_p5 }
  0x44   :  { %17628 = shalt.err (!%p17625_p9)
}
  0x45   :  { %101 = dma.hbm_to_vmem [thread:$0]  %s19193_s5, 64, %s99_s19, [#allocation12]  }
  0x46   :  { %s18008_s20 = smov [#allocation14]   ;;  %s18009_s22 = smov [#allocation17]  }
  0x47   :  { %s120_s21 = sshll.u32 %s18008_s20, 4  ;;  %s142_s2 = sshll.u32 %s18009_s22, 4  ;;  %s121_s21 = int_to_ptr.vmem [resolvable:$true] %s120_s21  ;;  %s143_s2 = int_to_ptr.vmem [resolvable:$true] %s142_s2 }
  0x48   :  { %s17629_s23 = scalar_lea.hbm %s19195_s7, 64 }
  0x49   :  { %p17630_p10 = scmp.ne.s32.totalorder %s19195_s7, %s17629_s23  ;;  %p17633_p11 = scmp.lt.u32.totalorder %s17629_s23, %s19195_s7 }
  0x4b   :  { %p17635_p12 = pnand %p17633_p11, %p17630_p10 }
  0x4d   :  { %17638 = shalt.err (!%p17635_p12)
}
  0x4e   :  { %s17639_s5 = scalar_lea.vmem %s121_s21, 64  ;;  %p17644_p0 = scmp.lt.s32.totalorder %s121_s21, %s121_s21 }
  0x4f   :  { %p17640_p13 = scmp.ne.s32.totalorder %s121_s21, %s17639_s5  ;;  %p17645_p1 = scmp.lt.s32.totalorder %s17639_s5, %s17639_s5 }
  0x51   :  { %p17646_p2 = por %p17645_p1, %p17644_p0 }
  0x53   :  { %p17647_p3 = pnand %p17646_p2, %p17640_p13 }
  0x55   :  { %17650 = shalt.err (!%p17647_p3)
}
  0x56   :  { %123 = dma.hbm_to_vmem [thread:$0]  %s19195_s7, 64, %s121_s21, [#allocation15]  }
  0x57   :  { %s17651_s1 = scalar_lea.hbm %s19197_s9, 64 }
  0x58   :  { %p17652_p4 = scmp.ne.s32.totalorder %s19197_s9, %s17651_s1  ;;  %p17655_p5 = scmp.lt.u32.totalorder %s17651_s1, %s19197_s9 }
  0x5a   :  { %p17657_p6 = pnand %p17655_p5, %p17652_p4 }
  0x5c   :  { %17660 = shalt.err (!%p17657_p6)
}
  0x5d   :  { %s17661_s28 = scalar_lea.vmem %s143_s2, 64  ;;  %p17666_p8 = scmp.lt.s32.totalorder %s143_s2, %s143_s2 }
  0x5e   :  { %p17662_p7 = scmp.ne.s32.totalorder %s143_s2, %s17661_s28  ;;  %p17667_p9 = scmp.lt.s32.totalorder %s17661_s28, %s17661_s28 }
  0x60   :  { %p17668_p10 = por %p17667_p9, %p17666_p8 }
  0x62   :  { %p17669_p11 = pnand %p17668_p10, %p17662_p7 }
  0x64   :  { %17672 = shalt.err (!%p17669_p11)
}
  0x65   :  { %145 = dma.hbm_to_vmem [thread:$0]  %s19197_s9, 64, %s143_s2, [#allocation18]  }
  0x66   :  { %s18010_s0 = smov [#allocation20]   ;;  %s18011_s24 = smov [#allocation23]  }
  0x67   :  { %s162_s23 = sshll.u32 %s18010_s0, 4  ;;  %s184_s25 = sshll.u32 %s18011_s24, 4  ;;  %s163_s23 = int_to_ptr.vmem [resolvable:$true] %s162_s23  ;;  %s185_s25 = int_to_ptr.vmem [resolvable:$true] %s184_s25 }
  0x68   :  { %s17673_s5 = scalar_lea.hbm %s19199_s11, 64 }
  0x69   :  { %p17674_p12 = scmp.ne.s32.totalorder %s19199_s11, %s17673_s5  ;;  %p17677_p13 = scmp.lt.u32.totalorder %s17673_s5, %s19199_s11 }
  0x6b   :  { %p17679_p0 = pnand %p17677_p13, %p17674_p12 }
  0x6d   :  { %17682 = shalt.err (!%p17679_p0)
}
  0x6e   :  { %s17683_s9 = scalar_lea.vmem %s163_s23, 64  ;;  %p17688_p2 = scmp.lt.s32.totalorder %s163_s23, %s163_s23 }
  0x6f   :  { %p17684_p1 = scmp.ne.s32.totalorder %s163_s23, %s17683_s9  ;;  %p17689_p3 = scmp.lt.s32.totalorder %s17683_s9, %s17683_s9 }
  0x71   :  { %p17690_p4 = por %p17689_p3, %p17688_p2 }
  0x73   :  { %p17691_p5 = pnand %p17690_p4, %p17684_p1 }
  0x75   :  { %17694 = shalt.err (!%p17691_p5)
}
  0x76   :  { %165 = dma.hbm_to_vmem [thread:$0]  %s19199_s11, 64, %s163_s23, [#allocation21]  }
  0x77   :  { %s17695_s20 = scalar_lea.hbm %s19201_s13, 256 }
  0x78   :  { %p17696_p6 = scmp.ne.s32.totalorder %s19201_s13, %s17695_s20  ;;  %p17699_p7 = scmp.lt.u32.totalorder %s17695_s20, %s19201_s13 }
  0x7a   :  { %p17701_p8 = pnand %p17699_p7, %p17696_p6 }
  0x7c   :  { %17704 = shalt.err (!%p17701_p8)
}
  0x7d   :  { %s17705_s0 = scalar_lea.vmem %s185_s25, 256  ;;  %p17710_p10 = scmp.lt.s32.totalorder %s185_s25, %s185_s25 }
  0x7e   :  { %p17706_p9 = scmp.ne.s32.totalorder %s185_s25, %s17705_s0  ;;  %p17711_p11 = scmp.lt.s32.totalorder %s17705_s0, %s17705_s0 }
  0x80   :  { %p17712_p12 = por %p17711_p11, %p17710_p10 }
  0x82   :  { %p17713_p13 = pnand %p17712_p12, %p17706_p9 }
  0x84   :  { %17716 = shalt.err (!%p17713_p13)
}
  0x85   :  { %187 = dma.hbm_to_vmem [thread:$0]  %s19201_s13, 256, %s185_s25, [#allocation24]  }
  0x86   :  { %s18012_s24 = smov [#allocation26]   ;;  %s18013_s17 = smov [#allocation2]  }
  0x87   :  { %s206_s26 = sshll.u32 %s18012_s24, 4  ;;  %s39_s5 = sshll.u32 %s18013_s17, 4  ;;  %s207_s26 = int_to_ptr.vmem [resolvable:$true] %s206_s26  ;;  %s40_s5 = int_to_ptr.vmem [resolvable:$true] %s39_s5 }
  0x88   :  { %s17717_s27 = scalar_lea.hbm %s19203_s15, 64 }
  0x89   :  { %p17718_p0 = scmp.ne.s32.totalorder %s19203_s15, %s17717_s27  ;;  %p17721_p1 = scmp.lt.u32.totalorder %s17717_s27, %s19203_s15 }
  0x8b   :  { %p17723_p2 = pnand %p17721_p1, %p17718_p0 }
  0x8d   :  { %17726 = shalt.err (!%p17723_p2)
}
  0x8e   :  { %s17727_s13 = scalar_lea.vmem %s207_s26, 64  ;;  %p17732_p4 = scmp.lt.s32.totalorder %s207_s26, %s207_s26 }
  0x8f   :  { %p17728_p3 = scmp.ne.s32.totalorder %s207_s26, %s17727_s13  ;;  %p17733_p5 = scmp.lt.s32.totalorder %s17727_s13, %s17727_s13 }
  0x91   :  { %p17734_p6 = por %p17733_p5, %p17732_p4 }
  0x93   :  { %p17735_p7 = pnand %p17734_p6, %p17728_p3 }
  0x95   :  { %17738 = shalt.err (!%p17735_p7)
}
  0x96   :  { %209 = dma.hbm_to_vmem [thread:$0]  %s19203_s15, 64, %s207_s26, [#allocation27]  }
  0x97   :  { %s19218_s22 = sld [smem:[#allocation43_spill]] }
  0x9d   :  { %s17739_s28 = scalar_lea.hbm %s19218_s22, 1024 }
  0x9e   :  { %p17740_p8 = scmp.ne.s32.totalorder %s19218_s22, %s17739_s28  ;;  %p17743_p9 = scmp.lt.u32.totalorder %s17739_s28, %s19218_s22 }
  0xa0   :  { %p17745_p10 = pnand %p17743_p9, %p17740_p8 }
  0xa2   :  { %17748 = shalt.err (!%p17745_p10)
}
  0xa3   :  { %s17749_s23 = scalar_lea.vmem %s40_s5, 1024  ;;  %p17754_p12 = scmp.lt.s32.totalorder %s40_s5, %s40_s5 }
  0xa4   :  { %p17750_p11 = scmp.ne.s32.totalorder %s40_s5, %s17749_s23  ;;  %p17755_p13 = scmp.lt.s32.totalorder %s17749_s23, %s17749_s23 }
  0xa6   :  { %p17756_p0 = por %p17755_p13, %p17754_p12 }
  0xa8   :  { %p17757_p1 = pnand %p17756_p0, %p17750_p11 }
  0xaa   :  { %17760 = shalt.err (!%p17757_p1)
}
  0xab   :  { %s18014_s15 = smov 512   ;;  %s18015_s24 = smov 32  }
  0xac   :  { %45 = dma.hbm_to_vmem [thread:$0]  %s19218_s22, 1024, %s40_s5, [#allocation3], %s18014_s15, %s18014_s15, %s18015_s24  }
  0xad   :  { %s18016_s19 = smov [#allocation7]   ;;  %s19219_s9 = sld [smem:[#allocation45_spill]] }
  0xae   :  { %s63_s18 = sshll.u32 %s18016_s19, 4  ;;  %s64_s18 = int_to_ptr.vmem [resolvable:$true] %s63_s18 }
  0xb3   :  { %s17761_s2 = scalar_lea.hbm %s19219_s9, 16384 }
  0xb4   :  { %p17762_p2 = scmp.ne.s32.totalorder %s19219_s9, %s17761_s2  ;;  %p17765_p3 = scmp.lt.u32.totalorder %s17761_s2, %s19219_s9 }
  0xb6   :  { %p17767_p4 = pnand %p17765_p3, %p17762_p2 }
  0xb8   :  { %17770 = shalt.err (!%p17767_p4)
}
  0xb9   :  { %s17771_s29 = scalar_lea.vmem %s64_s18, 16384  ;;  %p17776_p6 = scmp.lt.s32.totalorder %s64_s18, %s64_s18 }
  0xba   :  { %p17772_p5 = scmp.ne.s32.totalorder %s64_s18, %s17771_s29  ;;  %p17777_p7 = scmp.lt.s32.totalorder %s17771_s29, %s17771_s29 }
  0xbc   :  { %p17778_p8 = por %p17777_p7, %p17776_p6 }
  0xbe   :  { %p17779_p9 = pnand %p17778_p8, %p17772_p5 }
  0xc0   :  { %17782 = shalt.err (!%p17779_p9)
}
  0xc1   :  { %s18017_s5 = smov 256   ;;  %s18018_s20 = smov 16  }
  0xc2   :  { %69 = dma.hbm_to_vmem [thread:$0]  %s19219_s9, 16384, %s64_s18, [#allocation6], %s18017_s5, %s18017_s5, %s18018_s20  }
  0xc3   :  { %s18019_s7 = smov [#allocation10]   ;;  %s18020_s0 = smov [#allocation13]  }
  0xc4   :  { %s85_s21 = sshll.u32 %s18019_s7, 4  ;;  %s107_s11 = sshll.u32 %s18020_s0, 4  ;;  %s86_s21 = int_to_ptr.vmem [resolvable:$true] %s85_s21  ;;  %s18251_s11 = int_to_ptr.vmem [resolvable:$true] %s107_s11 }
  0xc5   :  { %s17783_s17 = scalar_lea.hbm %s19192_s4, 16384 }
  0xc6   :  { %p17784_p10 = scmp.ne.s32.totalorder %s19192_s4, %s17783_s17  ;;  %p17787_p11 = scmp.lt.u32.totalorder %s17783_s17, %s19192_s4 }
  0xc8   :  { %p17789_p12 = pnand %p17787_p11, %p17784_p10 }
  0xca   :  { %17792 = shalt.err (!%p17789_p12)
}
  0xcb   :  { %s17793_s18 = scalar_lea.vmem %s86_s21, 16384  ;;  %p17798_p0 = scmp.lt.s32.totalorder %s86_s21, %s86_s21 }
  0xcc   :  { %p17794_p13 = scmp.ne.s32.totalorder %s86_s21, %s17793_s18  ;;  %p17799_p1 = scmp.lt.s32.totalorder %s17793_s18, %s17793_s18 }
  0xce   :  { %p17800_p2 = por %p17799_p1, %p17798_p0 }
  0xd0   :  { %p17801_p3 = pnand %p17800_p2, %p17794_p13 }
  0xd2   :  { %17804 = shalt.err (!%p17801_p3)
}
  0xd3   :  { %91 = dma.hbm_to_vmem [thread:$0]  %s19192_s4, 16384, %s86_s21, [#allocation9], %s18017_s5, %s18017_s5, %s18018_s20  }
  0xd4   :  { %s17805_s3 = scalar_lea.hbm %s19194_s6, 16384 }
  0xd5   :  { %p17806_p4 = scmp.ne.s32.totalorder %s19194_s6, %s17805_s3  ;;  %p17809_p5 = scmp.lt.u32.totalorder %s17805_s3, %s19194_s6 }
  0xd7   :  { %p17811_p6 = pnand %p17809_p5, %p17806_p4 }
  0xd9   :  { %17814 = shalt.err (!%p17811_p6)
}
  0xda   :  { %s17815_s0 = scalar_lea.vmem %s18251_s11, 16384  ;;  %p17820_p8 = scmp.lt.s32.totalorder %s18251_s11, %s18251_s11 }
  0xdb   :  { %p17816_p7 = scmp.ne.s32.totalorder %s18251_s11, %s17815_s0  ;;  %p17821_p9 = scmp.lt.s32.totalorder %s17815_s0, %s17815_s0 }
  0xdd   :  { %p17822_p10 = por %p17821_p9, %p17820_p8 }
  0xdf   :  { %p17823_p11 = pnand %p17822_p10, %p17816_p7 }
  0xe1   :  { %17826 = shalt.err (!%p17823_p11)
}
  0xe2   :  { %113 = dma.hbm_to_vmem [thread:$0]  %s19194_s6, 16384, %s18251_s11, [#allocation12], %s18017_s5, %s18017_s5, %s18018_s20  }
  0xe3   :  { %s18021_s23 = smov [#allocation16]   ;;  %s18022_s17 = smov [#allocation19]  }
  0xe4   :  { %s129_s26 = sshll.u32 %s18021_s23, 4  ;;  %s152_s19 = sshll.u32 %s18022_s17, 4  ;;  %s130_s26 = int_to_ptr.vmem [resolvable:$true] %s129_s26  ;;  %s153_s19 = int_to_ptr.vmem [resolvable:$true] %s152_s19 }
  0xe5   :  { %s17827_s2 = scalar_lea.hbm %s19196_s8, 16384 }
  0xe6   :  { %p17828_p12 = scmp.ne.s32.totalorder %s19196_s8, %s17827_s2  ;;  %p17831_p13 = scmp.lt.u32.totalorder %s17827_s2, %s19196_s8 }
  0xe8   :  { %p17833_p0 = pnand %p17831_p13, %p17828_p12 }
  0xea   :  { %17836 = shalt.err (!%p17833_p0)
}
  0xeb   :  { %s17837_s6 = scalar_lea.vmem %s130_s26, 16384  ;;  %p17842_p2 = scmp.lt.s32.totalorder %s130_s26, %s130_s26 }
  0xec   :  { %p17838_p1 = scmp.ne.s32.totalorder %s130_s26, %s17837_s6  ;;  %p17843_p3 = scmp.lt.s32.totalorder %s17837_s6, %s17837_s6 }
  0xee   :  { %p17844_p4 = por %p17843_p3, %p17842_p2 }
  0xf0   :  { %p17845_p5 = pnand %p17844_p4, %p17838_p1 }
  0xf2   :  { %17848 = shalt.err (!%p17845_p5)
}
  0xf3   :  { %135 = dma.hbm_to_vmem [thread:$0]  %s19196_s8, 16384, %s130_s26, [#allocation15], %s18017_s5, %s18017_s5, %s18018_s20  }
  0xf4   :  { %s17849_s22 = scalar_lea.hbm %s19198_s10, 64 }
  0xf5   :  { %p17850_p6 = scmp.ne.s32.totalorder %s19198_s10, %s17849_s22  ;;  %p17853_p7 = scmp.lt.u32.totalorder %s17849_s22, %s19198_s10 }
  0xf7   :  { %p17855_p8 = pnand %p17853_p7, %p17850_p6 }
  0xf9   :  { %17858 = shalt.err (!%p17855_p8)
}
  0xfa   :  { %s17859_s21 = scalar_lea.vmem %s153_s19, 64  ;;  %p17864_p10 = scmp.lt.s32.totalorder %s153_s19, %s153_s19 }
  0xfb   :  { %p17860_p9 = scmp.ne.s32.totalorder %s153_s19, %s17859_s21  ;;  %p17865_p11 = scmp.lt.s32.totalorder %s17859_s21, %s17859_s21 }
  0xfd   :  { %p17866_p12 = por %p17865_p11, %p17864_p10 }
  0xff   :  { %p17867_p13 = pnand %p17866_p12, %p17860_p9 }
 0x101   :  { %17870 = shalt.err (!%p17867_p13)
}
 0x102   :  { %155 = dma.hbm_to_vmem [thread:$0]  %s19198_s10, 64, %s153_s19, [#allocation18]  }
 0x103   :  { %s18023_s26 = smov [#allocation22]   ;;  %s17871_s2 = scalar_lea.hbm %s19200_s12, 65536 }
 0x104   :  { %s171_s17 = sshll.u32 %s18023_s26, 4  ;;  %p17872_p0 = scmp.ne.s32.totalorder %s19200_s12, %s17871_s2  ;;  %s172_s17 = int_to_ptr.vmem [resolvable:$true] %s171_s17 }
 0x105   :  { %p17875_p1 = scmp.lt.u32.totalorder %s17871_s2, %s19200_s12 }
 0x107   :  { %p17877_p2 = pnand %p17875_p1, %p17872_p0 }
 0x109   :  { %17880 = shalt.err (!%p17877_p2)
}
 0x10a   :  { %s17881_s6 = scalar_lea.vmem %s172_s17, 65536  ;;  %p17886_p4 = scmp.lt.s32.totalorder %s172_s17, %s172_s17 }
 0x10b   :  { %p17882_p3 = scmp.ne.s32.totalorder %s172_s17, %s17881_s6  ;;  %p17887_p5 = scmp.lt.s32.totalorder %s17881_s6, %s17881_s6 }
 0x10d   :  { %p17888_p6 = por %p17887_p5, %p17886_p4 }
 0x10f   :  { %p17889_p7 = pnand %p17888_p6, %p17882_p3 }
 0x111   :  { %17892 = shalt.err (!%p17889_p7)
}
 0x112   :  { %s18024_s10 = smov 1024   ;;  %s18025_s19 = smov 64  }
 0x113   :  { %177 = dma.hbm_to_vmem [thread:$0]  %s19200_s12, 65536, %s172_s17, [#allocation21], %s18024_s10, %s18024_s10, %s18025_s19  }
 0x114   :  { %s18026_s3 = smov [#allocation25]   ;;  %s18027_s22 = smov [#allocation28]  }
 0x115   :  { %s193_s29 = sshll.u32 %s18026_s3, 4  ;;  %s216_s28 = sshll.u32 %s18027_s22, 4  ;;  %s194_s29 = int_to_ptr.vmem [resolvable:$true] %s193_s29  ;;  %s217_s28 = int_to_ptr.vmem [resolvable:$true] %s216_s28 }
 0x116   :  { %s17893_s4 = scalar_lea.hbm %s19202_s14, 65536 }
 0x117   :  { %p17894_p8 = scmp.ne.s32.totalorder %s19202_s14, %s17893_s4  ;;  %p17897_p9 = scmp.lt.u32.totalorder %s17893_s4, %s19202_s14 }
 0x119   :  { %p17899_p10 = pnand %p17897_p9, %p17894_p8 }
 0x11b   :  { %17902 = shalt.err (!%p17899_p10)
}
 0x11c   :  { %s17903_s12 = scalar_lea.vmem %s194_s29, 65536  ;;  %p17908_p12 = scmp.lt.s32.totalorder %s194_s29, %s194_s29 }
 0x11d   :  { %p17904_p11 = scmp.ne.s32.totalorder %s194_s29, %s17903_s12  ;;  %p17909_p13 = scmp.lt.s32.totalorder %s17903_s12, %s17903_s12 }
 0x11f   :  { %p17910_p0 = por %p17909_p13, %p17908_p12 }
 0x121   :  { %p17911_p1 = pnand %p17910_p0, %p17904_p11 }
 0x123   :  { %17914 = shalt.err (!%p17911_p1)
}
 0x124   :  { %199 = dma.hbm_to_vmem [thread:$0]  %s19202_s14, 65536, %s194_s29, [#allocation24], %s18017_s5, %s18017_s5, %s18018_s20  }
 0x125   :  { %s17915_s18 = scalar_lea.hbm %s19204_s16, 64 }
 0x126   :  { %p17916_p2 = scmp.ne.s32.totalorder %s19204_s16, %s17915_s18  ;;  %p17919_p3 = scmp.lt.u32.totalorder %s17915_s18, %s19204_s16 }
 0x128   :  { %p17921_p4 = pnand %p17919_p3, %p17916_p2 }
 0x12a   :  { %17924 = shalt.err (!%p17921_p4)
}
 0x12b   :  { %s17925_s10 = scalar_lea.vmem %s217_s28, 64  ;;  %p17930_p6 = scmp.lt.s32.totalorder %s217_s28, %s217_s28 }
 0x12c   :  { %p17926_p5 = scmp.ne.s32.totalorder %s217_s28, %s17925_s10  ;;  %p17931_p7 = scmp.lt.s32.totalorder %s17925_s10, %s17925_s10 }
 0x12e   :  { %p17932_p8 = por %p17931_p7, %p17930_p6 }
 0x130   :  { %p17933_p9 = pnand %p17932_p8, %p17926_p5 }
 0x132   :  { %17936 = shalt.err (!%p17933_p9)
}
 0x133   :  { %219 = dma.hbm_to_vmem [thread:$0]  %s19204_s16, 64, %s217_s28, [#allocation27]  }
 0x134   :  { %s18028_s20 = smov [#allocation29]   ;;  %s19220_s29 = sld [smem:[#allocation46_spill]] }
 0x135   :  { %s226_s11 = sshll.u32 %s18028_s20, 4  ;;  %s227_s11 = int_to_ptr.vmem [resolvable:$true] %s226_s11 }
 0x13a   :  { %s17937_s22 = scalar_lea.hbm %s19220_s29, 64 }
 0x13b   :  { %p17938_p10 = scmp.ne.s32.totalorder %s19220_s29, %s17937_s22  ;;  %p17941_p11 = scmp.lt.u32.totalorder %s17937_s22, %s19220_s29 }
 0x13d   :  { %p17943_p12 = pnand %p17941_p11, %p17938_p10 }
 0x13f   :  { %17946 = shalt.err (!%p17943_p12)
}
 0x140   :  { %s17947_s8 = scalar_lea.vmem %s227_s11, 64  ;;  %p17952_p0 = scmp.lt.s32.totalorder %s227_s11, %s227_s11 }
 0x141   :  { %p17948_p13 = scmp.ne.s32.totalorder %s227_s11, %s17947_s8  ;;  %p17953_p1 = scmp.lt.s32.totalorder %s17947_s8, %s17947_s8 }
 0x143   :  { %p17954_p2 = por %p17953_p1, %p17952_p0 }
 0x145   :  { %p17955_p3 = pnand %p17954_p2, %p17948_p13 }
 0x147   :  { %17958 = shalt.err (!%p17955_p3)
}
 0x148   :  { %229 = dma.hbm_to_vmem [thread:$0]  %s19220_s29, 64, %s227_s11, [#allocation30]  }
 0x149   :  { %17981 = dma.done.wait [#allocation3], 1024  }
 0x14a   :  { %17982 = vsyncadd [#allocation3], 4294966272 }
 0x14b   :  { %17983 = dma.done.wait [#allocation6], 16640  }
 0x14c   :  { %17984 = vsyncadd [#allocation6], 4294950656 }
 0x14d   :  { %17985 = dma.done.wait [#allocation9], 16448  }
 0x14e   :  { %17986 = vsyncadd [#allocation9], 4294950848 }
 0x14f   :  { %17987 = dma.done.wait [#allocation12], 16448  }
 0x150   :  { %17988 = vsyncadd [#allocation12], 4294950848 }
 0x151   :  { %17989 = dma.done.wait [#allocation15], 16448  }
 0x152   :  { %17990 = vsyncadd [#allocation15], 4294950848 }
 0x153   :  { %17991 = dma.done.wait [#allocation18], 128  }
 0x154   :  { %17992 = vsyncadd [#allocation18], 4294967168 }
 0x155   :  { %17993 = dma.done.wait [#allocation21], 65600  }
 0x156   :  { %17994 = vsyncadd [#allocation21], 4294901696 }
 0x157   :  { %17995 = dma.done.wait [#allocation24], 65792  }
 0x158   :  { %17996 = vsyncadd [#allocation24], 4294901504 }
 0x159   :  { %17997 = dma.done.wait [#allocation27], 128  }
 0x15a   :  { %17998 = vsyncadd [#allocation27], 4294967168 }
 0x15b   :  { %17999 = dma.done.wait [#allocation30], 64  }
 0x15c   :  { %18000 = vsyncadd [#allocation30], 4294967232  ;;  %v15934_v0 = vld [vmem:[#allocation7 + $0x4] ss:$16 sps:$4 sm:$0xff]   ;;  %v15936_v1 = vld [vmem:[#allocation7 + $0xc] ss:$16 sps:$4 sm:$0xff]  }
 0x15d   :  { %10968 = vmatprep.subr.bf16.mxu0 %v15934_v0  ;;  %v15938_v2 = vld [vmem:[#allocation7] ss:$16 sps:$4 sm:$0xff]   ;;  %v15939_v3 = vld [vmem:[#allocation7 + $0x8] ss:$16 sps:$4 sm:$0xff]   ;;  %11096 = vmatprep.subr.bf16.mxu1 %v15936_v1  ;;  %v15940_v4 = vld [vmem:[#allocation7 + $0x24] ss:$16 sps:$4 sm:$0xff]  }
 0x15e   :  { %10970 = vmatpush1.bf16.msra.mxu0 %v15938_v2  ;;  %11098 = vmatpush1.bf16.msra.mxu1 %v15939_v3  ;;  %v15942_v5 = vld [vmem:[#allocation7 + $0x2c] ss:$16 sps:$4 sm:$0xff]   ;;  %v15944_v6 = vld [vmem:[#allocation7 + $0x20] ss:$16 sps:$4 sm:$0xff]   ;;  %v15945_v7 = vld [vmem:[#allocation7 + $0x28] ss:$16 sps:$4 sm:$0xff]  }
 0x15f   :  { %10972 = vmatprep.subr.bf16.mxu0 %v15940_v4  ;;  %11100 = vmatprep.subr.bf16.mxu1 %v15942_v5  ;;  %v15946_v8 = vld [vmem:[#allocation7 + $0x44] ss:$16 sps:$4 sm:$0xff]   ;;  %v15948_v9 = vld [vmem:[#allocation7 + $0x4c] ss:$16 sps:$4 sm:$0xff]   ;;  %v15950_v10 = vld [vmem:[#allocation7 + $0x40] ss:$16 sps:$4 sm:$0xff]  }
 0x160   :  { %v15951_v11 = vld [vmem:[#allocation7 + $0x48] ss:$16 sps:$4 sm:$0xff]   ;;  %v15952_v12 = vld [vmem:[#allocation7 + $0x64] ss:$16 sps:$4 sm:$0xff]   ;;  %v15954_v13 = vld [vmem:[#allocation7 + $0x6c] ss:$16 sps:$4 sm:$0xff]  }
 0x161   :  { %v15956_v14 = vld [vmem:[#allocation7 + $0x60] ss:$16 sps:$4 sm:$0xff]   ;;  %v15957_v15 = vld [vmem:[#allocation7 + $0x68] ss:$16 sps:$4 sm:$0xff]   ;;  %v15958_v16 = vld [vmem:[#allocation7 + $0x84] ss:$16 sps:$4 sm:$0xff]  }
 0x162   :  { %10974 = vmatpush1.bf16.msra.mxu0 %v15944_v6  ;;  %11102 = vmatpush1.bf16.msra.mxu1 %v15945_v7  ;;  %v15960_v17 = vld [vmem:[#allocation7 + $0x8c] ss:$16 sps:$4 sm:$0xff]   ;;  %v15962_v18 = vld [vmem:[#allocation7 + $0x80] ss:$16 sps:$4 sm:$0xff]   ;;  %v15963_v19 = vld [vmem:[#allocation7 + $0x88] ss:$16 sps:$4 sm:$0xff]  }
 0x163   :  { %10976 = vmatprep.subr.bf16.mxu0 %v15946_v8  ;;  %11104 = vmatprep.subr.bf16.mxu1 %v15948_v9  ;;  %v15964_v20 = vld [vmem:[#allocation7 + $0xa4] ss:$16 sps:$4 sm:$0xff]   ;;  %v15966_v21 = vld [vmem:[#allocation7 + $0xac] ss:$16 sps:$4 sm:$0xff]   ;;  %v15968_v22 = vld [vmem:[#allocation7 + $0xa0] ss:$16 sps:$4 sm:$0xff]  }
 0x164   :  { %v15969_v23 = vld [vmem:[#allocation7 + $0xa8] ss:$16 sps:$4 sm:$0xff]   ;;  %v15970_v24 = vld [vmem:[#allocation7 + $0xc4] ss:$16 sps:$4 sm:$0xff]   ;;  %v15972_v25 = vld [vmem:[#allocation7 + $0xcc] ss:$16 sps:$4 sm:$0xff]  }
 0x165   :  { %v15974_v26 = vld [vmem:[#allocation7 + $0xc0] ss:$16 sps:$4 sm:$0xff]   ;;  %v15975_v27 = vld [vmem:[#allocation7 + $0xc8] ss:$16 sps:$4 sm:$0xff]   ;;  %v15976_v28 = vld [vmem:[#allocation7 + $0xe4] ss:$16 sps:$4 sm:$0xff]  }
 0x166   :  { %10978 = vmatpush1.bf16.msra.mxu0 %v15950_v10  ;;  %11106 = vmatpush1.bf16.msra.mxu1 %v15951_v11  ;;  %v15978_v29 = vld [vmem:[#allocation7 + $0xec] ss:$16 sps:$4 sm:$0xff]   ;;  %v15980_v30 = vld [vmem:[#allocation7 + $0xe0] ss:$16 sps:$4 sm:$0xff]   ;;  %v15981_v31 = vld [vmem:[#allocation7 + $0xe8] ss:$16 sps:$4 sm:$0xff]  }
 0x167   :  { %10980 = vmatprep.subr.bf16.mxu0 %v15952_v12  ;;  %11108 = vmatprep.subr.bf16.mxu1 %v15954_v13  ;;  %v15982_v32 = vld [vmem:[#allocation7 + $0x104] ss:$16 sps:$4 sm:$0xff]   ;;  %v15984_v33 = vld [vmem:[#allocation7 + $0x10c] ss:$16 sps:$4 sm:$0xff]   ;;  %v15986_v34 = vld [vmem:[#allocation7 + $0x100] ss:$16 sps:$4 sm:$0xff]  }
 0x168   :  { %v15987_v35 = vld [vmem:[#allocation7 + $0x108] ss:$16 sps:$4 sm:$0xff]   ;;  %v15988_v36 = vld [vmem:[#allocation7 + $0x124] ss:$16 sps:$4 sm:$0xff]   ;;  %v15990_v37 = vld [vmem:[#allocation7 + $0x12c] ss:$16 sps:$4 sm:$0xff]  }
 0x169   :  { %v15992_v38 = vld [vmem:[#allocation7 + $0x120] ss:$16 sps:$4 sm:$0xff]   ;;  %v15993_v39 = vld [vmem:[#allocation7 + $0x128] ss:$16 sps:$4 sm:$0xff]   ;;  %v15994_v40 = vld [vmem:[#allocation7 + $0x144] ss:$16 sps:$4 sm:$0xff]  }
 0x16a   :  { %10982 = vmatpush1.bf16.msra.mxu0 %v15956_v14  ;;  %11110 = vmatpush1.bf16.msra.mxu1 %v15957_v15  ;;  %v15996_v41 = vld [vmem:[#allocation7 + $0x14c] ss:$16 sps:$4 sm:$0xff]   ;;  %v15998_v42 = vld [vmem:[#allocation7 + $0x140] ss:$16 sps:$4 sm:$0xff]   ;;  %v15999_v43 = vld [vmem:[#allocation7 + $0x148] ss:$16 sps:$4 sm:$0xff]  }
 0x16b   :  { %10984 = vmatprep.subr.bf16.mxu0 %v15958_v16  ;;  %11112 = vmatprep.subr.bf16.mxu1 %v15960_v17  ;;  %v16000_v44 = vld [vmem:[#allocation7 + $0x164] ss:$16 sps:$4 sm:$0xff]   ;;  %v16002_v45 = vld [vmem:[#allocation7 + $0x16c] ss:$16 sps:$4 sm:$0xff]   ;;  %v16004_v47 = vld [vmem:[#allocation7 + $0x160] ss:$16 sps:$4 sm:$0xff]  }
 0x16c   :  { %v18367_v46 = vld [vmem:[#allocation2 + $0x8] sm:$0xff]  ;;  %v16006_v49 = vld [vmem:[#allocation7 + $0x184] ss:$16 sps:$4 sm:$0xff]   ;;  %v16010_v51 = vld [vmem:[#allocation7 + $0x180] ss:$16 sps:$4 sm:$0xff]   ;;  %vm2900_vm0 = vcmask 523264  }
 0x16d   :  { %1916 = vmatprep.mubr.f32.mxu0 %v18367_v46  ;;  %2070 = vmatprep.mubr.f32.mxu1 %v18367_v46  ;;  %v16005_v48 = vld [vmem:[#allocation7 + $0x168] ss:$16 sps:$4 sm:$0xff]   ;;  %v16008_v50 = vld [vmem:[#allocation7 + $0x18c] ss:$16 sps:$4 sm:$0xff]   ;;  %v16012_v53 = vld [vmem:[#allocation7 + $0x1a4] ss:$16 sps:$4 sm:$0xff]  }
 0x16e   :  { %10986 = vmatpush1.bf16.msra.mxu0 %v15962_v18  ;;  %11114 = vmatpush1.bf16.msra.mxu1 %v15963_v19  ;;  %v16011_v52 = vld [vmem:[#allocation7 + $0x188] ss:$16 sps:$4 sm:$0xff]   ;;  %v16014_v54 = vld [vmem:[#allocation7 + $0x1ac] ss:$16 sps:$4 sm:$0xff]   ;;  %v16016_v55 = vld [vmem:[#allocation7 + $0x1a0] ss:$16 sps:$4 sm:$0xff]  }
 0x16f   :  { %10988 = vmatprep.subr.bf16.mxu0 %v15964_v20  ;;  %11116 = vmatprep.subr.bf16.mxu1 %v15966_v21  ;;  %v16017_v56 = vld [vmem:[#allocation7 + $0x1a8] ss:$16 sps:$4 sm:$0xff]   ;;  %v16018_v57 = vld [vmem:[#allocation7 + $0x1c4] ss:$16 sps:$4 sm:$0xff]   ;;  %v16020_v58 = vld [vmem:[#allocation7 + $0x1cc] ss:$16 sps:$4 sm:$0xff]  }
 0x170   :  { %v16022_v59 = vld [vmem:[#allocation7 + $0x1c0] ss:$16 sps:$4 sm:$0xff]   ;;  %v16023_v60 = vld [vmem:[#allocation7 + $0x1c8] ss:$16 sps:$4 sm:$0xff]   ;;  %v16024_v61 = vld [vmem:[#allocation7 + $0x1e4] ss:$16 sps:$4 sm:$0xff]  }
 0x171   :  { %v16026_v62 = vld [vmem:[#allocation7 + $0x1ec] ss:$16 sps:$4 sm:$0xff]   ;;  %v16028_v63 = vld [vmem:[#allocation7 + $0x1e0] ss:$16 sps:$4 sm:$0xff]   ;;  %v16029_v0 = vld [vmem:[#allocation7 + $0x1e8] ss:$16 sps:$4 sm:$0xff]  }
 0x172   :  { %10990 = vmatpush1.bf16.msra.mxu0 %v15968_v22  ;;  %11118 = vmatpush1.bf16.msra.mxu1 %v15969_v23  ;;  %v16030_v1 = vld [vmem:[#allocation7 + $0x204] ss:$16 sps:$4 sm:$0xff]   ;;  %v16033_v2 = vld [vmem:[#allocation7 + $0x20c] ss:$16 sps:$4 sm:$0xff]   ;;  %v16032_v3 = vld [vmem:[#allocation7 + $0x200] ss:$16 sps:$4 sm:$0xff]  }
 0x173   :  { %10992 = vmatprep.subr.bf16.mxu0 %v15970_v24  ;;  %11120 = vmatprep.subr.bf16.mxu1 %v15972_v25  ;;  %v16035_v4 = vld [vmem:[#allocation7 + $0x208] ss:$16 sps:$4 sm:$0xff]   ;;  %v18371_v5 = vld [vmem:[#allocation2] sm:$0xff]  ;;  %v16039_v7 = vld [vmem:[#allocation7 + $0x22c] ss:$16 sps:$4 sm:$0xff]   ;;  %vm3599_vm4 = vcmask 130048  }
 0x174   :  { %v16036_v6 = vld [vmem:[#allocation7 + $0x224] ss:$16 sps:$4 sm:$0xff]   ;;  %v16038_v8 = vld [vmem:[#allocation7 + $0x220] ss:$16 sps:$4 sm:$0xff]   ;;  %v16041_v9 = vld [vmem:[#allocation7 + $0x228] ss:$16 sps:$4 sm:$0xff]  }
 0x175   :  { %v16042_v10 = vld [vmem:[#allocation7 + $0x244] ss:$16 sps:$4 sm:$0xff]   ;;  %v16045_v11 = vld [vmem:[#allocation7 + $0x24c] ss:$16 sps:$4 sm:$0xff]   ;;  %v16044_v12 = vld [vmem:[#allocation7 + $0x240] ss:$16 sps:$4 sm:$0xff]  }
 0x176   :  { %10994 = vmatpush1.bf16.msra.mxu0 %v15974_v26  ;;  %11122 = vmatpush1.bf16.msra.mxu1 %v15975_v27  ;;  %v16047_v13 = vld [vmem:[#allocation7 + $0x248] ss:$16 sps:$4 sm:$0xff]   ;;  %v16048_v14 = vld [vmem:[#allocation7 + $0x264] ss:$16 sps:$4 sm:$0xff]   ;;  %v16051_v15 = vld [vmem:[#allocation7 + $0x26c] ss:$16 sps:$4 sm:$0xff]  }
 0x177   :  { %10996 = vmatprep.subr.bf16.mxu0 %v15976_v28  ;;  %11124 = vmatprep.subr.bf16.mxu1 %v15978_v29  ;;  %v16050_v16 = vld [vmem:[#allocation7 + $0x260] ss:$16 sps:$4 sm:$0xff]   ;;  %v16053_v17 = vld [vmem:[#allocation7 + $0x268] ss:$16 sps:$4 sm:$0xff]   ;;  %v16054_v18 = vld [vmem:[#allocation7 + $0x284] ss:$16 sps:$4 sm:$0xff]  }
 0x178   :  { %v16057_v19 = vld [vmem:[#allocation7 + $0x28c] ss:$16 sps:$4 sm:$0xff]   ;;  %v16056_v20 = vld [vmem:[#allocation7 + $0x280] ss:$16 sps:$4 sm:$0xff]   ;;  %v16059_v21 = vld [vmem:[#allocation7 + $0x288] ss:$16 sps:$4 sm:$0xff]  }
 0x179   :  { %v16060_v22 = vld [vmem:[#allocation7 + $0x2a4] ss:$16 sps:$4 sm:$0xff]   ;;  %v16063_v23 = vld [vmem:[#allocation7 + $0x2ac] ss:$16 sps:$4 sm:$0xff]   ;;  %v16062_v24 = vld [vmem:[#allocation7 + $0x2a0] ss:$16 sps:$4 sm:$0xff]  }
 0x17a   :  { %10998 = vmatpush1.bf16.msra.mxu0 %v15980_v30  ;;  %11126 = vmatpush1.bf16.msra.mxu1 %v15981_v31  ;;  %v16065_v25 = vld [vmem:[#allocation7 + $0x2a8] ss:$16 sps:$4 sm:$0xff]   ;;  %v16066_v26 = vld [vmem:[#allocation7 + $0x2c4] ss:$16 sps:$4 sm:$0xff]   ;;  %v16069_v29 = vld [vmem:[#allocation7 + $0x2cc] ss:$16 sps:$4 sm:$0xff]  }
 0x17b   :  { %11000 = vmatprep.subr.bf16.mxu0 %v15982_v32  ;;  %11128 = vmatprep.subr.bf16.mxu1 %v15984_v33  ;;  %v18375_v27 = vld [vmem:[#allocation2 + $0x28] sm:$0xff]  ;;  %v18377_v28 = vld [vmem:[#allocation2 + $0x20] sm:$0xff]  ;;  %v18383_v30 = vld [vmem:[#allocation2 + $0x18] sm:$0xff] }
 0x17c   :  { %v16068_v31 = vld [vmem:[#allocation7 + $0x2c0] ss:$16 sps:$4 sm:$0xff]   ;;  %v16071_v32 = vld [vmem:[#allocation7 + $0x2c8] ss:$16 sps:$4 sm:$0xff]   ;;  %v16072_v33 = vld [vmem:[#allocation7 + $0x2e4] ss:$16 sps:$4 sm:$0xff]  }
 0x17d   :  { %vm18446_vm1 = vmpackc.low %vm2900_vm0, %vm2900_vm0 }
 0x17e   :  { %11002 = vmatpush1.bf16.msra.mxu0 %v15986_v34  ;;  %11130 = vmatpush1.bf16.msra.mxu1 %v15987_v35  ;;  %v16075_v34 = vld [vmem:[#allocation7 + $0x2ec] ss:$16 sps:$4 sm:$0xff]   ;;  %v16074_v35 = vld [vmem:[#allocation7 + $0x2e0] ss:$16 sps:$4 sm:$0xff]  }
 0x17f   :  { %11004 = vmatprep.subr.bf16.mxu0 %v15988_v36  ;;  %11132 = vmatprep.subr.bf16.mxu1 %v15990_v37  ;;  %v16077_v36 = vld [vmem:[#allocation7 + $0x2e8] ss:$16 sps:$4 sm:$0xff]   ;;  %v16078_v37 = vld [vmem:[#allocation7 + $0x304] ss:$16 sps:$4 sm:$0xff]  }
 0x182   :  { %11006 = vmatpush1.bf16.msra.mxu0 %v15992_v38  ;;  %11134 = vmatpush1.bf16.msra.mxu1 %v15993_v39  ;;  %v16081_v38 = vld [vmem:[#allocation7 + $0x30c] ss:$16 sps:$4 sm:$0xff]   ;;  %v16080_v39 = vld [vmem:[#allocation7 + $0x300] ss:$16 sps:$4 sm:$0xff]  }
 0x183   :  { %11008 = vmatprep.subr.bf16.mxu0 %v15994_v40  ;;  %11136 = vmatprep.subr.bf16.mxu1 %v15996_v41  ;;  %v16083_v40 = vld [vmem:[#allocation7 + $0x308] ss:$16 sps:$4 sm:$0xff]   ;;  %v16084_v41 = vld [vmem:[#allocation7 + $0x324] ss:$16 sps:$4 sm:$0xff]  }
 0x186   :  { %11010 = vmatpush1.bf16.msra.mxu0 %v15998_v42  ;;  %11138 = vmatpush1.bf16.msra.mxu1 %v15999_v43  ;;  %v16087_v42 = vld [vmem:[#allocation7 + $0x32c] ss:$16 sps:$4 sm:$0xff]   ;;  %v16086_v43 = vld [vmem:[#allocation7 + $0x320] ss:$16 sps:$4 sm:$0xff]  }
 0x187   :  { %11012 = vmatprep.subr.bf16.mxu0 %v16000_v44  ;;  %11140 = vmatprep.subr.bf16.mxu1 %v16002_v45  ;;  %v16089_v44 = vld [vmem:[#allocation7 + $0x328] ss:$16 sps:$4 sm:$0xff]   ;;  %v16090_v45 = vld [vmem:[#allocation7 + $0x344] ss:$16 sps:$4 sm:$0xff]  }
 0x18a   :  { %11014 = vmatpush1.bf16.msra.mxu0 %v16004_v47  ;;  %11142 = vmatpush1.bf16.msra.mxu1 %v16005_v48  ;;  %v16093_v47 = vld [vmem:[#allocation7 + $0x34c] ss:$16 sps:$4 sm:$0xff]   ;;  %v16092_v48 = vld [vmem:[#allocation7 + $0x340] ss:$16 sps:$4 sm:$0xff]  }
 0x18b   :  { %11016 = vmatprep.subr.bf16.mxu0 %v16006_v49  ;;  %11144 = vmatprep.subr.bf16.mxu1 %v16008_v50  ;;  %v16095_v49 = vld [vmem:[#allocation7 + $0x348] ss:$16 sps:$4 sm:$0xff]   ;;  %v16096_v50 = vld [vmem:[#allocation7 + $0x364] ss:$16 sps:$4 sm:$0xff]  }
 0x18e   :  { %11018 = vmatpush1.bf16.msra.mxu0 %v16010_v51  ;;  %11146 = vmatpush1.bf16.msra.mxu1 %v16011_v52  ;;  %v16099_v51 = vld [vmem:[#allocation7 + $0x36c] ss:$16 sps:$4 sm:$0xff]   ;;  %v16098_v52 = vld [vmem:[#allocation7 + $0x360] ss:$16 sps:$4 sm:$0xff]  }
 0x18f   :  { %11020 = vmatprep.subr.bf16.mxu0 %v16012_v53  ;;  %11148 = vmatprep.subr.bf16.mxu1 %v16014_v54  ;;  %v16101_v53 = vld [vmem:[#allocation7 + $0x368] ss:$16 sps:$4 sm:$0xff]   ;;  %v16102_v54 = vld [vmem:[#allocation7 + $0x384] ss:$16 sps:$4 sm:$0xff]  }
 0x192   :  { %11022 = vmatpush1.bf16.msra.mxu0 %v16016_v55  ;;  %11150 = vmatpush1.bf16.msra.mxu1 %v16017_v56  ;;  %v16105_v55 = vld [vmem:[#allocation7 + $0x38c] ss:$16 sps:$4 sm:$0xff]   ;;  %v16104_v56 = vld [vmem:[#allocation7 + $0x380] ss:$16 sps:$4 sm:$0xff]  }
 0x193   :  { %11024 = vmatprep.subr.bf16.mxu0 %v16018_v57  ;;  %11152 = vmatprep.subr.bf16.mxu1 %v16020_v58  ;;  %v16107_v57 = vld [vmem:[#allocation7 + $0x388] ss:$16 sps:$4 sm:$0xff]   ;;  %v16108_v58 = vld [vmem:[#allocation7 + $0x3a4] ss:$16 sps:$4 sm:$0xff]  }
 0x196   :  { %11026 = vmatpush1.bf16.msra.mxu0 %v16022_v59  ;;  %11154 = vmatpush1.bf16.msra.mxu1 %v16023_v60  ;;  %v16111_v59 = vld [vmem:[#allocation7 + $0x3ac] ss:$16 sps:$4 sm:$0xff]   ;;  %v16110_v60 = vld [vmem:[#allocation7 + $0x3a0] ss:$16 sps:$4 sm:$0xff]  }
 0x197   :  { %11028 = vmatprep.subr.bf16.mxu0 %v16024_v61  ;;  %11156 = vmatprep.subr.bf16.mxu1 %v16026_v62  ;;  %v16113_v61 = vld [vmem:[#allocation7 + $0x3a8] ss:$16 sps:$4 sm:$0xff]   ;;  %v16114_v62 = vld [vmem:[#allocation7 + $0x3c4] ss:$16 sps:$4 sm:$0xff]  }
 0x19a   :  { %11030 = vmatpush1.bf16.msra.mxu0 %v16028_v63  ;;  %11158 = vmatpush1.bf16.msra.mxu1 %v16029_v0  ;;  %v16117_v63 = vld [vmem:[#allocation7 + $0x3cc] ss:$16 sps:$4 sm:$0xff]   ;;  %v16116_v0 = vld [vmem:[#allocation7 + $0x3c0] ss:$16 sps:$4 sm:$0xff]  }
 0x19b   :  { %11032 = vmatprep.subr.bf16.mxu0 %v16030_v1  ;;  %11160 = vmatprep.subr.bf16.mxu1 %v16033_v2  ;;  %v16119_v1 = vld [vmem:[#allocation7 + $0x3c8] ss:$16 sps:$4 sm:$0xff]   ;;  %v16120_v2 = vld [vmem:[#allocation7 + $0x3e4] ss:$16 sps:$4 sm:$0xff]  }
 0x19d   :  { %1917 = vmatmul.mubr.f32.vlgmr.msra.gmra.mrb[0].mxu0 %v18371_v5  ;;  %2071 = vmatmul.mubr.f32.vlgmr.msra.gmra.mrb[0].mxu1 %v18371_v5 }
 0x19e   :  { %11034 = vmatpush1.bf16.msra.mxu0 %v16032_v3  ;;  %11162 = vmatpush1.bf16.msra.mxu1 %v16035_v4  ;;  %v16123_v3 = vld [vmem:[#allocation7 + $0x3ec] ss:$16 sps:$4 sm:$0xff]   ;;  %v16122_v4 = vld [vmem:[#allocation7 + $0x3e0] ss:$16 sps:$4 sm:$0xff]  }
 0x19f   :  { %11036 = vmatprep.subr.bf16.mxu0 %v16036_v6  ;;  %11164 = vmatprep.subr.bf16.mxu1 %v16039_v7  ;;  %v16125_v6 = vld [vmem:[#allocation7 + $0x3e8] ss:$16 sps:$4 sm:$0xff]  }
 0x1a0   :  { %1922 = vmatprep.mubr.f32.mxu0 %v18375_v27  ;;  %2076 = vmatprep.mubr.f32.mxu1 %v18375_v27  ;;  %v16126_v7 = vld [vmem:[#allocation10 + $0x4] ss:$16 sps:$4 sm:$0xff]  }
 0x1a1   :  { %1923 = vmatmul.mubr.f32.gmra.mrb[2].mxu0 %v18377_v28  ;;  %2077 = vmatmul.mubr.f32.gmra.mrb[2].mxu1 %v18377_v28 }
 0x1a2   :  { %11038 = vmatpush1.bf16.msra.mxu0 %v16038_v8  ;;  %11166 = vmatpush1.bf16.msra.mxu1 %v16041_v9  ;;  %v16129_v8 = vld [vmem:[#allocation10 + $0xc] ss:$16 sps:$4 sm:$0xff]  }
 0x1a3   :  { %11040 = vmatprep.subr.bf16.mxu0 %v16042_v10  ;;  %11168 = vmatprep.subr.bf16.mxu1 %v16045_v11  ;;  %v286_v9 = vld [vmem:[#allocation2 + $0x10] sm:$0xff]  ;;  %v16131_v11 = vld [vmem:[#allocation10 + $0x8] ss:$16 sps:$4 sm:$0xff]  }
 0x1a4   :  { %1993 = vmatprep.mubr.f32.mxu0 %v18383_v30  ;;  %2147 = vmatprep.mubr.f32.mxu1 %v18383_v30  ;;  %v16128_v10 = vld [vmem:[#allocation10] ss:$16 sps:$4 sm:$0xff]  }
 0x1a6   :  { %11042 = vmatpush1.bf16.msra.mxu0 %v16044_v12  ;;  %11170 = vmatpush1.bf16.msra.mxu1 %v16047_v13  ;;  %v291_v12 = vld [vmem:[#allocation2 + $0x38] sm:$0xff] }
 0x1a7   :  { %11044 = vmatprep.subr.bf16.mxu0 %v16048_v14  ;;  %11172 = vmatprep.subr.bf16.mxu1 %v16051_v15  ;;  %v16132_v13 = vld [vmem:[#allocation10 + $0x24] ss:$16 sps:$4 sm:$0xff]   ;;  %v290_v14 = vld [vmem:[#allocation2 + $0x30] sm:$0xff] }
 0x1a8   :  { %v16135_v15 = vld [vmem:[#allocation10 + $0x2c] ss:$16 sps:$4 sm:$0xff]  }
 0x1aa   :  { %11046 = vmatpush1.bf16.msra.mxu0 %v16050_v16  ;;  %11174 = vmatpush1.bf16.msra.mxu1 %v16053_v17  ;;  %v16134_v16 = vld [vmem:[#allocation10 + $0x20] ss:$16 sps:$4 sm:$0xff]   ;;  %v16137_v17 = vld [vmem:[#allocation10 + $0x28] ss:$16 sps:$4 sm:$0xff]  }
 0x1ab   :  { %11048 = vmatprep.subr.bf16.mxu0 %v16054_v18  ;;  %11176 = vmatprep.subr.bf16.mxu1 %v16057_v19  ;;  %v16138_v18 = vld [vmem:[#allocation10 + $0x44] ss:$16 sps:$4 sm:$0xff]   ;;  %v16141_v19 = vld [vmem:[#allocation10 + $0x4c] ss:$16 sps:$4 sm:$0xff]  }
 0x1ae   :  { %11050 = vmatpush1.bf16.msra.mxu0 %v16056_v20  ;;  %11178 = vmatpush1.bf16.msra.mxu1 %v16059_v21  ;;  %v16140_v20 = vld [vmem:[#allocation10 + $0x40] ss:$16 sps:$4 sm:$0xff]   ;;  %v16143_v21 = vld [vmem:[#allocation10 + $0x48] ss:$16 sps:$4 sm:$0xff]  }
 0x1af   :  { %11052 = vmatprep.subr.bf16.mxu0 %v16060_v22  ;;  %11180 = vmatprep.subr.bf16.mxu1 %v16063_v23  ;;  %v16144_v22 = vld [vmem:[#allocation10 + $0x64] ss:$16 sps:$4 sm:$0xff]   ;;  %v16147_v23 = vld [vmem:[#allocation10 + $0x6c] ss:$16 sps:$4 sm:$0xff]  }
 0x1b2   :  { %11054 = vmatpush1.bf16.msra.mxu0 %v16062_v24  ;;  %11182 = vmatpush1.bf16.msra.mxu1 %v16065_v25  ;;  %v16146_v24 = vld [vmem:[#allocation10 + $0x60] ss:$16 sps:$4 sm:$0xff]   ;;  %v16149_v25 = vld [vmem:[#allocation10 + $0x68] ss:$16 sps:$4 sm:$0xff]  }
 0x1b3   :  { %11056 = vmatprep.subr.bf16.mxu0 %v16066_v26  ;;  %11184 = vmatprep.subr.bf16.mxu1 %v16069_v29  ;;  %v16150_v26 = vld [vmem:[#allocation10 + $0x84] ss:$16 sps:$4 sm:$0xff]   ;;  %v16153_v29 = vld [vmem:[#allocation10 + $0x8c] ss:$16 sps:$4 sm:$0xff]  }
 0x1b6   :  { %11058 = vmatpush1.bf16.msra.mxu0 %v16068_v31  ;;  %11186 = vmatpush1.bf16.msra.mxu1 %v16071_v32  ;;  %v16152_v31 = vld [vmem:[#allocation10 + $0x80] ss:$16 sps:$4 sm:$0xff]   ;;  %v16155_v32 = vld [vmem:[#allocation10 + $0x88] ss:$16 sps:$4 sm:$0xff]  }
 0x1b7   :  { %11060 = vmatprep.subr.bf16.mxu0 %v16072_v33  ;;  %11188 = vmatprep.subr.bf16.mxu1 %v16075_v34  ;;  %v16156_v33 = vld [vmem:[#allocation10 + $0xa4] ss:$16 sps:$4 sm:$0xff]   ;;  %v16159_v34 = vld [vmem:[#allocation10 + $0xac] ss:$16 sps:$4 sm:$0xff]  }
 0x1ba   :  { %11062 = vmatpush1.bf16.msra.mxu0 %v16074_v35  ;;  %11190 = vmatpush1.bf16.msra.mxu1 %v16077_v36  ;;  %v16158_v35 = vld [vmem:[#allocation10 + $0xa0] ss:$16 sps:$4 sm:$0xff]   ;;  %v16161_v36 = vld [vmem:[#allocation10 + $0xa8] ss:$16 sps:$4 sm:$0xff]  }
 0x1bb   :  { %11064 = vmatprep.subr.bf16.mxu0 %v16078_v37  ;;  %11192 = vmatprep.subr.bf16.mxu1 %v16081_v38  ;;  %v16165_v37 = vld [vmem:[#allocation10 + $0xcc] ss:$16 sps:$4 sm:$0xff]   ;;  %v16164_v38 = vld [vmem:[#allocation10 + $0xc0] ss:$16 sps:$4 sm:$0xff]  }
 0x1be   :  { %11066 = vmatpush1.bf16.msra.mxu0 %v16080_v39  ;;  %11194 = vmatpush1.bf16.msra.mxu1 %v16083_v40  ;;  %v16167_v39 = vld [vmem:[#allocation10 + $0xc8] ss:$16 sps:$4 sm:$0xff]   ;;  %v16168_v40 = vld [vmem:[#allocation10 + $0xe4] ss:$16 sps:$4 sm:$0xff]  }
 0x1bf   :  { %11068 = vmatprep.subr.bf16.mxu0 %v16084_v41  ;;  %11196 = vmatprep.subr.bf16.mxu1 %v16087_v42  ;;  %v16171_v41 = vld [vmem:[#allocation10 + $0xec] ss:$16 sps:$4 sm:$0xff]   ;;  %v16170_v42 = vld [vmem:[#allocation10 + $0xe0] ss:$16 sps:$4 sm:$0xff]  }
 0x1c2   :  { %11070 = vmatpush1.bf16.msra.mxu0 %v16086_v43  ;;  %11198 = vmatpush1.bf16.msra.mxu1 %v16089_v44  ;;  %v16173_v43 = vld [vmem:[#allocation10 + $0xe8] ss:$16 sps:$4 sm:$0xff]   ;;  %v16174_v44 = vld [vmem:[#allocation10 + $0x104] ss:$16 sps:$4 sm:$0xff]  }
 0x1c3   :  { %11072 = vmatprep.subr.bf16.mxu0 %v16090_v45  ;;  %11200 = vmatprep.subr.bf16.mxu1 %v16093_v47  ;;  %v16177_v45 = vld [vmem:[#allocation10 + $0x10c] ss:$16 sps:$4 sm:$0xff]   ;;  %v16176_v47 = vld [vmem:[#allocation10 + $0x100] ss:$16 sps:$4 sm:$0xff]  }
 0x1c6   :  { %11074 = vmatpush1.bf16.msra.mxu0 %v16092_v48  ;;  %11202 = vmatpush1.bf16.msra.mxu1 %v16095_v49  ;;  %v16179_v48 = vld [vmem:[#allocation10 + $0x108] ss:$16 sps:$4 sm:$0xff]   ;;  %v16180_v49 = vld [vmem:[#allocation10 + $0x124] ss:$16 sps:$4 sm:$0xff]  }
 0x1c7   :  { %11076 = vmatprep.subr.bf16.mxu0 %v16096_v50  ;;  %11204 = vmatprep.subr.bf16.mxu1 %v16099_v51  ;;  %v16183_v50 = vld [vmem:[#allocation10 + $0x12c] ss:$16 sps:$4 sm:$0xff]   ;;  %v16182_v51 = vld [vmem:[#allocation10 + $0x120] ss:$16 sps:$4 sm:$0xff]  }
 0x1ca   :  { %11078 = vmatpush1.bf16.msra.mxu0 %v16098_v52  ;;  %11206 = vmatpush1.bf16.msra.mxu1 %v16101_v53  ;;  %v16185_v52 = vld [vmem:[#allocation10 + $0x128] ss:$16 sps:$4 sm:$0xff]   ;;  %v16186_v53 = vld [vmem:[#allocation10 + $0x144] ss:$16 sps:$4 sm:$0xff]  }
 0x1cb   :  { %11080 = vmatprep.subr.bf16.mxu0 %v16102_v54  ;;  %11208 = vmatprep.subr.bf16.mxu1 %v16105_v55  ;;  %v16189_v54 = vld [vmem:[#allocation10 + $0x14c] ss:$16 sps:$4 sm:$0xff]   ;;  %v16188_v55 = vld [vmem:[#allocation10 + $0x140] ss:$16 sps:$4 sm:$0xff]  }
 0x1ce   :  { %11082 = vmatpush1.bf16.msra.mxu0 %v16104_v56  ;;  %11210 = vmatpush1.bf16.msra.mxu1 %v16107_v57  ;;  %v16191_v56 = vld [vmem:[#allocation10 + $0x148] ss:$16 sps:$4 sm:$0xff]   ;;  %v16192_v57 = vld [vmem:[#allocation10 + $0x164] ss:$16 sps:$4 sm:$0xff]  }
 0x1cf   :  { %11084 = vmatprep.subr.bf16.mxu0 %v16108_v58  ;;  %11212 = vmatprep.subr.bf16.mxu1 %v16111_v59  ;;  %v16195_v58 = vld [vmem:[#allocation10 + $0x16c] ss:$16 sps:$4 sm:$0xff]   ;;  %v16194_v59 = vld [vmem:[#allocation10 + $0x160] ss:$16 sps:$4 sm:$0xff]  }
 0x1d2   :  { %11086 = vmatpush1.bf16.msra.mxu0 %v16110_v60  ;;  %11214 = vmatpush1.bf16.msra.mxu1 %v16113_v61  ;;  %v16197_v60 = vld [vmem:[#allocation10 + $0x168] ss:$16 sps:$4 sm:$0xff]   ;;  %v16198_v61 = vld [vmem:[#allocation10 + $0x184] ss:$16 sps:$4 sm:$0xff]  }
 0x1d3   :  { %11088 = vmatprep.subr.bf16.mxu0 %v16114_v62  ;;  %11216 = vmatprep.subr.bf16.mxu1 %v16117_v63  ;;  %v16201_v62 = vld [vmem:[#allocation10 + $0x18c] ss:$16 sps:$4 sm:$0xff]   ;;  %v16200_v63 = vld [vmem:[#allocation10 + $0x180] ss:$16 sps:$4 sm:$0xff]  }
 0x1d6   :  { %11090 = vmatpush1.bf16.msra.mxu0 %v16116_v0  ;;  %11218 = vmatpush1.bf16.msra.mxu1 %v16119_v1  ;;  %v16203_v0 = vld [vmem:[#allocation10 + $0x188] ss:$16 sps:$4 sm:$0xff]   ;;  %v16204_v1 = vld [vmem:[#allocation10 + $0x1a4] ss:$16 sps:$4 sm:$0xff]  }
 0x1d7   :  { %11092 = vmatprep.subr.bf16.mxu0 %v16120_v2  ;;  %11220 = vmatprep.subr.bf16.mxu1 %v16123_v3  ;;  %v16207_v2 = vld [vmem:[#allocation10 + $0x1ac] ss:$16 sps:$4 sm:$0xff]   ;;  %v16206_v3 = vld [vmem:[#allocation10 + $0x1a0] ss:$16 sps:$4 sm:$0xff]  }
 0x1da   :  { %11094 = vmatpush1.bf16.msra.mxu0 %v16122_v4  ;;  %11222 = vmatpush1.bf16.msra.mxu1 %v16125_v6  ;;  %v16209_v4 = vld [vmem:[#allocation10 + $0x1a8] ss:$16 sps:$4 sm:$0xff]   ;;  %v16210_v6 = vld [vmem:[#allocation10 + $0x1c4] ss:$16 sps:$4 sm:$0xff]  }
 0x1db   :  { %11224 = vmatprep.subr.bf16.mxu0 %v16126_v7  ;;  %11352 = vmatprep.subr.bf16.mxu1 %v16129_v8  ;;  %v16213_v7 = vld [vmem:[#allocation10 + $0x1cc] ss:$16 sps:$4 sm:$0xff]   ;;  %v16212_v8 = vld [vmem:[#allocation10 + $0x1c0] ss:$16 sps:$4 sm:$0xff]  }
 0x1dd   :  { %1994 = vmatmul.mubr.f32.vlgmr.msra.gmra.mrb[0].mxu0 %v286_v9  ;;  %2148 = vmatmul.mubr.f32.vlgmr.msra.gmra.mrb[0].mxu1 %v286_v9  ;;  %v16215_v9 = vld [vmem:[#allocation10 + $0x1c8] ss:$16 sps:$4 sm:$0xff]  }
 0x1de   :  { %11226 = vmatpush1.bf16.msra.mxu0 %v16128_v10  ;;  %11354 = vmatpush1.bf16.msra.mxu1 %v16131_v11  ;;  %v16216_v10 = vld [vmem:[#allocation10 + $0x1e4] ss:$16 sps:$4 sm:$0xff]   ;;  %v16219_v11 = vld [vmem:[#allocation10 + $0x1ec] ss:$16 sps:$4 sm:$0xff]  }
 0x1df   :  { %1999 = vmatprep.mubr.f32.mxu0 %v291_v12  ;;  %11228 = vmatprep.subr.bf16.mxu0 %v16132_v13  ;;  %v16221_v13 = vld [vmem:[#allocation10 + $0x1e8] ss:$16 sps:$4 sm:$0xff]  }
 0x1e0   :  { %11356 = vmatprep.subr.bf16.mxu1 %v16135_v15  ;;  %2153 = vmatprep.mubr.f32.mxu1 %v291_v12  ;;  %v16218_v12 = vld [vmem:[#allocation10 + $0x1e0] ss:$16 sps:$4 sm:$0xff]   ;;  %v16225_v15 = vld [vmem:[#allocation10 + $0x20c] ss:$16 sps:$4 sm:$0xff]  }
 0x1e1   :  { %2000 = vmatmul.mubr.f32.gmra.mrb[2].mxu0 %v290_v14  ;;  %2154 = vmatmul.mubr.f32.gmra.mrb[2].mxu1 %v290_v14  ;;  %v16222_v14 = vld [vmem:[#allocation10 + $0x204] ss:$16 sps:$4 sm:$0xff]  }
 0x1e2   :  { %11230 = vmatpush1.bf16.msra.mxu0 %v16134_v16  ;;  %11358 = vmatpush1.bf16.msra.mxu1 %v16137_v17  ;;  %v16224_v16 = vld [vmem:[#allocation10 + $0x200] ss:$16 sps:$4 sm:$0xff]   ;;  %v16227_v17 = vld [vmem:[#allocation10 + $0x208] ss:$16 sps:$4 sm:$0xff]  }
 0x1e3   :  { %11232 = vmatprep.subr.bf16.mxu0 %v16138_v18  ;;  %11360 = vmatprep.subr.bf16.mxu1 %v16141_v19  ;;  %v16228_v18 = vld [vmem:[#allocation10 + $0x224] ss:$16 sps:$4 sm:$0xff]   ;;  %v16231_v19 = vld [vmem:[#allocation10 + $0x22c] ss:$16 sps:$4 sm:$0xff]  }
 0x1e4   :  { %2246 = vmatprep.mubr.f32.mxu0 %v18367_v46  ;;  %2400 = vmatprep.mubr.f32.mxu1 %v18367_v46  ;;  %v16162_v46 = vld [vmem:[#allocation10 + $0xc4] ss:$16 sps:$4 sm:$0xff]  }
 0x1e6   :  { %11234 = vmatpush1.bf16.msra.mxu0 %v16140_v20  ;;  %11362 = vmatpush1.bf16.msra.mxu1 %v16143_v21  ;;  %v16230_v20 = vld [vmem:[#allocation10 + $0x220] ss:$16 sps:$4 sm:$0xff]   ;;  %v16233_v21 = vld [vmem:[#allocation10 + $0x228] ss:$16 sps:$4 sm:$0xff]  }
 0x1e7   :  { %11236 = vmatprep.subr.bf16.mxu0 %v16144_v22  ;;  %11364 = vmatprep.subr.bf16.mxu1 %v16147_v23  ;;  %v16234_v22 = vld [vmem:[#allocation10 + $0x244] ss:$16 sps:$4 sm:$0xff]   ;;  %v16237_v23 = vld [vmem:[#allocation10 + $0x24c] ss:$16 sps:$4 sm:$0xff]  }
 0x1ea   :  { %11238 = vmatpush1.bf16.msra.mxu0 %v16146_v24  ;;  %11366 = vmatpush1.bf16.msra.mxu1 %v16149_v25  ;;  %v16236_v24 = vld [vmem:[#allocation10 + $0x240] ss:$16 sps:$4 sm:$0xff]   ;;  %v16240_v25 = vld [vmem:[#allocation10 + $0x264] ss:$16 sps:$4 sm:$0xff]  }
 0x1eb   :  { %11240 = vmatprep.subr.bf16.mxu0 %v16150_v26  ;;  %11368 = vmatprep.subr.bf16.mxu1 %v16153_v29  ;;  %v16243_v26 = vld [vmem:[#allocation10 + $0x26c] ss:$16 sps:$4 sm:$0xff]   ;;  %v16242_v29 = vld [vmem:[#allocation10 + $0x260] ss:$16 sps:$4 sm:$0xff]  }
 0x1ee   :  { %11242 = vmatpush1.bf16.msra.mxu0 %v16152_v31  ;;  %11370 = vmatpush1.bf16.msra.mxu1 %v16155_v32  ;;  %v16245_v31 = vld [vmem:[#allocation10 + $0x268] ss:$16 sps:$4 sm:$0xff]   ;;  %v16249_v32 = vld [vmem:[#allocation10 + $0x28c] ss:$16 sps:$4 sm:$0xff]  }
 0x1ef   :  { %11244 = vmatprep.subr.bf16.mxu0 %v16156_v33  ;;  %11372 = vmatprep.subr.bf16.mxu1 %v16159_v34  ;;  %v16251_v33 = vld [vmem:[#allocation10 + $0x288] ss:$16 sps:$4 sm:$0xff]   ;;  %v16252_v34 = vld [vmem:[#allocation10 + $0x2a4] ss:$16 sps:$4 sm:$0xff]  }
 0x1f2   :  { %11246 = vmatpush1.bf16.msra.mxu0 %v16158_v35  ;;  %11374 = vmatpush1.bf16.msra.mxu1 %v16161_v36  ;;  %v16255_v35 = vld [vmem:[#allocation10 + $0x2ac] ss:$16 sps:$4 sm:$0xff]   ;;  %v16254_v36 = vld [vmem:[#allocation10 + $0x2a0] ss:$16 sps:$4 sm:$0xff]  }
 0x1f3   :  { %11248 = vmatprep.subr.bf16.mxu0 %v16162_v46  ;;  %11376 = vmatprep.subr.bf16.mxu1 %v16165_v37  ;;  %v16257_v46 = vld [vmem:[#allocation10 + $0x2a8] ss:$16 sps:$4 sm:$0xff]   ;;  %v16261_v37 = vld [vmem:[#allocation10 + $0x2cc] ss:$16 sps:$4 sm:$0xff]  }
 0x1f6   :  { %11250 = vmatpush1.bf16.msra.mxu0 %v16164_v38  ;;  %11378 = vmatpush1.bf16.msra.mxu1 %v16167_v39  ;;  %v16260_v38 = vld [vmem:[#allocation10 + $0x2c0] ss:$16 sps:$4 sm:$0xff]   ;;  %v16263_v39 = vld [vmem:[#allocation10 + $0x2c8] ss:$16 sps:$4 sm:$0xff]  }
 0x1f7   :  { %11252 = vmatprep.subr.bf16.mxu0 %v16168_v40  ;;  %11380 = vmatprep.subr.bf16.mxu1 %v16171_v41  ;;  %v16264_v40 = vld [vmem:[#allocation10 + $0x2e4] ss:$16 sps:$4 sm:$0xff]   ;;  %v16267_v41 = vld [vmem:[#allocation10 + $0x2ec] ss:$16 sps:$4 sm:$0xff]  }
 0x1fa   :  { %11254 = vmatpush1.bf16.msra.mxu0 %v16170_v42  ;;  %11382 = vmatpush1.bf16.msra.mxu1 %v16173_v43  ;;  %v16266_v42 = vld [vmem:[#allocation10 + $0x2e0] ss:$16 sps:$4 sm:$0xff]   ;;  %v16269_v43 = vld [vmem:[#allocation10 + $0x2e8] ss:$16 sps:$4 sm:$0xff]  }
 0x1fb   :  { %11256 = vmatprep.subr.bf16.mxu0 %v16174_v44  ;;  %11384 = vmatprep.subr.bf16.mxu1 %v16177_v45  ;;  %v16270_v44 = vld [vmem:[#allocation10 + $0x304] ss:$16 sps:$4 sm:$0xff]   ;;  %v16273_v45 = vld [vmem:[#allocation10 + $0x30c] ss:$16 sps:$4 sm:$0xff]  }
 0x1fe   :  { %11258 = vmatpush1.bf16.msra.mxu0 %v16176_v47  ;;  %11386 = vmatpush1.bf16.msra.mxu1 %v16179_v48  ;;  %v16272_v47 = vld [vmem:[#allocation10 + $0x300] ss:$16 sps:$4 sm:$0xff]   ;;  %v16275_v48 = vld [vmem:[#allocation10 + $0x308] ss:$16 sps:$4 sm:$0xff]  }
 0x1ff   :  { %11260 = vmatprep.subr.bf16.mxu0 %v16180_v49  ;;  %11388 = vmatprep.subr.bf16.mxu1 %v16183_v50  ;;  %v16276_v49 = vld [vmem:[#allocation10 + $0x324] ss:$16 sps:$4 sm:$0xff]   ;;  %v16279_v50 = vld [vmem:[#allocation10 + $0x32c] ss:$16 sps:$4 sm:$0xff]  }
 0x202   :  { %11262 = vmatpush1.bf16.msra.mxu0 %v16182_v51  ;;  %11390 = vmatpush1.bf16.msra.mxu1 %v16185_v52  ;;  %v16278_v51 = vld [vmem:[#allocation10 + $0x320] ss:$16 sps:$4 sm:$0xff]   ;;  %v16281_v52 = vld [vmem:[#allocation10 + $0x328] ss:$16 sps:$4 sm:$0xff]  }
 0x203   :  { %11264 = vmatprep.subr.bf16.mxu0 %v16186_v53  ;;  %11392 = vmatprep.subr.bf16.mxu1 %v16189_v54  ;;  %v16282_v53 = vld [vmem:[#allocation10 + $0x344] ss:$16 sps:$4 sm:$0xff]   ;;  %v16285_v54 = vld [vmem:[#allocation10 + $0x34c] ss:$16 sps:$4 sm:$0xff]  }
 0x206   :  { %11266 = vmatpush1.bf16.msra.mxu0 %v16188_v55  ;;  %11394 = vmatpush1.bf16.msra.mxu1 %v16191_v56  ;;  %v16284_v55 = vld [vmem:[#allocation10 + $0x340] ss:$16 sps:$4 sm:$0xff]   ;;  %v16287_v56 = vld [vmem:[#allocation10 + $0x348] ss:$16 sps:$4 sm:$0xff]  }
 0x207   :  { %11268 = vmatprep.subr.bf16.mxu0 %v16192_v57  ;;  %11396 = vmatprep.subr.bf16.mxu1 %v16195_v58  ;;  %v16288_v57 = vld [vmem:[#allocation10 + $0x364] ss:$16 sps:$4 sm:$0xff]   ;;  %v16291_v58 = vld [vmem:[#allocation10 + $0x36c] ss:$16 sps:$4 sm:$0xff]  }
 0x20a   :  { %11270 = vmatpush1.bf16.msra.mxu0 %v16194_v59  ;;  %11398 = vmatpush1.bf16.msra.mxu1 %v16197_v60  ;;  %v16290_v59 = vld [vmem:[#allocation10 + $0x360] ss:$16 sps:$4 sm:$0xff]   ;;  %v16293_v60 = vld [vmem:[#allocation10 + $0x368] ss:$16 sps:$4 sm:$0xff]  }
 0x20b   :  { %11272 = vmatprep.subr.bf16.mxu0 %v16198_v61  ;;  %11400 = vmatprep.subr.bf16.mxu1 %v16201_v62  ;;  %v16294_v61 = vld [vmem:[#allocation10 + $0x384] ss:$16 sps:$4 sm:$0xff]   ;;  %v16297_v62 = vld [vmem:[#allocation10 + $0x38c] ss:$16 sps:$4 sm:$0xff]  }
 0x20e   :  { %11274 = vmatpush1.bf16.msra.mxu0 %v16200_v63  ;;  %11402 = vmatpush1.bf16.msra.mxu1 %v16203_v0  ;;  %v16296_v63 = vld [vmem:[#allocation10 + $0x380] ss:$16 sps:$4 sm:$0xff]   ;;  %v16299_v0 = vld [vmem:[#allocation10 + $0x388] ss:$16 sps:$4 sm:$0xff]  }
 0x20f   :  { %11276 = vmatprep.subr.bf16.mxu0 %v16204_v1  ;;  %11404 = vmatprep.subr.bf16.mxu1 %v16207_v2  ;;  %v16300_v1 = vld [vmem:[#allocation10 + $0x3a4] ss:$16 sps:$4 sm:$0xff]   ;;  %v16303_v2 = vld [vmem:[#allocation10 + $0x3ac] ss:$16 sps:$4 sm:$0xff]  }
 0x212   :  { %11278 = vmatpush1.bf16.msra.mxu0 %v16206_v3  ;;  %11406 = vmatpush1.bf16.msra.mxu1 %v16209_v4  ;;  %v16302_v3 = vld [vmem:[#allocation10 + $0x3a0] ss:$16 sps:$4 sm:$0xff]   ;;  %v16305_v4 = vld [vmem:[#allocation10 + $0x3a8] ss:$16 sps:$4 sm:$0xff]  }
 0x213   :  { %11280 = vmatprep.subr.bf16.mxu0 %v16210_v6  ;;  %11408 = vmatprep.subr.bf16.mxu1 %v16213_v7  ;;  %v16306_v6 = vld [vmem:[#allocation10 + $0x3c4] ss:$16 sps:$4 sm:$0xff]   ;;  %v16309_v7 = vld [vmem:[#allocation10 + $0x3cc] ss:$16 sps:$4 sm:$0xff]  }
 0x216   :  { %11282 = vmatpush1.bf16.msra.mxu0 %v16212_v8  ;;  %11410 = vmatpush1.bf16.msra.mxu1 %v16215_v9  ;;  %v16308_v8 = vld [vmem:[#allocation10 + $0x3c0] ss:$16 sps:$4 sm:$0xff]   ;;  %v16311_v9 = vld [vmem:[#allocation10 + $0x3c8] ss:$16 sps:$4 sm:$0xff]  }
 0x217   :  { %11284 = vmatprep.subr.bf16.mxu0 %v16216_v10  ;;  %11412 = vmatprep.subr.bf16.mxu1 %v16219_v11  ;;  %v16312_v10 = vld [vmem:[#allocation10 + $0x3e4] ss:$16 sps:$4 sm:$0xff]   ;;  %v16315_v11 = vld [vmem:[#allocation10 + $0x3ec] ss:$16 sps:$4 sm:$0xff]  }
 0x21a   :  { %11286 = vmatpush1.bf16.msra.mxu0 %v16218_v12  ;;  %11414 = vmatpush1.bf16.msra.mxu1 %v16221_v13  ;;  %v16314_v12 = vld [vmem:[#allocation10 + $0x3e0] ss:$16 sps:$4 sm:$0xff]   ;;  %v16317_v13 = vld [vmem:[#allocation10 + $0x3e8] ss:$16 sps:$4 sm:$0xff]  }
 0x21b   :  { %11288 = vmatprep.subr.bf16.mxu0 %v16222_v14  ;;  %11416 = vmatprep.subr.bf16.mxu1 %v16225_v15  ;;  %v16318_v14 = vld [vmem:[#allocation13 + $0x4] ss:$16 sps:$4 sm:$0xff]   ;;  %v16372_v15 = vld [vmem:[#allocation13 + $0xc] ss:$16 sps:$4 sm:$0xff]  }
 0x21d   :  { %2247 = vmatmul.mubr.f32.vlgmr.msra.gmra.mrb[4].mxu0 %v18371_v5  ;;  %2401 = vmatmul.mubr.f32.vlgmr.msra.gmra.mrb[4].mxu1 %v18371_v5  ;;  %v16239_v5 = vld [vmem:[#allocation10 + $0x248] ss:$16 sps:$4 sm:$0xff]  }
 0x21e   :  { %11290 = vmatpush1.bf16.msra.mxu0 %v16224_v16  ;;  %11418 = vmatpush1.bf16.msra.mxu1 %v16227_v17  ;;  %v16320_v16 = vld [vmem:[#allocation13] ss:$16 sps:$4 sm:$0xff]   ;;  %v16321_v17 = vld [vmem:[#allocation13 + $0x24] ss:$16 sps:$4 sm:$0xff]  }
 0x21f   :  { %11292 = vmatprep.subr.bf16.mxu0 %v16228_v18  ;;  %11420 = vmatprep.subr.bf16.mxu1 %v16231_v19  ;;  %v16323_v18 = vld [vmem:[#allocation13 + $0x20] ss:$16 sps:$4 sm:$0xff]   ;;  %v16374_v19 = vld [vmem:[#allocation13 + $0x8] ss:$16 sps:$4 sm:$0xff]  }
 0x220   :  { %2252 = vmatprep.mubr.f32.mxu0 %v18375_v27  ;;  %2406 = vmatprep.mubr.f32.mxu1 %v18375_v27  ;;  %v16246_v27 = vld [vmem:[#allocation10 + $0x284] ss:$16 sps:$4 sm:$0xff]  }
 0x221   :  { %2253 = vmatmul.mubr.f32.gmra.mrb[6].mxu0 %v18377_v28  ;;  %2407 = vmatmul.mubr.f32.gmra.mrb[6].mxu1 %v18377_v28  ;;  %v16248_v28 = vld [vmem:[#allocation10 + $0x280] ss:$16 sps:$4 sm:$0xff]  }
 0x222   :  { %11294 = vmatpush1.bf16.msra.mxu0 %v16230_v20  ;;  %11422 = vmatpush1.bf16.msra.mxu1 %v16233_v21  ;;  %v17542_v20 = vld [vmem:[#allocation2 + $0x10] sm:$0xff]  ;;  %v16324_v21 = vld [vmem:[#allocation13 + $0x44] ss:$16 sps:$4 sm:$0xff]  }
 0x223   :  { %11296 = vmatprep.subr.bf16.mxu0 %v16234_v22  ;;  %11424 = vmatprep.subr.bf16.mxu1 %v16237_v23  ;;  %v16378_v22 = vld [vmem:[#allocation13 + $0x2c] ss:$16 sps:$4 sm:$0xff]   ;;  %v17543_v23 = vld [vmem:[#allocation2 + $0x38] sm:$0xff] }
 0x224   :  { %2323 = vmatprep.mubr.f32.mxu0 %v18383_v30  ;;  %2477 = vmatprep.mubr.f32.mxu1 %v18383_v30  ;;  %v16258_v30 = vld [vmem:[#allocation10 + $0x2c4] ss:$16 sps:$4 sm:$0xff]  }
 0x226   :  { %11298 = vmatpush1.bf16.msra.mxu0 %v16236_v24  ;;  %11426 = vmatpush1.bf16.msra.mxu1 %v16239_v5  ;;  %v16380_v24 = vld [vmem:[#allocation13 + $0x28] ss:$16 sps:$4 sm:$0xff]   ;;  %v16384_v5 = vld [vmem:[#allocation13 + $0x4c] ss:$16 sps:$4 sm:$0xff]  }
 0x227   :  { %11300 = vmatprep.subr.bf16.mxu0 %v16240_v25  ;;  %11428 = vmatprep.subr.bf16.mxu1 %v16243_v26  ;;  %v17544_v25 = vld [vmem:[#allocation2 + $0x30] sm:$0xff]  ;;  %v16326_v26 = vld [vmem:[#allocation13 + $0x40] ss:$16 sps:$4 sm:$0xff]  }
 0x22a   :  { %11302 = vmatpush1.bf16.msra.mxu0 %v16242_v29  ;;  %11430 = vmatpush1.bf16.msra.mxu1 %v16245_v31  ;;  %v17545_v29 = vld [vmem:[#allocation2 + $0x8] sm:$0xff] }
 0x22b   :  { %11304 = vmatprep.subr.bf16.mxu0 %v16246_v27  ;;  %11432 = vmatprep.subr.bf16.mxu1 %v16249_v32  ;;  %v16327_v31 = vld [vmem:[#allocation13 + $0x64] ss:$16 sps:$4 sm:$0xff]   ;;  %v16386_v27 = vld [vmem:[#allocation13 + $0x48] ss:$16 sps:$4 sm:$0xff]   ;;  %v16390_v32 = vld [vmem:[#allocation13 + $0x6c] ss:$16 sps:$4 sm:$0xff]  }
 0x22e   :  { %11306 = vmatpush1.bf16.msra.mxu0 %v16248_v28  ;;  %11434 = vmatpush1.bf16.msra.mxu1 %v16251_v33  ;;  %v16329_v28 = vld [vmem:[#allocation13 + $0x60] ss:$16 sps:$4 sm:$0xff]   ;;  %v16330_v33 = vld [vmem:[#allocation13 + $0x84] ss:$16 sps:$4 sm:$0xff]  }
 0x22f   :  { %11308 = vmatprep.subr.bf16.mxu0 %v16252_v34  ;;  %11436 = vmatprep.subr.bf16.mxu1 %v16255_v35  ;;  %v16392_v34 = vld [vmem:[#allocation13 + $0x68] ss:$16 sps:$4 sm:$0xff]   ;;  %v16396_v35 = vld [vmem:[#allocation13 + $0x8c] ss:$16 sps:$4 sm:$0xff]  }
 0x232   :  { %11310 = vmatpush1.bf16.msra.mxu0 %v16254_v36  ;;  %11438 = vmatpush1.bf16.msra.mxu1 %v16257_v46  ;;  %v16332_v36 = vld [vmem:[#allocation13 + $0x80] ss:$16 sps:$4 sm:$0xff]   ;;  %v16333_v46 = vld [vmem:[#allocation13 + $0xa4] ss:$16 sps:$4 sm:$0xff]  }
 0x233   :  { %11312 = vmatprep.subr.bf16.mxu0 %v16258_v30  ;;  %11440 = vmatprep.subr.bf16.mxu1 %v16261_v37  ;;  %v16398_v30 = vld [vmem:[#allocation13 + $0x88] ss:$16 sps:$4 sm:$0xff]   ;;  %v16402_v37 = vld [vmem:[#allocation13 + $0xac] ss:$16 sps:$4 sm:$0xff]  }
 0x236   :  { %11314 = vmatpush1.bf16.msra.mxu0 %v16260_v38  ;;  %11442 = vmatpush1.bf16.msra.mxu1 %v16263_v39  ;;  %v16335_v38 = vld [vmem:[#allocation13 + $0xa0] ss:$16 sps:$4 sm:$0xff]   ;;  %v16336_v39 = vld [vmem:[#allocation13 + $0xc4] ss:$16 sps:$4 sm:$0xff]  }
 0x237   :  { %11316 = vmatprep.subr.bf16.mxu0 %v16264_v40  ;;  %11444 = vmatprep.subr.bf16.mxu1 %v16267_v41  ;;  %v16404_v40 = vld [vmem:[#allocation13 + $0xa8] ss:$16 sps:$4 sm:$0xff]   ;;  %v16408_v41 = vld [vmem:[#allocation13 + $0xcc] ss:$16 sps:$4 sm:$0xff]  }
 0x23a   :  { %11318 = vmatpush1.bf16.msra.mxu0 %v16266_v42  ;;  %11446 = vmatpush1.bf16.msra.mxu1 %v16269_v43  ;;  %v16338_v42 = vld [vmem:[#allocation13 + $0xc0] ss:$16 sps:$4 sm:$0xff]   ;;  %v16339_v43 = vld [vmem:[#allocation13 + $0xe4] ss:$16 sps:$4 sm:$0xff]  }
 0x23b   :  { %11320 = vmatprep.subr.bf16.mxu0 %v16270_v44  ;;  %11448 = vmatprep.subr.bf16.mxu1 %v16273_v45  ;;  %v16410_v44 = vld [vmem:[#allocation13 + $0xc8] ss:$16 sps:$4 sm:$0xff]   ;;  %v16414_v45 = vld [vmem:[#allocation13 + $0xec] ss:$16 sps:$4 sm:$0xff]  }
 0x23e   :  { %11322 = vmatpush1.bf16.msra.mxu0 %v16272_v47  ;;  %11450 = vmatpush1.bf16.msra.mxu1 %v16275_v48  ;;  %v16341_v47 = vld [vmem:[#allocation13 + $0xe0] ss:$16 sps:$4 sm:$0xff]   ;;  %v16342_v48 = vld [vmem:[#allocation13 + $0x104] ss:$16 sps:$4 sm:$0xff]  }
 0x23f   :  { %11324 = vmatprep.subr.bf16.mxu0 %v16276_v49  ;;  %11452 = vmatprep.subr.bf16.mxu1 %v16279_v50  ;;  %v16416_v49 = vld [vmem:[#allocation13 + $0xe8] ss:$16 sps:$4 sm:$0xff]   ;;  %v16420_v50 = vld [vmem:[#allocation13 + $0x10c] ss:$16 sps:$4 sm:$0xff]  }
 0x242   :  { %11326 = vmatpush1.bf16.msra.mxu0 %v16278_v51  ;;  %11454 = vmatpush1.bf16.msra.mxu1 %v16281_v52  ;;  %v16344_v51 = vld [vmem:[#allocation13 + $0x100] ss:$16 sps:$4 sm:$0xff]   ;;  %v16345_v52 = vld [vmem:[#allocation13 + $0x124] ss:$16 sps:$4 sm:$0xff]  }
 0x243   :  { %11328 = vmatprep.subr.bf16.mxu0 %v16282_v53  ;;  %11456 = vmatprep.subr.bf16.mxu1 %v16285_v54  ;;  %v16422_v53 = vld [vmem:[#allocation13 + $0x108] ss:$16 sps:$4 sm:$0xff]   ;;  %v16426_v54 = vld [vmem:[#allocation13 + $0x12c] ss:$16 sps:$4 sm:$0xff]  }
 0x246   :  { %11330 = vmatpush1.bf16.msra.mxu0 %v16284_v55  ;;  %11458 = vmatpush1.bf16.msra.mxu1 %v16287_v56  ;;  %v16347_v55 = vld [vmem:[#allocation13 + $0x120] ss:$16 sps:$4 sm:$0xff]   ;;  %v16348_v56 = vld [vmem:[#allocation13 + $0x144] ss:$16 sps:$4 sm:$0xff]  }
 0x247   :  { %11332 = vmatprep.subr.bf16.mxu0 %v16288_v57  ;;  %11460 = vmatprep.subr.bf16.mxu1 %v16291_v58  ;;  %v16428_v57 = vld [vmem:[#allocation13 + $0x128] ss:$16 sps:$4 sm:$0xff]   ;;  %v16432_v58 = vld [vmem:[#allocation13 + $0x14c] ss:$16 sps:$4 sm:$0xff]  }
 0x24a   :  { %11334 = vmatpush1.bf16.msra.mxu0 %v16290_v59  ;;  %11462 = vmatpush1.bf16.msra.mxu1 %v16293_v60  ;;  %v16350_v59 = vld [vmem:[#allocation13 + $0x140] ss:$16 sps:$4 sm:$0xff]   ;;  %v16351_v60 = vld [vmem:[#allocation13 + $0x164] ss:$16 sps:$4 sm:$0xff]  }
 0x24b   :  { %11336 = vmatprep.subr.bf16.mxu0 %v16294_v61  ;;  %11464 = vmatprep.subr.bf16.mxu1 %v16297_v62  ;;  %v16434_v61 = vld [vmem:[#allocation13 + $0x148] ss:$16 sps:$4 sm:$0xff]   ;;  %v16438_v62 = vld [vmem:[#allocation13 + $0x16c] ss:$16 sps:$4 sm:$0xff]  }
 0x24e   :  { %11338 = vmatpush1.bf16.msra.mxu0 %v16296_v63  ;;  %11466 = vmatpush1.bf16.msra.mxu1 %v16299_v0  ;;  %v16353_v63 = vld [vmem:[#allocation13 + $0x160] ss:$16 sps:$4 sm:$0xff]   ;;  %v16354_v0 = vld [vmem:[#allocation13 + $0x184] ss:$16 sps:$4 sm:$0xff]  }
 0x24f   :  { %11340 = vmatprep.subr.bf16.mxu0 %v16300_v1  ;;  %11468 = vmatprep.subr.bf16.mxu1 %v16303_v2  ;;  %v16440_v1 = vld [vmem:[#allocation13 + $0x168] ss:$16 sps:$4 sm:$0xff]   ;;  %v16444_v2 = vld [vmem:[#allocation13 + $0x18c] ss:$16 sps:$4 sm:$0xff]  }
 0x252   :  { %11342 = vmatpush1.bf16.msra.mxu0 %v16302_v3  ;;  %11470 = vmatpush1.bf16.msra.mxu1 %v16305_v4  ;;  %v16356_v3 = vld [vmem:[#allocation13 + $0x180] ss:$16 sps:$4 sm:$0xff]   ;;  %v16357_v4 = vld [vmem:[#allocation13 + $0x1a4] ss:$16 sps:$4 sm:$0xff]  }
 0x253   :  { %11344 = vmatprep.subr.bf16.mxu0 %v16306_v6  ;;  %11472 = vmatprep.subr.bf16.mxu1 %v16309_v7  ;;  %v16446_v6 = vld [vmem:[#allocation13 + $0x188] ss:$16 sps:$4 sm:$0xff]   ;;  %v16450_v7 = vld [vmem:[#allocation13 + $0x1ac] ss:$16 sps:$4 sm:$0xff]  }
 0x256   :  { %11346 = vmatpush1.bf16.msra.mxu0 %v16308_v8  ;;  %11474 = vmatpush1.bf16.msra.mxu1 %v16311_v9  ;;  %v16359_v8 = vld [vmem:[#allocation13 + $0x1a0] ss:$16 sps:$4 sm:$0xff]   ;;  %v16360_v9 = vld [vmem:[#allocation13 + $0x1c4] ss:$16 sps:$4 sm:$0xff]  }
 0x257   :  { %11348 = vmatprep.subr.bf16.mxu0 %v16312_v10  ;;  %11476 = vmatprep.subr.bf16.mxu1 %v16315_v11  ;;  %v16452_v10 = vld [vmem:[#allocation13 + $0x1a8] ss:$16 sps:$4 sm:$0xff]   ;;  %v16456_v11 = vld [vmem:[#allocation13 + $0x1cc] ss:$16 sps:$4 sm:$0xff]  }
 0x25a   :  { %11350 = vmatpush1.bf16.msra.mxu0 %v16314_v12  ;;  %11478 = vmatpush1.bf16.msra.mxu1 %v16317_v13  ;;  %v16362_v12 = vld [vmem:[#allocation13 + $0x1c0] ss:$16 sps:$4 sm:$0xff]   ;;  %v16363_v13 = vld [vmem:[#allocation13 + $0x1e4] ss:$16 sps:$4 sm:$0xff]  }
 0x25b   :  { %11480 = vmatprep.subr.bf16.mxu0 %v16318_v14  ;;  %11608 = vmatprep.subr.bf16.mxu1 %v16372_v15  ;;  %v16458_v14 = vld [vmem:[#allocation13 + $0x1c8] ss:$16 sps:$4 sm:$0xff]   ;;  %v16459_v15 = vld [vmem:[#allocation13 + $0x1ec] ss:$16 sps:$4 sm:$0xff]  }
 0x25d   :  { %2324 = vmatmul.mubr.f32.vlgmr.msra.gmra.mrb[4].mxu0 %v17542_v20  ;;  %2478 = vmatmul.mubr.f32.vlgmr.msra.gmra.mrb[4].mxu1 %v17542_v20  ;;  %v16368_v20 = vld [vmem:[#allocation13 + $0x200] ss:$16 sps:$4 sm:$0xff]  }
 0x25e   :  { %11482 = vmatpush1.bf16.msra.mxu0 %v16320_v16  ;;  %2329 = vmatprep.mubr.f32.mxu0 %v17543_v23  ;;  %v16365_v16 = vld [vmem:[#allocation13 + $0x1e0] ss:$16 sps:$4 sm:$0xff]  }
 0x25f   :  { %2483 = vmatprep.mubr.f32.mxu1 %v17543_v23  ;;  %11484 = vmatprep.subr.bf16.mxu0 %v16321_v17  ;;  %v16366_v17 = vld [vmem:[#allocation13 + $0x204] ss:$16 sps:$4 sm:$0xff]   ;;  %v16465_v23 = vld [vmem:[#allocation13 + $0x22c] ss:$16 sps:$4 sm:$0xff]  }
 0x260   :  { %11610 = vmatpush1.bf16.msra.mxu1 %v16374_v19  ;;  %v16462_v19 = vld [vmem:[#allocation13 + $0x20c] ss:$16 sps:$4 sm:$0xff]  }
 0x261   :  { %2330 = vmatmul.mubr.f32.gmra.mrb[6].mxu0 %v17544_v25  ;;  %2484 = vmatmul.mubr.f32.gmra.mrb[6].mxu1 %v17544_v25  ;;  %v16375_v25 = vld [vmem:[#allocation13 + $0x244] ss:$16 sps:$4 sm:$0xff]  }
 0x262   :  { %11486 = vmatpush1.bf16.msra.mxu0 %v16323_v18  ;;  %2576 = vmatprep.mubr.f32.mxu0 %v17545_v29  ;;  %v16461_v18 = vld [vmem:[#allocation13 + $0x1e8] ss:$16 sps:$4 sm:$0xff]  }
 0x263   :  { %11488 = vmatprep.subr.bf16.mxu0 %v16324_v21  ;;  %11612 = vmatprep.subr.bf16.mxu1 %v16378_v22  ;;  %v16369_v21 = vld [vmem:[#allocation13 + $0x224] ss:$16 sps:$4 sm:$0xff]   ;;  %v16464_v22 = vld [vmem:[#allocation13 + $0x208] ss:$16 sps:$4 sm:$0xff]  }
 0x264   :  { %11614 = vmatpush1.bf16.msra.mxu1 %v16380_v24  ;;  %2730 = vmatprep.mubr.f32.mxu1 %v17545_v29  ;;  %v16371_v24 = vld [vmem:[#allocation13 + $0x220] ss:$16 sps:$4 sm:$0xff]   ;;  %v16467_v29 = vld [vmem:[#allocation13 + $0x228] ss:$16 sps:$4 sm:$0xff]  }
 0x265   :  { %11616 = vmatprep.subr.bf16.mxu1 %v16384_v5  ;;  %v17546_v5 = vld [vmem:[#allocation2] sm:$0xff] }
 0x266   :  { %11490 = vmatpush1.bf16.msra.mxu0 %v16326_v26  ;;  %v17547_v26 = vld [vmem:[#allocation2 + $0x28] sm:$0xff] }
 0x267   :  { %11492 = vmatprep.subr.bf16.mxu0 %v16327_v31  ;;  %v16468_v31 = vld [vmem:[#allocation13 + $0x24c] ss:$16 sps:$4 sm:$0xff]  }
 0x268   :  { %11618 = vmatpush1.bf16.msra.mxu1 %v16386_v27  ;;  %v16377_v27 = vld [vmem:[#allocation13 + $0x240] ss:$16 sps:$4 sm:$0xff]  }
 0x269   :  { %11620 = vmatprep.subr.bf16.mxu1 %v16390_v32  ;;  %v16381_v32 = vld [vmem:[#allocation13 + $0x264] ss:$16 sps:$4 sm:$0xff]  }
 0x26a   :  { %11494 = vmatpush1.bf16.msra.mxu0 %v16329_v28  ;;  %v1832_v28 = vlaneseq }
 0x26b   :  { %11496 = vmatprep.subr.bf16.mxu0 %v16330_v33  ;;  %v17548_v33 = vld [vmem:[#allocation2 + $0x20] sm:$0xff] }
 0x26c   :  { %11622 = vmatpush1.bf16.msra.mxu1 %v16392_v34  ;;  %v17549_v34 = vld [vmem:[#allocation2 + $0x18] sm:$0xff] }
 0x26d   :  { %11624 = vmatprep.subr.bf16.mxu1 %v16396_v35  ;;  %v16470_v35 = vld [vmem:[#allocation13 + $0x248] ss:$16 sps:$4 sm:$0xff]  }
 0x26e   :  { %11498 = vmatpush1.bf16.msra.mxu0 %v16332_v36  ;;  %v16471_v36 = vld [vmem:[#allocation13 + $0x26c] ss:$16 sps:$4 sm:$0xff]  }
 0x26f   :  { %11500 = vmatprep.subr.bf16.mxu0 %v16333_v46  ;;  %v16383_v46 = vld [vmem:[#allocation13 + $0x260] ss:$16 sps:$4 sm:$0xff]  }
 0x270   :  { %11626 = vmatpush1.bf16.msra.mxu1 %v16398_v30  ;;  %v16387_v30 = vld [vmem:[#allocation13 + $0x284] ss:$16 sps:$4 sm:$0xff]  }
 0x271   :  { %11628 = vmatprep.subr.bf16.mxu1 %v16402_v37  ;;  %v18397_v37 = vshrl.u32 %v1832_v28, 7  ;;  %v16435_v28 = vld [vmem:[#allocation13 + $0x384] ss:$16 sps:$4 sm:$0xff]  }
 0x272   :  { %11502 = vmatpush1.bf16.msra.mxu0 %v16335_v38  ;;  %v16473_v38 = vld [vmem:[#allocation13 + $0x268] ss:$16 sps:$4 sm:$0xff]  }
 0x273   :  { %11504 = vmatprep.subr.bf16.mxu0 %v16336_v39  ;;  %v16474_v39 = vld [vmem:[#allocation13 + $0x28c] ss:$16 sps:$4 sm:$0xff]  }
 0x274   :  { %11630 = vmatpush1.bf16.msra.mxu1 %v16404_v40  ;;  %v16389_v40 = vld [vmem:[#allocation13 + $0x280] ss:$16 sps:$4 sm:$0xff]  }
 0x275   :  { %11632 = vmatprep.subr.bf16.mxu1 %v16408_v41  ;;  %v1830_v41 = vld [vmem:[#allocation8] sm:$0xf] }
 0x276   :  { %11506 = vmatpush1.bf16.msra.mxu0 %v16338_v42  ;;  %v18400_v42 = vsub.s32 0, %v18397_v37 }
 0x277   :  { %11508 = vmatprep.subr.bf16.mxu0 %v16339_v43  ;;  %v16393_v43 = vld [vmem:[#allocation13 + $0x2a4] ss:$16 sps:$4 sm:$0xff]  }
 0x278   :  { %11634 = vmatpush1.bf16.msra.mxu1 %v16410_v44  ;;  %v18403_v44 = vsub.s32 2, %v18397_v37 }
 0x279   :  { %11636 = vmatprep.subr.bf16.mxu1 %v16414_v45  ;;  %v18406_v45 = vsub.s32 1, %v18397_v37 }
 0x27a   :  { %11510 = vmatpush1.bf16.msra.mxu0 %v16341_v47  ;;  %v18409_v47 = vsub.s32 3, %v18397_v37 }
 0x27b   :  { %11512 = vmatprep.subr.bf16.mxu0 %v16342_v48  ;;  %v16476_v48 = vld [vmem:[#allocation13 + $0x288] ss:$16 sps:$4 sm:$0xff]  }
 0x27c   :  { %11638 = vmatpush1.bf16.msra.mxu1 %v16416_v49  ;;  %v16395_v49 = vld [vmem:[#allocation13 + $0x2a0] ss:$16 sps:$4 sm:$0xff]  }
 0x27d   :  { %11640 = vmatprep.subr.bf16.mxu1 %v16420_v50  ;;  %v1835_v50 = vrot.slane %v1830_v41, %v18400_v42 }
 0x27e   :  { %11514 = vmatpush1.bf16.msra.mxu0 %v16344_v51  ;;  %v16399_v51 = vld [vmem:[#allocation13 + $0x2c4] ss:$16 sps:$4 sm:$0xff]  }
 0x27f   :  { %11516 = vmatprep.subr.bf16.mxu0 %v16345_v52  ;;  %v1843_v52 = vrot.slane %v1830_v41, %v18403_v44 }
 0x280   :  { %11642 = vmatpush1.bf16.msra.mxu1 %v16422_v53  ;;  %v16477_v53 = vld [vmem:[#allocation13 + $0x2ac] ss:$16 sps:$4 sm:$0xff]  }
 0x281   :  { %11644 = vmatprep.subr.bf16.mxu1 %v16426_v54  ;;  %v1839_v54 = vrot.slane %v1830_v41, %v18406_v45 }
 0x282   :  { %11518 = vmatpush1.bf16.msra.mxu0 %v16347_v55  ;;  %v1847_v55 = vrot.slane %v1830_v41, %v18409_v47  ;;  %v16504_v41 = vld [vmem:[#allocation13 + $0x3cc] ss:$16 sps:$4 sm:$0xff]  }
 0x283   :  { %11520 = vmatprep.subr.bf16.mxu0 %v16348_v56  ;;  %v16479_v56 = vld [vmem:[#allocation13 + $0x2a8] ss:$16 sps:$4 sm:$0xff]  }
 0x284   :  { %11646 = vmatpush1.bf16.msra.mxu1 %v16428_v57  ;;  %v16480_v57 = vld [vmem:[#allocation13 + $0x2cc] ss:$16 sps:$4 sm:$0xff]  }
 0x285   :  { %11648 = vmatprep.subr.bf16.mxu1 %v16432_v58 }
 0x286   :  { %11522 = vmatpush1.bf16.msra.mxu0 %v16350_v59  ;;  %v16401_v59 = vld [vmem:[#allocation13 + $0x2c0] ss:$16 sps:$4 sm:$0xff]  }
 0x287   :  { %11524 = vmatprep.subr.bf16.mxu0 %v16351_v60 }
 0x288   :  { %11650 = vmatpush1.bf16.msra.mxu1 %v16434_v61 }
 0x289   :  { %11652 = vmatprep.subr.bf16.mxu1 %v16438_v62 }
 0x28a   :  { %11526 = vmatpush1.bf16.msra.mxu0 %v16353_v63  ;;  %v16405_v63 = vld [vmem:[#allocation13 + $0x2e4] ss:$16 sps:$4 sm:$0xff]  }
 0x28b   :  { %11528 = vmatprep.subr.bf16.mxu0 %v16354_v0 }
 0x28c   :  { %11654 = vmatpush1.bf16.msra.mxu1 %v16440_v1 }
 0x28d   :  { %11656 = vmatprep.subr.bf16.mxu1 %v16444_v2 }
 0x28e   :  { %11530 = vmatpush1.bf16.msra.mxu0 %v16356_v3 }
 0x28f   :  { %11532 = vmatprep.subr.bf16.mxu0 %v16357_v4  ;;  %v16482_v4 = vld [vmem:[#allocation13 + $0x2c8] ss:$16 sps:$4 sm:$0xff]  }
 0x290   :  { %11658 = vmatpush1.bf16.msra.mxu1 %v16446_v6  ;;  %v16483_v6 = vld [vmem:[#allocation13 + $0x2ec] ss:$16 sps:$4 sm:$0xff]  }
 0x291   :  { %11660 = vmatprep.subr.bf16.mxu1 %v16450_v7 }
 0x292   :  { %11534 = vmatpush1.bf16.msra.mxu0 %v16359_v8  ;;  %v16407_v8 = vld [vmem:[#allocation13 + $0x2e0] ss:$16 sps:$4 sm:$0xff]  }
 0x293   :  { %11536 = vmatprep.subr.bf16.mxu0 %v16360_v9 }
 0x294   :  { %11662 = vmatpush1.bf16.msra.mxu1 %v16452_v10 }
 0x295   :  { %11664 = vmatprep.subr.bf16.mxu1 %v16456_v11 }
 0x296   :  { %11538 = vmatpush1.bf16.msra.mxu0 %v16362_v12  ;;  %v16411_v12 = vld [vmem:[#allocation13 + $0x304] ss:$16 sps:$4 sm:$0xff]  }
 0x297   :  { %11540 = vmatprep.subr.bf16.mxu0 %v16363_v13 }
 0x298   :  { %11666 = vmatpush1.bf16.msra.mxu1 %v16458_v14 }
 0x299   :  { %11668 = vmatprep.subr.bf16.mxu1 %v16459_v15  ;;  %v16485_v15 = vld [vmem:[#allocation13 + $0x2e8] ss:$16 sps:$4 sm:$0xff]  }
 0x29a   :  { %11542 = vmatpush1.bf16.msra.mxu0 %v16365_v16 }
 0x29b   :  { %11544 = vmatprep.subr.bf16.mxu0 %v16366_v17  ;;  %v16413_v17 = vld [vmem:[#allocation13 + $0x300] ss:$16 sps:$4 sm:$0xff]  }
 0x29c   :  { %11670 = vmatpush1.bf16.msra.mxu1 %v16461_v18  ;;  %v16486_v18 = vld [vmem:[#allocation13 + $0x30c] ss:$16 sps:$4 sm:$0xff]  }
 0x29d   :  { %2577 = vmatmul.mubr.f32.vlgmr.msra.gmra.mrb[8].mxu0 %v17546_v5  ;;  %11672 = vmatprep.subr.bf16.mxu1 %v16462_v19 }
 0x29e   :  { %11546 = vmatpush1.bf16.msra.mxu0 %v16368_v20  ;;  %2582 = vmatprep.mubr.f32.mxu0 %v17547_v26  ;;  %v16417_v20 = vld [vmem:[#allocation13 + $0x324] ss:$16 sps:$4 sm:$0xff]  }
 0x29f   :  { %11548 = vmatprep.subr.bf16.mxu0 %v16369_v21  ;;  %2731 = vmatmul.mubr.f32.vlgmr.msra.gmra.mrb[8].mxu1 %v17546_v5  ;;  %v16488_v21 = vld [vmem:[#allocation13 + $0x308] ss:$16 sps:$4 sm:$0xff]  }
 0x2a0   :  { %11674 = vmatpush1.bf16.msra.mxu1 %v16464_v22  ;;  %2736 = vmatprep.mubr.f32.mxu1 %v17547_v26  ;;  %v16489_v22 = vld [vmem:[#allocation13 + $0x32c] ss:$16 sps:$4 sm:$0xff]   ;;  %v16491_v5 = vld [vmem:[#allocation13 + $0x328] ss:$16 sps:$4 sm:$0xff]   ;;  %v16425_v26 = vld [vmem:[#allocation13 + $0x340] ss:$16 sps:$4 sm:$0xff]  }
 0x2a1   :  { %2583 = vmatmul.mubr.f32.gmra.mrb[10].mxu0 %v17548_v33  ;;  %11676 = vmatprep.subr.bf16.mxu1 %v16465_v23  ;;  %v16419_v23 = vld [vmem:[#allocation13 + $0x320] ss:$16 sps:$4 sm:$0xff]  }
 0x2a2   :  { %11550 = vmatpush1.bf16.msra.mxu0 %v16371_v24  ;;  %2653 = vmatprep.mubr.f32.mxu0 %v17549_v34  ;;  %v16423_v24 = vld [vmem:[#allocation13 + $0x344] ss:$16 sps:$4 sm:$0xff]  }
 0x2a3   :  { %11552 = vmatprep.subr.bf16.mxu0 %v16375_v25  ;;  %2737 = vmatmul.mubr.f32.gmra.mrb[10].mxu1 %v17548_v33  ;;  %v16492_v25 = vld [vmem:[#allocation13 + $0x34c] ss:$16 sps:$4 sm:$0xff]   ;;  %v16497_v33 = vld [vmem:[#allocation13 + $0x368] ss:$16 sps:$4 sm:$0xff]  }
 0x2a4   :  { %11678 = vmatpush1.bf16.msra.mxu1 %v16467_v29  ;;  %2807 = vmatprep.mubr.f32.mxu1 %v17549_v34  ;;  %v16429_v29 = vld [vmem:[#allocation13 + $0x364] ss:$16 sps:$4 sm:$0xff]   ;;  %v16498_v34 = vld [vmem:[#allocation13 + $0x38c] ss:$16 sps:$4 sm:$0xff]  }
 0x2a5   :  { %11680 = vmatprep.subr.bf16.mxu1 %v16468_v31  ;;  %v16494_v31 = vld [vmem:[#allocation13 + $0x348] ss:$16 sps:$4 sm:$0xff]  }
 0x2a6   :  { %11554 = vmatpush1.bf16.msra.mxu0 %v16377_v27  ;;  %v16495_v27 = vld [vmem:[#allocation13 + $0x36c] ss:$16 sps:$4 sm:$0xff]  }
 0x2a7   :  { %11556 = vmatprep.subr.bf16.mxu0 %v16381_v32  ;;  %v16431_v32 = vld [vmem:[#allocation13 + $0x360] ss:$16 sps:$4 sm:$0xff]  }
 0x2a8   :  { %11682 = vmatpush1.bf16.msra.mxu1 %v16470_v35  ;;  %v16437_v35 = vld [vmem:[#allocation13 + $0x380] ss:$16 sps:$4 sm:$0xff]  }
 0x2a9   :  { %11684 = vmatprep.subr.bf16.mxu1 %v16471_v36  ;;  %v16441_v36 = vld [vmem:[#allocation13 + $0x3a4] ss:$16 sps:$4 sm:$0xff]  }
 0x2aa   :  { %11558 = vmatpush1.bf16.msra.mxu0 %v16383_v46  ;;  %v16500_v46 = vld [vmem:[#allocation13 + $0x388] ss:$16 sps:$4 sm:$0xff]  }
 0x2ab   :  { %11560 = vmatprep.subr.bf16.mxu0 %v16387_v30  ;;  %v16501_v30 = vld [vmem:[#allocation13 + $0x3ac] ss:$16 sps:$4 sm:$0xff]  }
 0x2ac   :  { %11686 = vmatpush1.bf16.msra.mxu1 %v16473_v38  ;;  %v16443_v38 = vld [vmem:[#allocation13 + $0x3a0] ss:$16 sps:$4 sm:$0xff]  }
 0x2ad   :  { %11688 = vmatprep.subr.bf16.mxu1 %v16474_v39  ;;  %v16447_v39 = vld [vmem:[#allocation13 + $0x3c4] ss:$16 sps:$4 sm:$0xff]  }
 0x2ae   :  { %11562 = vmatpush1.bf16.msra.mxu0 %v16389_v40  ;;  %v16503_v40 = vld [vmem:[#allocation13 + $0x3a8] ss:$16 sps:$4 sm:$0xff]  }
 0x2af   :  { %11564 = vmatprep.subr.bf16.mxu0 %v16393_v43  ;;  %v16449_v43 = vld [vmem:[#allocation13 + $0x3c0] ss:$16 sps:$4 sm:$0xff]  }
 0x2b0   :  { %v1995_v58 = vpop.f32.mrb[0].mxu0  ;;  %v2149_v60 = vpop.f32.mrb[0].mxu1  ;;  %11690 = vmatpush1.bf16.msra.mxu1 %v16476_v48  ;;  %v16453_v48 = vld [vmem:[#allocation13 + $0x3e4] ss:$16 sps:$4 sm:$0xff]  }
 0x2b1   :  { %v18415_v61 = vadd.f32 %v1995_v58, %v1835_v50  ;;  %v1997_v62 = vpop.f32.mrb[1].mxu0  ;;  %v18417_v0 = vadd.f32 %v2149_v60, %v1843_v52  ;;  %v2151_v1 = vpop.f32.mrb[1].mxu1  ;;  %11692 = vmatprep.subr.bf16.mxu1 %v16477_v53  ;;  %v17550_v53 = vld [vmem:[#allocation2 + $0x10] sm:$0xff] }
 0x2b2   :  { %v18419_v2 = vadd.f32 %v1997_v62, %v1839_v54  ;;  %11566 = vmatpush1.bf16.msra.mxu0 %v16395_v49  ;;  %v18421_v3 = vadd.f32 %v2151_v1, %v1847_v55  ;;  %v16506_v49 = vld [vmem:[#allocation13 + $0x3c8] ss:$16 sps:$4 sm:$0xff]  }
 0x2b3   :  { %2822 = vrot.lane.b32.xlu1 %v18415_v61, %s18025_s19  ;;  %11568 = vmatprep.subr.bf16.mxu0 %v16399_v51  ;;  %v16455_v51 = vld [vmem:[#allocation13 + $0x3e0] ss:$16 sps:$4 sm:$0xff]  }
 0x2b4   :  { %v2001_v7 = vpop.f32.mrb[2].mxu0  ;;  %11694 = vmatpush1.bf16.msra.mxu1 %v16479_v56  ;;  %v2155_v9 = vpop.f32.mrb[2].mxu1 }
 0x2b5   :  { %v18425_v10 = vadd.f32 %v2001_v7, %v1835_v50  ;;  %v2003_v11 = vpop.f32.mrb[3].mxu0  ;;  %11696 = vmatprep.subr.bf16.mxu1 %v16480_v57  ;;  %v18427_v13 = vadd.f32 %v2155_v9, %v1843_v52  ;;  %v2157_v14 = vpop.f32.mrb[3].mxu1  ;;  %v16507_v50 = vld [vmem:[#allocation13 + $0x3ec] ss:$16 sps:$4 sm:$0xff]   ;;  %v16509_v52 = vld [vmem:[#allocation13 + $0x3e8] ss:$16 sps:$4 sm:$0xff]  }
 0x2b6   :  { %11570 = vmatpush1.bf16.msra.mxu0 %v16401_v59  ;;  %v18429_v16 = vadd.f32 %v2157_v14, %v1847_v55  ;;  %v18433_v19 = vadd.f32 %v2003_v11, %v1839_v54  ;;  %v17551_v54 = vld [vmem:[#allocation2 + $0x38] sm:$0xff]  ;;  %v17552_v55 = vld [vmem:[#allocation2 + $0x30] sm:$0xff] }
 0x2b7   :  { %2824 = vrot.lane.b32.xlu1 %v18425_v10, %s18025_s19  ;;  %11572 = vmatprep.subr.bf16.mxu0 %v16405_v63  ;;  %v2160_v57 = vld [vmem:[#allocation11] sm:$0xf] }
 0x2b8   :  { %11698 = vmatpush1.bf16.msra.mxu1 %v16482_v4  ;;  %v2173_v58 = vrot.slane %v2160_v57, %v18403_v44  ;;  %v2177_v62 = vrot.slane %v2160_v57, %v18409_v47  ;;  %v2165_v63 = vrot.slane %v2160_v57, %v18400_v42 }
 0x2b9   :  { %11700 = vmatprep.subr.bf16.mxu1 %v16483_v6  ;;  %v2169_v6 = vrot.slane %v2160_v57, %v18406_v45 }
 0x2ba   :  { %11574 = vmatpush1.bf16.msra.mxu0 %v16407_v8 }
 0x2bb   :  { %2830 = vrot.lane.b32.xlu1 %v18433_v19, %s18025_s19  ;;  %11576 = vmatprep.subr.bf16.mxu0 %v16411_v12 }
 0x2bc   :  { %11702 = vmatpush1.bf16.msra.mxu1 %v16485_v15 }
 0x2bd   :  { %11704 = vmatprep.subr.bf16.mxu1 %v16486_v18 }
 0x2be   :  { %11578 = vmatpush1.bf16.msra.mxu0 %v16413_v17 }
 0x2bf   :  { %11580 = vmatprep.subr.bf16.mxu0 %v16417_v20 }
 0x2c0   :  { %11706 = vmatpush1.bf16.msra.mxu1 %v16488_v21 }
 0x2c1   :  { %11708 = vmatprep.subr.bf16.mxu1 %v16489_v22  ;;  %v18566_v22 = vld [vmem:[#allocation5] sm:$0xff] }
 0x2c2   :  { %11582 = vmatpush1.bf16.msra.mxu0 %v16419_v23  ;;  %vm3581_vm3 = vcmp.ne.f32.partialorder %v18566_v22, 0.0 }
 0x2c3   :  { %11584 = vmatprep.subr.bf16.mxu0 %v16423_v24 }
 0x2c4   :  { %11710 = vmatpush1.bf16.msra.mxu1 %v16491_v5 }
 0x2c5   :  { %11712 = vmatprep.subr.bf16.mxu1 %v16492_v25 }
 0x2c6   :  { %11586 = vmatpush1.bf16.msra.mxu0 %v16425_v26 }
 0x2c7   :  { %11588 = vmatprep.subr.bf16.mxu0 %v16429_v29 }
 0x2c8   :  { %11714 = vmatpush1.bf16.msra.mxu1 %v16494_v31 }
 0x2c9   :  { %11716 = vmatprep.subr.bf16.mxu1 %v16495_v27 }
 0x2ca   :  { %11590 = vmatpush1.bf16.msra.mxu0 %v16431_v32  ;;  %v2490_v32 = vld [vmem:[#allocation14] sm:$0xf] }
 0x2cb   :  { %11592 = vmatprep.subr.bf16.mxu0 %v16435_v28 }
 0x2cc   :  { %11718 = vmatpush1.bf16.msra.mxu1 %v16497_v33 }
 0x2cd   :  { %11720 = vmatprep.subr.bf16.mxu1 %v16498_v34  ;;  %v2495_v34 = vrot.slane %v2490_v32, %v18400_v42 }
 0x2ce   :  { %11594 = vmatpush1.bf16.msra.mxu0 %v16437_v35 }
 0x2cf   :  { %11596 = vmatprep.subr.bf16.mxu0 %v16441_v36 }
 0x2d0   :  { %11722 = vmatpush1.bf16.msra.mxu1 %v16500_v46  ;;  %v2503_v46 = vrot.slane %v2490_v32, %v18403_v44 }
 0x2d1   :  { %11724 = vmatprep.subr.bf16.mxu1 %v16501_v30 }
 0x2d2   :  { %11598 = vmatpush1.bf16.msra.mxu0 %v16443_v38 }
 0x2d3   :  { %11600 = vmatprep.subr.bf16.mxu0 %v16447_v39  ;;  %v2507_v39 = vrot.slane %v2490_v32, %v18409_v47 }
 0x2d4   :  { %11726 = vmatpush1.bf16.msra.mxu1 %v16503_v40 }
 0x2d5   :  { %11728 = vmatprep.subr.bf16.mxu1 %v16504_v41 }
 0x2d6   :  { %11602 = vmatpush1.bf16.msra.mxu0 %v16449_v43 }
 0x2d7   :  { %11604 = vmatprep.subr.bf16.mxu0 %v16453_v48 }
 0x2d8   :  { %11730 = vmatpush1.bf16.msra.mxu1 %v16506_v49 }
 0x2d9   :  { %11732 = vmatprep.subr.bf16.mxu1 %v16507_v50 }
 0x2da   :  { %11606 = vmatpush1.bf16.msra.mxu0 %v16455_v51 }
 0x2dc   :  { %11734 = vmatpush1.bf16.msra.mxu1 %v16509_v52 }
 0x2dd   :  { %2654 = vmatmul.mubr.f32.vlgmr.msra.gmra.mrb[8].mxu0 %v17550_v53 }
 0x2de   :  { %2659 = vmatprep.mubr.f32.mxu0 %v17551_v54 }
 0x2df   :  { %2808 = vmatmul.mubr.f32.vlgmr.msra.gmra.mrb[8].mxu1 %v17550_v53 }
 0x2e0   :  { %2813 = vmatprep.mubr.f32.mxu1 %v17551_v54 }
 0x2e1   :  { %2660 = vmatmul.mubr.f32.gmra.mrb[10].mxu0 %v17552_v55 }
 0x2e2   :  { %10859 = vmatprep.mubr.msk.f32.mxu0 %vm2900_vm0, %v18415_v61 }
 0x2e3   :  { %2814 = vmatmul.mubr.f32.gmra.mrb[10].mxu1 %v17552_v55 }
 0x325   :  { %v2823_v56 = vpop.permute.xlu1 %2822 }
 0x326   :  { %10866 = vmatprep.mubr.msk.f32.mxu1 %vm2900_vm0, %v2823_v56 }
 0x329   :  { %v2825_v28 = vpop.permute.xlu1 %2824 }
 0x32d   :  { %v2831_v50 = vpop.permute.xlu1 %2830 }
 0x330   :  { %v2325_v59 = vpop.f32.mrb[4].mxu0  ;;  %v2479_v60 = vpop.f32.mrb[4].mxu1 }
 0x331   :  { %v2327_v1 = vpop.f32.mrb[5].mxu0  ;;  %v2481_v4 = vpop.f32.mrb[5].mxu1  ;;  %v14131_v7 = vadd.f32 %v2479_v60, %v2173_v58  ;;  %v14127_v11 = vadd.f32 %v2325_v59, %v2165_v63 }
 0x332   :  { %v14132_v8 = vadd.f32 %v2481_v4, %v2177_v62  ;;  %v14128_v18 = vadd.f32 %v2327_v1, %v2169_v6 }
 0x334   :  { %v2331_v61 = vpop.f32.mrb[6].mxu0  ;;  %v2485_v9 = vpop.f32.mrb[6].mxu1 }
 0x335   :  { %v14129_v12 = vadd.f32 %v2331_v61, %v2165_v63  ;;  %v14133_v14 = vadd.f32 %v2485_v9, %v2173_v58  ;;  %v2333_v15 = vpop.f32.mrb[7].mxu0  ;;  %v2487_v17 = vpop.f32.mrb[7].mxu1 }
 0x336   :  { %v14130_v20 = vadd.f32 %v2333_v15, %v2169_v6  ;;  %v14134_v21 = vadd.f32 %v2487_v17, %v2177_v62 }
 0x337   :  { %v11735_v23 = vpack.c.bf16 %v14129_v12, %v14127_v11  ;;  %v11759_v24 = vpack.c.bf16 %v14133_v14, %v14131_v7  ;;  %v15874_v5 = vpack.i.bf16 %v14129_v12, %v14127_v11  ;;  %v15884_v25 = vpack.i.bf16 %v14133_v14, %v14131_v7 }
 0x338   :  { %v11747_v26 = vpack.c.bf16 %v14130_v20, %v14128_v18  ;;  %v11771_v29 = vpack.c.bf16 %v14134_v21, %v14132_v8  ;;  %v15889_v31 = vpack.i.bf16 %v14134_v21, %v14132_v8  ;;  %v15879_v27 = vpack.i.bf16 %v14130_v20, %v14128_v18 }
 0x339   :  { %15875 = vrot.lane.b32.xlu0 %v15874_v5, %s18025_s19  ;;  %11737 = vmatprep.subr.msk.bf16.mxu0 %vm18446_vm1, %v11735_v23 }
 0x33a   :  { %11740 = vmatpush3.bf16.xpose.msk.msra.mxu0 %vm18446_vm1, %v11735_v23  ;;  %15890 = vrot.lane.b32.xlu1 %v15889_v31, %s18025_s19 }
 0x33b   :  { %11749 = vmatprep.subr.msk.bf16.mxu0 %vm18446_vm1, %v11747_v26 }
 0x33d   :  { %15880 = vrot.lane.b32.xlu0 %v15879_v27, %s18025_s19 }
 0x33e   :  { %2836 = vrot.lane.b32.xlu1 %v18427_v13, %s18025_s19 }
 0x341   :  { %2828 = vrot.lane.b32.xlu0 %v18419_v2, %s18025_s19  ;;  %10860 = vmatmul.mubr.msk.f32.vlgmr.msra.gmra.mrb[12].mxu0 %vm2900_vm0, %v18425_v10 }
 0x342   :  { %2842 = vrot.lane.b32.xlu1 %v18429_v16, %s18025_s19  ;;  %11752 = vmatpush3.bf16.xpose.msk.msra.mxu0 %vm18446_vm1, %v11747_v26 }
 0x343   :  { %10873 = vmatprep.mubr.msk.f32.mxu0 %vm2900_vm0, %v18419_v2  ;;  %11761 = vmatprep.subr.msk.bf16.mxu0 %vm18446_vm1, %v11759_v24 }
 0x345   :  { %15885 = vrot.lane.b32.xlu0 %v15884_v25, %s18025_s19 }
 0x349   :  { %2834 = vrot.lane.b32.xlu0 %v18417_v0, %s18025_s19  ;;  %10874 = vmatmul.mubr.msk.f32.vlgmr.msra.gmra.mrb[14].mxu0 %vm2900_vm0, %v18433_v19 }
 0x34a   :  { %11764 = vmatpush3.bf16.xpose.msk.msra.mxu0 %vm18446_vm1, %v11759_v24  ;;  %10887 = vmatprep.mubr.msk.f32.mxu0 %vm2900_vm0, %v18417_v0 }
 0x34b   :  { %11773 = vmatprep.subr.msk.bf16.mxu0 %vm18446_vm1, %v11771_v29 }
 0x34d   :  { %2840 = vrot.lane.b32.xlu0 %v18421_v3, %s18025_s19 }
 0x351   :  { %10888 = vmatmul.mubr.msk.f32.vlgmr.msra.gmra.mrb[16].mxu0 %vm2900_vm0, %v18427_v13 }
 0x352   :  { %11776 = vmatpush3.bf16.xpose.msk.msra.mxu0 %vm18446_vm1, %v11771_v29  ;;  %10901 = vmatprep.mubr.msk.f32.mxu0 %vm2900_vm0, %v18421_v3  ;;  %v2499_v3 = vrot.slane %v2490_v32, %v18406_v45 }
 0x359   :  { %10902 = vmatmul.mubr.msk.f32.vlgmr.msra.gmra.mrb[18].mxu0 %vm2900_vm0, %v18429_v16 }
 0x3ab   :  { %v15876_v2 = vpop.permute.xlu0 %15875 }
 0x3ac   :  { %v15878_v0 = vunpack.i.h.bf16 %v15876_v2  ;;  %v15877_v10 = vunpack.i.l.bf16 %v15876_v2  ;;  %v15891_v6 = vpop.permute.xlu1 %15890  ;;  %v18564_v2 = vld [vmem:[#allocation5 + $0x8] sm:$0xff] }
 0x3ad   :  { %v15893_v8 = vunpack.i.h.bf16 %v15891_v6  ;;  %v15892_v61 = vunpack.i.l.bf16 %v15891_v6  ;;  %vm3582_vm2 = vcmp.ne.f32.partialorder %v18564_v2, 0.0 }
 0x3ae   :  { %v11741_v19 = vpack.c.bf16 %v15878_v0, %v15877_v10 }
 0x3af   :  { %v15881_v33 = vpop.permute.xlu0 %15880  ;;  %v11777_v12 = vpack.c.bf16 %v15893_v8, %v15892_v61 }
 0x3b0   :  { %v15883_v35 = vunpack.i.h.bf16 %v15881_v33  ;;  %v15882_v13 = vunpack.i.l.bf16 %v15881_v33  ;;  %11743 = vmatprep.subr.msk.bf16.mxu1 %vm18446_vm1, %v11741_v19  ;;  %v2655_v36 = vpop.f32.mrb[8].mxu0  ;;  %v2837_v18 = vpop.permute.xlu1 %2836 }
 0x3b1   :  { %11746 = vmatpush3.bf16.xpose.msk.msra.mxu1 %vm18446_vm1, %v11741_v19  ;;  %v2657_v16 = vpop.f32.mrb[9].mxu0  ;;  %v18502_v41 = vadd.f32 %v2655_v36, %v2495_v34 }
 0x3b2   :  { %v11753_v30 = vpack.c.bf16 %v15883_v35, %v15882_v13  ;;  %v2809_v38 = vpop.f32.mrb[8].mxu1  ;;  %v18506_v48 = vadd.f32 %v2657_v16, %v2499_v3 }
 0x3b3   :  { %v2829_v40 = vpop.permute.xlu0 %2828  ;;  %v2811_v43 = vpop.f32.mrb[9].mxu1  ;;  %v18510_v53 = vadd.f32 %v2809_v38, %v2503_v46 }
 0x3b4   :  { %11755 = vmatprep.subr.msk.bf16.mxu1 %vm18446_vm1, %v11753_v30  ;;  %v2661_v49 = vpop.f32.mrb[10].mxu0  ;;  %v18514_v55 = vadd.f32 %v2811_v43, %v2507_v39  ;;  %v2843_v21 = vpop.permute.xlu1 %2842 }
 0x3b5   :  { %v18508_v51 = vadd.f32 %v2661_v49, %v2495_v34  ;;  %v2663_v52 = vpop.f32.mrb[11].mxu0 }
 0x3b6   :  { %v18512_v54 = vadd.f32 %v2663_v52, %v2499_v3  ;;  %v2815_v56 = vpop.f32.mrb[10].mxu1 }
 0x3b7   :  { %v15886_v57 = vpop.permute.xlu0 %15885  ;;  %v11783_v58 = vpack.c.bf16 %v18508_v51, %v18502_v41  ;;  %v18518_v59 = vadd.f32 %v2815_v56, %v2503_v46  ;;  %v2817_v60 = vpop.f32.mrb[11].mxu1 }
 0x3b8   :  { %v15888_v62 = vunpack.i.h.bf16 %v15886_v57  ;;  %v15887_v63 = vunpack.i.l.bf16 %v15886_v57  ;;  %10867 = vmatmul.mubr.msk.f32.vlgmr.msra.gmra.mrb[12].mxu1 %vm2900_vm0, %v2825_v28  ;;  %v18523_v1 = vpack.c.bf16 %v18512_v54, %v18506_v48  ;;  %v18525_v4 = vadd.f32 %v2817_v60, %v2507_v39 }
 0x3b9   :  { %11758 = vmatpush3.bf16.xpose.msk.msra.mxu1 %vm18446_vm1, %v11753_v30  ;;  %10880 = vmatprep.mubr.msk.f32.mxu1 %vm2900_vm0, %v2829_v40  ;;  %v18532_v7 = vpack.c.bf16 %v18518_v59, %v18510_v53  ;;  %v15904_v15 = vpack.i.bf16 %v18518_v59, %v18510_v53 }
 0x3ba   :  { %v11765_v9 = vpack.c.bf16 %v15888_v62, %v15887_v63  ;;  %v18536_v11 = vpack.c.bf16 %v18525_v4, %v18514_v55  ;;  %11784 = vmatprep.subr.bf16.mxu0 %v11783_v58  ;;  %v15909_v17 = vpack.i.bf16 %v18525_v4, %v18514_v55 }
 0x3bb   :  { %11786 = vmatpush3.bf16.msra.mxu0 %v11783_v58  ;;  %v2835_v14 = vpop.permute.xlu0 %2834 }
 0x3bc   :  { %11767 = vmatprep.subr.msk.bf16.mxu1 %vm18446_vm1, %v11765_v9  ;;  %11792 = vmatprep.subr.bf16.mxu0 %v18523_v1 }
 0x3bf   :  { %v2841_v20 = vpop.permute.xlu0 %2840 }
 0x3c0   :  { %10881 = vmatmul.mubr.msk.f32.vlgmr.msra.gmra.mrb[14].mxu1 %vm2900_vm0, %v2831_v50 }
 0x3c1   :  { %11770 = vmatpush3.bf16.xpose.msk.msra.mxu1 %vm18446_vm1, %v11765_v9  ;;  %10894 = vmatprep.mubr.msk.f32.mxu1 %vm2900_vm0, %v2835_v14 }
 0x3c2   :  { %11779 = vmatprep.subr.msk.bf16.mxu1 %vm18446_vm1, %v11777_v12 }
 0x3c8   :  { %10895 = vmatmul.mubr.msk.f32.vlgmr.msra.gmra.mrb[16].mxu1 %vm2900_vm0, %v2837_v18 }
 0x3c9   :  { %11782 = vmatpush3.bf16.xpose.msk.msra.mxu1 %vm18446_vm1, %v11777_v12  ;;  %10908 = vmatprep.mubr.msk.f32.mxu1 %vm2900_vm0, %v2841_v20 }
 0x3d0   :  { %10909 = vmatmul.mubr.msk.f32.vlgmr.msra.gmra.mrb[18].mxu1 %vm2900_vm0, %v2843_v21 }
 0x414   :  { %v10861_v23 = vpop.f32.mrb[12].mxu0 }
 0x415   :  { %v2975_v24 = vpop.f32.mrb[13].mxu0  ;;  %v3566_v52 = vmul.f32 0.125, %v10861_v23 }
 0x416   :  { %v3565_v10 = vmul.f32 0.125, %v2975_v24 }
 0x417   :  { %v18596_v6 = vsel %vm3582_vm2, %v3566_v52, -1e+09 }
 0x418   :  { %v18578_v3 = vsel %vm3581_vm3, %v3565_v10, -1e+09  ;;  %v3603_v61 = vsel %vm3599_vm4, %v18596_v6, -inf }
 0x419   :  { %v3600_v46 = vsel %vm3599_vm4, %v18578_v3, -inf }
 0x41c   :  { %v10875_v5 = vpop.f32.mrb[14].mxu0 }
 0x41d   :  { %v3141_v25 = vpop.f32.mrb[15].mxu0  ;;  %v3570_v62 = vmul.f32 0.125, %v10875_v5 }
 0x41e   :  { %v3569_v13 = vmul.f32 0.125, %v3141_v25 }
 0x41f   :  { %v18608_v14 = vsel %vm3582_vm2, %v3570_v62, -1e+09 }
 0x420   :  { %v18584_v38 = vsel %vm3581_vm3, %v3569_v13, -1e+09  ;;  %v3615_v21 = vsel %vm3599_vm4, %v18608_v14, -inf }
 0x421   :  { %v3612_v43 = vsel %vm3599_vm4, %v18584_v38, -inf }
 0x424   :  { %v18556_v26 = vpop.f32.mrb[16].mxu0 }
 0x425   :  { %v18558_v29 = vpop.f32.mrb[17].mxu0 }
 0x42c   :  { %v18560_v31 = vpop.f32.mrb[18].mxu0 }
 0x42d   :  { %v18562_v27 = vpop.f32.mrb[19].mxu0 }
 0x48b   :  { %v10868_v0 = vpop.f32.mrb[12].mxu1 }
 0x48c   :  { %v3568_v19 = vmul.f32 0.125, %v10868_v0  ;;  %v3058_v32 = vpop.f32.mrb[13].mxu1 }
 0x48d   :  { %v3567_v28 = vmul.f32 0.125, %v3058_v32 }
 0x48e   :  { %v3586_v33 = vsel %vm3582_vm2, %v3568_v19, -1e+09 }
 0x48f   :  { %v3609_v34 = vsel %vm3599_vm4, %v3586_v33, -inf  ;;  %v3585_v35 = vsel %vm3581_vm3, %v3567_v28, -1e+09 }
 0x490   :  { %3610 = vmax.xlane.f32.xlu1 %v3609_v34  ;;  %v3606_v36 = vsel %vm3599_vm4, %v3585_v35, -inf }
 0x491   :  { %3607 = vmax.xlane.f32.xlu0 %v3606_v36 }
 0x493   :  { %v10882_v16 = vpop.f32.mrb[14].mxu1 }
 0x494   :  { %v3224_v30 = vpop.f32.mrb[15].mxu1  ;;  %3601 = vmax.xlane.f32.xlu1 %v3600_v46  ;;  %v3572_v39 = vmul.f32 0.125, %v10882_v16 }
 0x495   :  { %v3571_v40 = vmul.f32 0.125, %v3224_v30 }
 0x496   :  { %v3590_v56 = vsel %vm3582_vm2, %v3572_v39, -1e+09 }
 0x497   :  { %v3589_v49 = vsel %vm3581_vm3, %v3571_v40, -1e+09  ;;  %v3621_v60 = vsel %vm3599_vm4, %v3590_v56, -inf }
 0x498   :  { %3613 = vmax.xlane.f32.xlu1 %v3612_v43  ;;  %v3618_v50 = vsel %vm3599_vm4, %v3589_v49, -inf }
 0x499   :  { %3619 = vmax.xlane.f32.xlu0 %v3618_v50 }
 0x49b   :  { %v10896_v57 = vpop.f32.mrb[16].mxu1 }
 0x49c   :  { %v3390_v58 = vpop.f32.mrb[17].mxu1  ;;  %v3576_v12 = vmul.f32 0.125, %v10896_v57 }
 0x49d   :  { %v3575_v63 = vmul.f32 0.125, %v3390_v58  ;;  %3622 = vmax.xlane.f32.xlu0 %v3621_v60 }
 0x49e   :  { %v18614_v5 = vsel %vm3582_vm2, %v3576_v12, -1e+09 }
 0x49f   :  { %v18600_v8 = vsel %vm3581_vm3, %v3575_v63, -1e+09  ;;  %v3633_v0 = vsel %vm3599_vm4, %v18614_v5, -inf  ;;  %v15894_v63 = vpack.i.bf16 %v18508_v51, %v18502_v41  ;;  %v3573_v41 = vmul.f32 0.125, %v18558_v29 }
 0x4a0   :  { %v3630_v9 = vsel %vm3599_vm4, %v18600_v8, -inf }
 0x4a1   :  { %3604 = vmax.xlane.f32.xlu0 %v3603_v61  ;;  %3631 = vmax.xlane.f32.xlu1 %v3630_v9  ;;  %v15899_v61 = vpack.i.bf16 %v18512_v54, %v18506_v48 }
 0x4a3   :  { %v10910_v18 = vpop.f32.mrb[18].mxu1 }
 0x4a4   :  { %v3556_v20 = vpop.f32.mrb[19].mxu1  ;;  %v3580_v23 = vmul.f32 0.125, %v10910_v18 }
 0x4a5   :  { %v3579_v24 = vmul.f32 0.125, %v3556_v20  ;;  %3616 = vmax.xlane.f32.xlu0 %v3615_v21 }
 0x4a6   :  { %v18626_v19 = vsel %vm3582_vm2, %v3580_v23, -1e+09 }
 0x4a7   :  { %v18618_v25 = vsel %vm3581_vm3, %v3579_v24, -1e+09  ;;  %v3645_v32 = vsel %vm3599_vm4, %v18626_v19, -inf }
 0x4a8   :  { %v3642_v10 = vsel %vm3599_vm4, %v18618_v25, -inf }
 0x4a9   :  { %3634 = vmax.xlane.f32.xlu0 %v3633_v0  ;;  %3643 = vmax.xlane.f32.xlu1 %v3642_v10 }
 0x4ad   :  { %3646 = vmax.xlane.f32.xlu0 %v3645_v32 }
 0x51d   :  { %v3611_v28 = vpop.xlane.xlu1 %3610 }
 0x51e   :  { %v3651_v34 = vsub.f32 %v3586_v33, %v3611_v28  ;;  %v3608_v13 = vpop.xlane.xlu0 %3607 }
 0x51f   :  { %v3650_v36 = vsub.f32 %v3585_v35, %v3608_v13  ;;  %v3577_v13 = vmul.f32 0.125, %v18562_v27 }
 0x520   :  { %v3670_v16 = vmul.f32 1.442695, %v3651_v34 }
 0x521   :  { %v3668_v46 = vmul.f32 1.442695, %v3650_v36  ;;  %v3602_v9 = vpop.xlane.xlu1 %3601 }
 0x522   :  { %17470 = vpow2.f32 %v3670_v16  ;;  %v3648_v18 = vsub.f32 %v18578_v3, %v3602_v9  ;;  %v3574_v3 = vmul.f32 0.125, %v18556_v26  ;;  %v3578_v26 = vmul.f32 0.125, %v18560_v31 }
 0x523   :  { %17472 = vpow2.f32 %v3668_v46  ;;  %v18675_v46 = vsel %vm3581_vm3, %v3577_v13, -1e+09 }
 0x524   :  { %v3664_v24 = vmul.f32 1.442695, %v3648_v18  ;;  %v18671_v27 = vsel %vm3582_vm2, %v3574_v3, -1e+09  ;;  %v3636_v31 = vsel %vm3599_vm4, %v18675_v46, -inf }
 0x525   :  { %v3614_v20 = vpop.xlane.xlu1 %3613  ;;  %v18686_v22 = vsel %vm3582_vm2, %v3578_v26, -1e+09 }
 0x526   :  { %v3620_v30 = vpop.xlane.xlu0 %3619  ;;  %v3652_v23 = vsub.f32 %v18584_v38, %v3614_v20  ;;  %v18662_v38 = vsel %vm3581_vm3, %v3573_v41, -1e+09 }
 0x527   :  { %v3654_v39 = vsub.f32 %v3589_v49, %v3620_v30 }
 0x528   :  { %v3672_v51 = vmul.f32 1.442695, %v3652_v23 }
 0x529   :  { %v3676_v40 = vmul.f32 1.442695, %v3654_v39  ;;  %v3627_v39 = vsel %vm3599_vm4, %v18671_v27, -inf }
 0x52a   :  { %v3623_v43 = vpop.xlane.xlu0 %3622 }
 0x52b   :  { %17474 = vpow2.f32 %v3676_v40  ;;  %v3655_v50 = vsub.f32 %v3590_v56, %v3623_v43 }
 0x52c   :  { %v18630_v52 = vpop.eup %17470 }
 0x52d   :  { %v18632_v57 = vpop.eup %17472  ;;  %v3678_v58 = vmul.f32 1.442695, %v3655_v50  ;;  %v3705_v33 = vsel %vm3599_vm4, %v18630_v52, 0.0 }
 0x52e   :  { %3706 = vadd.xlane.f32.xlu0 %v3705_v33  ;;  %v3702_v35 = vsel %vm3599_vm4, %v18632_v57, 0.0  ;;  %v3605_v12 = vpop.xlane.xlu0 %3604  ;;  %v3632_v10 = vpop.xlane.xlu1 %3631 }
 0x52f   :  { %17476 = vpow2.f32 %v3678_v58  ;;  %3703 = vadd.xlane.f32.xlu1 %v3702_v35  ;;  %v3649_v0 = vsub.f32 %v18596_v6, %v3605_v12  ;;  %v3658_v32 = vsub.f32 %v18600_v8, %v3632_v10 }
 0x530   :  { %17478 = vpow2.f32 %v3664_v24 }
 0x531   :  { %v3666_v54 = vmul.f32 1.442695, %v3649_v0  ;;  %17480 = vpow2.f32 %v3672_v51  ;;  %v3684_v6 = vmul.f32 1.442695, %v3658_v32 }
 0x532   :  { %v3617_v21 = vpop.xlane.xlu0 %3616 }
 0x533   :  { %v3653_v28 = vsub.f32 %v18608_v14, %v3617_v21  ;;  %17482 = vpow2.f32 %v3666_v54  ;;  %v3624_v14 = vsel %vm3599_vm4, %v18662_v38, -inf }
 0x534   :  { %17484 = vpow2.f32 %v3684_v6 }
 0x535   :  { %v18638_v60 = vpop.eup %17474  ;;  %v3674_v8 = vmul.f32 1.442695, %v3653_v28 }
 0x536   :  { %v3714_v49 = vsel %vm3599_vm4, %v18638_v60, 0.0  ;;  %v3635_v48 = vpop.xlane.xlu0 %3634  ;;  %v3644_v34 = vpop.xlane.xlu1 %3643 }
 0x537   :  { %3715 = vadd.xlane.f32.xlu1 %v3714_v49  ;;  %v3659_v29 = vsub.f32 %v18614_v5, %v3635_v48  ;;  %v3662_v36 = vsub.f32 %v18618_v25, %v3644_v34  ;;  %17486 = vpow2.f32 %v3674_v8 }
 0x539   :  { %v18642_v56 = vpop.eup %17476  ;;  %v3686_v5 = vmul.f32 1.442695, %v3659_v29  ;;  %v3692_v30 = vmul.f32 1.442695, %v3662_v36 }
 0x53a   :  { %v3717_v62 = vsel %vm3599_vm4, %v18642_v56, 0.0  ;;  %v3647_v16 = vpop.xlane.xlu0 %3646  ;;  %v18682_v40 = vpop.eup %17478 }
 0x53b   :  { %3718 = vadd.xlane.f32.xlu0 %v3717_v62  ;;  %v3663_v25 = vsub.f32 %v18626_v19, %v3647_v16  ;;  %17488 = vpow2.f32 %v3686_v5  ;;  %v18688_v50 = vpop.eup %17480  ;;  %v3639_v19 = vsel %vm3599_vm4, %v18686_v22, -inf  ;;  %v3696_v58 = vsel %vm3599_vm4, %v18682_v40, 0.0 }
 0x53c   :  { %17490 = vpow2.f32 %v3692_v30  ;;  %v3708_v49 = vsel %vm3599_vm4, %v18688_v50, 0.0 }
 0x53d   :  { %v3694_v43 = vmul.f32 1.442695, %v3663_v25  ;;  %v18694_v33 = vpop.eup %17482 }
 0x53e   :  { %v18696_v35 = vpop.eup %17484  ;;  %v3699_v2 = vsel %vm3599_vm4, %v18694_v33, 0.0 }
 0x53f   :  { %17492 = vpow2.f32 %v3694_v43  ;;  %v3726_v9 = vsel %vm3599_vm4, %v18696_v35, 0.0 }
 0x541   :  { %v18702_v62 = vpop.eup %17486 }
 0x548   :  { %15895 = vrot.lane.b32.xlu1 %v15894_v63, %s18025_s19  ;;  %v18704_v63 = vpop.eup %17488 }
 0x549   :  { %v18710_v12 = vpop.eup %17490  ;;  %v3729_v18 = vsel %vm3599_vm4, %v18704_v63, 0.0 }
 0x54a   :  { %v3738_v20 = vsel %vm3599_vm4, %v18710_v12, 0.0  ;;  %v18716_v21 = vpop.eup %17492 }
 0x54b   :  { %v3741_v23 = vsel %vm3599_vm4, %v18716_v21, 0.0 }
 0x551   :  { %15900 = vrot.lane.b32.xlu0 %v15899_v61, %s18025_s19  ;;  %v3711_v61 = vsel %vm3599_vm4, %v18702_v62, 0.0 }
 0x56c   :  { %3625 = vmax.xlane.f32.xlu1 %v3624_v14 }
 0x570   :  { %3628 = vmax.xlane.f32.xlu0 %v3627_v39  ;;  %3637 = vmax.xlane.f32.xlu1 %v3636_v31 }
 0x574   :  { %3640 = vmax.xlane.f32.xlu0 %v3639_v19  ;;  %3697 = vadd.xlane.f32.xlu1 %v3696_v58 }
 0x578   :  { %3700 = vadd.xlane.f32.xlu0 %v3699_v2  ;;  %3709 = vadd.xlane.f32.xlu1 %v3708_v49 }
 0x57c   :  { %3712 = vadd.xlane.f32.xlu0 %v3711_v61  ;;  %3727 = vadd.xlane.f32.xlu1 %v3726_v9 }
 0x580   :  { %3730 = vadd.xlane.f32.xlu0 %v3729_v18  ;;  %3739 = vadd.xlane.f32.xlu1 %v3738_v20 }
 0x584   :  { %3742 = vadd.xlane.f32.xlu0 %v3741_v23 }
 0x591   :  { %15905 = vrot.lane.b32.xlu1 %v15904_v15, %s18025_s19 }
 0x59a   :  { %15910 = vrot.lane.b32.xlu0 %v15909_v17, %s18025_s19 }
 0x5bb   :  { %v3707_v0 = vpop.xlane.xlu0 %3706 }
 0x5bc   :  { %v3704_v24 = vpop.xlane.xlu1 %3703 }
 0x5bd   :  { %17494 = vrcp.f32 %v3704_v24 }
 0x5be   :  { %17496 = vrcp.f32 %v3707_v0 }
 0x5c4   :  { %v3716_v10 = vpop.xlane.xlu1 %3715 }
 0x5c5   :  { %17498 = vrcp.f32 %v3716_v10 }
 0x5c7   :  { %v17495_v41 = vpop.eup %17494 }
 0x5c8   :  { %v3719_v51 = vpop.xlane.xlu0 %3718  ;;  %v15896_v32 = vpop.permute.xlu1 %15895  ;;  %v3762_v48 = vmul.f32 %v17495_v41, %v18632_v57 }
 0x5c9   :  { %17500 = vrcp.f32 %v3719_v51  ;;  %v15898_v54 = vunpack.i.h.bf16 %v15896_v32  ;;  %v15897_v53 = vunpack.i.l.bf16 %v15896_v32  ;;  %v17497_v15 = vpop.eup %17496 }
 0x5ca   :  { %10922 = vmatprep.mubr.msk.f32.mxu1 %vm3599_vm4, %v3762_v48  ;;  %v3763_v34 = vmul.f32 %v17497_v15, %v18630_v52 }
 0x5cb   :  { %v11787_v59 = vpack.c.bf16 %v15898_v54, %v15897_v53 }
 0x5cc   :  { %v15901_v55 = vpop.permute.xlu0 %15900 }
 0x5cd   :  { %v15903_v4 = vunpack.i.h.bf16 %v15901_v55  ;;  %v15902_v17 = vunpack.i.l.bf16 %v15901_v55  ;;  %11788 = vmatprep.subr.bf16.mxu1 %v11787_v59 }
 0x5ce   :  { %11790 = vmatpush3.bf16.msra.mxu1 %v11787_v59 }
 0x5cf   :  { %v17499_v28 = vpop.eup %17498  ;;  %v11795_v3 = vpack.c.bf16 %v15903_v4, %v15902_v17 }
 0x5d0   :  { %v3766_v13 = vmul.f32 %v17499_v28, %v18638_v60 }
 0x5d1   :  { %10923 = vmatmul.mubr.msk.f32.vlgmr.msra.gmra.mrb[20].mxu1 %vm3599_vm4, %v3763_v34  ;;  %11796 = vmatprep.subr.bf16.mxu1 %v11795_v3 }
 0x5d2   :  { %11798 = vmatpush3.bf16.msra.mxu1 %v11795_v3  ;;  %10936 = vmatprep.mubr.msk.f32.mxu1 %vm3599_vm4, %v3766_v13 }
 0x5d3   :  { %v17501_v57 = vpop.eup %17500 }
 0x5d4   :  { %v3767_v6 = vmul.f32 %v17501_v57, %v18642_v56  ;;  %v16513_v57 = vld [vmem:[#allocation16 + $0xc] ss:$16 sps:$4 sm:$0xff]  }
 0x5d6   :  { %10937 = vmatmul.mubr.msk.f32.vlgmr.msra.gmra.mrb[22].mxu1 %vm3599_vm4, %v3767_v6  ;;  %v16515_v6 = vld [vmem:[#allocation16 + $0x8] ss:$16 sps:$4 sm:$0xff]  }
 0x5f9   :  { %v3626_v29 = vpop.xlane.xlu1 %3625 }
 0x5fa   :  { %v3656_v8 = vsub.f32 %v18662_v38, %v3626_v29  ;;  %v16525_v29 = vld [vmem:[#allocation16 + $0x4c] ss:$16 sps:$4 sm:$0xff]  }
 0x5fc   :  { %v3680_v36 = vmul.f32 1.442695, %v3656_v8  ;;  %v16531_v8 = vld [vmem:[#allocation16 + $0x6c] ss:$16 sps:$4 sm:$0xff]  }
 0x5fd   :  { %v3629_v16 = vpop.xlane.xlu0 %3628  ;;  %v3638_v52 = vpop.xlane.xlu1 %3637 }
 0x5fe   :  { %17502 = vpow2.f32 %v3680_v36  ;;  %v3657_v60 = vsub.f32 %v18671_v27, %v3629_v16  ;;  %v3660_v14 = vsub.f32 %v18675_v46, %v3638_v52  ;;  %v16533_v36 = vld [vmem:[#allocation16 + $0x68] ss:$16 sps:$4 sm:$0xff]   ;;  %v16537_v16 = vld [vmem:[#allocation16 + $0x8c] ss:$16 sps:$4 sm:$0xff]  }
 0x5ff   :  { %v16543_v52 = vld [vmem:[#allocation16 + $0xac] ss:$16 sps:$4 sm:$0xff]  }
 0x600   :  { %v3682_v26 = vmul.f32 1.442695, %v3657_v60  ;;  %v3688_v5 = vmul.f32 1.442695, %v3660_v14  ;;  %v16545_v60 = vld [vmem:[#allocation16 + $0xa8] ss:$16 sps:$4 sm:$0xff]  }
 0x601   :  { %v3641_v30 = vpop.xlane.xlu0 %3640  ;;  %v3698_v25 = vpop.xlane.xlu1 %3697  ;;  %v16549_v14 = vld [vmem:[#allocation16 + $0xcc] ss:$16 sps:$4 sm:$0xff]  }
 0x602   :  { %17504 = vpow2.f32 %v3682_v26  ;;  %v3661_v56 = vsub.f32 %v18686_v22, %v3641_v30  ;;  %v16551_v26 = vld [vmem:[#allocation16 + $0xc8] ss:$16 sps:$4 sm:$0xff]  }
 0x603   :  { %17506 = vpow2.f32 %v3688_v5  ;;  %v16555_v5 = vld [vmem:[#allocation16 + $0xec] ss:$16 sps:$4 sm:$0xff]   ;;  %v16557_v30 = vld [vmem:[#allocation16 + $0xe8] ss:$16 sps:$4 sm:$0xff]  }
 0x604   :  { %v3690_v39 = vmul.f32 1.442695, %v3661_v56  ;;  %17508 = vrcp.f32 %v3698_v25  ;;  %v16561_v25 = vld [vmem:[#allocation16 + $0x10c] ss:$16 sps:$4 sm:$0xff]   ;;  %v16563_v56 = vld [vmem:[#allocation16 + $0x108] ss:$16 sps:$4 sm:$0xff]  }
 0x605   :  { %v3701_v31 = vpop.xlane.xlu0 %3700  ;;  %v3710_v38 = vpop.xlane.xlu1 %3709 }
 0x606   :  { %17510 = vpow2.f32 %v3690_v39  ;;  %v16567_v39 = vld [vmem:[#allocation16 + $0x12c] ss:$16 sps:$4 sm:$0xff]  }
 0x607   :  { %17512 = vrcp.f32 %v3701_v31  ;;  %v16569_v31 = vld [vmem:[#allocation16 + $0x128] ss:$16 sps:$4 sm:$0xff]  }
 0x608   :  { %v18740_v43 = vpop.eup %17502  ;;  %17514 = vrcp.f32 %v3710_v38  ;;  %v16573_v38 = vld [vmem:[#allocation16 + $0x14c] ss:$16 sps:$4 sm:$0xff]  }
 0x609   :  { %v3713_v27 = vpop.xlane.xlu0 %3712  ;;  %v3728_v19 = vpop.xlane.xlu1 %3727  ;;  %v3720_v46 = vsel %vm3599_vm4, %v18740_v43, 0.0 }
 0x60a   :  { %17516 = vrcp.f32 %v3713_v27  ;;  %3721 = vadd.xlane.f32.xlu1 %v3720_v46  ;;  %v16575_v27 = vld [vmem:[#allocation16 + $0x148] ss:$16 sps:$4 sm:$0xff]  }
 0x60b   :  { %17518 = vrcp.f32 %v3728_v19  ;;  %v16579_v19 = vld [vmem:[#allocation16 + $0x16c] ss:$16 sps:$4 sm:$0xff]   ;;  %v16581_v46 = vld [vmem:[#allocation16 + $0x168] ss:$16 sps:$4 sm:$0xff]  }
 0x60c   :  { %v18744_v58 = vpop.eup %17504 }
 0x60d   :  { %v18746_v22 = vpop.eup %17506  ;;  %v3731_v2 = vpop.xlane.xlu0 %3730  ;;  %v3723_v61 = vsel %vm3599_vm4, %v18744_v58, 0.0 }
 0x60e   :  { %v3740_v49 = vpop.xlane.xlu1 %3739  ;;  %v17509_v9 = vpop.eup %17508  ;;  %17520 = vrcp.f32 %v3731_v2  ;;  %3724 = vadd.xlane.f32.xlu0 %v3723_v61  ;;  %v3732_v18 = vsel %vm3599_vm4, %v18746_v22, 0.0  ;;  %v16585_v2 = vld [vmem:[#allocation16 + $0x18c] ss:$16 sps:$4 sm:$0xff]  }
 0x60f   :  { %17522 = vrcp.f32 %v3740_v49  ;;  %3733 = vadd.xlane.f32.xlu1 %v3732_v18  ;;  %v3760_v20 = vmul.f32 %v17509_v9, %v18682_v40  ;;  %v16587_v49 = vld [vmem:[#allocation16 + $0x188] ss:$16 sps:$4 sm:$0xff]   ;;  %v16591_v61 = vld [vmem:[#allocation16 + $0x1ac] ss:$16 sps:$4 sm:$0xff]  }
 0x610   :  { %v18753_v23 = vpop.eup %17510  ;;  %v16593_v18 = vld [vmem:[#allocation16 + $0x1a8] ss:$16 sps:$4 sm:$0xff]  }
 0x611   :  { %v17513_v24 = vpop.eup %17512  ;;  %10915 = vmatprep.mubr.msk.f32.mxu0 %vm3599_vm4, %v3760_v20  ;;  %v3743_v0 = vpop.xlane.xlu0 %3742  ;;  %v3735_v41 = vsel %vm3599_vm4, %v18753_v23, 0.0  ;;  %v16597_v20 = vld [vmem:[#allocation16 + $0x1cc] ss:$16 sps:$4 sm:$0xff]  }
 0x612   :  { %v15906_v10 = vpop.permute.xlu1 %15905  ;;  %v17515_v51 = vpop.eup %17514  ;;  %v3761_v32 = vmul.f32 %v17513_v24, %v18694_v33  ;;  %17524 = vrcp.f32 %v3743_v0  ;;  %3736 = vadd.xlane.f32.xlu0 %v3735_v41  ;;  %v16599_v0 = vld [vmem:[#allocation16 + $0x1c8] ss:$16 sps:$4 sm:$0xff]  }
 0x613   :  { %v15908_v48 = vunpack.i.h.bf16 %v15906_v10  ;;  %v15907_v54 = vunpack.i.l.bf16 %v15906_v10  ;;  %v3764_v53 = vmul.f32 %v17515_v51, %v18688_v50  ;;  %v16603_v51 = vld [vmem:[#allocation16 + $0x1ec] ss:$16 sps:$4 sm:$0xff]  }
 0x614   :  { %v17517_v40 = vpop.eup %17516  ;;  %10916 = vmatmul.mubr.msk.f32.vlgmr.msra.gmra.mrb[20].mxu0 %vm3599_vm4, %v3761_v32  ;;  %v16605_v32 = vld [vmem:[#allocation16 + $0x1e8] ss:$16 sps:$4 sm:$0xff]  }
 0x615   :  { %v11803_v59 = vpack.c.bf16 %v15908_v48, %v15907_v54  ;;  %v17519_v15 = vpop.eup %17518  ;;  %v3765_v55 = vmul.f32 %v17517_v40, %v18702_v62  ;;  %11794 = vmatpush3.bf16.msra.mxu0 %v18523_v1  ;;  %10929 = vmatprep.mubr.msk.f32.mxu0 %vm3599_vm4, %v3764_v53  ;;  %v15911_v4 = vpop.permute.xlu0 %15910 }
 0x616   :  { %11800 = vmatprep.subr.bf16.mxu0 %v18532_v7  ;;  %v15913_v33 = vunpack.i.h.bf16 %v15911_v4  ;;  %v15912_v17 = vunpack.i.l.bf16 %v15911_v4  ;;  %v3770_v28 = vmul.f32 %v17519_v15, %v18696_v35  ;;  %v16510_v4 = vld [vmem:[#allocation16 + $0x4] ss:$16 sps:$4 sm:$0xff]  }
 0x617   :  { %11804 = vmatprep.subr.bf16.mxu1 %v11803_v59 }
 0x618   :  { %11806 = vmatpush3.bf16.msra.mxu1 %v11803_v59  ;;  %v17521_v50 = vpop.eup %17520  ;;  %v11811_v34 = vpack.c.bf16 %v15913_v33, %v15912_v17  ;;  %10930 = vmatmul.mubr.msk.f32.vlgmr.msra.gmra.mrb[22].mxu0 %vm3599_vm4, %v3765_v55  ;;  %v16609_v17 = vld [vmem:[#allocation16 + $0x20c] ss:$16 sps:$4 sm:$0xff]  }
 0x619   :  { %10950 = vmatprep.mubr.msk.f32.mxu1 %vm3599_vm4, %v3770_v28  ;;  %v17523_v62 = vpop.eup %17522  ;;  %v3771_v1 = vmul.f32 %v17521_v50, %v18704_v63  ;;  %11802 = vmatpush3.bf16.msra.mxu0 %v18532_v7  ;;  %v16519_v7 = vld [vmem:[#allocation16 + $0x2c] ss:$16 sps:$4 sm:$0xff]   ;;  %v16521_v63 = vld [vmem:[#allocation16 + $0x28] ss:$16 sps:$4 sm:$0xff]  }
 0x61a   :  { %11808 = vmatprep.subr.bf16.mxu0 %v18536_v11  ;;  %11812 = vmatprep.subr.bf16.mxu1 %v11811_v34  ;;  %v3774_v3 = vmul.f32 %v17523_v62, %v18710_v12  ;;  %v16527_v12 = vld [vmem:[#allocation16 + $0x48] ss:$16 sps:$4 sm:$0xff]   ;;  %v16512_v62 = vld [vmem:[#allocation16] ss:$16 sps:$4 sm:$0xff]  }
 0x61b   :  { %10951 = vmatmul.mubr.msk.f32.vlgmr.msra.gmra.mrb[24].mxu1 %vm3599_vm4, %v3771_v1 }
 0x61c   :  { %v17525_v35 = vpop.eup %17524  ;;  %11814 = vmatpush3.bf16.msra.mxu1 %v11811_v34  ;;  %10964 = vmatprep.mubr.msk.f32.mxu1 %vm3599_vm4, %v3774_v3 }
 0x61d   :  { %v3775_v13 = vmul.f32 %v17525_v35, %v18716_v21  ;;  %11944 = vmatprep.subr.bf16.mxu1 %v16513_v57  ;;  %v16539_v21 = vld [vmem:[#allocation16 + $0x88] ss:$16 sps:$4 sm:$0xff]   ;;  %v16524_v35 = vld [vmem:[#allocation16 + $0x40] ss:$16 sps:$4 sm:$0xff]   ;;  %v16534_v57 = vld [vmem:[#allocation16 + $0x84] ss:$16 sps:$4 sm:$0xff]  }
 0x61f   :  { %10965 = vmatmul.mubr.msk.f32.vlgmr.msra.gmra.mrb[26].mxu1 %vm3599_vm4, %v3775_v13  ;;  %v16528_v13 = vld [vmem:[#allocation16 + $0x64] ss:$16 sps:$4 sm:$0xff]  }
 0x620   :  { %11946 = vmatpush1.bf16.msra.mxu1 %v16515_v6  ;;  %v16536_v6 = vld [vmem:[#allocation16 + $0x80] ss:$16 sps:$4 sm:$0xff]  }
 0x621   :  { %11948 = vmatprep.subr.bf16.mxu1 %v16519_v7  ;;  %v16540_v7 = vld [vmem:[#allocation16 + $0xa4] ss:$16 sps:$4 sm:$0xff]  }
 0x624   :  { %11950 = vmatpush1.bf16.msra.mxu1 %v16521_v63  ;;  %v16542_v63 = vld [vmem:[#allocation16 + $0xa0] ss:$16 sps:$4 sm:$0xff]  }
 0x625   :  { %11952 = vmatprep.subr.bf16.mxu1 %v16525_v29  ;;  %v16546_v29 = vld [vmem:[#allocation16 + $0xc4] ss:$16 sps:$4 sm:$0xff]  }
 0x628   :  { %11954 = vmatpush1.bf16.msra.mxu1 %v16527_v12  ;;  %v16548_v12 = vld [vmem:[#allocation16 + $0xc0] ss:$16 sps:$4 sm:$0xff]  }
 0x629   :  { %11956 = vmatprep.subr.bf16.mxu1 %v16531_v8  ;;  %v16552_v8 = vld [vmem:[#allocation16 + $0xe4] ss:$16 sps:$4 sm:$0xff]  }
 0x62c   :  { %11958 = vmatpush1.bf16.msra.mxu1 %v16533_v36  ;;  %v16554_v36 = vld [vmem:[#allocation16 + $0xe0] ss:$16 sps:$4 sm:$0xff]  }
 0x62d   :  { %11960 = vmatprep.subr.bf16.mxu1 %v16537_v16  ;;  %v16558_v16 = vld [vmem:[#allocation16 + $0x104] ss:$16 sps:$4 sm:$0xff]  }
 0x630   :  { %11962 = vmatpush1.bf16.msra.mxu1 %v16539_v21  ;;  %v16560_v21 = vld [vmem:[#allocation16 + $0x100] ss:$16 sps:$4 sm:$0xff]  }
 0x631   :  { %11964 = vmatprep.subr.bf16.mxu1 %v16543_v52  ;;  %v16564_v52 = vld [vmem:[#allocation16 + $0x124] ss:$16 sps:$4 sm:$0xff]  }
 0x634   :  { %11966 = vmatpush1.bf16.msra.mxu1 %v16545_v60  ;;  %v16566_v60 = vld [vmem:[#allocation16 + $0x120] ss:$16 sps:$4 sm:$0xff]  }
 0x635   :  { %11968 = vmatprep.subr.bf16.mxu1 %v16549_v14  ;;  %v16570_v14 = vld [vmem:[#allocation16 + $0x144] ss:$16 sps:$4 sm:$0xff]  }
 0x638   :  { %11970 = vmatpush1.bf16.msra.mxu1 %v16551_v26  ;;  %v16572_v26 = vld [vmem:[#allocation16 + $0x140] ss:$16 sps:$4 sm:$0xff]  }
 0x639   :  { %11972 = vmatprep.subr.bf16.mxu1 %v16555_v5  ;;  %v16576_v5 = vld [vmem:[#allocation16 + $0x164] ss:$16 sps:$4 sm:$0xff]  }
 0x63c   :  { %11974 = vmatpush1.bf16.msra.mxu1 %v16557_v30  ;;  %v16578_v30 = vld [vmem:[#allocation16 + $0x160] ss:$16 sps:$4 sm:$0xff]  }
 0x63d   :  { %11976 = vmatprep.subr.bf16.mxu1 %v16561_v25  ;;  %v16582_v25 = vld [vmem:[#allocation16 + $0x184] ss:$16 sps:$4 sm:$0xff]  }
 0x640   :  { %11978 = vmatpush1.bf16.msra.mxu1 %v16563_v56  ;;  %v16584_v56 = vld [vmem:[#allocation16 + $0x180] ss:$16 sps:$4 sm:$0xff]  }
 0x641   :  { %11980 = vmatprep.subr.bf16.mxu1 %v16567_v39  ;;  %v16588_v39 = vld [vmem:[#allocation16 + $0x1a4] ss:$16 sps:$4 sm:$0xff]  }
 0x644   :  { %11982 = vmatpush1.bf16.msra.mxu1 %v16569_v31  ;;  %v16590_v31 = vld [vmem:[#allocation16 + $0x1a0] ss:$16 sps:$4 sm:$0xff]  }
 0x645   :  { %11984 = vmatprep.subr.bf16.mxu1 %v16573_v38  ;;  %v16594_v38 = vld [vmem:[#allocation16 + $0x1c4] ss:$16 sps:$4 sm:$0xff]  }
 0x648   :  { %11986 = vmatpush1.bf16.msra.mxu1 %v16575_v27  ;;  %v16596_v27 = vld [vmem:[#allocation16 + $0x1c0] ss:$16 sps:$4 sm:$0xff]  }
 0x649   :  { %11988 = vmatprep.subr.bf16.mxu1 %v16579_v19  ;;  %v16600_v19 = vld [vmem:[#allocation16 + $0x1e4] ss:$16 sps:$4 sm:$0xff]  }
 0x64c   :  { %11990 = vmatpush1.bf16.msra.mxu1 %v16581_v46  ;;  %v16602_v46 = vld [vmem:[#allocation16 + $0x1e0] ss:$16 sps:$4 sm:$0xff]  }
 0x64d   :  { %11992 = vmatprep.subr.bf16.mxu1 %v16585_v2 }
 0x650   :  { %11994 = vmatpush1.bf16.msra.mxu1 %v16587_v49  ;;  %v16606_v49 = vld [vmem:[#allocation16 + $0x204] ss:$16 sps:$4 sm:$0xff]  }
 0x651   :  { %11996 = vmatprep.subr.bf16.mxu1 %v16591_v61 }
 0x654   :  { %11998 = vmatpush1.bf16.msra.mxu1 %v16593_v18 }
 0x655   :  { %12000 = vmatprep.subr.bf16.mxu1 %v16597_v20 }
 0x658   :  { %12002 = vmatpush1.bf16.msra.mxu1 %v16599_v0 }
 0x659   :  { %12004 = vmatprep.subr.bf16.mxu1 %v16603_v51 }
 0x65c   :  { %12006 = vmatpush1.bf16.msra.mxu1 %v16605_v32 }
 0x65d   :  { %12008 = vmatprep.subr.bf16.mxu1 %v16609_v17  ;;  %v16612_v17 = vld [vmem:[#allocation16 + $0x224] ss:$16 sps:$4 sm:$0xff]  }
 0x697   :  { %v3722_v9 = vpop.xlane.xlu1 %3721 }
 0x698   :  { %17526 = vrcp.f32 %v3722_v9 }
 0x69b   :  { %v3725_v24 = vpop.xlane.xlu0 %3724 }
 0x69c   :  { %17528 = vrcp.f32 %v3725_v24  ;;  %v3734_v10 = vpop.xlane.xlu1 %3733 }
 0x69d   :  { %17530 = vrcp.f32 %v3734_v10 }
 0x69f   :  { %v3737_v41 = vpop.xlane.xlu0 %3736 }
 0x6a0   :  { %17532 = vrcp.f32 %v3737_v41 }
 0x6a2   :  { %v17527_v48 = vpop.eup %17526 }
 0x6a3   :  { %v3768_v54 = vmul.f32 %v17527_v48, %v18740_v43 }
 0x6a4   :  { %v10924_v53 = vpop.f32.mrb[20].mxu1 }
 0x6a5   :  { %v3929_v40 = vpop.f32.mrb[21].mxu1  ;;  %10943 = vmatprep.mubr.msk.f32.mxu0 %vm3599_vm4, %v3768_v54 }
 0x6a6   :  { %v17529_v59 = vpop.eup %17528 }
 0x6a7   :  { %v17531_v15 = vpop.eup %17530  ;;  %v3769_v55 = vmul.f32 %v17529_v59, %v18744_v58  ;;  %v16516_v58 = vld [vmem:[#allocation16 + $0x24] ss:$16 sps:$4 sm:$0xff]  }
 0x6a8   :  { %v3772_v33 = vmul.f32 %v17531_v15, %v18746_v22  ;;  %v16518_v22 = vld [vmem:[#allocation16 + $0x20] ss:$16 sps:$4 sm:$0xff]  }
 0x6a9   :  { %v10938_v28 = vpop.f32.mrb[22].mxu1  ;;  %10944 = vmatmul.mubr.msk.f32.vlgmr.msra.gmra.mrb[24].mxu0 %vm3599_vm4, %v3769_v55  ;;  %v16608_v55 = vld [vmem:[#allocation16 + $0x200] ss:$16 sps:$4 sm:$0xff]  }
 0x6aa   :  { %v17533_v50 = vpop.eup %17532  ;;  %v15919_v34 = vpack.i.bf16 %v10924_v53, %v10938_v28  ;;  %11810 = vmatpush3.bf16.msra.mxu0 %v18536_v11  ;;  %v4091_v43 = vpop.f32.mrb[23].mxu1  ;;  %10957 = vmatprep.mubr.msk.f32.mxu0 %vm3599_vm4, %v3772_v33  ;;  %v16522_v11 = vld [vmem:[#allocation16 + $0x44] ss:$16 sps:$4 sm:$0xff]   ;;  %v16615_v28 = vld [vmem:[#allocation16 + $0x22c] ss:$16 sps:$4 sm:$0xff]  }
 0x6ab   :  { %v3773_v1 = vmul.f32 %v17533_v50, %v18753_v23  ;;  %v15914_v3 = vpack.i.bf16 %v3929_v40, %v4091_v43  ;;  %11816 = vmatprep.subr.bf16.mxu0 %v16510_v4  ;;  %v16530_v23 = vld [vmem:[#allocation16 + $0x60] ss:$16 sps:$4 sm:$0xff]   ;;  %v16611_v4 = vld [vmem:[#allocation16 + $0x208] ss:$16 sps:$4 sm:$0xff]  }
 0x6ac   :  { %15920 = vrot.lane.b32.xlu0 %v15919_v34, %s18025_s19  ;;  %v16614_v34 = vld [vmem:[#allocation16 + $0x220] ss:$16 sps:$4 sm:$0xff]   ;;  %v16617_v43 = vld [vmem:[#allocation16 + $0x228] ss:$16 sps:$4 sm:$0xff]  }
 0x6ad   :  { %15915 = vrot.lane.b32.xlu1 %v15914_v3, %s18025_s19  ;;  %10958 = vmatmul.mubr.msk.f32.vlgmr.msra.gmra.mrb[26].mxu0 %vm3599_vm4, %v3773_v1  ;;  %v16618_v1 = vld [vmem:[#allocation16 + $0x244] ss:$16 sps:$4 sm:$0xff]   ;;  %v16621_v3 = vld [vmem:[#allocation16 + $0x24c] ss:$16 sps:$4 sm:$0xff]  }
 0x6ae   :  { %11818 = vmatpush1.bf16.msra.mxu0 %v16512_v62 }
 0x6af   :  { %11820 = vmatprep.subr.bf16.mxu0 %v16516_v58  ;;  %v16620_v58 = vld [vmem:[#allocation16 + $0x240] ss:$16 sps:$4 sm:$0xff]  }
 0x6b2   :  { %11822 = vmatpush1.bf16.msra.mxu0 %v16518_v22  ;;  %v16623_v22 = vld [vmem:[#allocation16 + $0x248] ss:$16 sps:$4 sm:$0xff]  }
 0x6b3   :  { %11824 = vmatprep.subr.bf16.mxu0 %v16522_v11  ;;  %v16624_v11 = vld [vmem:[#allocation16 + $0x264] ss:$16 sps:$4 sm:$0xff]  }
 0x6b6   :  { %11826 = vmatpush1.bf16.msra.mxu0 %v16524_v35  ;;  %v16627_v35 = vld [vmem:[#allocation16 + $0x26c] ss:$16 sps:$4 sm:$0xff]  }
 0x6b7   :  { %11828 = vmatprep.subr.bf16.mxu0 %v16528_v13  ;;  %v16626_v13 = vld [vmem:[#allocation16 + $0x260] ss:$16 sps:$4 sm:$0xff]  }
 0x6ba   :  { %11830 = vmatpush1.bf16.msra.mxu0 %v16530_v23  ;;  %v16629_v23 = vld [vmem:[#allocation16 + $0x268] ss:$16 sps:$4 sm:$0xff]  }
 0x6bb   :  { %11832 = vmatprep.subr.bf16.mxu0 %v16534_v57  ;;  %v16630_v57 = vld [vmem:[#allocation16 + $0x284] ss:$16 sps:$4 sm:$0xff]  }
 0x6be   :  { %11834 = vmatpush1.bf16.msra.mxu0 %v16536_v6  ;;  %v16633_v6 = vld [vmem:[#allocation16 + $0x28c] ss:$16 sps:$4 sm:$0xff]  }
 0x6bf   :  { %11836 = vmatprep.subr.bf16.mxu0 %v16540_v7  ;;  %v16632_v7 = vld [vmem:[#allocation16 + $0x280] ss:$16 sps:$4 sm:$0xff]  }
 0x6c2   :  { %11838 = vmatpush1.bf16.msra.mxu0 %v16542_v63  ;;  %v16635_v63 = vld [vmem:[#allocation16 + $0x288] ss:$16 sps:$4 sm:$0xff]  }
 0x6c3   :  { %11840 = vmatprep.subr.bf16.mxu0 %v16546_v29  ;;  %v16636_v29 = vld [vmem:[#allocation16 + $0x2a4] ss:$16 sps:$4 sm:$0xff]  }
 0x6c6   :  { %11842 = vmatpush1.bf16.msra.mxu0 %v16548_v12  ;;  %v16639_v12 = vld [vmem:[#allocation16 + $0x2ac] ss:$16 sps:$4 sm:$0xff]  }
 0x6c7   :  { %11844 = vmatprep.subr.bf16.mxu0 %v16552_v8  ;;  %v16638_v8 = vld [vmem:[#allocation16 + $0x2a0] ss:$16 sps:$4 sm:$0xff]  }
 0x6ca   :  { %11846 = vmatpush1.bf16.msra.mxu0 %v16554_v36  ;;  %v16641_v36 = vld [vmem:[#allocation16 + $0x2a8] ss:$16 sps:$4 sm:$0xff]  }
 0x6cb   :  { %11848 = vmatprep.subr.bf16.mxu0 %v16558_v16  ;;  %v16642_v16 = vld [vmem:[#allocation16 + $0x2c4] ss:$16 sps:$4 sm:$0xff]  }
 0x6ce   :  { %11850 = vmatpush1.bf16.msra.mxu0 %v16560_v21  ;;  %v16645_v21 = vld [vmem:[#allocation16 + $0x2cc] ss:$16 sps:$4 sm:$0xff]  }
 0x6cf   :  { %11852 = vmatprep.subr.bf16.mxu0 %v16564_v52  ;;  %v16644_v52 = vld [vmem:[#allocation16 + $0x2c0] ss:$16 sps:$4 sm:$0xff]  }
 0x6d2   :  { %11854 = vmatpush1.bf16.msra.mxu0 %v16566_v60  ;;  %v16647_v60 = vld [vmem:[#allocation16 + $0x2c8] ss:$16 sps:$4 sm:$0xff]  }
 0x6d3   :  { %11856 = vmatprep.subr.bf16.mxu0 %v16570_v14  ;;  %v16648_v14 = vld [vmem:[#allocation16 + $0x2e4] ss:$16 sps:$4 sm:$0xff]  }
 0x6d6   :  { %11858 = vmatpush1.bf16.msra.mxu0 %v16572_v26  ;;  %v16651_v26 = vld [vmem:[#allocation16 + $0x2ec] ss:$16 sps:$4 sm:$0xff]  }
 0x6d7   :  { %11860 = vmatprep.subr.bf16.mxu0 %v16576_v5  ;;  %v16650_v5 = vld [vmem:[#allocation16 + $0x2e0] ss:$16 sps:$4 sm:$0xff]  }
 0x6da   :  { %11862 = vmatpush1.bf16.msra.mxu0 %v16578_v30  ;;  %v16653_v30 = vld [vmem:[#allocation16 + $0x2e8] ss:$16 sps:$4 sm:$0xff]  }
 0x6db   :  { %11864 = vmatprep.subr.bf16.mxu0 %v16582_v25  ;;  %v16654_v25 = vld [vmem:[#allocation16 + $0x304] ss:$16 sps:$4 sm:$0xff]  }
 0x6de   :  { %11866 = vmatpush1.bf16.msra.mxu0 %v16584_v56  ;;  %v16657_v56 = vld [vmem:[#allocation16 + $0x30c] ss:$16 sps:$4 sm:$0xff]  }
 0x6df   :  { %11868 = vmatprep.subr.bf16.mxu0 %v16588_v39  ;;  %v16656_v39 = vld [vmem:[#allocation16 + $0x300] ss:$16 sps:$4 sm:$0xff]  }
 0x6e2   :  { %11870 = vmatpush1.bf16.msra.mxu0 %v16590_v31  ;;  %v16659_v31 = vld [vmem:[#allocation16 + $0x308] ss:$16 sps:$4 sm:$0xff]  }
 0x6e3   :  { %11872 = vmatprep.subr.bf16.mxu0 %v16594_v38  ;;  %v16660_v38 = vld [vmem:[#allocation16 + $0x324] ss:$16 sps:$4 sm:$0xff]  }
 0x6e6   :  { %11874 = vmatpush1.bf16.msra.mxu0 %v16596_v27  ;;  %v16663_v27 = vld [vmem:[#allocation16 + $0x32c] ss:$16 sps:$4 sm:$0xff]  }
 0x6e7   :  { %v10917_v2 = vpop.f32.mrb[20].mxu0  ;;  %11876 = vmatprep.subr.bf16.mxu0 %v16600_v19  ;;  %v16662_v19 = vld [vmem:[#allocation16 + $0x320] ss:$16 sps:$4 sm:$0xff]  }
 0x6e8   :  { %v3848_v61 = vpop.f32.mrb[21].mxu0 }
 0x6ea   :  { %11878 = vmatpush1.bf16.msra.mxu0 %v16602_v46  ;;  %v16665_v46 = vld [vmem:[#allocation16 + $0x328] ss:$16 sps:$4 sm:$0xff]  }
 0x6eb   :  { %v10931_v9 = vpop.f32.mrb[22].mxu0  ;;  %11880 = vmatprep.subr.bf16.mxu0 %v16606_v49  ;;  %v16669_v49 = vld [vmem:[#allocation16 + $0x34c] ss:$16 sps:$4 sm:$0xff]  }
 0x6ec   :  { %v4010_v18 = vpop.f32.mrb[23].mxu0 }
 0x6ee   :  { %v10952_v20 = vpop.f32.mrb[24].mxu1 }
 0x6ef   :  { %v4253_v24 = vpop.f32.mrb[25].mxu1 }
 0x6f2   :  { %v10966_v0 = vpop.f32.mrb[26].mxu1 }
 0x6f3   :  { %v15929_v10 = vpack.i.bf16 %v10952_v20, %v10966_v0  ;;  %v4415_v41 = vpop.f32.mrb[27].mxu1  ;;  %v16675_v20 = vld [vmem:[#allocation16 + $0x36c] ss:$16 sps:$4 sm:$0xff]   ;;  %v16677_v0 = vld [vmem:[#allocation16 + $0x368] ss:$16 sps:$4 sm:$0xff]  }
 0x6f4   :  { %v15924_v51 = vpack.i.bf16 %v4253_v24, %v4415_v41  ;;  %v16674_v24 = vld [vmem:[#allocation16 + $0x360] ss:$16 sps:$4 sm:$0xff]   ;;  %v16681_v41 = vld [vmem:[#allocation16 + $0x38c] ss:$16 sps:$4 sm:$0xff]  }
 0x6f6   :  { %15925 = vrot.lane.b32.xlu1 %v15924_v51, %s18025_s19  ;;  %v16680_v51 = vld [vmem:[#allocation16 + $0x380] ss:$16 sps:$4 sm:$0xff]  }
 0x6fa   :  { %15930 = vrot.lane.b32.xlu1 %v15929_v10, %s18025_s19  ;;  %v16678_v10 = vld [vmem:[#allocation16 + $0x384] ss:$16 sps:$4 sm:$0xff]   ;;  %s18029_s19 = smov [#allocation31]  }
 0x6fb   :  { %s10722_s23 = sshll.u32 %s18029_s19, 4  ;;  %s10723_s23 = int_to_ptr.vmem [resolvable:$true] %s10722_s23 }
 0x6fc   :  { %s17959_s26 = scalar_lea.vmem %s10723_s23, 1024  ;;  %p17964_p5 = scmp.lt.s32.totalorder %s10723_s23, %s10723_s23 }
 0x6fd   :  { %p17960_p4 = scmp.ne.s32.totalorder %s10723_s23, %s17959_s26  ;;  %p17965_p6 = scmp.lt.s32.totalorder %s17959_s26, %s17959_s26 }
 0x6ff   :  { %p17966_p7 = por %p17965_p6, %p17964_p5 }
 0x701   :  { %p17967_p8 = pnand %p17966_p7, %p17960_p4 }
 0x71e   :  { %v15921_v32 = vpop.permute.xlu0 %15920 }
 0x71f   :  { %v15916_v48 = vpop.permute.xlu1 %15915  ;;  %v15922_v54 = vunpack.i.l.bf16 %v15921_v32  ;;  %v15923_v33 = vunpack.i.h.bf16 %v15921_v32  ;;  %v16683_v32 = vld [vmem:[#allocation16 + $0x388] ss:$16 sps:$4 sm:$0xff]  }
 0x720   :  { %v15918_v53 = vunpack.i.h.bf16 %v15916_v48  ;;  %v15917_v40 = vunpack.i.l.bf16 %v15916_v48  ;;  %v16684_v48 = vld [vmem:[#allocation16 + $0x3a4] ss:$16 sps:$4 sm:$0xff]  }
 0x721   :  { %v4459_v50 = vsel %vm2900_vm0, %v10931_v9, %v15922_v54  ;;  %v4457_v62 = vsel %vm2900_vm0, %v10917_v2, %v15923_v33  ;;  %v16666_v2 = vld [vmem:[#allocation16 + $0x344] ss:$16 sps:$4 sm:$0xff]   ;;  %v16671_v9 = vld [vmem:[#allocation16 + $0x348] ss:$16 sps:$4 sm:$0xff]   ;;  %v16687_v54 = vld [vmem:[#allocation16 + $0x3ac] ss:$16 sps:$4 sm:$0xff]  }
 0x722   :  { %v4458_v59 = vsel %vm2900_vm0, %v4010_v18, %v15917_v40  ;;  %v4456_v15 = vsel %vm2900_vm0, %v3848_v61, %v15918_v53  ;;  %v16668_v61 = vld [vmem:[#allocation16 + $0x340] ss:$16 sps:$4 sm:$0xff]   ;;  %v16672_v18 = vld [vmem:[#allocation16 + $0x364] ss:$16 sps:$4 sm:$0xff]   ;;  %v16689_v40 = vld [vmem:[#allocation16 + $0x3a8] ss:$16 sps:$4 sm:$0xff]  }
 0x723   :  { %4550 = vmatprep.mubr.f32.mxu0 %v4458_v59  ;;  %4704 = vmatprep.mubr.f32.mxu1 %v4458_v59  ;;  %v16686_v53 = vld [vmem:[#allocation16 + $0x3a0] ss:$16 sps:$4 sm:$0xff]   ;;  %v16690_v59 = vld [vmem:[#allocation16 + $0x3c4] ss:$16 sps:$4 sm:$0xff]  }
 0x724   :  { %4551 = vmatmul.mubr.f32.vlgmr.msra.gmra.mrb[28].mxu0 %v4456_v15  ;;  %4705 = vmatmul.mubr.f32.vlgmr.msra.gmra.mrb[28].mxu1 %v4456_v15  ;;  %v16693_v15 = vld [vmem:[#allocation16 + $0x3cc] ss:$16 sps:$4 sm:$0xff]   ;;  %v16696_v33 = vld [vmem:[#allocation16 + $0x3e4] ss:$16 sps:$4 sm:$0xff]  }
 0x725   :  { %4556 = vmatprep.mubr.f32.mxu0 %v4459_v50  ;;  %4710 = vmatprep.mubr.f32.mxu1 %v4459_v50  ;;  %v16701_v50 = vld [vmem:[#allocation16 + $0x3e8] ss:$16 sps:$4 sm:$0xff]  }
 0x726   :  { %11882 = vmatpush1.bf16.msra.mxu0 %v16608_v55  ;;  %12010 = vmatpush1.bf16.msra.mxu1 %v16611_v4  ;;  %v16692_v55 = vld [vmem:[#allocation16 + $0x3c0] ss:$16 sps:$4 sm:$0xff]   ;;  %v16695_v4 = vld [vmem:[#allocation16 + $0x3c8] ss:$16 sps:$4 sm:$0xff]  }
 0x727   :  { %11884 = vmatprep.subr.bf16.mxu0 %v16612_v17  ;;  %12012 = vmatprep.subr.bf16.mxu1 %v16615_v28  ;;  %v16699_v17 = vld [vmem:[#allocation16 + $0x3ec] ss:$16 sps:$4 sm:$0xff]   ;;  %v16698_v28 = vld [vmem:[#allocation16 + $0x3e0] ss:$16 sps:$4 sm:$0xff]  }
 0x728   :  { %4557 = vmatmul.mubr.f32.gmra.mrb[30].mxu0 %v4457_v62  ;;  %4711 = vmatmul.mubr.f32.gmra.mrb[30].mxu1 %v4457_v62 }
 0x72a   :  { %11886 = vmatpush1.bf16.msra.mxu0 %v16614_v34  ;;  %12014 = vmatpush1.bf16.msra.mxu1 %v16617_v43 }
 0x72b   :  { %11888 = vmatprep.subr.bf16.mxu0 %v16618_v1  ;;  %12016 = vmatprep.subr.bf16.mxu1 %v16621_v3 }
 0x72e   :  { %11890 = vmatpush1.bf16.msra.mxu0 %v16620_v58  ;;  %12018 = vmatpush1.bf16.msra.mxu1 %v16623_v22 }
 0x72f   :  { %11892 = vmatprep.subr.bf16.mxu0 %v16624_v11  ;;  %12020 = vmatprep.subr.bf16.mxu1 %v16627_v35 }
 0x732   :  { %11894 = vmatpush1.bf16.msra.mxu0 %v16626_v13  ;;  %12022 = vmatpush1.bf16.msra.mxu1 %v16629_v23 }
 0x733   :  { %11896 = vmatprep.subr.bf16.mxu0 %v16630_v57  ;;  %12024 = vmatprep.subr.bf16.mxu1 %v16633_v6 }
 0x736   :  { %11898 = vmatpush1.bf16.msra.mxu0 %v16632_v7  ;;  %12026 = vmatpush1.bf16.msra.mxu1 %v16635_v63  ;;  %v4464_v63 = vld [vmem:[#allocation17] sm:$0xf] }
 0x737   :  { %11900 = vmatprep.subr.bf16.mxu0 %v16636_v29  ;;  %12028 = vmatprep.subr.bf16.mxu1 %v16639_v12  ;;  %v4469_v29 = vrot.slane %v4464_v63, %v18400_v42  ;;  %v4477_v12 = vrot.slane %v4464_v63, %v18403_v44 }
 0x73a   :  { %11902 = vmatpush1.bf16.msra.mxu0 %v16638_v8  ;;  %12030 = vmatpush1.bf16.msra.mxu1 %v16641_v36  ;;  %v4473_v8 = vrot.slane %v4464_v63, %v18406_v45 }
 0x73b   :  { %11904 = vmatprep.subr.bf16.mxu0 %v16642_v16  ;;  %12032 = vmatprep.subr.bf16.mxu1 %v16645_v21  ;;  %v4481_v21 = vrot.slane %v4464_v63, %v18409_v47  ;;  %v4948_v63 = vld [vmem:[#allocation22 + $0x108] sm:$0xff] }
 0x73e   :  { %11906 = vmatpush1.bf16.msra.mxu0 %v16644_v52  ;;  %12034 = vmatpush1.bf16.msra.mxu1 %v16647_v60 }
 0x73f   :  { %11908 = vmatprep.subr.bf16.mxu0 %v16648_v14  ;;  %12036 = vmatprep.subr.bf16.mxu1 %v16651_v26 }
 0x742   :  { %11910 = vmatpush1.bf16.msra.mxu0 %v16650_v5  ;;  %12038 = vmatpush1.bf16.msra.mxu1 %v16653_v30  ;;  %v17553_v30 = vld [vmem:[#allocation2] sm:$0xff] }
 0x743   :  { %11912 = vmatprep.subr.bf16.mxu0 %v16654_v25  ;;  %12040 = vmatprep.subr.bf16.mxu1 %v16657_v56  ;;  %v17554_v56 = vld [vmem:[#allocation2 + $0x8] sm:$0xff] }
 0x746   :  { %11914 = vmatpush1.bf16.msra.mxu0 %v16656_v39  ;;  %12042 = vmatpush1.bf16.msra.mxu1 %v16659_v31 }
 0x747   :  { %11916 = vmatprep.subr.bf16.mxu0 %v16660_v38  ;;  %12044 = vmatprep.subr.bf16.mxu1 %v16663_v27 }
 0x74a   :  { %11918 = vmatpush1.bf16.msra.mxu0 %v16662_v19  ;;  %12046 = vmatpush1.bf16.msra.mxu1 %v16665_v46 }
 0x74b   :  { %11920 = vmatprep.subr.bf16.mxu0 %v16666_v2  ;;  %12048 = vmatprep.subr.bf16.mxu1 %v16669_v49  ;;  %v17555_v49 = vld [vmem:[#allocation2 + $0x10] sm:$0xff] }
 0x74e   :  { %11922 = vmatpush1.bf16.msra.mxu0 %v16668_v61  ;;  %12050 = vmatpush1.bf16.msra.mxu1 %v16671_v9 }
 0x74f   :  { %11924 = vmatprep.subr.bf16.mxu0 %v16672_v18  ;;  %12052 = vmatprep.subr.bf16.mxu1 %v16675_v20 }
 0x752   :  { %11926 = vmatpush1.bf16.msra.mxu0 %v16674_v24  ;;  %12054 = vmatpush1.bf16.msra.mxu1 %v16677_v0  ;;  %v17556_v24 = vld [vmem:[#allocation2 + $0x20] sm:$0xff] }
 0x753   :  { %11928 = vmatprep.subr.bf16.mxu0 %v16678_v10  ;;  %12056 = vmatprep.subr.bf16.mxu1 %v16681_v41  ;;  %v17557_v10 = vld [vmem:[#allocation2 + $0x18] sm:$0xff] }
 0x756   :  { %11930 = vmatpush1.bf16.msra.mxu0 %v16680_v51  ;;  %12058 = vmatpush1.bf16.msra.mxu1 %v16683_v32  ;;  %v17558_v51 = vld [vmem:[#allocation2 + $0x28] sm:$0xff] }
 0x757   :  { %11932 = vmatprep.subr.bf16.mxu0 %v16684_v48  ;;  %12060 = vmatprep.subr.bf16.mxu1 %v16687_v54 }
 0x75a   :  { %11934 = vmatpush1.bf16.msra.mxu0 %v16686_v53  ;;  %12062 = vmatpush1.bf16.msra.mxu1 %v16689_v40  ;;  %v17559_v53 = vld [vmem:[#allocation2 + $0x30] sm:$0xff] }
 0x75b   :  { %11936 = vmatprep.subr.bf16.mxu0 %v16690_v59  ;;  %12064 = vmatprep.subr.bf16.mxu1 %v16693_v15 }
 0x75e   :  { %11938 = vmatpush1.bf16.msra.mxu0 %v16692_v55  ;;  %12066 = vmatpush1.bf16.msra.mxu1 %v16695_v4  ;;  %v17560_v55 = vld [vmem:[#allocation2 + $0x38] sm:$0xff] }
 0x75f   :  { %11940 = vmatprep.subr.bf16.mxu0 %v16696_v33  ;;  %12068 = vmatprep.subr.bf16.mxu1 %v16699_v17 }
 0x762   :  { %11942 = vmatpush1.bf16.msra.mxu0 %v16698_v28  ;;  %12070 = vmatpush1.bf16.msra.mxu1 %v16701_v50  ;;  %v4915_v28 = vld [vmem:[#allocation22] sm:$0xff] }
 0x763   :  { %v4923_v50 = vld [vmem:[#allocation22 + $0x40] sm:$0xff] }
 0x768   :  { %v15926_v34 = vpop.permute.xlu1 %15925 }
 0x769   :  { %v15927_v3 = vunpack.i.l.bf16 %v15926_v34  ;;  %v15928_v22 = vunpack.i.h.bf16 %v15926_v34  ;;  %v4916_v34 = vld [vmem:[#allocation22 + $0x8] sm:$0xff] }
 0x76c   :  { %v15931_v1 = vpop.permute.xlu1 %15930 }
 0x76d   :  { %v15932_v35 = vunpack.i.l.bf16 %v15931_v1  ;;  %v15933_v6 = vunpack.i.h.bf16 %v15931_v1  ;;  %v4924_v1 = vld [vmem:[#allocation22 + $0x48] sm:$0xff] }
 0x77c   :  { %v10945_v43 = vpop.f32.mrb[24].mxu0 }
 0x77d   :  { %v4172_v62 = vpop.f32.mrb[25].mxu0  ;;  %v4461_v7 = vsel %vm2900_vm0, %v10945_v43, %v15933_v6  ;;  %v14823_v43 = vcombine.high %v4915_v28, %v4923_v50 }
 0x77e   :  { %v4460_v23 = vsel %vm2900_vm0, %v4172_v62, %v15928_v22  ;;  %v14824_v62 = vcombine.low %v4915_v28, %v4923_v50  ;;  %v14887_v22 = vcombine.high %v4916_v34, %v4924_v1 }
 0x77f   :  { %12072 = vmatprep.subr.bf16.mxu0 %v14823_v43  ;;  %v5027_v43 = vld [vmem:[#allocation22 + $0x380] sm:$0xff] }
 0x780   :  { %v10959_v58 = vpop.f32.mrb[26].mxu0  ;;  %12200 = vmatprep.subr.bf16.mxu1 %v14887_v22 }
 0x781   :  { %v4334_v11 = vpop.f32.mrb[27].mxu0  ;;  %v4463_v57 = vsel %vm2900_vm0, %v10959_v58, %v15932_v35  ;;  %v4939_v58 = vld [vmem:[#allocation22 + $0xc0] sm:$0xff] }
 0x782   :  { %v4462_v13 = vsel %vm2900_vm0, %v4334_v11, %v15927_v3  ;;  %v4931_v3 = vld [vmem:[#allocation22 + $0x80] sm:$0xff]  ;;  %v14888_v11 = vcombine.low %v4916_v34, %v4924_v1  ;;  %v5028_v1 = vld [vmem:[#allocation22 + $0x388] sm:$0xff] }
 0x783   :  { %4627 = vmatprep.mubr.f32.mxu0 %v4462_v13  ;;  %4781 = vmatprep.mubr.f32.mxu1 %v4462_v13  ;;  %v14825_v35 = vcombine.high %v4931_v3, %v4939_v58  ;;  %v4932_v13 = vld [vmem:[#allocation22 + $0x88] sm:$0xff] }
 0x784   :  { %4628 = vmatmul.mubr.f32.vlgmr.msra.gmra.mrb[28].mxu0 %v4460_v23  ;;  %4782 = vmatmul.mubr.f32.vlgmr.msra.gmra.mrb[28].mxu1 %v4460_v23  ;;  %v4940_v23 = vld [vmem:[#allocation22 + $0xc8] sm:$0xff] }
 0x785   :  { %4633 = vmatprep.mubr.f32.mxu0 %v4463_v57  ;;  %4787 = vmatprep.mubr.f32.mxu1 %v4463_v57  ;;  %v4947_v57 = vld [vmem:[#allocation22 + $0x100] sm:$0xff]  ;;  %v14889_v6 = vcombine.high %v4932_v13, %v4940_v23 }
 0x786   :  { %12074 = vmatpush1.bf16.msra.mxu0 %v14824_v62  ;;  %12202 = vmatpush1.bf16.msra.mxu1 %v14888_v11  ;;  %v5035_v62 = vld [vmem:[#allocation22 + $0x3c0] sm:$0xff] }
 0x787   :  { %12076 = vmatprep.subr.bf16.mxu0 %v14825_v35  ;;  %12204 = vmatprep.subr.bf16.mxu1 %v14889_v6  ;;  %v14837_v11 = vcombine.high %v5027_v43, %v5035_v62  ;;  %v5052_v6 = vld [vmem:[#allocation22 + $0x448] sm:$0xff] }
 0x788   :  { %4634 = vmatmul.mubr.f32.gmra.mrb[30].mxu0 %v4461_v7  ;;  %4788 = vmatmul.mubr.f32.gmra.mrb[30].mxu1 %v4461_v7  ;;  %v4955_v7 = vld [vmem:[#allocation22 + $0x140] sm:$0xff] }
 0x857   :  { %v4629_v36 = vpop.f32.mrb[28].mxu0  ;;  %v4783_v16 = vpop.f32.mrb[28].mxu1 }
 0x858   :  { %v14143_v52 = vadd.f32 %v4629_v36, %v4469_v29  ;;  %v4631_v60 = vpop.f32.mrb[29].mxu0  ;;  %v4785_v14 = vpop.f32.mrb[29].mxu1  ;;  %v14147_v26 = vadd.f32 %v4783_v16, %v4477_v12  ;;  %v14827_v36 = vcombine.high %v4947_v57, %v4955_v7 }
 0x859   :  { %v14144_v5 = vadd.f32 %v4631_v60, %v4473_v8  ;;  %v14148_v31 = vadd.f32 %v4785_v14, %v4481_v21  ;;  %v4964_v60 = vld [vmem:[#allocation22 + $0x188] sm:$0xff] }
 0x85a   :  { %v18801_v25 = vadd.f32 %v17553_v30, %v14143_v52  ;;  %v18805_v61 = vadd.f32 %v17555_v49, %v14147_v26  ;;  %v4971_v52 = vld [vmem:[#allocation22 + $0x1c0] sm:$0xff]  ;;  %v4972_v14 = vld [vmem:[#allocation22 + $0x1c8] sm:$0xff]  ;;  %v14828_v26 = vcombine.low %v4947_v57, %v4955_v7  ;;  %v14838_v7 = vcombine.low %v5027_v43, %v5035_v62 }
 0x85b   :  { %v18803_v39 = vadd.f32 %v17554_v56, %v14144_v5  ;;  %v4635_v38 = vpop.f32.mrb[30].mxu0  ;;  %v4789_v27 = vpop.f32.mrb[30].mxu1  ;;  %v18811_v41 = vadd.f32 %v17557_v10, %v14148_v31  ;;  %v14893_v56 = vcombine.high %v4964_v60, %v4972_v14  ;;  %v4979_v31 = vld [vmem:[#allocation22 + $0x200] sm:$0xff]  ;;  %v5004_v10 = vld [vmem:[#allocation22 + $0x2c8] sm:$0xff] }
 0x85c   :  { %v14145_v19 = vadd.f32 %v4635_v38, %v4469_v29  ;;  %v4637_v46 = vpop.f32.mrb[31].mxu0  ;;  %v4791_v2 = vpop.f32.mrb[31].mxu1  ;;  %v14149_v18 = vadd.f32 %v4789_v27, %v4477_v12  ;;  %v4956_v29 = vld [vmem:[#allocation22 + $0x148] sm:$0xff]  ;;  %v14826_v12 = vcombine.low %v4931_v3, %v4939_v58  ;;  %v4987_v38 = vld [vmem:[#allocation22 + $0x240] sm:$0xff] }
 0x85d   :  { %v4804_v9 = vadd.f32 %v18803_v39, %v18801_v25  ;;  %v14146_v20 = vadd.f32 %v4637_v46, %v4473_v8  ;;  %v14150_v48 = vadd.f32 %v4791_v2, %v4481_v21  ;;  %v14890_v8 = vcombine.low %v4932_v13, %v4940_v23  ;;  %v4963_v21 = vld [vmem:[#allocation22 + $0x180] sm:$0xff]  ;;  %v4980_v27 = vld [vmem:[#allocation22 + $0x208] sm:$0xff] }
 0x85e   :  { %v18809_v0 = vadd.f32 %v17556_v24, %v14145_v19  ;;  %v18816_v40 = vadd.f32 %v17559_v53, %v14149_v18  ;;  %v14891_v16 = vcombine.high %v4948_v63, %v4956_v29  ;;  %12078 = vmatpush1.bf16.msra.mxu0 %v14826_v12  ;;  %v14892_v5 = vcombine.low %v4948_v63, %v4956_v29  ;;  %v4988_v19 = vld [vmem:[#allocation22 + $0x248] sm:$0xff]  ;;  %v4995_v18 = vld [vmem:[#allocation22 + $0x280] sm:$0xff] }
 0x85f   :  { %v18813_v32 = vadd.f32 %v17558_v51, %v14146_v20  ;;  %v4805_v54 = vadd.f32 %v4804_v9, %v18805_v61  ;;  %v18821_v4 = vadd.f32 %v17560_v55, %v14150_v48  ;;  %12206 = vmatpush1.bf16.msra.mxu1 %v14890_v8  ;;  %12080 = vmatprep.subr.bf16.mxu0 %v14827_v36  ;;  %v5003_v20 = vld [vmem:[#allocation22 + $0x2c0] sm:$0xff]  ;;  %v4996_v24 = vld [vmem:[#allocation22 + $0x288] sm:$0xff] }
 0x860   :  { %v14829_v30 = vcombine.high %v4963_v21, %v4971_v52  ;;  %12208 = vmatprep.subr.bf16.mxu1 %v14891_v16  ;;  %v14830_v46 = vcombine.low %v4963_v21, %v4971_v52  ;;  %v14894_v2 = vcombine.low %v4964_v60, %v4972_v14  ;;  %v14831_v49 = vcombine.high %v4979_v31, %v4987_v38  ;;  %v5012_v55 = vld [vmem:[#allocation22 + $0x308] sm:$0xff]  ;;  %v5043_v13 = vld [vmem:[#allocation22 + $0x400] sm:$0xff] }
 0x861   :  { %v4809_v59 = vadd.f32 %v18813_v32, %v18809_v0  ;;  %v4806_v15 = vadd.f32 %v4805_v54, %v18811_v41  ;;  %v14895_v9 = vcombine.high %v4980_v27, %v4988_v19  ;;  %v14832_v51 = vcombine.low %v4979_v31, %v4987_v38  ;;  %v5036_v3 = vld [vmem:[#allocation22 + $0x3c8] sm:$0xff]  ;;  %v5051_v23 = vld [vmem:[#allocation22 + $0x440] sm:$0xff] }
 0x862   :  { %12082 = vmatpush1.bf16.msra.mxu0 %v14828_v26  ;;  %v14896_v48 = vcombine.low %v4980_v27, %v4988_v19  ;;  %v14833_v54 = vcombine.high %v4995_v18, %v5003_v20  ;;  %v14897_v53 = vcombine.high %v4996_v24, %v5004_v10  ;;  %v14898_v28 = vcombine.low %v4996_v24, %v5004_v10  ;;  %v5044_v57 = vld [vmem:[#allocation22 + $0x408] sm:$0xff]  ;;  %v5059_v8 = vld [vmem:[#allocation22 + $0x480] sm:$0xff] }
 0x863   :  { %4807 = vadd.xlane.f32.xlu0 %v4806_v15  ;;  %v4810_v33 = vadd.f32 %v4809_v59, %v18816_v40  ;;  %12210 = vmatpush1.bf16.msra.mxu1 %v14892_v5  ;;  %v5011_v59 = vld [vmem:[#allocation22 + $0x300] sm:$0xff]  ;;  %v14901_v35 = vcombine.high %v5028_v1, %v5036_v3  ;;  %v14902_v63 = vcombine.low %v5028_v1, %v5036_v3  ;;  %v5060_v16 = vld [vmem:[#allocation22 + $0x488] sm:$0xff] }
 0x864   :  { %12084 = vmatprep.subr.bf16.mxu0 %v14829_v30  ;;  %12212 = vmatprep.subr.bf16.mxu1 %v14893_v56  ;;  %v5019_v15 = vld [vmem:[#allocation22 + $0x340] sm:$0xff]  ;;  %v14839_v29 = vcombine.high %v5043_v13, %v5051_v23  ;;  %v14903_v12 = vcombine.high %v5044_v57, %v5052_v6  ;;  %v5068_v21 = vld [vmem:[#allocation22 + $0x4c8] sm:$0xff]  ;;  %v14840_v52 = vcombine.low %v5043_v13, %v5051_v23 }
 0x865   :  { %v4811_v17 = vadd.f32 %v4810_v33, %v18821_v4  ;;  %v5020_v33 = vld [vmem:[#allocation22 + $0x348] sm:$0xff]  ;;  %v14835_v50 = vcombine.high %v5011_v59, %v5019_v15  ;;  %v14836_v58 = vcombine.low %v5011_v59, %v5019_v15  ;;  %v5067_v36 = vld [vmem:[#allocation22 + $0x4c0] sm:$0xff]  ;;  %v14904_v60 = vcombine.low %v5044_v57, %v5052_v6 }
 0x866   :  { %12086 = vmatpush1.bf16.msra.mxu0 %v14830_v46  ;;  %v14899_v34 = vcombine.high %v5012_v55, %v5020_v33  ;;  %v14900_v22 = vcombine.low %v5012_v55, %v5020_v33  ;;  %v14841_v14 = vcombine.high %v5059_v8, %v5067_v36  ;;  %v14905_v26 = vcombine.high %v5060_v16, %v5068_v21  ;;  %v5075_v5 = vld [vmem:[#allocation22 + $0x500] sm:$0xff]  ;;  %v5076_v56 = vld [vmem:[#allocation22 + $0x508] sm:$0xff] }
 0x867   :  { %4812 = vadd.xlane.f32.xlu1 %v4811_v17  ;;  %12214 = vmatpush1.bf16.msra.mxu1 %v14894_v2  ;;  %v14834_v17 = vcombine.low %v4995_v18, %v5003_v20  ;;  %v5083_v30 = vld [vmem:[#allocation22 + $0x540] sm:$0xff]  ;;  %v5084_v31 = vld [vmem:[#allocation22 + $0x548] sm:$0xff]  ;;  %v14842_v38 = vcombine.low %v5059_v8, %v5067_v36  ;;  %v14906_v27 = vcombine.low %v5060_v16, %v5068_v21 }
 0x868   :  { %12088 = vmatprep.subr.bf16.mxu0 %v14831_v49  ;;  %12216 = vmatprep.subr.bf16.mxu1 %v14895_v9  ;;  %v14843_v19 = vcombine.high %v5075_v5, %v5083_v30  ;;  %v14907_v46 = vcombine.high %v5076_v56, %v5084_v31  ;;  %v14844_v2 = vcombine.low %v5075_v5, %v5083_v30  ;;  %v5099_v1 = vld [vmem:[#allocation22 + $0x5c0] sm:$0xff]  ;;  %v5092_v3 = vld [vmem:[#allocation22 + $0x588] sm:$0xff] }
 0x869   :  { %v14908_v49 = vcombine.low %v5076_v56, %v5084_v31  ;;  %v5107_v23 = vld [vmem:[#allocation22 + $0x600] sm:$0xff]  ;;  %v5108_v6 = vld [vmem:[#allocation22 + $0x608] sm:$0xff] }
 0x86a   :  { %12090 = vmatpush1.bf16.msra.mxu0 %v14832_v51  ;;  %v5115_v57 = vld [vmem:[#allocation22 + $0x640] sm:$0xff]  ;;  %v5124_v21 = vld [vmem:[#allocation22 + $0x688] sm:$0xff] }
 0x86b   :  { %12218 = vmatpush1.bf16.msra.mxu1 %v14896_v48  ;;  %12092 = vmatprep.subr.bf16.mxu0 %v14833_v54  ;;  %v5123_v36 = vld [vmem:[#allocation22 + $0x680] sm:$0xff] }
 0x86c   :  { %12220 = vmatprep.subr.bf16.mxu1 %v14897_v53  ;;  %v5131_v16 = vld [vmem:[#allocation22 + $0x6c0] sm:$0xff] }
 0x86d   :  { %v5147_v5 = vld [vmem:[#allocation22 + $0x740] sm:$0xff] }
 0x86e   :  { %12094 = vmatpush1.bf16.msra.mxu0 %v14834_v17 }
 0x86f   :  { %12222 = vmatpush1.bf16.msra.mxu1 %v14898_v28  ;;  %12096 = vmatprep.subr.bf16.mxu0 %v14835_v50 }
 0x870   :  { %12224 = vmatprep.subr.bf16.mxu1 %v14899_v34 }
 0x872   :  { %12098 = vmatpush1.bf16.msra.mxu0 %v14836_v58 }
 0x873   :  { %12226 = vmatpush1.bf16.msra.mxu1 %v14900_v22  ;;  %12100 = vmatprep.subr.bf16.mxu0 %v14837_v11  ;;  %v5100_v22 = vld [vmem:[#allocation22 + $0x5c8] sm:$0xff] }
 0x874   :  { %12228 = vmatprep.subr.bf16.mxu1 %v14901_v35  ;;  %v14909_v35 = vcombine.high %v5092_v3, %v5100_v22  ;;  %v14910_v13 = vcombine.low %v5092_v3, %v5100_v22  ;;  %v4803_v22 = vld [vmem:[#allocation20] sm:$0xf] }
 0x876   :  { %12102 = vmatpush1.bf16.msra.mxu0 %v14838_v7  ;;  %v14847_v7 = vcombine.high %v5107_v23, %v5115_v57 }
 0x877   :  { %12230 = vmatpush1.bf16.msra.mxu1 %v14902_v63  ;;  %12104 = vmatprep.subr.bf16.mxu0 %v14839_v29  ;;  %v5116_v63 = vld [vmem:[#allocation22 + $0x648] sm:$0xff]  ;;  %v14848_v29 = vcombine.low %v5107_v23, %v5115_v57  ;;  %v4894_v57 = vrot.slane %v4803_v22, %v18406_v45 }
 0x878   :  { %12232 = vmatprep.subr.bf16.mxu1 %v14903_v12  ;;  %v14911_v12 = vcombine.high %v5108_v6, %v5116_v63  ;;  %v14912_v8 = vcombine.low %v5108_v6, %v5116_v63  ;;  %v4890_v63 = vrot.slane %v4803_v22, %v18400_v42 }
 0x87a   :  { %12106 = vmatpush1.bf16.msra.mxu0 %v14840_v52  ;;  %v14849_v52 = vcombine.high %v5123_v36, %v5131_v16 }
 0x87b   :  { %12234 = vmatpush1.bf16.msra.mxu1 %v14904_v60  ;;  %12108 = vmatprep.subr.bf16.mxu0 %v14841_v14  ;;  %v14850_v60 = vcombine.low %v5123_v36, %v5131_v16  ;;  %v5132_v14 = vld [vmem:[#allocation22 + $0x6c8] sm:$0xff] }
 0x87c   :  { %12236 = vmatprep.subr.bf16.mxu1 %v14905_v26  ;;  %v5139_v26 = vld [vmem:[#allocation22 + $0x700] sm:$0xff]  ;;  %v14913_v30 = vcombine.high %v5124_v21, %v5132_v14  ;;  %v14914_v56 = vcombine.low %v5124_v21, %v5132_v14 }
 0x87d   :  { %v14851_v31 = vcombine.high %v5139_v26, %v5147_v5  ;;  %v5195_v21 = vld [vmem:[#allocation22 + $0x8c0] sm:$0xff] }
 0x87e   :  { %12110 = vmatpush1.bf16.msra.mxu0 %v14842_v38  ;;  %v5140_v38 = vld [vmem:[#allocation22 + $0x708] sm:$0xff] }
 0x87f   :  { %12238 = vmatpush1.bf16.msra.mxu1 %v14906_v27  ;;  %12112 = vmatprep.subr.bf16.mxu0 %v14843_v19  ;;  %v5148_v27 = vld [vmem:[#allocation22 + $0x748] sm:$0xff]  ;;  %v5155_v19 = vld [vmem:[#allocation22 + $0x780] sm:$0xff] }
 0x880   :  { %12240 = vmatprep.subr.bf16.mxu1 %v14907_v46  ;;  %v14915_v46 = vcombine.high %v5140_v38, %v5148_v27 }
 0x882   :  { %12114 = vmatpush1.bf16.msra.mxu0 %v14844_v2  ;;  %v5163_v2 = vld [vmem:[#allocation22 + $0x7c0] sm:$0xff] }
 0x883   :  { %12242 = vmatpush1.bf16.msra.mxu1 %v14908_v49  ;;  %v5156_v49 = vld [vmem:[#allocation22 + $0x788] sm:$0xff] }
 0x884   :  { %12244 = vmatprep.subr.bf16.mxu1 %v14909_v35 }
 0x887   :  { %12246 = vmatpush1.bf16.msra.mxu1 %v14910_v13 }
 0x888   :  { %12248 = vmatprep.subr.bf16.mxu1 %v14911_v12  ;;  %v5187_v12 = vld [vmem:[#allocation22 + $0x880] sm:$0xff] }
 0x88b   :  { %12250 = vmatpush1.bf16.msra.mxu1 %v14912_v8  ;;  %v4898_v8 = vrot.slane %v4803_v22, %v18403_v44 }
 0x88c   :  { %12252 = vmatprep.subr.bf16.mxu1 %v14913_v30 }
 0x88f   :  { %12254 = vmatpush1.bf16.msra.mxu1 %v14914_v56 }
 0x890   :  { %12256 = vmatprep.subr.bf16.mxu1 %v14915_v46 }
 0x8f0   :  { %v4808_v9 = vpop.xlane.xlu0 %4807 }
 0x8f1   :  { %v4815_v18 = vmul.f32 0.001953125, %v4808_v9  ;;  %v5164_v9 = vld [vmem:[#allocation22 + $0x7c8] sm:$0xff] }
 0x8f3   :  { %v18826_v20 = vsub.f32 %v18801_v25, %v4815_v18  ;;  %v18829_v24 = vsub.f32 %v18803_v39, %v4815_v18  ;;  %v18832_v10 = vsub.f32 %v18805_v61, %v4815_v18  ;;  %v18835_v48 = vsub.f32 %v18811_v41, %v4815_v18 }
 0x8f4   :  { %v4813_v51 = vpop.xlane.xlu1 %4812  ;;  %v14852_v18 = vcombine.low %v5139_v26, %v5147_v5 }
 0x8f5   :  { %v4816_v54 = vmul.f32 0.001953125, %v4813_v51  ;;  %v4825_v53 = vmul.f32 %v18826_v20, %v18826_v20  ;;  %v4826_v59 = vmul.f32 %v18829_v24, %v18829_v24  ;;  %v4827_v25 = vmul.f32 %v18832_v10, %v18832_v10 }
 0x8f6   :  { %v4828_v55 = vmul.f32 %v18835_v48, %v18835_v48  ;;  %v14916_v51 = vcombine.low %v5140_v38, %v5148_v27 }
 0x8f7   :  { %v18844_v39 = vsub.f32 %v18809_v0, %v4816_v54  ;;  %v18847_v61 = vsub.f32 %v18813_v32, %v4816_v54  ;;  %v4833_v15 = vadd.f32 %v4826_v59, %v4825_v53  ;;  %v18850_v41 = vsub.f32 %v18816_v40, %v4816_v54 }
 0x8f8   :  { %v18855_v17 = vsub.f32 %v18821_v4, %v4816_v54  ;;  %v5091_v4 = vld [vmem:[#allocation22 + $0x580] sm:$0xff]  ;;  %v14853_v54 = vcombine.high %v5155_v19, %v5163_v2  ;;  %v14917_v53 = vcombine.high %v5156_v49, %v5164_v9  ;;  %v14854_v59 = vcombine.low %v5155_v19, %v5163_v2  ;;  %12258 = vmatpush1.bf16.msra.mxu1 %v14916_v51 }
 0x8f9   :  { %v4834_v33 = vadd.f32 %v4833_v15, %v4827_v25  ;;  %v4829_v28 = vmul.f32 %v18844_v39, %v18844_v39  ;;  %v4830_v0 = vmul.f32 %v18847_v61, %v18847_v61  ;;  %v4831_v32 = vmul.f32 %v18850_v41, %v18850_v41  ;;  %v18865_v15 = vld [vmem:[#allocation22 + $0x800] sm:$0xff] }
 0x8fa   :  { %v4832_v40 = vmul.f32 %v18855_v17, %v18855_v17  ;;  %v14845_v58 = vcombine.high %v5091_v4, %v5099_v1  ;;  %v14846_v11 = vcombine.low %v5091_v4, %v5099_v1  ;;  %v14918_v25 = vcombine.low %v5156_v49, %v5164_v9  ;;  %12260 = vmatprep.subr.bf16.mxu1 %v14917_v53  ;;  %v5211_v9 = vld [vmem:[#allocation22 + $0x940] sm:$0xff] }
 0x8fb   :  { %v4835_v50 = vadd.f32 %v4834_v33, %v4828_v55  ;;  %v4838_v34 = vadd.f32 %v4830_v0, %v4829_v28  ;;  %v5179_v55 = vld [vmem:[#allocation22 + $0x840] sm:$0xff]  ;;  %v5172_v33 = vld [vmem:[#allocation22 + $0x808] sm:$0xff]  ;;  %v18899_v2 = vrot.slane %v4803_v22, %v18409_v47 }
 0x8fc   :  { %12116 = vmatprep.subr.bf16.mxu0 %v14845_v58  ;;  %12262 = vmatpush1.bf16.msra.mxu1 %v14918_v25  ;;  %v14855_v28 = vcombine.high %v18865_v15, %v5179_v55  ;;  %v14856_v0 = vcombine.low %v18865_v15, %v5179_v55  ;;  %v4802_v58 = vld [vmem:[#allocation19] sm:$0xf]  ;;  %v5219_v25 = vld [vmem:[#allocation22 + $0x980] sm:$0xff] }
 0x8fd   :  { %4836 = vadd.xlane.f32.xlu0 %v4835_v50  ;;  %v4839_v43 = vadd.f32 %v4838_v34, %v4831_v32  ;;  %12118 = vmatpush1.bf16.msra.mxu0 %v14846_v11  ;;  %v5180_v50 = vld [vmem:[#allocation22 + $0x848] sm:$0xff]  ;;  %v4865_v11 = vrot.slane %v4802_v58, %v18406_v45  ;;  %v4861_v35 = vrot.slane %v4802_v58, %v18400_v42 }
 0x8fe   :  { %12120 = vmatprep.subr.bf16.mxu0 %v14847_v7  ;;  %v14919_v32 = vcombine.high %v5172_v33, %v5180_v50  ;;  %v14920_v34 = vcombine.low %v5172_v33, %v5180_v50  ;;  %v4869_v13 = vrot.slane %v4802_v58, %v18403_v44  ;;  %v5220_v50 = vld [vmem:[#allocation22 + $0x988] sm:$0xff] }
 0x8ff   :  { %v4840_v62 = vadd.f32 %v4839_v43, %v4832_v40 }
 0x900   :  { %12264 = vmatprep.subr.bf16.mxu1 %v14919_v32 }
 0x901   :  { %4841 = vadd.xlane.f32.xlu0 %v4840_v62  ;;  %12122 = vmatpush1.bf16.msra.mxu0 %v14848_v29 }
 0x902   :  { %12124 = vmatprep.subr.bf16.mxu0 %v14849_v52  ;;  %v5188_v52 = vld [vmem:[#allocation22 + $0x888] sm:$0xff] }
 0x905   :  { %12126 = vmatpush1.bf16.msra.mxu0 %v14850_v60  ;;  %v5196_v60 = vld [vmem:[#allocation22 + $0x8c8] sm:$0xff] }
 0x906   :  { %12128 = vmatprep.subr.bf16.mxu0 %v14851_v31  ;;  %v14857_v31 = vcombine.high %v5187_v12, %v5195_v21  ;;  %v14921_v38 = vcombine.high %v5188_v52, %v5196_v60  ;;  %v14922_v53 = vcombine.low %v5188_v52, %v5196_v60  ;;  %v5276_v52 = vld [vmem:[#allocation22 + $0xb48] sm:$0xff] }
 0x909   :  { %12130 = vmatpush1.bf16.msra.mxu0 %v14852_v18  ;;  %v5204_v18 = vld [vmem:[#allocation22 + $0x908] sm:$0xff] }
 0x90a   :  { %12132 = vmatprep.subr.bf16.mxu0 %v14853_v54 }
 0x90d   :  { %12134 = vmatpush1.bf16.msra.mxu0 %v14854_v59 }
 0x90e   :  { %12136 = vmatprep.subr.bf16.mxu0 %v14855_v28  ;;  %v5227_v28 = vld [vmem:[#allocation22 + $0x9c0] sm:$0xff] }
 0x90f   :  { %v14862_v22 = vcombine.low %v5219_v25, %v5227_v28 }
 0x98a   :  { %v4837_v40 = vpop.xlane.xlu0 %4836 }
 0x98b   :  { %v4843_v43 = vmul.f32 0.001953125, %v4837_v40 }
 0x98d   :  { %v4845_v62 = vadd.f32 1e-05, %v4843_v43  ;;  %v14861_v43 = vcombine.high %v5219_v25, %v5227_v28  ;;  %v5323_v28 = vld [vmem:[#allocation22 + $0xcc0] sm:$0xff] }
 0x98e   :  { %v4842_v4 = vpop.xlane.xlu0 %4841 }
 0x98f   :  { %17534 = vrsqrt.f32 %v4845_v62  ;;  %v4844_v1 = vmul.f32 0.001953125, %v4842_v4  ;;  %v5235_v4 = vld [vmem:[#allocation22 + $0xa00] sm:$0xff] }
 0x991   :  { %v4846_v3 = vadd.f32 1e-05, %v4844_v1  ;;  %v5243_v1 = vld [vmem:[#allocation22 + $0xa40] sm:$0xff] }
 0x993   :  { %17536 = vrsqrt.f32 %v4846_v3  ;;  %v5236_v3 = vld [vmem:[#allocation22 + $0xa08] sm:$0xff] }
 0x999   :  { %v17535_v23 = vpop.eup %17534 }
 0x99a   :  { %v4850_v6 = vmul.f32 %v17535_v23, %v18829_v24  ;;  %v4849_v7 = vmul.f32 %v17535_v23, %v18826_v20  ;;  %v4851_v29 = vmul.f32 %v17535_v23, %v18832_v10  ;;  %v4852_v5 = vmul.f32 %v17535_v23, %v18835_v48  ;;  %v5251_v23 = vld [vmem:[#allocation22 + $0xa80] sm:$0xff] }
 0x99b   :  { %v18882_v24 = vrot.slane %v4802_v58, %v18409_v47  ;;  %v5244_v58 = vld [vmem:[#allocation22 + $0xa48] sm:$0xff] }
 0x99c   :  { %v4879_v36 = vmul.f32 %v4865_v11, %v4850_v6  ;;  %v4878_v16 = vmul.f32 %v4861_v35, %v4849_v7  ;;  %v4880_v14 = vmul.f32 %v4869_v13, %v4851_v29  ;;  %v5252_v6 = vld [vmem:[#allocation22 + $0xa88] sm:$0xff]  ;;  %v14928_v29 = vcombine.low %v5236_v3, %v5244_v58 }
 0x99d   :  { %v18878_v26 = vpop.eup %17536  ;;  %v4881_v49 = vmul.f32 %v18882_v24, %v4852_v5  ;;  %v5260_v7 = vld [vmem:[#allocation22 + $0xac8] sm:$0xff] }
 0x99e   :  { %v18884_v20 = vadd.f32 %v4894_v57, %v4879_v36  ;;  %v18886_v30 = vadd.f32 %v4890_v63, %v4878_v16  ;;  %v4854_v10 = vmul.f32 %v18878_v26, %v18847_v61  ;;  %v4853_v56 = vmul.f32 %v18878_v26, %v18844_v39  ;;  %v5203_v61 = vld [vmem:[#allocation22 + $0x900] sm:$0xff] }
 0x99f   :  { %v18892_v27 = vadd.f32 %v4898_v8, %v4880_v14  ;;  %v4855_v48 = vmul.f32 %v18878_v26, %v18850_v41  ;;  %v14858_v39 = vcombine.low %v5187_v12, %v5195_v21  ;;  %v5212_v41 = vld [vmem:[#allocation22 + $0x948] sm:$0xff]  ;;  %v14859_v55 = vcombine.high %v5203_v61, %v5211_v9  ;;  %v5267_v36 = vld [vmem:[#allocation22 + $0xb00] sm:$0xff] }
 0x9a0   :  { %8135 = vmatprep.mubr.f32.mxu0 %v18884_v20  ;;  %8289 = vmatprep.mubr.f32.mxu1 %v18884_v20  ;;  %v4883_v19 = vmul.f32 %v4865_v11, %v4854_v10  ;;  %v4882_v46 = vmul.f32 %v4861_v35, %v4853_v56  ;;  %v14923_v33 = vcombine.high %v5204_v18, %v5212_v41  ;;  %v5275_v16 = vld [vmem:[#allocation22 + $0xb40] sm:$0xff]  ;;  %v5268_v21 = vld [vmem:[#allocation22 + $0xb08] sm:$0xff] }
 0x9a1   :  { %8136 = vmatmul.mubr.f32.vlgmr.msra.gmra.mrb[32].mxu0 %v18886_v30  ;;  %8290 = vmatmul.mubr.f32.vlgmr.msra.gmra.mrb[32].mxu1 %v18886_v30  ;;  %v4884_v51 = vmul.f32 %v4869_v13, %v4855_v48  ;;  %v18915_v32 = vadd.f32 %v18899_v2, %v4881_v49  ;;  %v14924_v40 = vcombine.low %v5204_v18, %v5212_v41  ;;  %v5283_v56 = vld [vmem:[#allocation22 + $0xb80] sm:$0xff]  ;;  %v5292_v48 = vld [vmem:[#allocation22 + $0xbc8] sm:$0xff] }
 0x9a2   :  { %12138 = vmatpush1.bf16.msra.mxu0 %v14856_v0  ;;  %12266 = vmatpush1.bf16.msra.mxu1 %v14920_v34  ;;  %v18904_v54 = vadd.f32 %v4894_v57, %v4883_v19  ;;  %v18906_v59 = vadd.f32 %v4890_v63, %v4882_v46  ;;  %v5228_v0 = vld [vmem:[#allocation22 + $0x9c8] sm:$0xff]  ;;  %v14860_v34 = vcombine.low %v5203_v61, %v5211_v9  ;;  %v5259_v57 = vld [vmem:[#allocation22 + $0xac0] sm:$0xff] }
 0x9a3   :  { %12140 = vmatprep.subr.bf16.mxu0 %v14857_v31  ;;  %12268 = vmatprep.subr.bf16.mxu1 %v14921_v38  ;;  %v18908_v15 = vadd.f32 %v4898_v8, %v4884_v51  ;;  %v14925_v62 = vcombine.high %v5220_v50, %v5228_v0  ;;  %v14926_v11 = vcombine.low %v5220_v50, %v5228_v0  ;;  %v5291_v31 = vld [vmem:[#allocation22 + $0xbc0] sm:$0xff]  ;;  %v5284_v38 = vld [vmem:[#allocation22 + $0xb88] sm:$0xff] }
 0x9a4   :  { %8141 = vmatprep.mubr.f32.mxu0 %v18904_v54  ;;  %8295 = vmatprep.mubr.f32.mxu1 %v18904_v54  ;;  %v14863_v35 = vcombine.high %v5235_v4, %v5243_v1  ;;  %v14927_v13 = vcombine.high %v5236_v3, %v5244_v58  ;;  %v14864_v63 = vcombine.low %v5235_v4, %v5243_v1  ;;  %v5299_v49 = vld [vmem:[#allocation22 + $0xc00] sm:$0xff]  ;;  %v5300_v18 = vld [vmem:[#allocation22 + $0xc08] sm:$0xff] }
 0x9a5   :  { %8142 = vmatmul.mubr.f32.gmra.mrb[34].mxu0 %v18906_v59  ;;  %8296 = vmatmul.mubr.f32.gmra.mrb[34].mxu1 %v18906_v59  ;;  %v14865_v12 = vcombine.high %v5251_v23, %v5259_v57  ;;  %v14929_v8 = vcombine.high %v5252_v6, %v5260_v7  ;;  %v14866_v60 = vcombine.low %v5251_v23, %v5259_v57  ;;  %v5307_v9 = vld [vmem:[#allocation22 + $0xc40] sm:$0xff]  ;;  %v5308_v41 = vld [vmem:[#allocation22 + $0xc48] sm:$0xff] }
 0x9a6   :  { %12142 = vmatpush1.bf16.msra.mxu0 %v14858_v39  ;;  %12270 = vmatpush1.bf16.msra.mxu1 %v14922_v53  ;;  %v14930_v14 = vcombine.low %v5252_v6, %v5260_v7  ;;  %v14867_v5 = vcombine.high %v5267_v36, %v5275_v16  ;;  %v14931_v10 = vcombine.high %v5268_v21, %v5276_v52  ;;  %v5316_v50 = vld [vmem:[#allocation22 + $0xc88] sm:$0xff]  ;;  %v5331_v4 = vld [vmem:[#allocation22 + $0xd00] sm:$0xff] }
 0x9a7   :  { %8212 = vmatprep.mubr.f32.mxu0 %v18915_v32  ;;  %8366 = vmatprep.mubr.f32.mxu1 %v18915_v32  ;;  %v14868_v19 = vcombine.low %v5267_v36, %v5275_v16  ;;  %v14932_v46 = vcombine.low %v5268_v21, %v5276_v52  ;;  %v14869_v61 = vcombine.high %v5283_v56, %v5291_v31  ;;  %v5324_v0 = vld [vmem:[#allocation22 + $0xcc8] sm:$0xff]  ;;  %v5339_v1 = vld [vmem:[#allocation22 + $0xd40] sm:$0xff] }
 0x9a8   :  { %12144 = vmatprep.subr.bf16.mxu0 %v14859_v55  ;;  %12272 = vmatprep.subr.bf16.mxu1 %v14923_v33  ;;  %v14933_v39 = vcombine.high %v5284_v38, %v5292_v48  ;;  %v14870_v51 = vcombine.low %v5283_v56, %v5291_v31  ;;  %v14934_v53 = vcombine.low %v5284_v38, %v5292_v48  ;;  %v5315_v33 = vld [vmem:[#allocation22 + $0xc80] sm:$0xff]  ;;  %v5332_v3 = vld [vmem:[#allocation22 + $0xd08] sm:$0xff] }
 0x9a9   :  { %v14871_v25 = vcombine.high %v5299_v49, %v5307_v9  ;;  %v14935_v55 = vcombine.high %v5300_v18, %v5308_v41  ;;  %v5340_v58 = vld [vmem:[#allocation22 + $0xd48] sm:$0xff]  ;;  %v5347_v23 = vld [vmem:[#allocation22 + $0xd80] sm:$0xff] }
 0x9aa   :  { %12146 = vmatpush1.bf16.msra.mxu0 %v14860_v34  ;;  %12274 = vmatpush1.bf16.msra.mxu1 %v14924_v40  ;;  %v14872_v34 = vcombine.low %v5299_v49, %v5307_v9  ;;  %v14936_v40 = vcombine.low %v5300_v18, %v5308_v41  ;;  %v5355_v57 = vld [vmem:[#allocation22 + $0xdc0] sm:$0xff]  ;;  %v5348_v6 = vld [vmem:[#allocation22 + $0xd88] sm:$0xff] }
 0x9ab   :  { %12148 = vmatprep.subr.bf16.mxu0 %v14861_v43  ;;  %12276 = vmatprep.subr.bf16.mxu1 %v14925_v62  ;;  %v14873_v43 = vcombine.high %v5315_v33, %v5323_v28  ;;  %v14937_v62 = vcombine.high %v5316_v50, %v5324_v0  ;;  %v5356_v7 = vld [vmem:[#allocation22 + $0xdc8] sm:$0xff]  ;;  %v5363_v36 = vld [vmem:[#allocation22 + $0xe00] sm:$0xff] }
 0x9ac   :  { %v5371_v16 = vld [vmem:[#allocation22 + $0xe40] sm:$0xff]  ;;  %v5364_v21 = vld [vmem:[#allocation22 + $0xe08] sm:$0xff] }
 0x9ad   :  { %v5372_v52 = vld [vmem:[#allocation22 + $0xe48] sm:$0xff]  ;;  %v5379_v56 = vld [vmem:[#allocation22 + $0xe80] sm:$0xff] }
 0x9ae   :  { %12150 = vmatpush1.bf16.msra.mxu0 %v14862_v22  ;;  %12278 = vmatpush1.bf16.msra.mxu1 %v14926_v11  ;;  %v14874_v22 = vcombine.low %v5315_v33, %v5323_v28  ;;  %v14938_v11 = vcombine.low %v5316_v50, %v5324_v0  ;;  %v5387_v31 = vld [vmem:[#allocation22 + $0xec0] sm:$0xff]  ;;  %v5380_v38 = vld [vmem:[#allocation22 + $0xe88] sm:$0xff] }
 0x9af   :  { %12152 = vmatprep.subr.bf16.mxu0 %v14863_v35  ;;  %12280 = vmatprep.subr.bf16.mxu1 %v14927_v13  ;;  %v14875_v35 = vcombine.high %v5331_v4, %v5339_v1  ;;  %v14939_v13 = vcombine.high %v5332_v3, %v5340_v58  ;;  %v5388_v48 = vld [vmem:[#allocation22 + $0xec8] sm:$0xff]  ;;  %v5395_v49 = vld [vmem:[#allocation22 + $0xf00] sm:$0xff] }
 0x9b0   :  { %v5403_v9 = vld [vmem:[#allocation22 + $0xf40] sm:$0xff]  ;;  %v5396_v18 = vld [vmem:[#allocation22 + $0xf08] sm:$0xff] }
 0x9b1   :  { %v5404_v41 = vld [vmem:[#allocation22 + $0xf48] sm:$0xff]  ;;  %v5411_v33 = vld [vmem:[#allocation22 + $0xf80] sm:$0xff] }
 0x9b2   :  { %12154 = vmatpush1.bf16.msra.mxu0 %v14864_v63  ;;  %12282 = vmatpush1.bf16.msra.mxu1 %v14928_v29  ;;  %v14876_v63 = vcombine.low %v5331_v4, %v5339_v1  ;;  %v14940_v29 = vcombine.low %v5332_v3, %v5340_v58  ;;  %v5419_v28 = vld [vmem:[#allocation22 + $0xfc0] sm:$0xff]  ;;  %v5412_v50 = vld [vmem:[#allocation22 + $0xf88] sm:$0xff]  ;;  %v4917_v4 = vld [vmem:[#allocation22 + $0x10] sm:$0xff] }
 0x9b3   :  { %12156 = vmatprep.subr.bf16.mxu0 %v14865_v12  ;;  %12284 = vmatprep.subr.bf16.mxu1 %v14929_v8  ;;  %v14877_v12 = vcombine.high %v5347_v23, %v5355_v57  ;;  %v14941_v8 = vcombine.high %v5348_v6, %v5356_v7  ;;  %v5420_v0 = vld [vmem:[#allocation22 + $0xfc8] sm:$0xff]  ;;  %v4925_v1 = vld [vmem:[#allocation22 + $0x50] sm:$0xff]  ;;  %v4918_v3 = vld [vmem:[#allocation22 + $0x18] sm:$0xff] }
 0x9b4   :  { %v4926_v58 = vld [vmem:[#allocation22 + $0x58] sm:$0xff] }
 0x9b6   :  { %12158 = vmatpush1.bf16.msra.mxu0 %v14866_v60  ;;  %12286 = vmatpush1.bf16.msra.mxu1 %v14930_v14  ;;  %v14878_v60 = vcombine.low %v5347_v23, %v5355_v57  ;;  %v14942_v14 = vcombine.low %v5348_v6, %v5356_v7  ;;  %v15015_v23 = vcombine.high %v4918_v3, %v4926_v58  ;;  %v4933_v6 = vld [vmem:[#allocation22 + $0x90] sm:$0xff] }
 0x9b7   :  { %12160 = vmatprep.subr.bf16.mxu0 %v14867_v5  ;;  %12288 = vmatprep.subr.bf16.mxu1 %v14931_v10  ;;  %v14879_v5 = vcombine.high %v5363_v36, %v5371_v16  ;;  %v14943_v10 = vcombine.high %v5364_v21, %v5372_v52  ;;  %v4941_v7 = vld [vmem:[#allocation22 + $0xd0] sm:$0xff] }
 0x9ba   :  { %12162 = vmatpush1.bf16.msra.mxu0 %v14868_v19  ;;  %12290 = vmatpush1.bf16.msra.mxu1 %v14932_v46  ;;  %v14880_v19 = vcombine.low %v5363_v36, %v5371_v16  ;;  %v14944_v46 = vcombine.low %v5364_v21, %v5372_v52  ;;  %v4949_v16 = vld [vmem:[#allocation22 + $0x110] sm:$0xff]  ;;  %v4950_v21 = vld [vmem:[#allocation22 + $0x118] sm:$0xff] }
 0x9bb   :  { %12164 = vmatprep.subr.bf16.mxu0 %v14869_v61  ;;  %12292 = vmatprep.subr.bf16.mxu1 %v14933_v39  ;;  %v14881_v61 = vcombine.high %v5379_v56, %v5387_v31  ;;  %v14945_v39 = vcombine.high %v5380_v38, %v5388_v48  ;;  %v4958_v52 = vld [vmem:[#allocation22 + $0x158] sm:$0xff] }
 0x9be   :  { %12166 = vmatpush1.bf16.msra.mxu0 %v14870_v51  ;;  %12294 = vmatpush1.bf16.msra.mxu1 %v14934_v53  ;;  %v14882_v51 = vcombine.low %v5379_v56, %v5387_v31  ;;  %v14946_v53 = vcombine.low %v5380_v38, %v5388_v48  ;;  %v4973_v56 = vld [vmem:[#allocation22 + $0x1d0] sm:$0xff]  ;;  %v4966_v31 = vld [vmem:[#allocation22 + $0x198] sm:$0xff] }
 0x9bf   :  { %12168 = vmatprep.subr.bf16.mxu0 %v14871_v25  ;;  %12296 = vmatprep.subr.bf16.mxu1 %v14935_v55  ;;  %v14883_v25 = vcombine.high %v5395_v49, %v5403_v9  ;;  %v14947_v55 = vcombine.high %v5396_v18, %v5404_v41  ;;  %v4974_v38 = vld [vmem:[#allocation22 + $0x1d8] sm:$0xff] }
 0x9c2   :  { %12170 = vmatpush1.bf16.msra.mxu0 %v14872_v34  ;;  %12298 = vmatpush1.bf16.msra.mxu1 %v14936_v40  ;;  %v14884_v34 = vcombine.low %v5395_v49, %v5403_v9  ;;  %v14948_v40 = vcombine.low %v5396_v18, %v5404_v41  ;;  %v4989_v49 = vld [vmem:[#allocation22 + $0x250] sm:$0xff]  ;;  %v4982_v9 = vld [vmem:[#allocation22 + $0x218] sm:$0xff] }
 0x9c3   :  { %12172 = vmatprep.subr.bf16.mxu0 %v14873_v43  ;;  %12300 = vmatprep.subr.bf16.mxu1 %v14937_v62  ;;  %v14885_v43 = vcombine.high %v5411_v33, %v5419_v28  ;;  %v14949_v62 = vcombine.high %v5412_v50, %v5420_v0  ;;  %v4990_v18 = vld [vmem:[#allocation22 + $0x258] sm:$0xff] }
 0x9c6   :  { %12174 = vmatpush1.bf16.msra.mxu0 %v14874_v22  ;;  %12302 = vmatpush1.bf16.msra.mxu1 %v14938_v11  ;;  %v4856_v22 = vmul.f32 %v18878_v26, %v18855_v17  ;;  %v14886_v11 = vcombine.low %v5411_v33, %v5419_v28  ;;  %v15016_v17 = vcombine.low %v4918_v3, %v4926_v58  ;;  %v5005_v33 = vld [vmem:[#allocation22 + $0x2d0] sm:$0xff]  ;;  %v4998_v28 = vld [vmem:[#allocation22 + $0x298] sm:$0xff] }
 0x9c7   :  { %12176 = vmatprep.subr.bf16.mxu0 %v14875_v35  ;;  %12304 = vmatprep.subr.bf16.mxu1 %v14939_v13  ;;  %v14950_v35 = vcombine.low %v5412_v50, %v5420_v0  ;;  %v14951_v13 = vcombine.high %v4917_v4, %v4925_v1  ;;  %v5006_v50 = vld [vmem:[#allocation22 + $0x2d8] sm:$0xff] }
 0x9c8   :  { %v4885_v57 = vmul.f32 %v18882_v24, %v4856_v22  ;;  %v4957_v24 = vld [vmem:[#allocation22 + $0x150] sm:$0xff]  ;;  %v5022_v3 = vld [vmem:[#allocation22 + $0x358] sm:$0xff]  ;;  %v15026_v22 = vcombine.low %v4998_v28, %v5006_v50 }
 0x9c9   :  { %v14956_v48 = vcombine.low %v4949_v16, %v4957_v24 }
 0x9ca   :  { %12178 = vmatpush1.bf16.msra.mxu0 %v14876_v63  ;;  %12306 = vmatpush1.bf16.msra.mxu1 %v14940_v29  ;;  %v4934_v63 = vld [vmem:[#allocation22 + $0x98] sm:$0xff]  ;;  %v18923_v26 = vadd.f32 %v18899_v2, %v4885_v57  ;;  %v14955_v2 = vcombine.high %v4949_v16, %v4957_v24 }
 0x9cb   :  { %12180 = vmatprep.subr.bf16.mxu0 %v14877_v12  ;;  %12308 = vmatprep.subr.bf16.mxu1 %v14941_v8  ;;  %v4942_v29 = vld [vmem:[#allocation22 + $0xd8] sm:$0xff]  ;;  %v14952_v12 = vcombine.low %v4917_v4, %v4925_v1  ;;  %v14953_v8 = vcombine.high %v4933_v6, %v4941_v7  ;;  %v5021_v4 = vld [vmem:[#allocation22 + $0x350] sm:$0xff] }
 0x9cc   :  { %v15017_v36 = vcombine.high %v4934_v63, %v4942_v29  ;;  %v5014_v1 = vld [vmem:[#allocation22 + $0x318] sm:$0xff] }
 0x9cd   :  { %v5030_v57 = vld [vmem:[#allocation22 + $0x398] sm:$0xff] }
 0x9ce   :  { %12182 = vmatpush1.bf16.msra.mxu0 %v14878_v60  ;;  %12310 = vmatpush1.bf16.msra.mxu1 %v14942_v14  ;;  %v14954_v60 = vcombine.low %v4933_v6, %v4941_v7  ;;  %v15018_v14 = vcombine.low %v4934_v63, %v4942_v29  ;;  %v5038_v6 = vld [vmem:[#allocation22 + $0x3d8] sm:$0xff]  ;;  %v15028_v63 = vcombine.low %v5014_v1, %v5022_v3 }
 0x9cf   :  { %12184 = vmatprep.subr.bf16.mxu0 %v14879_v5  ;;  %12312 = vmatprep.subr.bf16.mxu1 %v14943_v10  ;;  %v15019_v5 = vcombine.high %v4950_v21, %v4958_v52  ;;  %v4965_v10 = vld [vmem:[#allocation22 + $0x190] sm:$0xff]  ;;  %v5054_v16 = vld [vmem:[#allocation22 + $0x458] sm:$0xff] }
 0x9d0   :  { %v14958_v41 = vcombine.low %v4965_v10, %v4973_v56 }
 0x9d2   :  { %12186 = vmatpush1.bf16.msra.mxu0 %v14880_v19  ;;  %12314 = vmatpush1.bf16.msra.mxu1 %v14944_v46  ;;  %v15020_v19 = vcombine.low %v4950_v21, %v4958_v52  ;;  %v14957_v46 = vcombine.high %v4965_v10, %v4973_v56  ;;  %v15030_v21 = vcombine.low %v5030_v57, %v5038_v6  ;;  %v5070_v10 = vld [vmem:[#allocation22 + $0x4d8] sm:$0xff] }
 0x9d3   :  { %12188 = vmatprep.subr.bf16.mxu0 %v14881_v61  ;;  %12316 = vmatprep.subr.bf16.mxu1 %v14945_v39  ;;  %v15021_v61 = vcombine.high %v4966_v31, %v4974_v38  ;;  %v4981_v39 = vld [vmem:[#allocation22 + $0x210] sm:$0xff] }
 0x9d4   :  { %v14960_v0 = vcombine.low %v4981_v39, %v4989_v49 }
 0x9d6   :  { %12190 = vmatpush1.bf16.msra.mxu0 %v14882_v51  ;;  %12318 = vmatpush1.bf16.msra.mxu1 %v14946_v53  ;;  %v15022_v51 = vcombine.low %v4966_v31, %v4974_v38  ;;  %v14959_v53 = vcombine.high %v4981_v39, %v4989_v49  ;;  %v5086_v39 = vld [vmem:[#allocation22 + $0x558] sm:$0xff] }
 0x9d7   :  { %12192 = vmatprep.subr.bf16.mxu0 %v14883_v25  ;;  %12320 = vmatprep.subr.bf16.mxu1 %v14947_v55  ;;  %v15023_v25 = vcombine.high %v4982_v9, %v4990_v18  ;;  %v4997_v55 = vld [vmem:[#allocation22 + $0x290] sm:$0xff] }
 0x9d8   :  { %v14962_v58 = vcombine.low %v4997_v55, %v5005_v33 }
 0x9da   :  { %12194 = vmatpush1.bf16.msra.mxu0 %v14884_v34  ;;  %12322 = vmatpush1.bf16.msra.mxu1 %v14948_v40  ;;  %v15024_v34 = vcombine.low %v4982_v9, %v4990_v18  ;;  %v14961_v40 = vcombine.high %v4997_v55, %v5005_v33  ;;  %v5102_v55 = vld [vmem:[#allocation22 + $0x5d8] sm:$0xff] }
 0x9db   :  { %12196 = vmatprep.subr.bf16.mxu0 %v14885_v43  ;;  %12324 = vmatprep.subr.bf16.mxu1 %v14949_v62  ;;  %v15025_v43 = vcombine.high %v4998_v28, %v5006_v50  ;;  %v5013_v62 = vld [vmem:[#allocation22 + $0x310] sm:$0xff] }
 0x9dc   :  { %v14964_v7 = vcombine.low %v5013_v62, %v5021_v4 }
 0x9de   :  { %12198 = vmatpush1.bf16.msra.mxu0 %v14886_v11  ;;  %12326 = vmatpush1.bf16.msra.mxu1 %v14950_v35  ;;  %v14963_v11 = vcombine.high %v5013_v62, %v5021_v4  ;;  %v15027_v35 = vcombine.high %v5014_v1, %v5022_v3  ;;  %v5118_v62 = vld [vmem:[#allocation22 + $0x658] sm:$0xff] }
 0x9df   :  { %12328 = vmatprep.subr.bf16.mxu0 %v14951_v13  ;;  %12456 = vmatprep.subr.bf16.mxu1 %v15015_v23  ;;  %v5029_v13 = vld [vmem:[#allocation22 + $0x390] sm:$0xff] }
 0x9e0   :  { %v5037_v23 = vld [vmem:[#allocation22 + $0x3d0] sm:$0xff] }
 0x9e1   :  { %8213 = vmatmul.mubr.f32.vlgmr.msra.gmra.mrb[32].mxu0 %v18892_v27  ;;  %8367 = vmatmul.mubr.f32.vlgmr.msra.gmra.mrb[32].mxu1 %v18892_v27  ;;  %v14965_v29 = vcombine.high %v5029_v13, %v5037_v23  ;;  %v14966_v24 = vcombine.low %v5029_v13, %v5037_v23  ;;  %v5134_v13 = vld [vmem:[#allocation22 + $0x6d8] sm:$0xff] }
 0x9e2   :  { %8218 = vmatprep.mubr.f32.mxu0 %v18923_v26  ;;  %8372 = vmatprep.mubr.f32.mxu1 %v18923_v26 }
 0x9e3   :  { %12330 = vmatpush1.bf16.msra.mxu0 %v14952_v12  ;;  %12458 = vmatpush1.bf16.msra.mxu1 %v15016_v17  ;;  %v15029_v12 = vcombine.high %v5030_v57, %v5038_v6  ;;  %v5045_v17 = vld [vmem:[#allocation22 + $0x410] sm:$0xff] }
 0x9e4   :  { %12332 = vmatprep.subr.bf16.mxu0 %v14953_v8  ;;  %12460 = vmatprep.subr.bf16.mxu1 %v15017_v36  ;;  %v5053_v8 = vld [vmem:[#allocation22 + $0x450] sm:$0xff]  ;;  %v5046_v36 = vld [vmem:[#allocation22 + $0x418] sm:$0xff] }
 0x9e5   :  { %8219 = vmatmul.mubr.f32.gmra.mrb[34].mxu0 %v18908_v15  ;;  %8373 = vmatmul.mubr.f32.gmra.mrb[34].mxu1 %v18908_v15  ;;  %v14967_v52 = vcombine.high %v5045_v17, %v5053_v8  ;;  %v14968_v56 = vcombine.low %v5045_v17, %v5053_v8  ;;  %v15032_v31 = vcombine.low %v5046_v36, %v5054_v16  ;;  %v5150_v17 = vld [vmem:[#allocation22 + $0x758] sm:$0xff] }
 0x9e6   :  { %8443 = vmatprep.mubr.f32.mxu0 %v18884_v20  ;;  %8597 = vmatprep.mubr.f32.mxu1 %v18884_v20 }
 0x9e7   :  { %12334 = vmatpush1.bf16.msra.mxu0 %v14954_v60  ;;  %12462 = vmatpush1.bf16.msra.mxu1 %v15018_v14  ;;  %v15031_v60 = vcombine.high %v5046_v36, %v5054_v16  ;;  %v5061_v14 = vld [vmem:[#allocation22 + $0x490] sm:$0xff] }
 0x9e8   :  { %12336 = vmatprep.subr.bf16.mxu0 %v14955_v2  ;;  %12464 = vmatprep.subr.bf16.mxu1 %v15019_v5  ;;  %v5069_v2 = vld [vmem:[#allocation22 + $0x4d0] sm:$0xff]  ;;  %v5062_v5 = vld [vmem:[#allocation22 + $0x498] sm:$0xff] }
 0x9e9   :  { %v14969_v38 = vcombine.high %v5061_v14, %v5069_v2  ;;  %v14970_v49 = vcombine.low %v5061_v14, %v5069_v2  ;;  %v15034_v9 = vcombine.low %v5062_v5, %v5070_v10  ;;  %v5166_v14 = vld [vmem:[#allocation22 + $0x7d8] sm:$0xff] }
 0x9eb   :  { %12338 = vmatpush1.bf16.msra.mxu0 %v14956_v48  ;;  %12466 = vmatpush1.bf16.msra.mxu1 %v15020_v19  ;;  %v15033_v48 = vcombine.high %v5062_v5, %v5070_v10  ;;  %v5077_v19 = vld [vmem:[#allocation22 + $0x510] sm:$0xff] }
 0x9ec   :  { %12340 = vmatprep.subr.bf16.mxu0 %v14957_v46  ;;  %12468 = vmatprep.subr.bf16.mxu1 %v15021_v61  ;;  %v5085_v46 = vld [vmem:[#allocation22 + $0x550] sm:$0xff]  ;;  %v5078_v61 = vld [vmem:[#allocation22 + $0x518] sm:$0xff] }
 0x9ed   :  { %v14971_v18 = vcombine.high %v5077_v19, %v5085_v46  ;;  %v14972_v33 = vcombine.low %v5077_v19, %v5085_v46  ;;  %v15036_v28 = vcombine.low %v5078_v61, %v5086_v39  ;;  %v5182_v19 = vld [vmem:[#allocation22 + $0x858] sm:$0xff] }
 0x9ef   :  { %12342 = vmatpush1.bf16.msra.mxu0 %v14958_v41  ;;  %12470 = vmatpush1.bf16.msra.mxu1 %v15022_v51  ;;  %v15035_v41 = vcombine.high %v5078_v61, %v5086_v39  ;;  %v5093_v51 = vld [vmem:[#allocation22 + $0x590] sm:$0xff] }
 0x9f0   :  { %12344 = vmatprep.subr.bf16.mxu0 %v14959_v53  ;;  %12472 = vmatprep.subr.bf16.mxu1 %v15023_v25  ;;  %v5101_v53 = vld [vmem:[#allocation22 + $0x5d0] sm:$0xff]  ;;  %v5094_v25 = vld [vmem:[#allocation22 + $0x598] sm:$0xff] }
 0x9f1   :  { %v14973_v50 = vcombine.high %v5093_v51, %v5101_v53  ;;  %v14974_v4 = vcombine.low %v5093_v51, %v5101_v53  ;;  %v15038_v1 = vcombine.low %v5094_v25, %v5102_v55  ;;  %v5198_v51 = vld [vmem:[#allocation22 + $0x8d8] sm:$0xff] }
 0x9f3   :  { %12346 = vmatpush1.bf16.msra.mxu0 %v14960_v0  ;;  %12474 = vmatpush1.bf16.msra.mxu1 %v15024_v34  ;;  %v15037_v0 = vcombine.high %v5094_v25, %v5102_v55  ;;  %v5109_v34 = vld [vmem:[#allocation22 + $0x610] sm:$0xff] }
 0x9f4   :  { %12348 = vmatprep.subr.bf16.mxu0 %v14961_v40  ;;  %12476 = vmatprep.subr.bf16.mxu1 %v15025_v43  ;;  %v5117_v40 = vld [vmem:[#allocation22 + $0x650] sm:$0xff]  ;;  %v5110_v43 = vld [vmem:[#allocation22 + $0x618] sm:$0xff] }
 0x9f5   :  { %v14975_v3 = vcombine.high %v5109_v34, %v5117_v40  ;;  %v14976_v23 = vcombine.low %v5109_v34, %v5117_v40  ;;  %v15040_v57 = vcombine.low %v5110_v43, %v5118_v62  ;;  %v5214_v34 = vld [vmem:[#allocation22 + $0x958] sm:$0xff] }
 0x9f7   :  { %12350 = vmatpush1.bf16.msra.mxu0 %v14962_v58  ;;  %12478 = vmatpush1.bf16.msra.mxu1 %v15026_v22  ;;  %v15039_v58 = vcombine.high %v5110_v43, %v5118_v62  ;;  %v5125_v22 = vld [vmem:[#allocation22 + $0x690] sm:$0xff] }
 0x9f8   :  { %12352 = vmatprep.subr.bf16.mxu0 %v14963_v11  ;;  %12480 = vmatprep.subr.bf16.mxu1 %v15027_v35  ;;  %v5133_v11 = vld [vmem:[#allocation22 + $0x6d0] sm:$0xff]  ;;  %v5126_v35 = vld [vmem:[#allocation22 + $0x698] sm:$0xff] }
 0x9f9   :  { %v14977_v6 = vcombine.high %v5125_v22, %v5133_v11  ;;  %v14978_v8 = vcombine.low %v5125_v22, %v5133_v11  ;;  %v15042_v36 = vcombine.low %v5126_v35, %v5134_v13  ;;  %v5230_v22 = vld [vmem:[#allocation22 + $0x9d8] sm:$0xff] }
 0x9fb   :  { %12354 = vmatpush1.bf16.msra.mxu0 %v14964_v7  ;;  %12482 = vmatpush1.bf16.msra.mxu1 %v15028_v63  ;;  %v15041_v7 = vcombine.high %v5126_v35, %v5134_v13  ;;  %v5141_v63 = vld [vmem:[#allocation22 + $0x710] sm:$0xff] }
 0x9fc   :  { %12356 = vmatprep.subr.bf16.mxu0 %v14965_v29  ;;  %12484 = vmatprep.subr.bf16.mxu1 %v15029_v12  ;;  %v5149_v29 = vld [vmem:[#allocation22 + $0x750] sm:$0xff]  ;;  %v5142_v12 = vld [vmem:[#allocation22 + $0x718] sm:$0xff] }
 0x9fd   :  { %v14979_v16 = vcombine.high %v5141_v63, %v5149_v29  ;;  %v14980_v2 = vcombine.low %v5141_v63, %v5149_v29  ;;  %v15044_v5 = vcombine.low %v5142_v12, %v5150_v17  ;;  %v5246_v63 = vld [vmem:[#allocation22 + $0xa58] sm:$0xff] }
 0x9ff   :  { %12358 = vmatpush1.bf16.msra.mxu0 %v14966_v24  ;;  %12486 = vmatpush1.bf16.msra.mxu1 %v15030_v21  ;;  %v15043_v24 = vcombine.high %v5142_v12, %v5150_v17  ;;  %v5157_v21 = vld [vmem:[#allocation22 + $0x790] sm:$0xff] }
 0xa00   :  { %12360 = vmatprep.subr.bf16.mxu0 %v14967_v52  ;;  %12488 = vmatprep.subr.bf16.mxu1 %v15031_v60  ;;  %v5165_v52 = vld [vmem:[#allocation22 + $0x7d0] sm:$0xff]  ;;  %v5158_v60 = vld [vmem:[#allocation22 + $0x798] sm:$0xff] }
 0xa01   :  { %v14981_v10 = vcombine.high %v5157_v21, %v5165_v52  ;;  %v14982_v46 = vcombine.low %v5157_v21, %v5165_v52  ;;  %v15046_v61 = vcombine.low %v5158_v60, %v5166_v14  ;;  %v5262_v21 = vld [vmem:[#allocation22 + $0xad8] sm:$0xff] }
 0xa03   :  { %12362 = vmatpush1.bf16.msra.mxu0 %v14968_v56  ;;  %12490 = vmatpush1.bf16.msra.mxu1 %v15032_v31  ;;  %v15045_v56 = vcombine.high %v5158_v60, %v5166_v14  ;;  %v5173_v31 = vld [vmem:[#allocation22 + $0x810] sm:$0xff] }
 0xa04   :  { %12364 = vmatprep.subr.bf16.mxu0 %v14969_v38  ;;  %12492 = vmatprep.subr.bf16.mxu1 %v15033_v48  ;;  %v5181_v38 = vld [vmem:[#allocation22 + $0x850] sm:$0xff]  ;;  %v5174_v48 = vld [vmem:[#allocation22 + $0x818] sm:$0xff] }
 0xa05   :  { %v14983_v39 = vcombine.high %v5173_v31, %v5181_v38  ;;  %v14984_v53 = vcombine.low %v5173_v31, %v5181_v38  ;;  %v15048_v25 = vcombine.low %v5174_v48, %v5182_v19  ;;  %v5278_v31 = vld [vmem:[#allocation22 + $0xb58] sm:$0xff] }
 0xa07   :  { %12366 = vmatpush1.bf16.msra.mxu0 %v14970_v49  ;;  %12494 = vmatpush1.bf16.msra.mxu1 %v15034_v9  ;;  %v15047_v49 = vcombine.high %v5174_v48, %v5182_v19  ;;  %v5189_v9 = vld [vmem:[#allocation22 + $0x890] sm:$0xff] }
 0xa08   :  { %12368 = vmatprep.subr.bf16.mxu0 %v14971_v18  ;;  %12496 = vmatprep.subr.bf16.mxu1 %v15035_v41  ;;  %v5197_v18 = vld [vmem:[#allocation22 + $0x8d0] sm:$0xff]  ;;  %v5190_v41 = vld [vmem:[#allocation22 + $0x898] sm:$0xff] }
 0xa09   :  { %v14985_v55 = vcombine.high %v5189_v9, %v5197_v18  ;;  %v14986_v40 = vcombine.low %v5189_v9, %v5197_v18  ;;  %v15050_v43 = vcombine.low %v5190_v41, %v5198_v51  ;;  %v5294_v9 = vld [vmem:[#allocation22 + $0xbd8] sm:$0xff] }
 0xa0b   :  { %12370 = vmatpush1.bf16.msra.mxu0 %v14972_v33  ;;  %12498 = vmatpush1.bf16.msra.mxu1 %v15036_v28  ;;  %v15049_v33 = vcombine.high %v5190_v41, %v5198_v51  ;;  %v5205_v28 = vld [vmem:[#allocation22 + $0x910] sm:$0xff] }
 0xa0c   :  { %12372 = vmatprep.subr.bf16.mxu0 %v14973_v50  ;;  %12500 = vmatprep.subr.bf16.mxu1 %v15037_v0  ;;  %v5213_v50 = vld [vmem:[#allocation22 + $0x950] sm:$0xff]  ;;  %v5206_v0 = vld [vmem:[#allocation22 + $0x918] sm:$0xff] }
 0xa0d   :  { %v14987_v62 = vcombine.high %v5205_v28, %v5213_v50  ;;  %v14988_v11 = vcombine.low %v5205_v28, %v5213_v50  ;;  %v15052_v35 = vcombine.low %v5206_v0, %v5214_v34  ;;  %v5310_v28 = vld [vmem:[#allocation22 + $0xc58] sm:$0xff] }
 0xa0f   :  { %12374 = vmatpush1.bf16.msra.mxu0 %v14974_v4  ;;  %12502 = vmatpush1.bf16.msra.mxu1 %v15038_v1  ;;  %v15051_v4 = vcombine.high %v5206_v0, %v5214_v34  ;;  %v5221_v1 = vld [vmem:[#allocation22 + $0x990] sm:$0xff] }
 0xa10   :  { %12376 = vmatprep.subr.bf16.mxu0 %v14975_v3  ;;  %12504 = vmatprep.subr.bf16.mxu1 %v15039_v58  ;;  %v5229_v3 = vld [vmem:[#allocation22 + $0x9d0] sm:$0xff]  ;;  %v5222_v58 = vld [vmem:[#allocation22 + $0x998] sm:$0xff] }
 0xa11   :  { %v14989_v13 = vcombine.high %v5221_v1, %v5229_v3  ;;  %v14990_v29 = vcombine.low %v5221_v1, %v5229_v3  ;;  %v15054_v12 = vcombine.low %v5222_v58, %v5230_v22  ;;  %v5326_v1 = vld [vmem:[#allocation22 + $0xcd8] sm:$0xff] }
 0xa13   :  { %12378 = vmatpush1.bf16.msra.mxu0 %v14976_v23  ;;  %12506 = vmatpush1.bf16.msra.mxu1 %v15040_v57  ;;  %v15053_v23 = vcombine.high %v5222_v58, %v5230_v22  ;;  %v5237_v57 = vld [vmem:[#allocation22 + $0xa10] sm:$0xff] }
 0xa14   :  { %12380 = vmatprep.subr.bf16.mxu0 %v14977_v6  ;;  %12508 = vmatprep.subr.bf16.mxu1 %v15041_v7  ;;  %v5245_v6 = vld [vmem:[#allocation22 + $0xa50] sm:$0xff]  ;;  %v5238_v7 = vld [vmem:[#allocation22 + $0xa18] sm:$0xff] }
 0xa15   :  { %v14991_v17 = vcombine.high %v5237_v57, %v5245_v6  ;;  %v14992_v52 = vcombine.low %v5237_v57, %v5245_v6  ;;  %v15056_v60 = vcombine.low %v5238_v7, %v5246_v63  ;;  %v5342_v57 = vld [vmem:[#allocation22 + $0xd58] sm:$0xff] }
 0xa17   :  { %12382 = vmatpush1.bf16.msra.mxu0 %v14978_v8  ;;  %12510 = vmatpush1.bf16.msra.mxu1 %v15042_v36  ;;  %v15055_v8 = vcombine.high %v5238_v7, %v5246_v63  ;;  %v5253_v36 = vld [vmem:[#allocation22 + $0xa90] sm:$0xff] }
 0xa18   :  { %12384 = vmatprep.subr.bf16.mxu0 %v14979_v16  ;;  %12512 = vmatprep.subr.bf16.mxu1 %v15043_v24  ;;  %v5261_v16 = vld [vmem:[#allocation22 + $0xad0] sm:$0xff]  ;;  %v5254_v24 = vld [vmem:[#allocation22 + $0xa98] sm:$0xff] }
 0xa19   :  { %v14993_v14 = vcombine.high %v5253_v36, %v5261_v16  ;;  %v14994_v38 = vcombine.low %v5253_v36, %v5261_v16  ;;  %v15058_v48 = vcombine.low %v5254_v24, %v5262_v21  ;;  %v5358_v36 = vld [vmem:[#allocation22 + $0xdd8] sm:$0xff] }
 0xa1b   :  { %12386 = vmatpush1.bf16.msra.mxu0 %v14980_v2  ;;  %12514 = vmatpush1.bf16.msra.mxu1 %v15044_v5  ;;  %v15057_v2 = vcombine.high %v5254_v24, %v5262_v21  ;;  %v5269_v5 = vld [vmem:[#allocation22 + $0xb10] sm:$0xff] }
 0xa1c   :  { %12388 = vmatprep.subr.bf16.mxu0 %v14981_v10  ;;  %12516 = vmatprep.subr.bf16.mxu1 %v15045_v56  ;;  %v5277_v10 = vld [vmem:[#allocation22 + $0xb50] sm:$0xff]  ;;  %v5270_v56 = vld [vmem:[#allocation22 + $0xb18] sm:$0xff] }
 0xa1d   :  { %v14995_v19 = vcombine.high %v5269_v5, %v5277_v10  ;;  %v14996_v18 = vcombine.low %v5269_v5, %v5277_v10  ;;  %v15060_v41 = vcombine.low %v5270_v56, %v5278_v31  ;;  %v5374_v5 = vld [vmem:[#allocation22 + $0xe58] sm:$0xff] }
 0xa1f   :  { %12390 = vmatpush1.bf16.msra.mxu0 %v14982_v46  ;;  %12518 = vmatpush1.bf16.msra.mxu1 %v15046_v61  ;;  %v15059_v46 = vcombine.high %v5270_v56, %v5278_v31  ;;  %v5285_v61 = vld [vmem:[#allocation22 + $0xb90] sm:$0xff] }
 0xa20   :  { %12392 = vmatprep.subr.bf16.mxu0 %v14983_v39  ;;  %12520 = vmatprep.subr.bf16.mxu1 %v15047_v49  ;;  %v5293_v39 = vld [vmem:[#allocation22 + $0xbd0] sm:$0xff]  ;;  %v5286_v49 = vld [vmem:[#allocation22 + $0xb98] sm:$0xff] }
 0xa21   :  { %v14997_v51 = vcombine.high %v5285_v61, %v5293_v39  ;;  %v14998_v50 = vcombine.low %v5285_v61, %v5293_v39  ;;  %v15062_v0 = vcombine.low %v5286_v49, %v5294_v9  ;;  %v5390_v61 = vld [vmem:[#allocation22 + $0xed8] sm:$0xff] }
 0xa22   :  { %8444 = vmatmul.mubr.f32.vlgmr.msra.gmra.mrb[36].mxu0 %v18886_v30  ;;  %8598 = vmatmul.mubr.f32.vlgmr.msra.gmra.mrb[36].mxu1 %v18886_v30 }
 0xa23   :  { %8449 = vmatprep.mubr.f32.mxu0 %v18904_v54  ;;  %12394 = vmatpush1.bf16.msra.mxu0 %v14984_v53  ;;  %v15061_v53 = vcombine.high %v5286_v49, %v5294_v9 }
 0xa24   :  { %8603 = vmatprep.mubr.f32.mxu1 %v18904_v54  ;;  %12522 = vmatpush1.bf16.msra.mxu1 %v15048_v25  ;;  %v5301_v25 = vld [vmem:[#allocation22 + $0xc10] sm:$0xff] }
 0xa25   :  { %12396 = vmatprep.subr.bf16.mxu0 %v14985_v55  ;;  %12524 = vmatprep.subr.bf16.mxu1 %v15049_v33  ;;  %v5309_v55 = vld [vmem:[#allocation22 + $0xc50] sm:$0xff]  ;;  %v5302_v33 = vld [vmem:[#allocation22 + $0xc18] sm:$0xff] }
 0xa26   :  { %8450 = vmatmul.mubr.f32.gmra.mrb[38].mxu0 %v18906_v59  ;;  %8604 = vmatmul.mubr.f32.gmra.mrb[38].mxu1 %v18906_v59  ;;  %v14999_v34 = vcombine.high %v5301_v25, %v5309_v55  ;;  %v15000_v3 = vcombine.low %v5301_v25, %v5309_v55  ;;  %v15064_v58 = vcombine.low %v5302_v33, %v5310_v28  ;;  %v5406_v25 = vld [vmem:[#allocation22 + $0xf58] sm:$0xff] }
 0xa27   :  { %12398 = vmatpush1.bf16.msra.mxu0 %v14986_v40  ;;  %8520 = vmatprep.mubr.f32.mxu0 %v18915_v32  ;;  %v15063_v40 = vcombine.high %v5302_v33, %v5310_v28 }
 0xa28   :  { %12526 = vmatpush1.bf16.msra.mxu1 %v15050_v43  ;;  %8674 = vmatprep.mubr.f32.mxu1 %v18915_v32  ;;  %v5317_v43 = vld [vmem:[#allocation22 + $0xc90] sm:$0xff] }
 0xa29   :  { %12400 = vmatprep.subr.bf16.mxu0 %v14987_v62  ;;  %12528 = vmatprep.subr.bf16.mxu1 %v15051_v4  ;;  %v5325_v62 = vld [vmem:[#allocation22 + $0xcd0] sm:$0xff]  ;;  %v5318_v4 = vld [vmem:[#allocation22 + $0xc98] sm:$0xff] }
 0xa2a   :  { %v15001_v22 = vcombine.high %v5317_v43, %v5325_v62  ;;  %v15002_v6 = vcombine.low %v5317_v43, %v5325_v62  ;;  %v15066_v7 = vcombine.low %v5318_v4, %v5326_v1  ;;  %v5422_v43 = vld [vmem:[#allocation22 + $0xfd8] sm:$0xff] }
 0xa2b   :  { %12402 = vmatpush1.bf16.msra.mxu0 %v14988_v11  ;;  %v15065_v11 = vcombine.high %v5318_v4, %v5326_v1 }
 0xa2c   :  { %12530 = vmatpush1.bf16.msra.mxu1 %v15052_v35  ;;  %12404 = vmatprep.subr.bf16.mxu0 %v14989_v13  ;;  %v5333_v35 = vld [vmem:[#allocation22 + $0xd10] sm:$0xff] }
 0xa2d   :  { %12532 = vmatprep.subr.bf16.mxu1 %v15053_v23  ;;  %v5341_v13 = vld [vmem:[#allocation22 + $0xd50] sm:$0xff]  ;;  %v5334_v23 = vld [vmem:[#allocation22 + $0xd18] sm:$0xff] }
 0xa2e   :  { %v15003_v63 = vcombine.high %v5333_v35, %v5341_v13  ;;  %v15004_v16 = vcombine.low %v5333_v35, %v5341_v13  ;;  %v15068_v24 = vcombine.low %v5334_v23, %v5342_v57  ;;  %v4928_v35 = vld [vmem:[#allocation22 + $0x68] sm:$0xff] }
 0xa2f   :  { %12406 = vmatpush1.bf16.msra.mxu0 %v14990_v29  ;;  %v15067_v29 = vcombine.high %v5334_v23, %v5342_v57 }
 0xa30   :  { %12534 = vmatpush1.bf16.msra.mxu1 %v15054_v12  ;;  %12408 = vmatprep.subr.bf16.mxu0 %v14991_v17  ;;  %v5349_v12 = vld [vmem:[#allocation22 + $0xd90] sm:$0xff] }
 0xa31   :  { %12536 = vmatprep.subr.bf16.mxu1 %v15055_v8  ;;  %v5357_v17 = vld [vmem:[#allocation22 + $0xdd0] sm:$0xff]  ;;  %v5350_v8 = vld [vmem:[#allocation22 + $0xd98] sm:$0xff] }
 0xa32   :  { %v15005_v21 = vcombine.high %v5349_v12, %v5357_v17  ;;  %v15006_v10 = vcombine.low %v5349_v12, %v5357_v17  ;;  %v15070_v56 = vcombine.low %v5350_v8, %v5358_v36  ;;  %v4944_v12 = vld [vmem:[#allocation22 + $0xe8] sm:$0xff] }
 0xa33   :  { %12410 = vmatpush1.bf16.msra.mxu0 %v14992_v52  ;;  %v15069_v52 = vcombine.high %v5350_v8, %v5358_v36 }
 0xa34   :  { %12538 = vmatpush1.bf16.msra.mxu1 %v15056_v60  ;;  %12412 = vmatprep.subr.bf16.mxu0 %v14993_v14  ;;  %v5365_v60 = vld [vmem:[#allocation22 + $0xe10] sm:$0xff] }
 0xa35   :  { %12540 = vmatprep.subr.bf16.mxu1 %v15057_v2  ;;  %v5373_v14 = vld [vmem:[#allocation22 + $0xe50] sm:$0xff]  ;;  %v5366_v2 = vld [vmem:[#allocation22 + $0xe18] sm:$0xff] }
 0xa36   :  { %v15007_v31 = vcombine.high %v5365_v60, %v5373_v14  ;;  %v15008_v39 = vcombine.low %v5365_v60, %v5373_v14  ;;  %v15072_v49 = vcombine.low %v5366_v2, %v5374_v5  ;;  %v4960_v60 = vld [vmem:[#allocation22 + $0x168] sm:$0xff] }
 0xa37   :  { %12414 = vmatpush1.bf16.msra.mxu0 %v14994_v38  ;;  %v15071_v38 = vcombine.high %v5366_v2, %v5374_v5 }
 0xa38   :  { %12542 = vmatpush1.bf16.msra.mxu1 %v15058_v48  ;;  %12416 = vmatprep.subr.bf16.mxu0 %v14995_v19  ;;  %v5381_v48 = vld [vmem:[#allocation22 + $0xe90] sm:$0xff] }
 0xa39   :  { %12544 = vmatprep.subr.bf16.mxu1 %v15059_v46  ;;  %v5389_v19 = vld [vmem:[#allocation22 + $0xed0] sm:$0xff]  ;;  %v5382_v46 = vld [vmem:[#allocation22 + $0xe98] sm:$0xff] }
 0xa3a   :  { %v15009_v9 = vcombine.high %v5381_v48, %v5389_v19  ;;  %v15010_v55 = vcombine.low %v5381_v48, %v5389_v19  ;;  %v15074_v33 = vcombine.low %v5382_v46, %v5390_v61  ;;  %v4976_v48 = vld [vmem:[#allocation22 + $0x1e8] sm:$0xff] }
 0xa3b   :  { %12418 = vmatpush1.bf16.msra.mxu0 %v14996_v18  ;;  %v15073_v18 = vcombine.high %v5382_v46, %v5390_v61 }
 0xa3c   :  { %12546 = vmatpush1.bf16.msra.mxu1 %v15060_v41  ;;  %12420 = vmatprep.subr.bf16.mxu0 %v14997_v51  ;;  %v5397_v41 = vld [vmem:[#allocation22 + $0xf10] sm:$0xff] }
 0xa3d   :  { %12548 = vmatprep.subr.bf16.mxu1 %v15061_v53  ;;  %v5405_v51 = vld [vmem:[#allocation22 + $0xf50] sm:$0xff]  ;;  %v5398_v53 = vld [vmem:[#allocation22 + $0xf18] sm:$0xff] }
 0xa3e   :  { %v15011_v28 = vcombine.high %v5397_v41, %v5405_v51  ;;  %v15012_v62 = vcombine.low %v5397_v41, %v5405_v51  ;;  %v15076_v4 = vcombine.low %v5398_v53, %v5406_v25  ;;  %v4992_v41 = vld [vmem:[#allocation22 + $0x268] sm:$0xff] }
 0xa3f   :  { %12422 = vmatpush1.bf16.msra.mxu0 %v14998_v50  ;;  %v15075_v50 = vcombine.high %v5398_v53, %v5406_v25 }
 0xa40   :  { %12550 = vmatpush1.bf16.msra.mxu1 %v15062_v0  ;;  %12424 = vmatprep.subr.bf16.mxu0 %v14999_v34  ;;  %v5413_v0 = vld [vmem:[#allocation22 + $0xf90] sm:$0xff] }
 0xa41   :  { %12552 = vmatprep.subr.bf16.mxu1 %v15063_v40  ;;  %v5421_v34 = vld [vmem:[#allocation22 + $0xfd0] sm:$0xff]  ;;  %v5414_v40 = vld [vmem:[#allocation22 + $0xf98] sm:$0xff] }
 0xa42   :  { %v15013_v1 = vcombine.high %v5413_v0, %v5421_v34  ;;  %v15014_v13 = vcombine.low %v5413_v0, %v5421_v34  ;;  %v15078_v23 = vcombine.low %v5414_v40, %v5422_v43  ;;  %v5008_v0 = vld [vmem:[#allocation22 + $0x2e8] sm:$0xff] }
 0xa43   :  { %12426 = vmatpush1.bf16.msra.mxu0 %v15000_v3  ;;  %v15077_v3 = vcombine.high %v5414_v40, %v5422_v43 }
 0xa44   :  { %12554 = vmatpush1.bf16.msra.mxu1 %v15064_v58  ;;  %12428 = vmatprep.subr.bf16.mxu0 %v15001_v22  ;;  %v4919_v58 = vld [vmem:[#allocation22 + $0x20] sm:$0xff] }
 0xa45   :  { %12556 = vmatprep.subr.bf16.mxu1 %v15065_v11  ;;  %v4927_v22 = vld [vmem:[#allocation22 + $0x60] sm:$0xff]  ;;  %v4920_v11 = vld [vmem:[#allocation22 + $0x28] sm:$0xff] }
 0xa46   :  { %v15079_v57 = vcombine.high %v4919_v58, %v4927_v22  ;;  %v15080_v17 = vcombine.low %v4919_v58, %v4927_v22  ;;  %v15144_v8 = vcombine.low %v4920_v11, %v4928_v35  ;;  %v5024_v58 = vld [vmem:[#allocation22 + $0x368] sm:$0xff] }
 0xa47   :  { %12430 = vmatpush1.bf16.msra.mxu0 %v15002_v6  ;;  %v15143_v6 = vcombine.high %v4920_v11, %v4928_v35 }
 0xa48   :  { %12558 = vmatpush1.bf16.msra.mxu1 %v15066_v7  ;;  %12432 = vmatprep.subr.bf16.mxu0 %v15003_v63  ;;  %v4935_v7 = vld [vmem:[#allocation22 + $0xa0] sm:$0xff] }
 0xa49   :  { %12560 = vmatprep.subr.bf16.mxu1 %v15067_v29  ;;  %v4943_v63 = vld [vmem:[#allocation22 + $0xe0] sm:$0xff]  ;;  %v4936_v29 = vld [vmem:[#allocation22 + $0xa8] sm:$0xff] }
 0xa4a   :  { %v15081_v36 = vcombine.high %v4935_v7, %v4943_v63  ;;  %v15082_v14 = vcombine.low %v4935_v7, %v4943_v63  ;;  %v15146_v2 = vcombine.low %v4936_v29, %v4944_v12  ;;  %v5040_v7 = vld [vmem:[#allocation22 + $0x3e8] sm:$0xff] }
 0xa4b   :  { %12434 = vmatpush1.bf16.msra.mxu0 %v15004_v16  ;;  %v15145_v16 = vcombine.high %v4936_v29, %v4944_v12 }
 0xa4c   :  { %12562 = vmatpush1.bf16.msra.mxu1 %v15068_v24  ;;  %12436 = vmatprep.subr.bf16.mxu0 %v15005_v21  ;;  %v4951_v24 = vld [vmem:[#allocation22 + $0x120] sm:$0xff] }
 0xa4d   :  { %12564 = vmatprep.subr.bf16.mxu1 %v15069_v52  ;;  %v4959_v21 = vld [vmem:[#allocation22 + $0x160] sm:$0xff]  ;;  %v4952_v52 = vld [vmem:[#allocation22 + $0x128] sm:$0xff] }
 0xa4e   :  { %v15083_v5 = vcombine.high %v4951_v24, %v4959_v21  ;;  %v15084_v19 = vcombine.low %v4951_v24, %v4959_v21  ;;  %v15148_v46 = vcombine.low %v4952_v52, %v4960_v60  ;;  %v5056_v24 = vld [vmem:[#allocation22 + $0x468] sm:$0xff] }
 0xa4f   :  { %12438 = vmatpush1.bf16.msra.mxu0 %v15006_v10  ;;  %v15147_v10 = vcombine.high %v4952_v52, %v4960_v60 }
 0xa50   :  { %12566 = vmatpush1.bf16.msra.mxu1 %v15070_v56  ;;  %12440 = vmatprep.subr.bf16.mxu0 %v15007_v31  ;;  %v4967_v56 = vld [vmem:[#allocation22 + $0x1a0] sm:$0xff] }
 0xa51   :  { %12568 = vmatprep.subr.bf16.mxu1 %v15071_v38  ;;  %v4975_v31 = vld [vmem:[#allocation22 + $0x1e0] sm:$0xff]  ;;  %v4968_v38 = vld [vmem:[#allocation22 + $0x1a8] sm:$0xff] }
 0xa52   :  { %v15085_v61 = vcombine.high %v4967_v56, %v4975_v31  ;;  %v15086_v51 = vcombine.low %v4967_v56, %v4975_v31  ;;  %v15150_v53 = vcombine.low %v4968_v38, %v4976_v48  ;;  %v5072_v56 = vld [vmem:[#allocation22 + $0x4e8] sm:$0xff] }
 0xa53   :  { %12442 = vmatpush1.bf16.msra.mxu0 %v15008_v39  ;;  %v15149_v39 = vcombine.high %v4968_v38, %v4976_v48 }
 0xa54   :  { %12570 = vmatpush1.bf16.msra.mxu1 %v15072_v49  ;;  %12444 = vmatprep.subr.bf16.mxu0 %v15009_v9  ;;  %v4983_v49 = vld [vmem:[#allocation22 + $0x220] sm:$0xff] }
 0xa55   :  { %12572 = vmatprep.subr.bf16.mxu1 %v15073_v18  ;;  %v4991_v9 = vld [vmem:[#allocation22 + $0x260] sm:$0xff]  ;;  %v4984_v18 = vld [vmem:[#allocation22 + $0x228] sm:$0xff] }
 0xa56   :  { %v15087_v25 = vcombine.high %v4983_v49, %v4991_v9  ;;  %v15088_v34 = vcombine.low %v4983_v49, %v4991_v9  ;;  %v15152_v40 = vcombine.low %v4984_v18, %v4992_v41  ;;  %v5088_v49 = vld [vmem:[#allocation22 + $0x568] sm:$0xff] }
 0xa57   :  { %12446 = vmatpush1.bf16.msra.mxu0 %v15010_v55  ;;  %v15151_v55 = vcombine.high %v4984_v18, %v4992_v41 }
 0xa58   :  { %12574 = vmatpush1.bf16.msra.mxu1 %v15074_v33  ;;  %12448 = vmatprep.subr.bf16.mxu0 %v15011_v28  ;;  %v4999_v33 = vld [vmem:[#allocation22 + $0x2a0] sm:$0xff] }
 0xa59   :  { %12576 = vmatprep.subr.bf16.mxu1 %v15075_v50  ;;  %v5007_v28 = vld [vmem:[#allocation22 + $0x2e0] sm:$0xff]  ;;  %v5000_v50 = vld [vmem:[#allocation22 + $0x2a8] sm:$0xff] }
 0xa5a   :  { %v15089_v43 = vcombine.high %v4999_v33, %v5007_v28  ;;  %v15090_v22 = vcombine.low %v4999_v33, %v5007_v28  ;;  %v15154_v11 = vcombine.low %v5000_v50, %v5008_v0  ;;  %v5104_v33 = vld [vmem:[#allocation22 + $0x5e8] sm:$0xff] }
 0xa5b   :  { %12450 = vmatpush1.bf16.msra.mxu0 %v15012_v62  ;;  %v15153_v62 = vcombine.high %v5000_v50, %v5008_v0 }
 0xa5c   :  { %12578 = vmatpush1.bf16.msra.mxu1 %v15076_v4  ;;  %12452 = vmatprep.subr.bf16.mxu0 %v15013_v1  ;;  %v5015_v4 = vld [vmem:[#allocation22 + $0x320] sm:$0xff] }
 0xa5d   :  { %12580 = vmatprep.subr.bf16.mxu1 %v15077_v3  ;;  %v5023_v1 = vld [vmem:[#allocation22 + $0x360] sm:$0xff]  ;;  %v5016_v3 = vld [vmem:[#allocation22 + $0x328] sm:$0xff] }
 0xa5e   :  { %v15091_v35 = vcombine.high %v5015_v4, %v5023_v1  ;;  %v15092_v63 = vcombine.low %v5015_v4, %v5023_v1  ;;  %v15156_v29 = vcombine.low %v5016_v3, %v5024_v58  ;;  %v5120_v4 = vld [vmem:[#allocation22 + $0x668] sm:$0xff] }
 0xa5f   :  { %12454 = vmatpush1.bf16.msra.mxu0 %v15014_v13  ;;  %v15155_v13 = vcombine.high %v5016_v3, %v5024_v58 }
 0xa60   :  { %12582 = vmatpush1.bf16.msra.mxu1 %v15078_v23  ;;  %12584 = vmatprep.subr.bf16.mxu0 %v15079_v57  ;;  %v5031_v23 = vld [vmem:[#allocation22 + $0x3a0] sm:$0xff] }
 0xa61   :  { %12712 = vmatprep.subr.bf16.mxu1 %v15143_v6  ;;  %v5039_v57 = vld [vmem:[#allocation22 + $0x3e0] sm:$0xff]  ;;  %v5032_v6 = vld [vmem:[#allocation22 + $0x3a8] sm:$0xff] }
 0xa62   :  { %8521 = vmatmul.mubr.f32.vlgmr.msra.gmra.mrb[36].mxu0 %v18892_v27  ;;  %v15093_v12 = vcombine.high %v5031_v23, %v5039_v57  ;;  %v15094_v21 = vcombine.low %v5031_v23, %v5039_v57  ;;  %v15158_v52 = vcombine.low %v5032_v6, %v5040_v7  ;;  %v5136_v23 = vld [vmem:[#allocation22 + $0x6e8] sm:$0xff] }
 0xa63   :  { %8675 = vmatmul.mubr.f32.vlgmr.msra.gmra.mrb[36].mxu1 %v18892_v27  ;;  %8526 = vmatprep.mubr.f32.mxu0 %v18923_v26 }
 0xa64   :  { %8680 = vmatprep.mubr.f32.mxu1 %v18923_v26  ;;  %12586 = vmatpush1.bf16.msra.mxu0 %v15080_v17  ;;  %v15157_v17 = vcombine.high %v5032_v6, %v5040_v7 }
 0xa65   :  { %12714 = vmatpush1.bf16.msra.mxu1 %v15144_v8  ;;  %12588 = vmatprep.subr.bf16.mxu0 %v15081_v36  ;;  %v5047_v8 = vld [vmem:[#allocation22 + $0x420] sm:$0xff] }
 0xa66   :  { %8527 = vmatmul.mubr.f32.gmra.mrb[38].mxu0 %v18908_v15  ;;  %12716 = vmatprep.subr.bf16.mxu1 %v15145_v16  ;;  %v5055_v36 = vld [vmem:[#allocation22 + $0x460] sm:$0xff]  ;;  %v5048_v16 = vld [vmem:[#allocation22 + $0x428] sm:$0xff] }
 0xa67   :  { %8681 = vmatmul.mubr.f32.gmra.mrb[38].mxu1 %v18908_v15  ;;  %8751 = vmatprep.mubr.f32.mxu0 %v18884_v20  ;;  %v15095_v60 = vcombine.high %v5047_v8, %v5055_v36  ;;  %v15096_v31 = vcombine.low %v5047_v8, %v5055_v36  ;;  %v15160_v38 = vcombine.low %v5048_v16, %v5056_v24  ;;  %v5152_v8 = vld [vmem:[#allocation22 + $0x768] sm:$0xff] }
 0xa68   :  { %12590 = vmatpush1.bf16.msra.mxu0 %v15082_v14  ;;  %8905 = vmatprep.mubr.f32.mxu1 %v18884_v20  ;;  %v15159_v14 = vcombine.high %v5048_v16, %v5056_v24 }
 0xa69   :  { %12718 = vmatpush1.bf16.msra.mxu1 %v15146_v2  ;;  %12592 = vmatprep.subr.bf16.mxu0 %v15083_v5  ;;  %v5063_v2 = vld [vmem:[#allocation22 + $0x4a0] sm:$0xff] }
 0xa6a   :  { %12720 = vmatprep.subr.bf16.mxu1 %v15147_v10  ;;  %v5071_v5 = vld [vmem:[#allocation22 + $0x4e0] sm:$0xff]  ;;  %v5064_v10 = vld [vmem:[#allocation22 + $0x4a8] sm:$0xff] }
 0xa6b   :  { %v15097_v48 = vcombine.high %v5063_v2, %v5071_v5  ;;  %v15098_v9 = vcombine.low %v5063_v2, %v5071_v5  ;;  %v15162_v18 = vcombine.low %v5064_v10, %v5072_v56  ;;  %v5168_v2 = vld [vmem:[#allocation22 + $0x7e8] sm:$0xff] }
 0xa6c   :  { %12594 = vmatpush1.bf16.msra.mxu0 %v15084_v19  ;;  %v15161_v19 = vcombine.high %v5064_v10, %v5072_v56 }
 0xa6d   :  { %12722 = vmatpush1.bf16.msra.mxu1 %v15148_v46  ;;  %12596 = vmatprep.subr.bf16.mxu0 %v15085_v61  ;;  %v5079_v46 = vld [vmem:[#allocation22 + $0x520] sm:$0xff] }
 0xa6e   :  { %12724 = vmatprep.subr.bf16.mxu1 %v15149_v39  ;;  %v5087_v61 = vld [vmem:[#allocation22 + $0x560] sm:$0xff]  ;;  %v5080_v39 = vld [vmem:[#allocation22 + $0x528] sm:$0xff] }
 0xa6f   :  { %v15099_v41 = vcombine.high %v5079_v46, %v5087_v61  ;;  %v15100_v28 = vcombine.low %v5079_v46, %v5087_v61  ;;  %v15164_v50 = vcombine.low %v5080_v39, %v5088_v49  ;;  %v5184_v46 = vld [vmem:[#allocation22 + $0x868] sm:$0xff] }
 0xa70   :  { %12598 = vmatpush1.bf16.msra.mxu0 %v15086_v51  ;;  %v15163_v51 = vcombine.high %v5080_v39, %v5088_v49 }
 0xa71   :  { %12726 = vmatpush1.bf16.msra.mxu1 %v15150_v53  ;;  %12600 = vmatprep.subr.bf16.mxu0 %v15087_v25  ;;  %v5095_v53 = vld [vmem:[#allocation22 + $0x5a0] sm:$0xff] }
 0xa72   :  { %12728 = vmatprep.subr.bf16.mxu1 %v15151_v55  ;;  %v5103_v25 = vld [vmem:[#allocation22 + $0x5e0] sm:$0xff]  ;;  %v5096_v55 = vld [vmem:[#allocation22 + $0x5a8] sm:$0xff] }
 0xa73   :  { %v15101_v0 = vcombine.high %v5095_v53, %v5103_v25  ;;  %v15102_v1 = vcombine.low %v5095_v53, %v5103_v25  ;;  %v15166_v3 = vcombine.low %v5096_v55, %v5104_v33  ;;  %v5200_v53 = vld [vmem:[#allocation22 + $0x8e8] sm:$0xff] }
 0xa74   :  { %12602 = vmatpush1.bf16.msra.mxu0 %v15088_v34  ;;  %v15165_v34 = vcombine.high %v5096_v55, %v5104_v33 }
 0xa75   :  { %12730 = vmatpush1.bf16.msra.mxu1 %v15152_v40  ;;  %12604 = vmatprep.subr.bf16.mxu0 %v15089_v43  ;;  %v5111_v40 = vld [vmem:[#allocation22 + $0x620] sm:$0xff] }
 0xa76   :  { %12732 = vmatprep.subr.bf16.mxu1 %v15153_v62  ;;  %v5119_v43 = vld [vmem:[#allocation22 + $0x660] sm:$0xff]  ;;  %v5112_v62 = vld [vmem:[#allocation22 + $0x628] sm:$0xff] }
 0xa77   :  { %v15103_v58 = vcombine.high %v5111_v40, %v5119_v43  ;;  %v15104_v57 = vcombine.low %v5111_v40, %v5119_v43  ;;  %v15168_v6 = vcombine.low %v5112_v62, %v5120_v4  ;;  %v5216_v40 = vld [vmem:[#allocation22 + $0x968] sm:$0xff] }
 0xa78   :  { %12606 = vmatpush1.bf16.msra.mxu0 %v15090_v22  ;;  %v15167_v22 = vcombine.high %v5112_v62, %v5120_v4 }
 0xa79   :  { %12734 = vmatpush1.bf16.msra.mxu1 %v15154_v11  ;;  %12608 = vmatprep.subr.bf16.mxu0 %v15091_v35  ;;  %v5127_v11 = vld [vmem:[#allocation22 + $0x6a0] sm:$0xff] }
 0xa7a   :  { %12736 = vmatprep.subr.bf16.mxu1 %v15155_v13  ;;  %v5135_v35 = vld [vmem:[#allocation22 + $0x6e0] sm:$0xff]  ;;  %v5128_v13 = vld [vmem:[#allocation22 + $0x6a8] sm:$0xff] }
 0xa7b   :  { %v15105_v7 = vcombine.high %v5127_v11, %v5135_v35  ;;  %v15106_v36 = vcombine.low %v5127_v11, %v5135_v35  ;;  %v15170_v16 = vcombine.low %v5128_v13, %v5136_v23  ;;  %v5232_v11 = vld [vmem:[#allocation22 + $0x9e8] sm:$0xff] }
 0xa7c   :  { %12610 = vmatpush1.bf16.msra.mxu0 %v15092_v63  ;;  %v15169_v63 = vcombine.high %v5128_v13, %v5136_v23 }
 0xa7d   :  { %12738 = vmatpush1.bf16.msra.mxu1 %v15156_v29  ;;  %12612 = vmatprep.subr.bf16.mxu0 %v15093_v12  ;;  %v5143_v29 = vld [vmem:[#allocation22 + $0x720] sm:$0xff] }
 0xa7e   :  { %12740 = vmatprep.subr.bf16.mxu1 %v15157_v17  ;;  %v5151_v12 = vld [vmem:[#allocation22 + $0x760] sm:$0xff]  ;;  %v5144_v17 = vld [vmem:[#allocation22 + $0x728] sm:$0xff] }
 0xa7f   :  { %v15107_v24 = vcombine.high %v5143_v29, %v5151_v12  ;;  %v15108_v5 = vcombine.low %v5143_v29, %v5151_v12  ;;  %v15172_v10 = vcombine.low %v5144_v17, %v5152_v8  ;;  %v5248_v29 = vld [vmem:[#allocation22 + $0xa68] sm:$0xff] }
 0xa80   :  { %12614 = vmatpush1.bf16.msra.mxu0 %v15094_v21  ;;  %v15171_v21 = vcombine.high %v5144_v17, %v5152_v8 }
 0xa81   :  { %12742 = vmatpush1.bf16.msra.mxu1 %v15158_v52  ;;  %12616 = vmatprep.subr.bf16.mxu0 %v15095_v60  ;;  %v5159_v52 = vld [vmem:[#allocation22 + $0x7a0] sm:$0xff] }
 0xa82   :  { %12744 = vmatprep.subr.bf16.mxu1 %v15159_v14  ;;  %v5167_v60 = vld [vmem:[#allocation22 + $0x7e0] sm:$0xff]  ;;  %v5160_v14 = vld [vmem:[#allocation22 + $0x7a8] sm:$0xff] }
 0xa83   :  { %v15109_v56 = vcombine.high %v5159_v52, %v5167_v60  ;;  %v15110_v61 = vcombine.low %v5159_v52, %v5167_v60  ;;  %v15174_v39 = vcombine.low %v5160_v14, %v5168_v2  ;;  %v5264_v52 = vld [vmem:[#allocation22 + $0xae8] sm:$0xff] }
 0xa84   :  { %12618 = vmatpush1.bf16.msra.mxu0 %v15096_v31  ;;  %v15173_v31 = vcombine.high %v5160_v14, %v5168_v2 }
 0xa85   :  { %12746 = vmatpush1.bf16.msra.mxu1 %v15160_v38  ;;  %12620 = vmatprep.subr.bf16.mxu0 %v15097_v48  ;;  %v5175_v38 = vld [vmem:[#allocation22 + $0x820] sm:$0xff] }
 0xa86   :  { %12748 = vmatprep.subr.bf16.mxu1 %v15161_v19  ;;  %v5183_v48 = vld [vmem:[#allocation22 + $0x860] sm:$0xff]  ;;  %v5176_v19 = vld [vmem:[#allocation22 + $0x828] sm:$0xff] }
 0xa87   :  { %v15111_v49 = vcombine.high %v5175_v38, %v5183_v48  ;;  %v15112_v25 = vcombine.low %v5175_v38, %v5183_v48  ;;  %v15176_v55 = vcombine.low %v5176_v19, %v5184_v46  ;;  %v5272_v48 = vld [vmem:[#allocation22 + $0xb28] sm:$0xff] }
 0xa88   :  { %12622 = vmatpush1.bf16.msra.mxu0 %v15098_v9  ;;  %v15175_v9 = vcombine.high %v5176_v19, %v5184_v46  ;;  %v5280_v19 = vld [vmem:[#allocation22 + $0xb68] sm:$0xff] }
 0xa89   :  { %12750 = vmatpush1.bf16.msra.mxu1 %v15162_v18  ;;  %12624 = vmatprep.subr.bf16.mxu0 %v15099_v41  ;;  %v5191_v18 = vld [vmem:[#allocation22 + $0x8a0] sm:$0xff] }
 0xa8a   :  { %12752 = vmatprep.subr.bf16.mxu1 %v15163_v51  ;;  %v5199_v41 = vld [vmem:[#allocation22 + $0x8e0] sm:$0xff]  ;;  %v5192_v51 = vld [vmem:[#allocation22 + $0x8a8] sm:$0xff] }
 0xa8b   :  { %v15113_v33 = vcombine.high %v5191_v18, %v5199_v41  ;;  %v15114_v43 = vcombine.low %v5191_v18, %v5199_v41  ;;  %v15178_v62 = vcombine.low %v5192_v51, %v5200_v53  ;;  %v15187_v18 = vcombine.high %v5272_v48, %v5280_v19  ;;  %v5287_v41 = vld [vmem:[#allocation22 + $0xba0] sm:$0xff] }
 0xa8c   :  { %12626 = vmatpush1.bf16.msra.mxu0 %v15100_v28  ;;  %v15177_v28 = vcombine.high %v5192_v51, %v5200_v53  ;;  %v5295_v51 = vld [vmem:[#allocation22 + $0xbe0] sm:$0xff] }
 0xa8d   :  { %12754 = vmatpush1.bf16.msra.mxu1 %v15164_v50  ;;  %12628 = vmatprep.subr.bf16.mxu0 %v15101_v0  ;;  %v5207_v50 = vld [vmem:[#allocation22 + $0x920] sm:$0xff] }
 0xa8e   :  { %12756 = vmatprep.subr.bf16.mxu1 %v15165_v34  ;;  %v5215_v0 = vld [vmem:[#allocation22 + $0x960] sm:$0xff]  ;;  %v5208_v34 = vld [vmem:[#allocation22 + $0x928] sm:$0xff] }
 0xa8f   :  { %v15115_v4 = vcombine.high %v5207_v50, %v5215_v0  ;;  %v15116_v35 = vcombine.low %v5207_v50, %v5215_v0  ;;  %v15180_v13 = vcombine.low %v5208_v34, %v5216_v40 }
 0xa90   :  { %12630 = vmatpush1.bf16.msra.mxu0 %v15102_v1  ;;  %v15179_v1 = vcombine.high %v5208_v34, %v5216_v40  ;;  %v15188_v34 = vcombine.low %v5272_v48, %v5280_v19  ;;  %v15125_v40 = vcombine.high %v5287_v41, %v5295_v51 }
 0xa91   :  { %12758 = vmatpush1.bf16.msra.mxu1 %v15166_v3  ;;  %12632 = vmatprep.subr.bf16.mxu0 %v15103_v58  ;;  %v5223_v3 = vld [vmem:[#allocation22 + $0x9a0] sm:$0xff] }
 0xa92   :  { %12760 = vmatprep.subr.bf16.mxu1 %v15167_v22  ;;  %v5231_v58 = vld [vmem:[#allocation22 + $0x9e0] sm:$0xff]  ;;  %v5224_v22 = vld [vmem:[#allocation22 + $0x9a8] sm:$0xff] }
 0xa93   :  { %v15117_v23 = vcombine.high %v5223_v3, %v5231_v58  ;;  %v15118_v12 = vcombine.low %v5223_v3, %v5231_v58  ;;  %v15182_v17 = vcombine.low %v5224_v22, %v5232_v11  ;;  %v5312_v3 = vld [vmem:[#allocation22 + $0xc68] sm:$0xff]  ;;  %v15126_v58 = vcombine.low %v5287_v41, %v5295_v51 }
 0xa94   :  { %12634 = vmatpush1.bf16.msra.mxu0 %v15104_v57  ;;  %v15181_v57 = vcombine.high %v5224_v22, %v5232_v11  ;;  %v5376_v41 = vld [vmem:[#allocation22 + $0xe68] sm:$0xff] }
 0xa95   :  { %12762 = vmatpush1.bf16.msra.mxu1 %v15168_v6  ;;  %12636 = vmatprep.subr.bf16.mxu0 %v15105_v7  ;;  %v5239_v6 = vld [vmem:[#allocation22 + $0xa20] sm:$0xff] }
 0xa96   :  { %12764 = vmatprep.subr.bf16.mxu1 %v15169_v63  ;;  %v5247_v7 = vld [vmem:[#allocation22 + $0xa60] sm:$0xff]  ;;  %v5240_v63 = vld [vmem:[#allocation22 + $0xa28] sm:$0xff] }
 0xa97   :  { %v15119_v8 = vcombine.high %v5239_v6, %v5247_v7  ;;  %v15120_v60 = vcombine.low %v5239_v6, %v5247_v7  ;;  %v15184_v14 = vcombine.low %v5240_v63, %v5248_v29  ;;  %v5328_v6 = vld [vmem:[#allocation22 + $0xce8] sm:$0xff] }
 0xa98   :  { %12638 = vmatpush1.bf16.msra.mxu0 %v15106_v36  ;;  %v15183_v36 = vcombine.high %v5240_v63, %v5248_v29 }
 0xa99   :  { %12766 = vmatpush1.bf16.msra.mxu1 %v15170_v16  ;;  %12640 = vmatprep.subr.bf16.mxu0 %v15107_v24  ;;  %v5255_v16 = vld [vmem:[#allocation22 + $0xaa0] sm:$0xff] }
 0xa9a   :  { %12768 = vmatprep.subr.bf16.mxu1 %v15171_v21  ;;  %v5263_v24 = vld [vmem:[#allocation22 + $0xae0] sm:$0xff]  ;;  %v5256_v21 = vld [vmem:[#allocation22 + $0xaa8] sm:$0xff] }
 0xa9b   :  { %v15121_v2 = vcombine.high %v5255_v16, %v5263_v24 }
 0xa9c   :  { %12642 = vmatpush1.bf16.msra.mxu0 %v15108_v5  ;;  %v15185_v5 = vcombine.high %v5256_v21, %v5264_v52 }
 0xa9d   :  { %12770 = vmatpush1.bf16.msra.mxu1 %v15172_v10  ;;  %12644 = vmatprep.subr.bf16.mxu0 %v15109_v56  ;;  %v5271_v10 = vld [vmem:[#allocation22 + $0xb20] sm:$0xff] }
 0xa9e   :  { %12772 = vmatprep.subr.bf16.mxu1 %v15173_v31  ;;  %v5279_v56 = vld [vmem:[#allocation22 + $0xb60] sm:$0xff] }
 0xa9f   :  { %v15124_v0 = vcombine.low %v5271_v10, %v5279_v56 }
 0xaa0   :  { %12646 = vmatpush1.bf16.msra.mxu0 %v15110_v61 }
 0xaa1   :  { %12774 = vmatpush1.bf16.msra.mxu1 %v15174_v39  ;;  %12648 = vmatprep.subr.bf16.mxu0 %v15111_v49  ;;  %v15122_v39 = vcombine.low %v5255_v16, %v5263_v24  ;;  %v15186_v49 = vcombine.low %v5256_v21, %v5264_v52  ;;  %v5344_v16 = vld [vmem:[#allocation22 + $0xd68] sm:$0xff] }
 0xaa2   :  { %12776 = vmatprep.subr.bf16.mxu1 %v15175_v9  ;;  %v15123_v9 = vcombine.high %v5271_v10, %v5279_v56  ;;  %v5360_v10 = vld [vmem:[#allocation22 + $0xde8] sm:$0xff] }
 0xaa3   :  { %8752 = vmatmul.mubr.f32.vlgmr.msra.gmra.mrb[40].mxu0 %v18886_v30 }
 0xaa4   :  { %8906 = vmatmul.mubr.f32.vlgmr.msra.gmra.mrb[40].mxu1 %v18886_v30  ;;  %8757 = vmatprep.mubr.f32.mxu0 %v18904_v54 }
 0xaa5   :  { %12650 = vmatpush1.bf16.msra.mxu0 %v15112_v25  ;;  %8911 = vmatprep.mubr.f32.mxu1 %v18904_v54 }
 0xaa6   :  { %12778 = vmatpush1.bf16.msra.mxu1 %v15176_v55  ;;  %12652 = vmatprep.subr.bf16.mxu0 %v15113_v33  ;;  %v5288_v55 = vld [vmem:[#allocation22 + $0xba8] sm:$0xff] }
 0xaa7   :  { %8758 = vmatmul.mubr.f32.gmra.mrb[42].mxu0 %v18906_v59  ;;  %12780 = vmatprep.subr.bf16.mxu1 %v15177_v28  ;;  %v5296_v33 = vld [vmem:[#allocation22 + $0xbe8] sm:$0xff] }
 0xaa8   :  { %8912 = vmatmul.mubr.f32.gmra.mrb[42].mxu1 %v18906_v59  ;;  %8828 = vmatprep.mubr.f32.mxu0 %v18915_v32  ;;  %v15190_v22 = vcombine.low %v5288_v55, %v5296_v33 }
 0xaa9   :  { %12654 = vmatpush1.bf16.msra.mxu0 %v15114_v43  ;;  %8982 = vmatprep.mubr.f32.mxu1 %v18915_v32  ;;  %v15189_v43 = vcombine.high %v5288_v55, %v5296_v33 }
 0xaaa   :  { %12782 = vmatpush1.bf16.msra.mxu1 %v15178_v62  ;;  %12656 = vmatprep.subr.bf16.mxu0 %v15115_v4  ;;  %v5303_v62 = vld [vmem:[#allocation22 + $0xc20] sm:$0xff] }
 0xaab   :  { %12784 = vmatprep.subr.bf16.mxu1 %v15179_v1  ;;  %v5311_v4 = vld [vmem:[#allocation22 + $0xc60] sm:$0xff]  ;;  %v5304_v1 = vld [vmem:[#allocation22 + $0xc28] sm:$0xff] }
 0xaac   :  { %v15127_v11 = vcombine.high %v5303_v62, %v5311_v4  ;;  %v15128_v7 = vcombine.low %v5303_v62, %v5311_v4  ;;  %v15192_v63 = vcombine.low %v5304_v1, %v5312_v3  ;;  %v5392_v62 = vld [vmem:[#allocation22 + $0xee8] sm:$0xff] }
 0xaad   :  { %12658 = vmatpush1.bf16.msra.mxu0 %v15116_v35  ;;  %v15191_v35 = vcombine.high %v5304_v1, %v5312_v3 }
 0xaae   :  { %12786 = vmatpush1.bf16.msra.mxu1 %v15180_v13  ;;  %12660 = vmatprep.subr.bf16.mxu0 %v15117_v23  ;;  %v5319_v13 = vld [vmem:[#allocation22 + $0xca0] sm:$0xff] }
 0xaaf   :  { %12788 = vmatprep.subr.bf16.mxu1 %v15181_v57  ;;  %v5327_v23 = vld [vmem:[#allocation22 + $0xce0] sm:$0xff]  ;;  %v5320_v57 = vld [vmem:[#allocation22 + $0xca8] sm:$0xff] }
 0xab0   :  { %v15129_v29 = vcombine.high %v5319_v13, %v5327_v23  ;;  %v15130_v24 = vcombine.low %v5319_v13, %v5327_v23  ;;  %v15194_v21 = vcombine.low %v5320_v57, %v5328_v6  ;;  %v5408_v13 = vld [vmem:[#allocation22 + $0xf68] sm:$0xff] }
 0xab1   :  { %12662 = vmatpush1.bf16.msra.mxu0 %v15118_v12  ;;  %v15193_v12 = vcombine.high %v5320_v57, %v5328_v6 }
 0xab2   :  { %12790 = vmatpush1.bf16.msra.mxu1 %v15182_v17  ;;  %12664 = vmatprep.subr.bf16.mxu0 %v15119_v8  ;;  %v5335_v17 = vld [vmem:[#allocation22 + $0xd20] sm:$0xff] }
 0xab3   :  { %12792 = vmatprep.subr.bf16.mxu1 %v15183_v36  ;;  %v5343_v8 = vld [vmem:[#allocation22 + $0xd60] sm:$0xff]  ;;  %v5336_v36 = vld [vmem:[#allocation22 + $0xd28] sm:$0xff] }
 0xab4   :  { %v18957_v31 = vpop.f32.mrb[32].mxu0  ;;  %v18959_v38 = vpop.f32.mrb[32].mxu1  ;;  %v15131_v52 = vcombine.high %v5335_v17, %v5343_v8  ;;  %v15132_v56 = vcombine.low %v5335_v17, %v5343_v8  ;;  %v15196_v48 = vcombine.low %v5336_v36, %v5344_v16  ;;  %v5424_v17 = vld [vmem:[#allocation22 + $0xfe8] sm:$0xff] }
 0xab5   :  { %12666 = vmatpush1.bf16.msra.mxu0 %v15120_v60  ;;  %v18961_v46 = vpop.f32.mrb[33].mxu0  ;;  %v18963_v61 = vpop.f32.mrb[33].mxu1  ;;  %v15195_v60 = vcombine.high %v5336_v36, %v5344_v16 }
 0xab6   :  { %12794 = vmatpush1.bf16.msra.mxu1 %v15184_v14  ;;  %12668 = vmatprep.subr.bf16.mxu0 %v15121_v2  ;;  %v5351_v14 = vld [vmem:[#allocation22 + $0xda0] sm:$0xff] }
 0xab7   :  { %12796 = vmatprep.subr.bf16.mxu1 %v15185_v5  ;;  %v5359_v2 = vld [vmem:[#allocation22 + $0xde0] sm:$0xff]  ;;  %v5352_v5 = vld [vmem:[#allocation22 + $0xda8] sm:$0xff] }
 0xab8   :  { %v18965_v53 = vpop.f32.mrb[34].mxu0  ;;  %v18967_v25 = vpop.f32.mrb[34].mxu1  ;;  %v15133_v19 = vcombine.high %v5351_v14, %v5359_v2  ;;  %v15134_v51 = vcombine.low %v5351_v14, %v5359_v2  ;;  %v15198_v55 = vcombine.low %v5352_v5, %v5360_v10  ;;  %v4930_v14 = vld [vmem:[#allocation22 + $0x78] sm:$0xff] }
 0xab9   :  { %12670 = vmatpush1.bf16.msra.mxu0 %v15122_v39  ;;  %v18969_v28 = vpop.f32.mrb[35].mxu0  ;;  %v18971_v50 = vpop.f32.mrb[35].mxu1  ;;  %v15197_v39 = vcombine.high %v5352_v5, %v5360_v10 }
 0xaba   :  { %12798 = vmatpush1.bf16.msra.mxu1 %v15186_v49  ;;  %12672 = vmatprep.subr.bf16.mxu0 %v15123_v9  ;;  %v5367_v49 = vld [vmem:[#allocation22 + $0xe20] sm:$0xff] }
 0xabb   :  { %12800 = vmatprep.subr.bf16.mxu1 %v15187_v18  ;;  %v5375_v9 = vld [vmem:[#allocation22 + $0xe60] sm:$0xff]  ;;  %v5368_v18 = vld [vmem:[#allocation22 + $0xe28] sm:$0xff] }
 0xabc   :  { %v15135_v33 = vcombine.high %v5367_v49, %v5375_v9  ;;  %v15136_v4 = vcombine.low %v5367_v49, %v5375_v9  ;;  %v15200_v1 = vcombine.low %v5368_v18, %v5376_v41  ;;  %v4946_v49 = vld [vmem:[#allocation22 + $0xf8] sm:$0xff] }
 0xabd   :  { %12674 = vmatpush1.bf16.msra.mxu0 %v15124_v0  ;;  %v15199_v0 = vcombine.high %v5368_v18, %v5376_v41 }
 0xabe   :  { %12802 = vmatpush1.bf16.msra.mxu1 %v15188_v34  ;;  %12676 = vmatprep.subr.bf16.mxu0 %v15125_v40  ;;  %v5383_v34 = vld [vmem:[#allocation22 + $0xea0] sm:$0xff] }
 0xabf   :  { %12804 = vmatprep.subr.bf16.mxu1 %v15189_v43  ;;  %v5391_v40 = vld [vmem:[#allocation22 + $0xee0] sm:$0xff]  ;;  %v5384_v43 = vld [vmem:[#allocation22 + $0xea8] sm:$0xff] }
 0xac0   :  { %v15137_v3 = vcombine.high %v5383_v34, %v5391_v40  ;;  %v15138_v23 = vcombine.low %v5383_v34, %v5391_v40  ;;  %v15202_v57 = vcombine.low %v5384_v43, %v5392_v62  ;;  %v4962_v34 = vld [vmem:[#allocation22 + $0x178] sm:$0xff] }
 0xac1   :  { %12678 = vmatpush1.bf16.msra.mxu0 %v15126_v58  ;;  %v15201_v58 = vcombine.high %v5384_v43, %v5392_v62 }
 0xac2   :  { %12806 = vmatpush1.bf16.msra.mxu1 %v15190_v22  ;;  %12680 = vmatprep.subr.bf16.mxu0 %v15127_v11  ;;  %v5399_v22 = vld [vmem:[#allocation22 + $0xf20] sm:$0xff] }
 0xac3   :  { %12808 = vmatprep.subr.bf16.mxu1 %v15191_v35  ;;  %v5407_v11 = vld [vmem:[#allocation22 + $0xf60] sm:$0xff]  ;;  %v5400_v35 = vld [vmem:[#allocation22 + $0xf28] sm:$0xff] }
 0xac4   :  { %v15139_v6 = vcombine.high %v5399_v22, %v5407_v11  ;;  %v15140_v8 = vcombine.low %v5399_v22, %v5407_v11  ;;  %v15204_v36 = vcombine.low %v5400_v35, %v5408_v13  ;;  %v4978_v22 = vld [vmem:[#allocation22 + $0x1f8] sm:$0xff] }
 0xac5   :  { %12682 = vmatpush1.bf16.msra.mxu0 %v15128_v7  ;;  %v15203_v7 = vcombine.high %v5400_v35, %v5408_v13 }
 0xac6   :  { %12810 = vmatpush1.bf16.msra.mxu1 %v15192_v63  ;;  %12684 = vmatprep.subr.bf16.mxu0 %v15129_v29  ;;  %v5415_v63 = vld [vmem:[#allocation22 + $0xfa0] sm:$0xff] }
 0xac7   :  { %12812 = vmatprep.subr.bf16.mxu1 %v15193_v12  ;;  %v5423_v29 = vld [vmem:[#allocation22 + $0xfe0] sm:$0xff]  ;;  %v5416_v12 = vld [vmem:[#allocation22 + $0xfa8] sm:$0xff] }
 0xac8   :  { %v15141_v16 = vcombine.high %v5415_v63, %v5423_v29  ;;  %v15142_v2 = vcombine.low %v5415_v63, %v5423_v29  ;;  %v15206_v5 = vcombine.low %v5416_v12, %v5424_v17  ;;  %v4994_v63 = vld [vmem:[#allocation22 + $0x278] sm:$0xff] }
 0xac9   :  { %12686 = vmatpush1.bf16.msra.mxu0 %v15130_v24  ;;  %v15205_v24 = vcombine.high %v5416_v12, %v5424_v17 }
 0xaca   :  { %12814 = vmatpush1.bf16.msra.mxu1 %v15194_v21  ;;  %12688 = vmatprep.subr.bf16.mxu0 %v15131_v52  ;;  %v4921_v21 = vld [vmem:[#allocation22 + $0x30] sm:$0xff] }
 0xacb   :  { %12816 = vmatprep.subr.bf16.mxu1 %v15195_v60  ;;  %v4929_v52 = vld [vmem:[#allocation22 + $0x70] sm:$0xff]  ;;  %v4922_v60 = vld [vmem:[#allocation22 + $0x38] sm:$0xff] }
 0xacc   :  { %v15207_v10 = vcombine.high %v4921_v21, %v4929_v52  ;;  %v15208_v9 = vcombine.low %v4921_v21, %v4929_v52  ;;  %v15272_v18 = vcombine.low %v4922_v60, %v4930_v14  ;;  %v5010_v21 = vld [vmem:[#allocation22 + $0x2f8] sm:$0xff] }
 0xacd   :  { %12690 = vmatpush1.bf16.msra.mxu0 %v15132_v56  ;;  %v15271_v56 = vcombine.high %v4922_v60, %v4930_v14 }
 0xace   :  { %12818 = vmatpush1.bf16.msra.mxu1 %v15196_v48  ;;  %12692 = vmatprep.subr.bf16.mxu0 %v15133_v19  ;;  %v4937_v48 = vld [vmem:[#allocation22 + $0xb0] sm:$0xff] }
 0xacf   :  { %12820 = vmatprep.subr.bf16.mxu1 %v15197_v39  ;;  %v4945_v19 = vld [vmem:[#allocation22 + $0xf0] sm:$0xff]  ;;  %v4938_v39 = vld [vmem:[#allocation22 + $0xb8] sm:$0xff] }
 0xad0   :  { %v15209_v41 = vcombine.high %v4937_v48, %v4945_v19  ;;  %v15210_v40 = vcombine.low %v4937_v48, %v4945_v19  ;;  %v15274_v43 = vcombine.low %v4938_v39, %v4946_v49  ;;  %v5026_v48 = vld [vmem:[#allocation22 + $0x378] sm:$0xff] }
 0xad1   :  { %12694 = vmatpush1.bf16.msra.mxu0 %v15134_v51  ;;  %v15273_v51 = vcombine.high %v4938_v39, %v4946_v49 }
 0xad2   :  { %12822 = vmatpush1.bf16.msra.mxu1 %v15198_v55  ;;  %12696 = vmatprep.subr.bf16.mxu0 %v15135_v33  ;;  %v4953_v55 = vld [vmem:[#allocation22 + $0x130] sm:$0xff] }
 0xad3   :  { %12824 = vmatprep.subr.bf16.mxu1 %v15199_v0  ;;  %v4961_v33 = vld [vmem:[#allocation22 + $0x170] sm:$0xff]  ;;  %v4954_v0 = vld [vmem:[#allocation22 + $0x138] sm:$0xff] }
 0xad4   :  { %v15211_v62 = vcombine.high %v4953_v55, %v4961_v33  ;;  %v15212_v11 = vcombine.low %v4953_v55, %v4961_v33  ;;  %v15276_v35 = vcombine.low %v4954_v0, %v4962_v34  ;;  %v5042_v55 = vld [vmem:[#allocation22 + $0x3f8] sm:$0xff] }
 0xad5   :  { %12698 = vmatpush1.bf16.msra.mxu0 %v15136_v4  ;;  %v15275_v4 = vcombine.high %v4954_v0, %v4962_v34 }
 0xad6   :  { %12826 = vmatpush1.bf16.msra.mxu1 %v15200_v1  ;;  %12700 = vmatprep.subr.bf16.mxu0 %v15137_v3  ;;  %v4969_v1 = vld [vmem:[#allocation22 + $0x1b0] sm:$0xff] }
 0xad7   :  { %12828 = vmatprep.subr.bf16.mxu1 %v15201_v58  ;;  %v4977_v3 = vld [vmem:[#allocation22 + $0x1f0] sm:$0xff]  ;;  %v4970_v58 = vld [vmem:[#allocation22 + $0x1b8] sm:$0xff] }
 0xad8   :  { %v15213_v13 = vcombine.high %v4969_v1, %v4977_v3  ;;  %v15214_v29 = vcombine.low %v4969_v1, %v4977_v3  ;;  %v15278_v12 = vcombine.low %v4970_v58, %v4978_v22  ;;  %v5058_v1 = vld [vmem:[#allocation22 + $0x478] sm:$0xff] }
 0xad9   :  { %12702 = vmatpush1.bf16.msra.mxu0 %v15138_v23  ;;  %v15277_v23 = vcombine.high %v4970_v58, %v4978_v22 }
 0xada   :  { %12830 = vmatpush1.bf16.msra.mxu1 %v15202_v57  ;;  %12704 = vmatprep.subr.bf16.mxu0 %v15139_v6  ;;  %v4985_v57 = vld [vmem:[#allocation22 + $0x230] sm:$0xff] }
 0xadb   :  { %12832 = vmatprep.subr.bf16.mxu1 %v15203_v7  ;;  %v4993_v6 = vld [vmem:[#allocation22 + $0x270] sm:$0xff]  ;;  %v4986_v7 = vld [vmem:[#allocation22 + $0x238] sm:$0xff] }
 0xadc   :  { %v15215_v17 = vcombine.high %v4985_v57, %v4993_v6  ;;  %v15216_v52 = vcombine.low %v4985_v57, %v4993_v6  ;;  %v15280_v60 = vcombine.low %v4986_v7, %v4994_v63  ;;  %v5074_v57 = vld [vmem:[#allocation22 + $0x4f8] sm:$0xff] }
 0xadd   :  { %12706 = vmatpush1.bf16.msra.mxu0 %v15140_v8  ;;  %v15279_v8 = vcombine.high %v4986_v7, %v4994_v63 }
 0xade   :  { %12834 = vmatpush1.bf16.msra.mxu1 %v15204_v36  ;;  %12708 = vmatprep.subr.bf16.mxu0 %v15141_v16  ;;  %v5001_v36 = vld [vmem:[#allocation22 + $0x2b0] sm:$0xff] }
 0xadf   :  { %12836 = vmatprep.subr.bf16.mxu1 %v15205_v24  ;;  %v5009_v16 = vld [vmem:[#allocation22 + $0x2f0] sm:$0xff]  ;;  %v5002_v24 = vld [vmem:[#allocation22 + $0x2b8] sm:$0xff] }
 0xae0   :  { %v15217_v14 = vcombine.high %v5001_v36, %v5009_v16  ;;  %v15218_v19 = vcombine.low %v5001_v36, %v5009_v16  ;;  %v15282_v39 = vcombine.low %v5002_v24, %v5010_v21  ;;  %v5090_v36 = vld [vmem:[#allocation22 + $0x578] sm:$0xff] }
 0xae1   :  { %12710 = vmatpush1.bf16.msra.mxu0 %v15142_v2  ;;  %v15281_v2 = vcombine.high %v5002_v24, %v5010_v21 }
 0xae2   :  { %12838 = vmatpush1.bf16.msra.mxu1 %v15206_v5  ;;  %12840 = vmatprep.subr.bf16.mxu0 %v15207_v10  ;;  %v5017_v5 = vld [vmem:[#allocation22 + $0x330] sm:$0xff] }
 0xae3   :  { %12968 = vmatprep.subr.bf16.mxu1 %v15271_v56  ;;  %v5025_v10 = vld [vmem:[#allocation22 + $0x370] sm:$0xff]  ;;  %v5018_v56 = vld [vmem:[#allocation22 + $0x338] sm:$0xff] }
 0xae4   :  { %8829 = vmatmul.mubr.f32.vlgmr.msra.gmra.mrb[40].mxu0 %v18892_v27  ;;  %v15219_v49 = vcombine.high %v5017_v5, %v5025_v10  ;;  %v15220_v33 = vcombine.low %v5017_v5, %v5025_v10  ;;  %v15284_v0 = vcombine.low %v5018_v56, %v5026_v48  ;;  %v5106_v5 = vld [vmem:[#allocation22 + $0x5f8] sm:$0xff] }
 0xae5   :  { %8983 = vmatmul.mubr.f32.vlgmr.msra.gmra.mrb[40].mxu1 %v18892_v27  ;;  %8834 = vmatprep.mubr.f32.mxu0 %v18923_v26 }
 0xae6   :  { %8988 = vmatprep.mubr.f32.mxu1 %v18923_v26  ;;  %12842 = vmatpush1.bf16.msra.mxu0 %v15208_v9  ;;  %v15283_v9 = vcombine.high %v5018_v56, %v5026_v48 }
 0xae7   :  { %12970 = vmatpush1.bf16.msra.mxu1 %v15272_v18  ;;  %12844 = vmatprep.subr.bf16.mxu0 %v15209_v41  ;;  %v5033_v18 = vld [vmem:[#allocation22 + $0x3b0] sm:$0xff] }
 0xae8   :  { %8835 = vmatmul.mubr.f32.gmra.mrb[42].mxu0 %v18908_v15  ;;  %12972 = vmatprep.subr.bf16.mxu1 %v15273_v51  ;;  %v5041_v41 = vld [vmem:[#allocation22 + $0x3f0] sm:$0xff]  ;;  %v5034_v51 = vld [vmem:[#allocation22 + $0x3b8] sm:$0xff] }
 0xae9   :  { %8989 = vmatmul.mubr.f32.gmra.mrb[42].mxu1 %v18908_v15  ;;  %9059 = vmatprep.mubr.f32.mxu0 %v18884_v20  ;;  %v15221_v34 = vcombine.high %v5033_v18, %v5041_v41  ;;  %v15222_v3 = vcombine.low %v5033_v18, %v5041_v41  ;;  %v15286_v58 = vcombine.low %v5034_v51, %v5042_v55  ;;  %v5122_v18 = vld [vmem:[#allocation22 + $0x678] sm:$0xff] }
 0xaea   :  { %12846 = vmatpush1.bf16.msra.mxu0 %v15210_v40  ;;  %9213 = vmatprep.mubr.f32.mxu1 %v18884_v20  ;;  %v15285_v40 = vcombine.high %v5034_v51, %v5042_v55 }
 0xaeb   :  { %12974 = vmatpush1.bf16.msra.mxu1 %v15274_v43  ;;  %12848 = vmatprep.subr.bf16.mxu0 %v15211_v62  ;;  %v5049_v43 = vld [vmem:[#allocation22 + $0x430] sm:$0xff] }
 0xaec   :  { %12976 = vmatprep.subr.bf16.mxu1 %v15275_v4  ;;  %v5057_v62 = vld [vmem:[#allocation22 + $0x470] sm:$0xff]  ;;  %v5050_v4 = vld [vmem:[#allocation22 + $0x438] sm:$0xff] }
 0xaed   :  { %v15223_v22 = vcombine.high %v5049_v43, %v5057_v62  ;;  %v15224_v6 = vcombine.low %v5049_v43, %v5057_v62  ;;  %v15288_v7 = vcombine.low %v5050_v4, %v5058_v1  ;;  %v5138_v43 = vld [vmem:[#allocation22 + $0x6f8] sm:$0xff] }
 0xaee   :  { %12850 = vmatpush1.bf16.msra.mxu0 %v15212_v11  ;;  %v15287_v11 = vcombine.high %v5050_v4, %v5058_v1 }
 0xaef   :  { %12978 = vmatpush1.bf16.msra.mxu1 %v15276_v35  ;;  %12852 = vmatprep.subr.bf16.mxu0 %v15213_v13  ;;  %v5065_v35 = vld [vmem:[#allocation22 + $0x4b0] sm:$0xff] }
 0xaf0   :  { %12980 = vmatprep.subr.bf16.mxu1 %v15277_v23  ;;  %v5073_v13 = vld [vmem:[#allocation22 + $0x4f0] sm:$0xff]  ;;  %v5066_v23 = vld [vmem:[#allocation22 + $0x4b8] sm:$0xff] }
 0xaf1   :  { %v15225_v63 = vcombine.high %v5065_v35, %v5073_v13  ;;  %v15226_v16 = vcombine.low %v5065_v35, %v5073_v13  ;;  %v15290_v24 = vcombine.low %v5066_v23, %v5074_v57  ;;  %v5154_v35 = vld [vmem:[#allocation22 + $0x778] sm:$0xff] }
 0xaf2   :  { %12854 = vmatpush1.bf16.msra.mxu0 %v15214_v29  ;;  %v15289_v29 = vcombine.high %v5066_v23, %v5074_v57 }
 0xaf3   :  { %12982 = vmatpush1.bf16.msra.mxu1 %v15278_v12  ;;  %12856 = vmatprep.subr.bf16.mxu0 %v15215_v17  ;;  %v5081_v12 = vld [vmem:[#allocation22 + $0x530] sm:$0xff] }
 0xaf4   :  { %12984 = vmatprep.subr.bf16.mxu1 %v15279_v8  ;;  %v5089_v17 = vld [vmem:[#allocation22 + $0x570] sm:$0xff]  ;;  %v5082_v8 = vld [vmem:[#allocation22 + $0x538] sm:$0xff] }
 0xaf5   :  { %v15227_v21 = vcombine.high %v5081_v12, %v5089_v17  ;;  %v15228_v10 = vcombine.low %v5081_v12, %v5089_v17  ;;  %v15292_v56 = vcombine.low %v5082_v8, %v5090_v36  ;;  %v5170_v12 = vld [vmem:[#allocation22 + $0x7f8] sm:$0xff] }
 0xaf6   :  { %12858 = vmatpush1.bf16.msra.mxu0 %v15216_v52  ;;  %v15291_v52 = vcombine.high %v5082_v8, %v5090_v36 }
 0xaf7   :  { %12986 = vmatpush1.bf16.msra.mxu1 %v15280_v60  ;;  %12860 = vmatprep.subr.bf16.mxu0 %v15217_v14  ;;  %v5097_v60 = vld [vmem:[#allocation22 + $0x5b0] sm:$0xff] }
 0xaf8   :  { %12988 = vmatprep.subr.bf16.mxu1 %v15281_v2  ;;  %v5105_v14 = vld [vmem:[#allocation22 + $0x5f0] sm:$0xff]  ;;  %v5098_v2 = vld [vmem:[#allocation22 + $0x5b8] sm:$0xff] }
 0xaf9   :  { %v15229_v48 = vcombine.high %v5097_v60, %v5105_v14  ;;  %v15230_v41 = vcombine.low %v5097_v60, %v5105_v14  ;;  %v15294_v51 = vcombine.low %v5098_v2, %v5106_v5  ;;  %v5186_v60 = vld [vmem:[#allocation22 + $0x878] sm:$0xff] }
 0xafa   :  { %12862 = vmatpush1.bf16.msra.mxu0 %v15218_v19  ;;  %v15293_v19 = vcombine.high %v5098_v2, %v5106_v5 }
 0xafb   :  { %12990 = vmatpush1.bf16.msra.mxu1 %v15282_v39  ;;  %12864 = vmatprep.subr.bf16.mxu0 %v15219_v49  ;;  %v5113_v39 = vld [vmem:[#allocation22 + $0x630] sm:$0xff] }
 0xafc   :  { %12992 = vmatprep.subr.bf16.mxu1 %v15283_v9  ;;  %v5121_v49 = vld [vmem:[#allocation22 + $0x670] sm:$0xff]  ;;  %v5114_v9 = vld [vmem:[#allocation22 + $0x638] sm:$0xff] }
 0xafd   :  { %v15231_v55 = vcombine.high %v5113_v39, %v5121_v49  ;;  %v15232_v62 = vcombine.low %v5113_v39, %v5121_v49  ;;  %v15296_v4 = vcombine.low %v5114_v9, %v5122_v18  ;;  %v5202_v39 = vld [vmem:[#allocation22 + $0x8f8] sm:$0xff] }
 0xafe   :  { %12866 = vmatpush1.bf16.msra.mxu0 %v15220_v33  ;;  %v15295_v33 = vcombine.high %v5114_v9, %v5122_v18 }
 0xaff   :  { %12994 = vmatpush1.bf16.msra.mxu1 %v15284_v0  ;;  %12868 = vmatprep.subr.bf16.mxu0 %v15221_v34  ;;  %v5129_v0 = vld [vmem:[#allocation22 + $0x6b0] sm:$0xff] }
 0xb00   :  { %12996 = vmatprep.subr.bf16.mxu1 %v15285_v40  ;;  %v5137_v34 = vld [vmem:[#allocation22 + $0x6f0] sm:$0xff]  ;;  %v5130_v40 = vld [vmem:[#allocation22 + $0x6b8] sm:$0xff] }
 0xb01   :  { %v15233_v1 = vcombine.high %v5129_v0, %v5137_v34  ;;  %v15234_v13 = vcombine.low %v5129_v0, %v5137_v34  ;;  %v15298_v23 = vcombine.low %v5130_v40, %v5138_v43  ;;  %v5218_v0 = vld [vmem:[#allocation22 + $0x978] sm:$0xff] }
 0xb02   :  { %12870 = vmatpush1.bf16.msra.mxu0 %v15222_v3  ;;  %v15297_v3 = vcombine.high %v5130_v40, %v5138_v43 }
 0xb03   :  { %12998 = vmatpush1.bf16.msra.mxu1 %v15286_v58  ;;  %12872 = vmatprep.subr.bf16.mxu0 %v15223_v22  ;;  %v5145_v58 = vld [vmem:[#allocation22 + $0x730] sm:$0xff] }
 0xb04   :  { %13000 = vmatprep.subr.bf16.mxu1 %v15287_v11  ;;  %v5153_v22 = vld [vmem:[#allocation22 + $0x770] sm:$0xff]  ;;  %v5146_v11 = vld [vmem:[#allocation22 + $0x738] sm:$0xff] }
 0xb05   :  { %v15235_v57 = vcombine.high %v5145_v58, %v5153_v22  ;;  %v15236_v17 = vcombine.low %v5145_v58, %v5153_v22  ;;  %v15300_v8 = vcombine.low %v5146_v11, %v5154_v35  ;;  %v5234_v58 = vld [vmem:[#allocation22 + $0x9f8] sm:$0xff] }
 0xb06   :  { %12874 = vmatpush1.bf16.msra.mxu0 %v15224_v6  ;;  %v15299_v6 = vcombine.high %v5146_v11, %v5154_v35 }
 0xb07   :  { %13002 = vmatpush1.bf16.msra.mxu1 %v15288_v7  ;;  %12876 = vmatprep.subr.bf16.mxu0 %v15225_v63  ;;  %v5161_v7 = vld [vmem:[#allocation22 + $0x7b0] sm:$0xff] }
 0xb08   :  { %13004 = vmatprep.subr.bf16.mxu1 %v15289_v29  ;;  %v5169_v63 = vld [vmem:[#allocation22 + $0x7f0] sm:$0xff]  ;;  %v5162_v29 = vld [vmem:[#allocation22 + $0x7b8] sm:$0xff] }
 0xb09   :  { %v15237_v36 = vcombine.high %v5161_v7, %v5169_v63  ;;  %v15238_v14 = vcombine.low %v5161_v7, %v5169_v63  ;;  %v15302_v2 = vcombine.low %v5162_v29, %v5170_v12  ;;  %v5250_v7 = vld [vmem:[#allocation22 + $0xa78] sm:$0xff] }
 0xb0a   :  { %12878 = vmatpush1.bf16.msra.mxu0 %v15226_v16  ;;  %v15301_v16 = vcombine.high %v5162_v29, %v5170_v12 }
 0xb0b   :  { %13006 = vmatpush1.bf16.msra.mxu1 %v15290_v24  ;;  %12880 = vmatprep.subr.bf16.mxu0 %v15227_v21  ;;  %v5177_v24 = vld [vmem:[#allocation22 + $0x830] sm:$0xff] }
 0xb0c   :  { %13008 = vmatprep.subr.bf16.mxu1 %v15291_v52  ;;  %v5185_v21 = vld [vmem:[#allocation22 + $0x870] sm:$0xff]  ;;  %v5178_v52 = vld [vmem:[#allocation22 + $0x838] sm:$0xff] }
 0xb0d   :  { %v15239_v5 = vcombine.high %v5177_v24, %v5185_v21  ;;  %v15240_v49 = vcombine.low %v5177_v24, %v5185_v21  ;;  %v15304_v9 = vcombine.low %v5178_v52, %v5186_v60  ;;  %v5266_v24 = vld [vmem:[#allocation22 + $0xaf8] sm:$0xff] }
 0xb0e   :  { %12882 = vmatpush1.bf16.msra.mxu0 %v15228_v10  ;;  %v15303_v10 = vcombine.high %v5178_v52, %v5186_v60 }
 0xb0f   :  { %13010 = vmatpush1.bf16.msra.mxu1 %v15292_v56  ;;  %12884 = vmatprep.subr.bf16.mxu0 %v15229_v48  ;;  %v5193_v56 = vld [vmem:[#allocation22 + $0x8b0] sm:$0xff] }
 0xb10   :  { %13012 = vmatprep.subr.bf16.mxu1 %v15293_v19  ;;  %v5201_v48 = vld [vmem:[#allocation22 + $0x8f0] sm:$0xff]  ;;  %v5194_v19 = vld [vmem:[#allocation22 + $0x8b8] sm:$0xff] }
 0xb11   :  { %v15241_v18 = vcombine.high %v5193_v56, %v5201_v48  ;;  %v15242_v34 = vcombine.low %v5193_v56, %v5201_v48  ;;  %v15306_v40 = vcombine.low %v5194_v19, %v5202_v39 }
 0xb12   :  { %12886 = vmatpush1.bf16.msra.mxu0 %v15230_v41  ;;  %v15305_v41 = vcombine.high %v5194_v19, %v5202_v39  ;;  %v5274_v19 = vld [vmem:[#allocation22 + $0xb38] sm:$0xff] }
 0xb13   :  { %13014 = vmatpush1.bf16.msra.mxu1 %v15294_v51  ;;  %12888 = vmatprep.subr.bf16.mxu0 %v15231_v55  ;;  %v5209_v51 = vld [vmem:[#allocation22 + $0x930] sm:$0xff]  ;;  %v5282_v39 = vld [vmem:[#allocation22 + $0xb78] sm:$0xff] }
 0xb14   :  { %13016 = vmatprep.subr.bf16.mxu1 %v15295_v33  ;;  %v5217_v55 = vld [vmem:[#allocation22 + $0x970] sm:$0xff]  ;;  %v5210_v33 = vld [vmem:[#allocation22 + $0x938] sm:$0xff] }
 0xb15   :  { %v15243_v43 = vcombine.high %v5209_v51, %v5217_v55  ;;  %v15244_v22 = vcombine.low %v5209_v51, %v5217_v55  ;;  %v15308_v11 = vcombine.low %v5210_v33, %v5218_v0  ;;  %v15315_v55 = vcombine.high %v5274_v19, %v5282_v39 }
 0xb16   :  { %12890 = vmatpush1.bf16.msra.mxu0 %v15232_v62  ;;  %v15307_v62 = vcombine.high %v5210_v33, %v5218_v0  ;;  %v5289_v33 = vld [vmem:[#allocation22 + $0xbb0] sm:$0xff] }
 0xb17   :  { %13018 = vmatpush1.bf16.msra.mxu1 %v15296_v4  ;;  %12892 = vmatprep.subr.bf16.mxu0 %v15233_v1  ;;  %v5225_v4 = vld [vmem:[#allocation22 + $0x9b0] sm:$0xff] }
 0xb18   :  { %13020 = vmatprep.subr.bf16.mxu1 %v15297_v3  ;;  %v5233_v1 = vld [vmem:[#allocation22 + $0x9f0] sm:$0xff]  ;;  %v5226_v3 = vld [vmem:[#allocation22 + $0x9b8] sm:$0xff] }
 0xb19   :  { %v15245_v35 = vcombine.high %v5225_v4, %v5233_v1  ;;  %v15246_v63 = vcombine.low %v5225_v4, %v5233_v1  ;;  %v15310_v29 = vcombine.low %v5226_v3, %v5234_v58  ;;  %v5297_v0 = vld [vmem:[#allocation22 + $0xbf0] sm:$0xff] }
 0xb1a   :  { %12894 = vmatpush1.bf16.msra.mxu0 %v15234_v13  ;;  %v15309_v13 = vcombine.high %v5226_v3, %v5234_v58  ;;  %v15316_v3 = vcombine.low %v5274_v19, %v5282_v39  ;;  %v15253_v58 = vcombine.high %v5289_v33, %v5297_v0 }
 0xb1b   :  { %13022 = vmatpush1.bf16.msra.mxu1 %v15298_v23  ;;  %12896 = vmatprep.subr.bf16.mxu0 %v15235_v57  ;;  %v5241_v23 = vld [vmem:[#allocation22 + $0xa30] sm:$0xff] }
 0xb1c   :  { %13024 = vmatprep.subr.bf16.mxu1 %v15299_v6  ;;  %v5249_v57 = vld [vmem:[#allocation22 + $0xa70] sm:$0xff]  ;;  %v5242_v6 = vld [vmem:[#allocation22 + $0xa38] sm:$0xff] }
 0xb1d   :  { %v15247_v12 = vcombine.high %v5241_v23, %v5249_v57  ;;  %v15248_v21 = vcombine.low %v5241_v23, %v5249_v57  ;;  %v15312_v52 = vcombine.low %v5242_v6, %v5250_v7  ;;  %v5314_v23 = vld [vmem:[#allocation22 + $0xc78] sm:$0xff]  ;;  %v15254_v57 = vcombine.low %v5289_v33, %v5297_v0 }
 0xb1e   :  { %12898 = vmatpush1.bf16.msra.mxu0 %v15236_v17  ;;  %v15311_v17 = vcombine.high %v5242_v6, %v5250_v7  ;;  %v5362_v33 = vld [vmem:[#allocation22 + $0xdf8] sm:$0xff] }
 0xb1f   :  { %13026 = vmatpush1.bf16.msra.mxu1 %v15300_v8  ;;  %12900 = vmatprep.subr.bf16.mxu0 %v15237_v36  ;;  %v5257_v8 = vld [vmem:[#allocation22 + $0xab0] sm:$0xff] }
 0xb20   :  { %13028 = vmatprep.subr.bf16.mxu1 %v15301_v16  ;;  %v5265_v36 = vld [vmem:[#allocation22 + $0xaf0] sm:$0xff]  ;;  %v5258_v16 = vld [vmem:[#allocation22 + $0xab8] sm:$0xff] }
 0xb21   :  { %v15249_v60 = vcombine.high %v5257_v8, %v5265_v36 }
 0xb22   :  { %12902 = vmatpush1.bf16.msra.mxu0 %v15238_v14 }
 0xb23   :  { %13030 = vmatpush1.bf16.msra.mxu1 %v15302_v2  ;;  %12904 = vmatprep.subr.bf16.mxu0 %v15239_v5  ;;  %v15313_v2 = vcombine.high %v5258_v16, %v5266_v24  ;;  %v5273_v5 = vld [vmem:[#allocation22 + $0xb30] sm:$0xff] }
 0xb24   :  { %13032 = vmatprep.subr.bf16.mxu1 %v15303_v10  ;;  %v5281_v10 = vld [vmem:[#allocation22 + $0xb70] sm:$0xff] }
 0xb25   :  { %9060 = vmatmul.mubr.f32.vlgmr.msra.gmra.mrb[44].mxu0 %v18886_v30  ;;  %v15252_v1 = vcombine.low %v5273_v5, %v5281_v10 }
 0xb26   :  { %9214 = vmatmul.mubr.f32.vlgmr.msra.gmra.mrb[44].mxu1 %v18886_v30  ;;  %9065 = vmatprep.mubr.f32.mxu0 %v18904_v54 }
 0xb27   :  { %12906 = vmatpush1.bf16.msra.mxu0 %v15240_v49  ;;  %9219 = vmatprep.mubr.f32.mxu1 %v18904_v54 }
 0xb28   :  { %13034 = vmatpush1.bf16.msra.mxu1 %v15304_v9  ;;  %12908 = vmatprep.subr.bf16.mxu0 %v15241_v18  ;;  %v15250_v9 = vcombine.low %v5257_v8, %v5265_v36  ;;  %v15314_v18 = vcombine.low %v5258_v16, %v5266_v24  ;;  %v5330_v8 = vld [vmem:[#allocation22 + $0xcf8] sm:$0xff] }
 0xb29   :  { %9066 = vmatmul.mubr.f32.gmra.mrb[46].mxu0 %v18906_v59  ;;  %13036 = vmatprep.subr.bf16.mxu1 %v15305_v41  ;;  %v15251_v41 = vcombine.high %v5273_v5, %v5281_v10  ;;  %v5346_v5 = vld [vmem:[#allocation22 + $0xd78] sm:$0xff] }
 0xb2a   :  { %9220 = vmatmul.mubr.f32.gmra.mrb[46].mxu1 %v18906_v59  ;;  %9136 = vmatprep.mubr.f32.mxu0 %v18915_v32 }
 0xb2b   :  { %12910 = vmatpush1.bf16.msra.mxu0 %v15242_v34  ;;  %9290 = vmatprep.mubr.f32.mxu1 %v18915_v32 }
 0xb2c   :  { %13038 = vmatpush1.bf16.msra.mxu1 %v15306_v40  ;;  %12912 = vmatprep.subr.bf16.mxu0 %v15243_v43  ;;  %v5290_v43 = vld [vmem:[#allocation22 + $0xbb8] sm:$0xff] }
 0xb2d   :  { %13040 = vmatprep.subr.bf16.mxu1 %v15307_v62  ;;  %v5298_v62 = vld [vmem:[#allocation22 + $0xbf8] sm:$0xff] }
 0xb2e   :  { %v15318_v6 = vcombine.low %v5290_v43, %v5298_v62 }
 0xb2f   :  { %12914 = vmatpush1.bf16.msra.mxu0 %v15244_v22  ;;  %v15317_v22 = vcombine.high %v5290_v43, %v5298_v62 }
 0xb30   :  { %13042 = vmatpush1.bf16.msra.mxu1 %v15308_v11  ;;  %12916 = vmatprep.subr.bf16.mxu0 %v15245_v35  ;;  %v5305_v11 = vld [vmem:[#allocation22 + $0xc30] sm:$0xff] }
 0xb31   :  { %13044 = vmatprep.subr.bf16.mxu1 %v15309_v13  ;;  %v5313_v35 = vld [vmem:[#allocation22 + $0xc70] sm:$0xff]  ;;  %v5306_v13 = vld [vmem:[#allocation22 + $0xc38] sm:$0xff] }
 0xb32   :  { %v15255_v7 = vcombine.high %v5305_v11, %v5313_v35  ;;  %v15256_v36 = vcombine.low %v5305_v11, %v5313_v35  ;;  %v15320_v16 = vcombine.low %v5306_v13, %v5314_v23  ;;  %v5378_v11 = vld [vmem:[#allocation22 + $0xe78] sm:$0xff] }
 0xb33   :  { %12918 = vmatpush1.bf16.msra.mxu0 %v15246_v63  ;;  %v15319_v63 = vcombine.high %v5306_v13, %v5314_v23 }
 0xb34   :  { %13046 = vmatpush1.bf16.msra.mxu1 %v15310_v29  ;;  %12920 = vmatprep.subr.bf16.mxu0 %v15247_v12  ;;  %v5321_v29 = vld [vmem:[#allocation22 + $0xcb0] sm:$0xff] }
 0xb35   :  { %13048 = vmatprep.subr.bf16.mxu1 %v15311_v17  ;;  %v18989_v14 = vpop.f32.mrb[36].mxu0  ;;  %v5329_v12 = vld [vmem:[#allocation22 + $0xcf0] sm:$0xff]  ;;  %v5322_v17 = vld [vmem:[#allocation22 + $0xcb8] sm:$0xff] }
 0xb36   :  { %v18991_v56 = vpop.f32.mrb[36].mxu1  ;;  %v18993_v48 = vpop.f32.mrb[37].mxu0  ;;  %v15257_v24 = vcombine.high %v5321_v29, %v5329_v12  ;;  %v15258_v10 = vcombine.low %v5321_v29, %v5329_v12  ;;  %v15322_v19 = vcombine.low %v5322_v17, %v5330_v8  ;;  %v5394_v29 = vld [vmem:[#allocation22 + $0xef8] sm:$0xff] }
 0xb37   :  { %12922 = vmatpush1.bf16.msra.mxu0 %v15248_v21  ;;  %v18995_v49 = vpop.f32.mrb[37].mxu1  ;;  %v15321_v21 = vcombine.high %v5322_v17, %v5330_v8 }
 0xb38   :  { %13050 = vmatpush1.bf16.msra.mxu1 %v15312_v52  ;;  %12924 = vmatprep.subr.bf16.mxu0 %v15249_v60  ;;  %v5337_v52 = vld [vmem:[#allocation22 + $0xd30] sm:$0xff] }
 0xb39   :  { %13052 = vmatprep.subr.bf16.mxu1 %v15313_v2  ;;  %v18997_v51 = vpop.f32.mrb[38].mxu0  ;;  %v5345_v60 = vld [vmem:[#allocation22 + $0xd70] sm:$0xff]  ;;  %v5338_v2 = vld [vmem:[#allocation22 + $0xd38] sm:$0xff] }
 0xb3a   :  { %v18999_v34 = vpop.f32.mrb[38].mxu1  ;;  %v19001_v40 = vpop.f32.mrb[39].mxu0  ;;  %v15259_v39 = vcombine.high %v5337_v52, %v5345_v60  ;;  %v15260_v0 = vcombine.low %v5337_v52, %v5345_v60  ;;  %v15324_v43 = vcombine.low %v5338_v2, %v5346_v5  ;;  %v5410_v52 = vld [vmem:[#allocation22 + $0xf78] sm:$0xff] }
 0xb3b   :  { %12926 = vmatpush1.bf16.msra.mxu0 %v15250_v9  ;;  %v19003_v4 = vpop.f32.mrb[39].mxu1  ;;  %v15323_v9 = vcombine.high %v5338_v2, %v5346_v5 }
 0xb3c   :  { %13054 = vmatpush1.bf16.msra.mxu1 %v15314_v18  ;;  %12928 = vmatprep.subr.bf16.mxu0 %v15251_v41  ;;  %v5353_v18 = vld [vmem:[#allocation22 + $0xdb0] sm:$0xff] }
 0xb3d   :  { %13056 = vmatprep.subr.bf16.mxu1 %v15315_v55  ;;  %v5361_v41 = vld [vmem:[#allocation22 + $0xdf0] sm:$0xff]  ;;  %v5354_v55 = vld [vmem:[#allocation22 + $0xdb8] sm:$0xff] }
 0xb3e   :  { %v15261_v62 = vcombine.high %v5353_v18, %v5361_v41  ;;  %v15262_v35 = vcombine.low %v5353_v18, %v5361_v41  ;;  %v15326_v13 = vcombine.low %v5354_v55, %v5362_v33  ;;  %v5426_v18 = vld [vmem:[#allocation22 + $0xff8] sm:$0xff] }
 0xb3f   :  { %12930 = vmatpush1.bf16.msra.mxu0 %v15252_v1  ;;  %v15325_v1 = vcombine.high %v5354_v55, %v5362_v33 }
 0xb40   :  { %13058 = vmatpush1.bf16.msra.mxu1 %v15316_v3  ;;  %12932 = vmatprep.subr.bf16.mxu0 %v15253_v58  ;;  %v5369_v3 = vld [vmem:[#allocation22 + $0xe30] sm:$0xff] }
 0xb41   :  { %13060 = vmatprep.subr.bf16.mxu1 %v15317_v22  ;;  %v5377_v58 = vld [vmem:[#allocation22 + $0xe70] sm:$0xff]  ;;  %v5370_v22 = vld [vmem:[#allocation22 + $0xe38] sm:$0xff] }
 0xb42   :  { %v15263_v23 = vcombine.high %v5369_v3, %v5377_v58  ;;  %v15264_v12 = vcombine.low %v5369_v3, %v5377_v58  ;;  %v15328_v17 = vcombine.low %v5370_v22, %v5378_v11  ;;  %v16702_v3 = vld [vmem:[#allocation25 + $0x4] ss:$16 sps:$4 sm:$0xff]  }
 0xb43   :  { %12934 = vmatpush1.bf16.msra.mxu0 %v15254_v57  ;;  %v15327_v57 = vcombine.high %v5370_v22, %v5378_v11  ;;  %v16705_v22 = vld [vmem:[#allocation25 + $0xc] ss:$16 sps:$4 sm:$0xff]   ;;  %v16704_v11 = vld [vmem:[#allocation25] ss:$16 sps:$4 sm:$0xff]  }
 0xb44   :  { %13062 = vmatpush1.bf16.msra.mxu1 %v15318_v6  ;;  %12936 = vmatprep.subr.bf16.mxu0 %v15255_v7  ;;  %v5385_v6 = vld [vmem:[#allocation22 + $0xeb0] sm:$0xff] }
 0xb45   :  { %13064 = vmatprep.subr.bf16.mxu1 %v15319_v63  ;;  %v5393_v7 = vld [vmem:[#allocation22 + $0xef0] sm:$0xff]  ;;  %v5386_v63 = vld [vmem:[#allocation22 + $0xeb8] sm:$0xff] }
 0xb46   :  { %v15265_v8 = vcombine.high %v5385_v6, %v5393_v7  ;;  %v15266_v60 = vcombine.low %v5385_v6, %v5393_v7  ;;  %v15330_v2 = vcombine.low %v5386_v63, %v5394_v29  ;;  %v16710_v6 = vld [vmem:[#allocation25 + $0x20] ss:$16 sps:$4 sm:$0xff]  }
 0xb47   :  { %12938 = vmatpush1.bf16.msra.mxu0 %v15256_v36  ;;  %v15329_v36 = vcombine.high %v5386_v63, %v5394_v29  ;;  %v16713_v63 = vld [vmem:[#allocation25 + $0x28] ss:$16 sps:$4 sm:$0xff]   ;;  %v16714_v29 = vld [vmem:[#allocation25 + $0x44] ss:$16 sps:$4 sm:$0xff]  }
 0xb48   :  { %13066 = vmatpush1.bf16.msra.mxu1 %v15320_v16  ;;  %12940 = vmatprep.subr.bf16.mxu0 %v15257_v24  ;;  %v5401_v16 = vld [vmem:[#allocation22 + $0xf30] sm:$0xff] }
 0xb49   :  { %13068 = vmatprep.subr.bf16.mxu1 %v15321_v21  ;;  %v5409_v24 = vld [vmem:[#allocation22 + $0xf70] sm:$0xff]  ;;  %v5402_v21 = vld [vmem:[#allocation22 + $0xf38] sm:$0xff] }
 0xb4a   :  { %v15267_v5 = vcombine.high %v5401_v16, %v5409_v24  ;;  %v15268_v41 = vcombine.low %v5401_v16, %v5409_v24  ;;  %v15332_v55 = vcombine.low %v5402_v21, %v5410_v52  ;;  %v16722_v16 = vld [vmem:[#allocation25 + $0x60] ss:$16 sps:$4 sm:$0xff]   ;;  %v16725_v24 = vld [vmem:[#allocation25 + $0x68] ss:$16 sps:$4 sm:$0xff]  }
 0xb4b   :  { %12942 = vmatpush1.bf16.msra.mxu0 %v15258_v10  ;;  %v15331_v10 = vcombine.high %v5402_v21, %v5410_v52  ;;  %v16726_v21 = vld [vmem:[#allocation25 + $0x84] ss:$16 sps:$4 sm:$0xff]   ;;  %v16729_v52 = vld [vmem:[#allocation25 + $0x8c] ss:$16 sps:$4 sm:$0xff]  }
 0xb4c   :  { %13070 = vmatpush1.bf16.msra.mxu1 %v15322_v19  ;;  %12944 = vmatprep.subr.bf16.mxu0 %v15259_v39  ;;  %v5417_v19 = vld [vmem:[#allocation22 + $0xfb0] sm:$0xff] }
 0xb4d   :  { %13072 = vmatprep.subr.bf16.mxu1 %v15323_v9  ;;  %v5425_v39 = vld [vmem:[#allocation22 + $0xff0] sm:$0xff]  ;;  %v5418_v9 = vld [vmem:[#allocation22 + $0xfb8] sm:$0xff] }
 0xb4e   :  { %v15269_v33 = vcombine.high %v5417_v19, %v5425_v39 }
 0xb4f   :  { %12946 = vmatpush1.bf16.msra.mxu0 %v15260_v0  ;;  %v15333_v0 = vcombine.high %v5418_v9, %v5426_v18 }
 0xb50   :  { %13074 = vmatpush1.bf16.msra.mxu1 %v15324_v43  ;;  %12948 = vmatprep.subr.bf16.mxu0 %v15261_v62  ;;  %v19005_v43 = vld [vmem:[#allocation23] sm:$0xff]  ;;  %v15270_v62 = vcombine.low %v5417_v19, %v5425_v39  ;;  %v16737_v39 = vld [vmem:[#allocation25 + $0xa8] ss:$16 sps:$4 sm:$0xff]  }
 0xb51   :  { %13076 = vmatprep.subr.bf16.mxu1 %v15325_v1  ;;  %v15334_v1 = vcombine.low %v5418_v9, %v5426_v18  ;;  %v19009_v58 = vrot.slane %v19005_v43, %v18406_v45  ;;  %v16734_v19 = vld [vmem:[#allocation25 + $0xa0] ss:$16 sps:$4 sm:$0xff]   ;;  %v16738_v9 = vld [vmem:[#allocation25 + $0xc4] ss:$16 sps:$4 sm:$0xff]   ;;  %v16741_v18 = vld [vmem:[#allocation25 + $0xcc] ss:$16 sps:$4 sm:$0xff]  }
 0xb53   :  { %12950 = vmatpush1.bf16.msra.mxu0 %v15262_v35  ;;  %v14152_v35 = vadd.f32 %v18961_v46, %v19009_v58  ;;  %v16717_v46 = vld [vmem:[#allocation25 + $0x4c] ss:$16 sps:$4 sm:$0xff]  }
 0xb54   :  { %13078 = vmatpush1.bf16.msra.mxu1 %v15326_v13  ;;  %12952 = vmatprep.subr.bf16.mxu0 %v15263_v23  ;;  %v16707_v13 = vld [vmem:[#allocation25 + $0x8] ss:$16 sps:$4 sm:$0xff]   ;;  %v16708_v23 = vld [vmem:[#allocation25 + $0x24] ss:$16 sps:$4 sm:$0xff]  }
 0xb55   :  { %13080 = vmatprep.subr.bf16.mxu1 %v15327_v57  ;;  %v16711_v57 = vld [vmem:[#allocation25 + $0x2c] ss:$16 sps:$4 sm:$0xff]   ;;  %v9304_v7 = vmax.f32 %v14152_v35, 0.0  ;;  %v16755_v35 = vld [vmem:[#allocation25 + $0x108] ss:$16 sps:$4 sm:$0xff]  }
 0xb57   :  { %12954 = vmatpush1.bf16.msra.mxu0 %v15264_v12  ;;  %v16716_v12 = vld [vmem:[#allocation25 + $0x40] ss:$16 sps:$4 sm:$0xff]  }
 0xb58   :  { %13082 = vmatpush1.bf16.msra.mxu1 %v15328_v17  ;;  %12956 = vmatprep.subr.bf16.mxu0 %v15265_v8  ;;  %v16719_v17 = vld [vmem:[#allocation25 + $0x48] ss:$16 sps:$4 sm:$0xff]   ;;  %v16720_v8 = vld [vmem:[#allocation25 + $0x64] ss:$16 sps:$4 sm:$0xff]  }
 0xb59   :  { %13084 = vmatprep.subr.bf16.mxu1 %v15329_v36  ;;  %v16723_v36 = vld [vmem:[#allocation25 + $0x6c] ss:$16 sps:$4 sm:$0xff]  }
 0xb5b   :  { %12958 = vmatpush1.bf16.msra.mxu0 %v15266_v60  ;;  %v16728_v60 = vld [vmem:[#allocation25 + $0x80] ss:$16 sps:$4 sm:$0xff]  }
 0xb5c   :  { %13086 = vmatpush1.bf16.msra.mxu1 %v15330_v2  ;;  %12960 = vmatprep.subr.bf16.mxu0 %v15267_v5  ;;  %v16731_v2 = vld [vmem:[#allocation25 + $0x88] ss:$16 sps:$4 sm:$0xff]   ;;  %v16732_v5 = vld [vmem:[#allocation25 + $0xa4] ss:$16 sps:$4 sm:$0xff]  }
 0xb5d   :  { %13088 = vmatprep.subr.bf16.mxu1 %v15331_v10  ;;  %v16735_v10 = vld [vmem:[#allocation25 + $0xac] ss:$16 sps:$4 sm:$0xff]  }
 0xb5f   :  { %12962 = vmatpush1.bf16.msra.mxu0 %v15268_v41  ;;  %v16740_v41 = vld [vmem:[#allocation25 + $0xc0] ss:$16 sps:$4 sm:$0xff]  }
 0xb60   :  { %13090 = vmatpush1.bf16.msra.mxu1 %v15332_v55  ;;  %12964 = vmatprep.subr.bf16.mxu0 %v15269_v33  ;;  %v16743_v55 = vld [vmem:[#allocation25 + $0xc8] ss:$16 sps:$4 sm:$0xff]   ;;  %v16744_v33 = vld [vmem:[#allocation25 + $0xe4] ss:$16 sps:$4 sm:$0xff]  }
 0xb61   :  { %13092 = vmatprep.subr.bf16.mxu1 %v15333_v0  ;;  %v16747_v0 = vld [vmem:[#allocation25 + $0xec] ss:$16 sps:$4 sm:$0xff]  }
 0xb63   :  { %12966 = vmatpush1.bf16.msra.mxu0 %v15270_v62  ;;  %v16746_v62 = vld [vmem:[#allocation25 + $0xe0] ss:$16 sps:$4 sm:$0xff]  }
 0xb64   :  { %13094 = vmatpush1.bf16.msra.mxu1 %v15334_v1  ;;  %13096 = vmatprep.subr.bf16.mxu0 %v16702_v3  ;;  %v16749_v1 = vld [vmem:[#allocation25 + $0xe8] ss:$16 sps:$4 sm:$0xff]   ;;  %v16750_v3 = vld [vmem:[#allocation25 + $0x104] ss:$16 sps:$4 sm:$0xff]  }
 0xb65   :  { %13608 = vmatprep.subr.bf16.mxu1 %v16705_v22  ;;  %v16753_v22 = vld [vmem:[#allocation25 + $0x10c] ss:$16 sps:$4 sm:$0xff]  }
 0xb66   :  { %9137 = vmatmul.mubr.f32.vlgmr.msra.gmra.mrb[44].mxu0 %v18892_v27 }
 0xb67   :  { %9291 = vmatmul.mubr.f32.vlgmr.msra.gmra.mrb[44].mxu1 %v18892_v27  ;;  %9142 = vmatprep.mubr.f32.mxu0 %v18923_v26 }
 0xb68   :  { %9296 = vmatprep.mubr.f32.mxu1 %v18923_v26  ;;  %13098 = vmatpush1.bf16.msra.mxu0 %v16704_v11  ;;  %v16752_v11 = vld [vmem:[#allocation25 + $0x100] ss:$16 sps:$4 sm:$0xff]  }
 0xb69   :  { %13610 = vmatpush1.bf16.msra.mxu1 %v16707_v13  ;;  %13100 = vmatprep.subr.bf16.mxu0 %v16708_v23  ;;  %v16756_v13 = vld [vmem:[#allocation25 + $0x124] ss:$16 sps:$4 sm:$0xff]   ;;  %v16759_v23 = vld [vmem:[#allocation25 + $0x12c] ss:$16 sps:$4 sm:$0xff]  }
 0xb6a   :  { %9143 = vmatmul.mubr.f32.gmra.mrb[46].mxu0 %v18908_v15  ;;  %13612 = vmatprep.subr.bf16.mxu1 %v16711_v57  ;;  %v16758_v57 = vld [vmem:[#allocation25 + $0x120] ss:$16 sps:$4 sm:$0xff]  }
 0xb6b   :  { %9297 = vmatmul.mubr.f32.gmra.mrb[46].mxu1 %v18908_v15  ;;  %9421 = vmatprep.mubr.f32.mxu0 %v9304_v7 }
 0xb6c   :  { %13102 = vmatpush1.bf16.msra.mxu0 %v16710_v6  ;;  %10037 = vmatprep.mubr.f32.mxu1 %v9304_v7  ;;  %v16761_v6 = vld [vmem:[#allocation25 + $0x128] ss:$16 sps:$4 sm:$0xff]   ;;  %v16762_v7 = vld [vmem:[#allocation25 + $0x144] ss:$16 sps:$4 sm:$0xff]  }
 0xb6d   :  { %13614 = vmatpush1.bf16.msra.mxu1 %v16713_v63  ;;  %13104 = vmatprep.subr.bf16.mxu0 %v16714_v29  ;;  %v16765_v63 = vld [vmem:[#allocation25 + $0x14c] ss:$16 sps:$4 sm:$0xff]   ;;  %v16764_v29 = vld [vmem:[#allocation25 + $0x140] ss:$16 sps:$4 sm:$0xff]  }
 0xb6e   :  { %13616 = vmatprep.subr.bf16.mxu1 %v16717_v46  ;;  %v16767_v46 = vld [vmem:[#allocation25 + $0x148] ss:$16 sps:$4 sm:$0xff]  }
 0xb70   :  { %13106 = vmatpush1.bf16.msra.mxu0 %v16716_v12  ;;  %v16768_v12 = vld [vmem:[#allocation25 + $0x164] ss:$16 sps:$4 sm:$0xff]  }
 0xb71   :  { %13618 = vmatpush1.bf16.msra.mxu1 %v16719_v17  ;;  %13108 = vmatprep.subr.bf16.mxu0 %v16720_v8  ;;  %v16771_v17 = vld [vmem:[#allocation25 + $0x16c] ss:$16 sps:$4 sm:$0xff]   ;;  %v16770_v8 = vld [vmem:[#allocation25 + $0x160] ss:$16 sps:$4 sm:$0xff]  }
 0xb72   :  { %13620 = vmatprep.subr.bf16.mxu1 %v16723_v36  ;;  %v16773_v36 = vld [vmem:[#allocation25 + $0x168] ss:$16 sps:$4 sm:$0xff]  }
 0xb74   :  { %13110 = vmatpush1.bf16.msra.mxu0 %v16722_v16  ;;  %v16774_v16 = vld [vmem:[#allocation25 + $0x184] ss:$16 sps:$4 sm:$0xff]  }
 0xb75   :  { %13622 = vmatpush1.bf16.msra.mxu1 %v16725_v24  ;;  %13112 = vmatprep.subr.bf16.mxu0 %v16726_v21  ;;  %v16777_v24 = vld [vmem:[#allocation25 + $0x18c] ss:$16 sps:$4 sm:$0xff]   ;;  %v16776_v21 = vld [vmem:[#allocation25 + $0x180] ss:$16 sps:$4 sm:$0xff]  }
 0xb76   :  { %13624 = vmatprep.subr.bf16.mxu1 %v16729_v52  ;;  %v16779_v52 = vld [vmem:[#allocation25 + $0x188] ss:$16 sps:$4 sm:$0xff]  }
 0xb78   :  { %13114 = vmatpush1.bf16.msra.mxu0 %v16728_v60  ;;  %v16780_v60 = vld [vmem:[#allocation25 + $0x1a4] ss:$16 sps:$4 sm:$0xff]  }
 0xb79   :  { %13626 = vmatpush1.bf16.msra.mxu1 %v16731_v2  ;;  %13116 = vmatprep.subr.bf16.mxu0 %v16732_v5  ;;  %v16783_v2 = vld [vmem:[#allocation25 + $0x1ac] ss:$16 sps:$4 sm:$0xff]   ;;  %v16782_v5 = vld [vmem:[#allocation25 + $0x1a0] ss:$16 sps:$4 sm:$0xff]  }
 0xb7a   :  { %13628 = vmatprep.subr.bf16.mxu1 %v16735_v10  ;;  %v16785_v10 = vld [vmem:[#allocation25 + $0x1a8] ss:$16 sps:$4 sm:$0xff]  }
 0xb7c   :  { %13118 = vmatpush1.bf16.msra.mxu0 %v16734_v19  ;;  %v16786_v19 = vld [vmem:[#allocation25 + $0x1c4] ss:$16 sps:$4 sm:$0xff]  }
 0xb7d   :  { %13630 = vmatpush1.bf16.msra.mxu1 %v16737_v39  ;;  %13120 = vmatprep.subr.bf16.mxu0 %v16738_v9  ;;  %v16789_v39 = vld [vmem:[#allocation25 + $0x1cc] ss:$16 sps:$4 sm:$0xff]   ;;  %v16788_v9 = vld [vmem:[#allocation25 + $0x1c0] ss:$16 sps:$4 sm:$0xff]  }
 0xb7e   :  { %13632 = vmatprep.subr.bf16.mxu1 %v16741_v18  ;;  %v7994_v18 = vrot.slane %v19005_v43, %v18400_v42 }
 0xb80   :  { %13122 = vmatpush1.bf16.msra.mxu0 %v16740_v41  ;;  %v16791_v41 = vld [vmem:[#allocation25 + $0x1c8] ss:$16 sps:$4 sm:$0xff]  }
 0xb81   :  { %13634 = vmatpush1.bf16.msra.mxu1 %v16743_v55  ;;  %13124 = vmatprep.subr.bf16.mxu0 %v16744_v33  ;;  %v16792_v55 = vld [vmem:[#allocation25 + $0x1e4] ss:$16 sps:$4 sm:$0xff]   ;;  %v16795_v33 = vld [vmem:[#allocation25 + $0x1ec] ss:$16 sps:$4 sm:$0xff]  }
 0xb82   :  { %13636 = vmatprep.subr.bf16.mxu1 %v16747_v0  ;;  %v16794_v0 = vld [vmem:[#allocation25 + $0x1e0] ss:$16 sps:$4 sm:$0xff]  }
 0xb84   :  { %13126 = vmatpush1.bf16.msra.mxu0 %v16746_v62  ;;  %v14151_v62 = vadd.f32 %v18957_v31, %v7994_v18  ;;  %v16800_v31 = vld [vmem:[#allocation25 + $0x200] ss:$16 sps:$4 sm:$0xff]  }
 0xb85   :  { %13638 = vmatpush1.bf16.msra.mxu1 %v16749_v1  ;;  %13128 = vmatprep.subr.bf16.mxu0 %v16750_v3  ;;  %v16797_v1 = vld [vmem:[#allocation25 + $0x1e8] ss:$16 sps:$4 sm:$0xff]   ;;  %v16798_v3 = vld [vmem:[#allocation25 + $0x204] ss:$16 sps:$4 sm:$0xff]  }
 0xb86   :  { %13640 = vmatprep.subr.bf16.mxu1 %v16753_v22  ;;  %v19024_v22 = vrot.slane %v19005_v43, %v18409_v47 }
 0xb88   :  { %13130 = vmatpush1.bf16.msra.mxu0 %v16752_v11  ;;  %v14154_v11 = vadd.f32 %v18969_v28, %v19009_v58  ;;  %v16806_v58 = vld [vmem:[#allocation25 + $0x220] ss:$16 sps:$4 sm:$0xff]  }
 0xb89   :  { %13642 = vmatpush1.bf16.msra.mxu1 %v16755_v35  ;;  %13132 = vmatprep.subr.bf16.mxu0 %v16756_v13  ;;  %v16801_v35 = vld [vmem:[#allocation25 + $0x20c] ss:$16 sps:$4 sm:$0xff]   ;;  %v9303_v13 = vmax.f32 %v14151_v62, 0.0 }
 0xb8a   :  { %13644 = vmatprep.subr.bf16.mxu1 %v16759_v23  ;;  %v14153_v23 = vadd.f32 %v18965_v53, %v7994_v18  ;;  %v16809_v53 = vld [vmem:[#allocation25 + $0x228] ss:$16 sps:$4 sm:$0xff]  }
 0xb8c   :  { %13134 = vmatpush1.bf16.msra.mxu0 %v16758_v57  ;;  %v14156_v57 = vadd.f32 %v18963_v61, %v19024_v22  ;;  %v9319_v28 = vmax.f32 %v14153_v23, 0.0  ;;  %v16813_v61 = vld [vmem:[#allocation25 + $0x24c] ss:$16 sps:$4 sm:$0xff]   ;;  %v16839_v23 = vld [vmem:[#allocation25 + $0x2c8] ss:$16 sps:$4 sm:$0xff]  }
 0xb8d   :  { %13646 = vmatpush1.bf16.msra.mxu1 %v16761_v6  ;;  %13136 = vmatprep.subr.bf16.mxu0 %v16762_v7  ;;  %v9320_v6 = vmax.f32 %v14154_v11, 0.0  ;;  %v16803_v7 = vld [vmem:[#allocation25 + $0x208] ss:$16 sps:$4 sm:$0xff]  }
 0xb8e   :  { %13648 = vmatprep.subr.bf16.mxu1 %v16765_v63  ;;  %v16804_v63 = vld [vmem:[#allocation25 + $0x224] ss:$16 sps:$4 sm:$0xff]  }
 0xb90   :  { %13138 = vmatpush1.bf16.msra.mxu0 %v16764_v29  ;;  %v16807_v29 = vld [vmem:[#allocation25 + $0x22c] ss:$16 sps:$4 sm:$0xff]  }
 0xb91   :  { %13650 = vmatpush1.bf16.msra.mxu1 %v16767_v46  ;;  %13140 = vmatprep.subr.bf16.mxu0 %v16768_v12  ;;  %v9306_v46 = vmax.f32 %v14156_v57, 0.0  ;;  %v16810_v12 = vld [vmem:[#allocation25 + $0x244] ss:$16 sps:$4 sm:$0xff]   ;;  %v16843_v57 = vld [vmem:[#allocation25 + $0x2ec] ss:$16 sps:$4 sm:$0xff]  }
 0xb92   :  { %13652 = vmatprep.subr.bf16.mxu1 %v16771_v17  ;;  %v16812_v17 = vld [vmem:[#allocation25 + $0x240] ss:$16 sps:$4 sm:$0xff]  }
 0xb94   :  { %13142 = vmatpush1.bf16.msra.mxu0 %v16770_v8  ;;  %v16815_v8 = vld [vmem:[#allocation25 + $0x248] ss:$16 sps:$4 sm:$0xff]  }
 0xb95   :  { %13654 = vmatpush1.bf16.msra.mxu1 %v16773_v36  ;;  %13144 = vmatprep.subr.bf16.mxu0 %v16774_v16  ;;  %v16816_v36 = vld [vmem:[#allocation25 + $0x264] ss:$16 sps:$4 sm:$0xff]   ;;  %v16819_v16 = vld [vmem:[#allocation25 + $0x26c] ss:$16 sps:$4 sm:$0xff]  }
 0xb96   :  { %13656 = vmatprep.subr.bf16.mxu1 %v16777_v24  ;;  %v16818_v24 = vld [vmem:[#allocation25 + $0x260] ss:$16 sps:$4 sm:$0xff]  }
 0xb98   :  { %13146 = vmatpush1.bf16.msra.mxu0 %v16776_v21  ;;  %v16821_v21 = vld [vmem:[#allocation25 + $0x268] ss:$16 sps:$4 sm:$0xff]  }
 0xb99   :  { %13658 = vmatpush1.bf16.msra.mxu1 %v16779_v52  ;;  %13148 = vmatprep.subr.bf16.mxu0 %v16780_v60  ;;  %v16822_v52 = vld [vmem:[#allocation25 + $0x284] ss:$16 sps:$4 sm:$0xff]   ;;  %v16825_v60 = vld [vmem:[#allocation25 + $0x28c] ss:$16 sps:$4 sm:$0xff]  }
 0xb9a   :  { %13660 = vmatprep.subr.bf16.mxu1 %v16783_v2  ;;  %v16824_v2 = vld [vmem:[#allocation25 + $0x280] ss:$16 sps:$4 sm:$0xff]  }
 0xb9c   :  { %13150 = vmatpush1.bf16.msra.mxu0 %v16782_v5  ;;  %v16827_v5 = vld [vmem:[#allocation25 + $0x288] ss:$16 sps:$4 sm:$0xff]  }
 0xb9d   :  { %13662 = vmatpush1.bf16.msra.mxu1 %v16785_v10  ;;  %13152 = vmatprep.subr.bf16.mxu0 %v16786_v19  ;;  %v16828_v10 = vld [vmem:[#allocation25 + $0x2a4] ss:$16 sps:$4 sm:$0xff]  }
 0xb9e   :  { %13664 = vmatprep.subr.bf16.mxu1 %v16789_v39  ;;  %v16831_v39 = vld [vmem:[#allocation25 + $0x2ac] ss:$16 sps:$4 sm:$0xff]  }
 0xba0   :  { %13154 = vmatpush1.bf16.msra.mxu0 %v16788_v9 }
 0xba1   :  { %13666 = vmatpush1.bf16.msra.mxu1 %v16791_v41  ;;  %13156 = vmatprep.subr.bf16.mxu0 %v16792_v55  ;;  %v16830_v55 = vld [vmem:[#allocation25 + $0x2a0] ss:$16 sps:$4 sm:$0xff]  }
 0xba2   :  { %13668 = vmatprep.subr.bf16.mxu1 %v16795_v33  ;;  %v16833_v33 = vld [vmem:[#allocation25 + $0x2a8] ss:$16 sps:$4 sm:$0xff]  }
 0xba4   :  { %13158 = vmatpush1.bf16.msra.mxu0 %v16794_v0  ;;  %v16834_v0 = vld [vmem:[#allocation25 + $0x2c4] ss:$16 sps:$4 sm:$0xff]  }
 0xba5   :  { %13670 = vmatpush1.bf16.msra.mxu1 %v16797_v1  ;;  %13160 = vmatprep.subr.bf16.mxu0 %v16798_v3  ;;  %v16837_v1 = vld [vmem:[#allocation25 + $0x2cc] ss:$16 sps:$4 sm:$0xff]  }
 0xba6   :  { %13672 = vmatprep.subr.bf16.mxu1 %v16801_v35 }
 0xba7   :  { %9422 = vmatmul.mubr.f32.vlgmr.msra.gmra.mrb[48].mxu0 %v9303_v13 }
 0xba8   :  { %10038 = vmatmul.mubr.f32.vlgmr.msra.gmra.mrb[48].mxu1 %v9303_v13  ;;  %9427 = vmatprep.mubr.f32.mxu0 %v9320_v6  ;;  %v16836_v13 = vld [vmem:[#allocation25 + $0x2c0] ss:$16 sps:$4 sm:$0xff]  }
 0xba9   :  { %13162 = vmatpush1.bf16.msra.mxu0 %v16800_v31  ;;  %10043 = vmatprep.mubr.f32.mxu1 %v9320_v6  ;;  %v16840_v31 = vld [vmem:[#allocation25 + $0x2e4] ss:$16 sps:$4 sm:$0xff]   ;;  %v16842_v6 = vld [vmem:[#allocation25 + $0x2e0] ss:$16 sps:$4 sm:$0xff]  }
 0xbaa   :  { %13674 = vmatpush1.bf16.msra.mxu1 %v16803_v7  ;;  %13164 = vmatprep.subr.bf16.mxu0 %v16804_v63  ;;  %v16845_v7 = vld [vmem:[#allocation25 + $0x2e8] ss:$16 sps:$4 sm:$0xff]   ;;  %v16846_v63 = vld [vmem:[#allocation25 + $0x304] ss:$16 sps:$4 sm:$0xff]  }
 0xbab   :  { %9428 = vmatmul.mubr.f32.gmra.mrb[50].mxu0 %v9319_v28  ;;  %13676 = vmatprep.subr.bf16.mxu1 %v16807_v29  ;;  %v16849_v29 = vld [vmem:[#allocation25 + $0x30c] ss:$16 sps:$4 sm:$0xff]  }
 0xbac   :  { %10044 = vmatmul.mubr.f32.gmra.mrb[50].mxu1 %v9319_v28  ;;  %9498 = vmatprep.mubr.f32.mxu0 %v9306_v46  ;;  %v16848_v28 = vld [vmem:[#allocation25 + $0x300] ss:$16 sps:$4 sm:$0xff]  }
 0xbad   :  { %13166 = vmatpush1.bf16.msra.mxu0 %v16806_v58  ;;  %10114 = vmatprep.mubr.f32.mxu1 %v9306_v46  ;;  %v16851_v58 = vld [vmem:[#allocation25 + $0x308] ss:$16 sps:$4 sm:$0xff]   ;;  %v16852_v46 = vld [vmem:[#allocation25 + $0x324] ss:$16 sps:$4 sm:$0xff]  }
 0xbae   :  { %13678 = vmatpush1.bf16.msra.mxu1 %v16809_v53  ;;  %13168 = vmatprep.subr.bf16.mxu0 %v16810_v12  ;;  %v16855_v53 = vld [vmem:[#allocation25 + $0x32c] ss:$16 sps:$4 sm:$0xff]   ;;  %v16854_v12 = vld [vmem:[#allocation25 + $0x320] ss:$16 sps:$4 sm:$0xff]  }
 0xbaf   :  { %13680 = vmatprep.subr.bf16.mxu1 %v16813_v61  ;;  %v16857_v61 = vld [vmem:[#allocation25 + $0x328] ss:$16 sps:$4 sm:$0xff]  }
 0xbb1   :  { %13170 = vmatpush1.bf16.msra.mxu0 %v16812_v17  ;;  %v16858_v17 = vld [vmem:[#allocation25 + $0x344] ss:$16 sps:$4 sm:$0xff]  }
 0xbb2   :  { %13682 = vmatpush1.bf16.msra.mxu1 %v16815_v8  ;;  %13172 = vmatprep.subr.bf16.mxu0 %v16816_v36  ;;  %v16861_v8 = vld [vmem:[#allocation25 + $0x34c] ss:$16 sps:$4 sm:$0xff]   ;;  %v16860_v36 = vld [vmem:[#allocation25 + $0x340] ss:$16 sps:$4 sm:$0xff]  }
 0xbb3   :  { %13684 = vmatprep.subr.bf16.mxu1 %v16819_v16  ;;  %v16863_v16 = vld [vmem:[#allocation25 + $0x348] ss:$16 sps:$4 sm:$0xff]  }
 0xbb5   :  { %13174 = vmatpush1.bf16.msra.mxu0 %v16818_v24  ;;  %v16864_v24 = vld [vmem:[#allocation25 + $0x364] ss:$16 sps:$4 sm:$0xff]  }
 0xbb6   :  { %13686 = vmatpush1.bf16.msra.mxu1 %v16821_v21  ;;  %13176 = vmatprep.subr.bf16.mxu0 %v16822_v52  ;;  %v16867_v21 = vld [vmem:[#allocation25 + $0x36c] ss:$16 sps:$4 sm:$0xff]   ;;  %v16866_v52 = vld [vmem:[#allocation25 + $0x360] ss:$16 sps:$4 sm:$0xff]  }
 0xbb7   :  { %13688 = vmatprep.subr.bf16.mxu1 %v16825_v60  ;;  %v19031_v19 = vpop.f32.mrb[40].mxu0  ;;  %v16869_v60 = vld [vmem:[#allocation25 + $0x368] ss:$16 sps:$4 sm:$0xff]  }
 0xbb8   :  { %v19033_v9 = vpop.f32.mrb[40].mxu1  ;;  %v19035_v18 = vpop.f32.mrb[41].mxu0 }
 0xbb9   :  { %13178 = vmatpush1.bf16.msra.mxu0 %v16824_v2  ;;  %v19037_v41 = vpop.f32.mrb[41].mxu1  ;;  %v16870_v2 = vld [vmem:[#allocation25 + $0x384] ss:$16 sps:$4 sm:$0xff]  }
 0xbba   :  { %13690 = vmatpush1.bf16.msra.mxu1 %v16827_v5  ;;  %13180 = vmatprep.subr.bf16.mxu0 %v16828_v10  ;;  %v16873_v5 = vld [vmem:[#allocation25 + $0x38c] ss:$16 sps:$4 sm:$0xff]   ;;  %v16872_v10 = vld [vmem:[#allocation25 + $0x380] ss:$16 sps:$4 sm:$0xff]  }
 0xbbb   :  { %13692 = vmatprep.subr.bf16.mxu1 %v16831_v39  ;;  %v19039_v62 = vpop.f32.mrb[42].mxu0  ;;  %v16875_v39 = vld [vmem:[#allocation25 + $0x388] ss:$16 sps:$4 sm:$0xff]  }
 0xbbc   :  { %v19041_v3 = vpop.f32.mrb[42].mxu1  ;;  %v19043_v11 = vpop.f32.mrb[43].mxu0 }
 0xbbd   :  { %13182 = vmatpush1.bf16.msra.mxu0 %v16830_v55  ;;  %v19045_v35 = vpop.f32.mrb[43].mxu1  ;;  %v16876_v55 = vld [vmem:[#allocation25 + $0x3a4] ss:$16 sps:$4 sm:$0xff]  }
 0xbbe   :  { %13694 = vmatpush1.bf16.msra.mxu1 %v16833_v33  ;;  %13184 = vmatprep.subr.bf16.mxu0 %v16834_v0  ;;  %v16879_v33 = vld [vmem:[#allocation25 + $0x3ac] ss:$16 sps:$4 sm:$0xff]   ;;  %v16878_v0 = vld [vmem:[#allocation25 + $0x3a0] ss:$16 sps:$4 sm:$0xff]  }
 0xbbf   :  { %13696 = vmatprep.subr.bf16.mxu1 %v16837_v1  ;;  %v16881_v1 = vld [vmem:[#allocation25 + $0x3a8] ss:$16 sps:$4 sm:$0xff]  }
 0xbc1   :  { %13186 = vmatpush1.bf16.msra.mxu0 %v16836_v13  ;;  %v16882_v13 = vld [vmem:[#allocation25 + $0x3c4] ss:$16 sps:$4 sm:$0xff]  }
 0xbc2   :  { %13698 = vmatpush1.bf16.msra.mxu1 %v16839_v23  ;;  %13188 = vmatprep.subr.bf16.mxu0 %v16840_v31  ;;  %v16885_v23 = vld [vmem:[#allocation25 + $0x3cc] ss:$16 sps:$4 sm:$0xff]   ;;  %v16884_v31 = vld [vmem:[#allocation25 + $0x3c0] ss:$16 sps:$4 sm:$0xff]  }
 0xbc3   :  { %13700 = vmatprep.subr.bf16.mxu1 %v16843_v57  ;;  %v8002_v57 = vrot.slane %v19005_v43, %v18403_v44 }
 0xbc5   :  { %13190 = vmatpush1.bf16.msra.mxu0 %v16842_v6  ;;  %v16887_v6 = vld [vmem:[#allocation25 + $0x3c8] ss:$16 sps:$4 sm:$0xff]  }
 0xbc6   :  { %13702 = vmatpush1.bf16.msra.mxu1 %v16845_v7  ;;  %13192 = vmatprep.subr.bf16.mxu0 %v16846_v63  ;;  %v16888_v7 = vld [vmem:[#allocation25 + $0x3e4] ss:$16 sps:$4 sm:$0xff]   ;;  %v8013_v63 = vsub.s32 5, %v18397_v37 }
 0xbc7   :  { %13704 = vmatprep.subr.bf16.mxu1 %v16849_v29  ;;  %v16891_v29 = vld [vmem:[#allocation25 + $0x3ec] ss:$16 sps:$4 sm:$0xff]  }
 0xbc9   :  { %13194 = vmatpush1.bf16.msra.mxu0 %v16848_v28  ;;  %v16890_v28 = vld [vmem:[#allocation25 + $0x3e0] ss:$16 sps:$4 sm:$0xff]  }
 0xbca   :  { %13706 = vmatpush1.bf16.msra.mxu1 %v16851_v58  ;;  %13196 = vmatprep.subr.bf16.mxu0 %v16852_v46  ;;  %v14155_v58 = vadd.f32 %v18959_v38, %v8002_v57  ;;  %v16893_v46 = vld [vmem:[#allocation25 + $0x3e8] ss:$16 sps:$4 sm:$0xff]   ;;  %v16896_v38 = vld [vmem:[#allocation25 + $0x400] ss:$16 sps:$4 sm:$0xff]  }
 0xbcb   :  { %13708 = vmatprep.subr.bf16.mxu1 %v16855_v53  ;;  %v16894_v53 = vld [vmem:[#allocation25 + $0x404] ss:$16 sps:$4 sm:$0xff]  }
 0xbcd   :  { %13198 = vmatpush1.bf16.msra.mxu0 %v16854_v12  ;;  %v14158_v12 = vadd.f32 %v18971_v50, %v19024_v22  ;;  %v16899_v50 = vld [vmem:[#allocation25 + $0x408] ss:$16 sps:$4 sm:$0xff]   ;;  %v16900_v22 = vld [vmem:[#allocation25 + $0x424] ss:$16 sps:$4 sm:$0xff]  }
 0xbce   :  { %13710 = vmatpush1.bf16.msra.mxu1 %v16857_v61  ;;  %13200 = vmatprep.subr.bf16.mxu0 %v16858_v17  ;;  %v19056_v61 = vrot.slane %v19005_v43, %v8013_v63  ;;  %v16897_v17 = vld [vmem:[#allocation25 + $0x40c] ss:$16 sps:$4 sm:$0xff]  }
 0xbcf   :  { %13712 = vmatprep.subr.bf16.mxu1 %v16861_v8  ;;  %v9305_v8 = vmax.f32 %v14155_v58, 0.0  ;;  %v16930_v58 = vld [vmem:[#allocation25 + $0x4c4] ss:$16 sps:$4 sm:$0xff]  }
 0xbd1   :  { %13202 = vmatpush1.bf16.msra.mxu0 %v16860_v36  ;;  %v14157_v36 = vadd.f32 %v18967_v25, %v8002_v57  ;;  %v16905_v25 = vld [vmem:[#allocation25 + $0x428] ss:$16 sps:$4 sm:$0xff]  }
 0xbd2   :  { %13714 = vmatpush1.bf16.msra.mxu1 %v16863_v16  ;;  %13204 = vmatprep.subr.bf16.mxu0 %v16864_v24  ;;  %v9322_v16 = vmax.f32 %v14158_v12, 0.0  ;;  %v14160_v24 = vadd.f32 %v18993_v48, %v19056_v61  ;;  %v16908_v48 = vld [vmem:[#allocation25 + $0x440] ss:$16 sps:$4 sm:$0xff]   ;;  %v16923_v57 = vld [vmem:[#allocation25 + $0x488] ss:$16 sps:$4 sm:$0xff]  }
 0xbd3   :  { %13716 = vmatprep.subr.bf16.mxu1 %v16867_v21  ;;  %v16903_v21 = vld [vmem:[#allocation25 + $0x42c] ss:$16 sps:$4 sm:$0xff]   ;;  %v16935_v12 = vld [vmem:[#allocation25 + $0x4c8] ss:$16 sps:$4 sm:$0xff]  }
 0xbd5   :  { %13206 = vmatpush1.bf16.msra.mxu0 %v16866_v52  ;;  %v9321_v52 = vmax.f32 %v14157_v36, 0.0  ;;  %v16938_v36 = vld [vmem:[#allocation25 + $0x4e0] ss:$16 sps:$4 sm:$0xff]  }
 0xbd6   :  { %13718 = vmatpush1.bf16.msra.mxu1 %v16869_v60  ;;  %13208 = vmatprep.subr.bf16.mxu0 %v16870_v2  ;;  %v16902_v60 = vld [vmem:[#allocation25 + $0x420] ss:$16 sps:$4 sm:$0xff]   ;;  %v9308_v2 = vmax.f32 %v14160_v24, 0.0  ;;  %v16945_v24 = vld [vmem:[#allocation25 + $0x50c] ss:$16 sps:$4 sm:$0xff]  }
 0xbd7   :  { %13720 = vmatprep.subr.bf16.mxu1 %v16873_v5  ;;  %v16906_v5 = vld [vmem:[#allocation25 + $0x444] ss:$16 sps:$4 sm:$0xff]  }
 0xbd9   :  { %13210 = vmatpush1.bf16.msra.mxu0 %v16872_v10  ;;  %v16909_v10 = vld [vmem:[#allocation25 + $0x44c] ss:$16 sps:$4 sm:$0xff]  }
 0xbda   :  { %13722 = vmatpush1.bf16.msra.mxu1 %v16875_v39  ;;  %13212 = vmatprep.subr.bf16.mxu0 %v16876_v55  ;;  %v16911_v39 = vld [vmem:[#allocation25 + $0x448] ss:$16 sps:$4 sm:$0xff]   ;;  %v16912_v55 = vld [vmem:[#allocation25 + $0x464] ss:$16 sps:$4 sm:$0xff]  }
 0xbdb   :  { %13724 = vmatprep.subr.bf16.mxu1 %v16879_v33  ;;  %v16915_v33 = vld [vmem:[#allocation25 + $0x46c] ss:$16 sps:$4 sm:$0xff]  }
 0xbdd   :  { %13214 = vmatpush1.bf16.msra.mxu0 %v16878_v0  ;;  %v16914_v0 = vld [vmem:[#allocation25 + $0x460] ss:$16 sps:$4 sm:$0xff]  }
 0xbde   :  { %13726 = vmatpush1.bf16.msra.mxu1 %v16881_v1  ;;  %13216 = vmatprep.subr.bf16.mxu0 %v16882_v13  ;;  %v16917_v1 = vld [vmem:[#allocation25 + $0x468] ss:$16 sps:$4 sm:$0xff]   ;;  %v16918_v13 = vld [vmem:[#allocation25 + $0x484] ss:$16 sps:$4 sm:$0xff]  }
 0xbdf   :  { %13728 = vmatprep.subr.bf16.mxu1 %v16885_v23  ;;  %v16921_v23 = vld [vmem:[#allocation25 + $0x48c] ss:$16 sps:$4 sm:$0xff]  }
 0xbe1   :  { %13218 = vmatpush1.bf16.msra.mxu0 %v16884_v31  ;;  %v16920_v31 = vld [vmem:[#allocation25 + $0x480] ss:$16 sps:$4 sm:$0xff]  }
 0xbe2   :  { %13730 = vmatpush1.bf16.msra.mxu1 %v16887_v6  ;;  %13220 = vmatprep.subr.bf16.mxu0 %v16888_v7  ;;  %v16924_v6 = vld [vmem:[#allocation25 + $0x4a4] ss:$16 sps:$4 sm:$0xff]   ;;  %v16927_v7 = vld [vmem:[#allocation25 + $0x4ac] ss:$16 sps:$4 sm:$0xff]  }
 0xbe3   :  { %13732 = vmatprep.subr.bf16.mxu1 %v16891_v29  ;;  %v16926_v29 = vld [vmem:[#allocation25 + $0x4a0] ss:$16 sps:$4 sm:$0xff]  }
 0xbe5   :  { %13222 = vmatpush1.bf16.msra.mxu0 %v16890_v28  ;;  %v16929_v28 = vld [vmem:[#allocation25 + $0x4a8] ss:$16 sps:$4 sm:$0xff]  }
 0xbe6   :  { %13734 = vmatpush1.bf16.msra.mxu1 %v16893_v46  ;;  %13224 = vmatprep.subr.bf16.mxu0 %v16894_v53  ;;  %v16933_v46 = vld [vmem:[#allocation25 + $0x4cc] ss:$16 sps:$4 sm:$0xff]   ;;  %v16932_v53 = vld [vmem:[#allocation25 + $0x4c0] ss:$16 sps:$4 sm:$0xff]  }
 0xbe7   :  { %13736 = vmatprep.subr.bf16.mxu1 %v16897_v17  ;;  %v16936_v17 = vld [vmem:[#allocation25 + $0x4e4] ss:$16 sps:$4 sm:$0xff]  }
 0xbe8   :  { %9499 = vmatmul.mubr.f32.vlgmr.msra.gmra.mrb[48].mxu0 %v9305_v8 }
 0xbe9   :  { %10115 = vmatmul.mubr.f32.vlgmr.msra.gmra.mrb[48].mxu1 %v9305_v8  ;;  %9504 = vmatprep.mubr.f32.mxu0 %v9322_v16  ;;  %v16939_v8 = vld [vmem:[#allocation25 + $0x4ec] ss:$16 sps:$4 sm:$0xff]  }
 0xbea   :  { %13226 = vmatpush1.bf16.msra.mxu0 %v16896_v38  ;;  %10120 = vmatprep.mubr.f32.mxu1 %v9322_v16  ;;  %v16941_v38 = vld [vmem:[#allocation25 + $0x4e8] ss:$16 sps:$4 sm:$0xff]   ;;  %v16942_v16 = vld [vmem:[#allocation25 + $0x504] ss:$16 sps:$4 sm:$0xff]  }
 0xbeb   :  { %13738 = vmatpush1.bf16.msra.mxu1 %v16899_v50  ;;  %13228 = vmatprep.subr.bf16.mxu0 %v16900_v22  ;;  %v16944_v50 = vld [vmem:[#allocation25 + $0x500] ss:$16 sps:$4 sm:$0xff]   ;;  %v16947_v22 = vld [vmem:[#allocation25 + $0x508] ss:$16 sps:$4 sm:$0xff]  }
 0xbec   :  { %9505 = vmatmul.mubr.f32.gmra.mrb[50].mxu0 %v9321_v52  ;;  %13740 = vmatprep.subr.bf16.mxu1 %v16903_v21  ;;  %v16948_v21 = vld [vmem:[#allocation25 + $0x524] ss:$16 sps:$4 sm:$0xff]  }
 0xbed   :  { %10121 = vmatmul.mubr.f32.gmra.mrb[50].mxu1 %v9321_v52  ;;  %9575 = vmatprep.mubr.f32.mxu0 %v9308_v2  ;;  %v16951_v52 = vld [vmem:[#allocation25 + $0x52c] ss:$16 sps:$4 sm:$0xff]  }
 0xbee   :  { %13230 = vmatpush1.bf16.msra.mxu0 %v16902_v60  ;;  %10191 = vmatprep.mubr.f32.mxu1 %v9308_v2  ;;  %v16950_v60 = vld [vmem:[#allocation25 + $0x520] ss:$16 sps:$4 sm:$0xff]   ;;  %v16953_v2 = vld [vmem:[#allocation25 + $0x528] ss:$16 sps:$4 sm:$0xff]  }
 0xbef   :  { %13742 = vmatpush1.bf16.msra.mxu1 %v16905_v25  ;;  %13232 = vmatprep.subr.bf16.mxu0 %v16906_v5  ;;  %v16954_v25 = vld [vmem:[#allocation25 + $0x544] ss:$16 sps:$4 sm:$0xff]   ;;  %v16957_v5 = vld [vmem:[#allocation25 + $0x54c] ss:$16 sps:$4 sm:$0xff]  }
 0xbf0   :  { %13744 = vmatprep.subr.bf16.mxu1 %v16909_v10  ;;  %v16956_v10 = vld [vmem:[#allocation25 + $0x540] ss:$16 sps:$4 sm:$0xff]  }
 0xbf2   :  { %13234 = vmatpush1.bf16.msra.mxu0 %v16908_v48  ;;  %v16959_v48 = vld [vmem:[#allocation25 + $0x548] ss:$16 sps:$4 sm:$0xff]  }
 0xbf3   :  { %13746 = vmatpush1.bf16.msra.mxu1 %v16911_v39  ;;  %13236 = vmatprep.subr.bf16.mxu0 %v16912_v55  ;;  %v16960_v39 = vld [vmem:[#allocation25 + $0x564] ss:$16 sps:$4 sm:$0xff]   ;;  %v16963_v55 = vld [vmem:[#allocation25 + $0x56c] ss:$16 sps:$4 sm:$0xff]  }
 0xbf4   :  { %13748 = vmatprep.subr.bf16.mxu1 %v16915_v33  ;;  %v16962_v33 = vld [vmem:[#allocation25 + $0x560] ss:$16 sps:$4 sm:$0xff]  }
 0xbf6   :  { %13238 = vmatpush1.bf16.msra.mxu0 %v16914_v0  ;;  %v16965_v0 = vld [vmem:[#allocation25 + $0x568] ss:$16 sps:$4 sm:$0xff]  }
 0xbf7   :  { %13750 = vmatpush1.bf16.msra.mxu1 %v16917_v1  ;;  %13240 = vmatprep.subr.bf16.mxu0 %v16918_v13  ;;  %v16966_v1 = vld [vmem:[#allocation25 + $0x584] ss:$16 sps:$4 sm:$0xff]   ;;  %v16969_v13 = vld [vmem:[#allocation25 + $0x58c] ss:$16 sps:$4 sm:$0xff]  }
 0xbf8   :  { %13752 = vmatprep.subr.bf16.mxu1 %v16921_v23  ;;  %v16968_v23 = vld [vmem:[#allocation25 + $0x580] ss:$16 sps:$4 sm:$0xff]  }
 0xbfa   :  { %13242 = vmatpush1.bf16.msra.mxu0 %v16920_v31  ;;  %v16971_v31 = vld [vmem:[#allocation25 + $0x588] ss:$16 sps:$4 sm:$0xff]  }
 0xbfb   :  { %13754 = vmatpush1.bf16.msra.mxu1 %v16923_v57  ;;  %13244 = vmatprep.subr.bf16.mxu0 %v16924_v6  ;;  %v16972_v57 = vld [vmem:[#allocation25 + $0x5a4] ss:$16 sps:$4 sm:$0xff]   ;;  %v16975_v6 = vld [vmem:[#allocation25 + $0x5ac] ss:$16 sps:$4 sm:$0xff]  }
 0xbfc   :  { %13756 = vmatprep.subr.bf16.mxu1 %v16927_v7  ;;  %v16974_v7 = vld [vmem:[#allocation25 + $0x5a0] ss:$16 sps:$4 sm:$0xff]  }
 0xbfe   :  { %13246 = vmatpush1.bf16.msra.mxu0 %v16926_v29  ;;  %v8009_v29 = vsub.s32 4, %v18397_v37 }
 0xbff   :  { %13758 = vmatpush1.bf16.msra.mxu1 %v16929_v28  ;;  %13248 = vmatprep.subr.bf16.mxu0 %v16930_v58  ;;  %v16977_v28 = vld [vmem:[#allocation25 + $0x5a8] ss:$16 sps:$4 sm:$0xff]   ;;  %v16978_v58 = vld [vmem:[#allocation25 + $0x5c4] ss:$16 sps:$4 sm:$0xff]  }
 0xc00   :  { %13760 = vmatprep.subr.bf16.mxu1 %v16933_v46  ;;  %v16981_v46 = vld [vmem:[#allocation25 + $0x5cc] ss:$16 sps:$4 sm:$0xff]  }
 0xc02   :  { %13250 = vmatpush1.bf16.msra.mxu0 %v16932_v53  ;;  %v16980_v53 = vld [vmem:[#allocation25 + $0x5c0] ss:$16 sps:$4 sm:$0xff]  }
 0xc03   :  { %13762 = vmatpush1.bf16.msra.mxu1 %v16935_v12  ;;  %13252 = vmatprep.subr.bf16.mxu0 %v16936_v17  ;;  %v8010_v12 = vrot.slane %v19005_v43, %v8009_v29  ;;  %v16983_v17 = vld [vmem:[#allocation25 + $0x5c8] ss:$16 sps:$4 sm:$0xff]  }
 0xc04   :  { %13764 = vmatprep.subr.bf16.mxu1 %v16939_v8  ;;  %v16984_v8 = vld [vmem:[#allocation25 + $0x5e4] ss:$16 sps:$4 sm:$0xff]  }
 0xc06   :  { %13254 = vmatpush1.bf16.msra.mxu0 %v16938_v36  ;;  %v8021_v36 = vsub.s32 7, %v18397_v37 }
 0xc07   :  { %13766 = vmatpush1.bf16.msra.mxu1 %v16941_v38  ;;  %13256 = vmatprep.subr.bf16.mxu0 %v16942_v16  ;;  %v16987_v38 = vld [vmem:[#allocation25 + $0x5ec] ss:$16 sps:$4 sm:$0xff]   ;;  %v16986_v16 = vld [vmem:[#allocation25 + $0x5e0] ss:$16 sps:$4 sm:$0xff]  }
 0xc08   :  { %13768 = vmatprep.subr.bf16.mxu1 %v16945_v24  ;;  %v14159_v24 = vadd.f32 %v18989_v14, %v8010_v12  ;;  %v16992_v14 = vld [vmem:[#allocation25 + $0x600] ss:$16 sps:$4 sm:$0xff]  }
 0xc0a   :  { %13258 = vmatpush1.bf16.msra.mxu0 %v16944_v50  ;;  %v16989_v50 = vld [vmem:[#allocation25 + $0x5e8] ss:$16 sps:$4 sm:$0xff]  }
 0xc0b   :  { %13770 = vmatpush1.bf16.msra.mxu1 %v16947_v22  ;;  %13260 = vmatprep.subr.bf16.mxu0 %v16948_v21  ;;  %v16990_v22 = vld [vmem:[#allocation25 + $0x604] ss:$16 sps:$4 sm:$0xff]   ;;  %v19070_v21 = vrot.slane %v19005_v43, %v8021_v36 }
 0xc0c   :  { %13772 = vmatprep.subr.bf16.mxu1 %v16951_v52  ;;  %v14162_v52 = vadd.f32 %v19001_v40, %v19056_v61  ;;  %v16996_v43 = vld [vmem:[#allocation25 + $0x624] ss:$16 sps:$4 sm:$0xff]   ;;  %v16998_v61 = vld [vmem:[#allocation25 + $0x620] ss:$16 sps:$4 sm:$0xff]  }
 0xc0e   :  { %13262 = vmatpush1.bf16.msra.mxu0 %v16950_v60  ;;  %v16993_v60 = vld [vmem:[#allocation25 + $0x60c] ss:$16 sps:$4 sm:$0xff]  }
 0xc0f   :  { %13774 = vmatpush1.bf16.msra.mxu1 %v16953_v2  ;;  %13264 = vmatprep.subr.bf16.mxu0 %v16954_v25  ;;  %v9307_v2 = vmax.f32 %v14159_v24, 0.0  ;;  %v14161_v25 = vadd.f32 %v18997_v51, %v8010_v12  ;;  %v17001_v51 = vld [vmem:[#allocation25 + $0x628] ss:$16 sps:$4 sm:$0xff]   ;;  %v17023_v12 = vld [vmem:[#allocation25 + $0x6ac] ss:$16 sps:$4 sm:$0xff]  }
 0xc10   :  { %13776 = vmatprep.subr.bf16.mxu1 %v16957_v5  ;;  %v14164_v5 = vadd.f32 %v18995_v49, %v19070_v21  ;;  %v17005_v49 = vld [vmem:[#allocation25 + $0x64c] ss:$16 sps:$4 sm:$0xff]   ;;  %v17025_v24 = vld [vmem:[#allocation25 + $0x6a8] ss:$16 sps:$4 sm:$0xff]  }
 0xc11   :  { %v9323_v40 = vmax.f32 %v14161_v25, 0.0 }
 0xc12   :  { %13266 = vmatpush1.bf16.msra.mxu0 %v16956_v10  ;;  %v9324_v10 = vmax.f32 %v14162_v52, 0.0  ;;  %v17029_v52 = vld [vmem:[#allocation25 + $0x6cc] ss:$16 sps:$4 sm:$0xff]  }
 0xc13   :  { %13778 = vmatpush1.bf16.msra.mxu1 %v16959_v48  ;;  %13268 = vmatprep.subr.bf16.mxu0 %v16960_v39  ;;  %v16995_v48 = vld [vmem:[#allocation25 + $0x608] ss:$16 sps:$4 sm:$0xff]   ;;  %v16999_v39 = vld [vmem:[#allocation25 + $0x62c] ss:$16 sps:$4 sm:$0xff]  }
 0xc14   :  { %13780 = vmatprep.subr.bf16.mxu1 %v16963_v55  ;;  %v9310_v55 = vmax.f32 %v14164_v5, 0.0  ;;  %v17031_v5 = vld [vmem:[#allocation25 + $0x6c8] ss:$16 sps:$4 sm:$0xff]  }
 0xc16   :  { %13270 = vmatpush1.bf16.msra.mxu0 %v16962_v33  ;;  %v17002_v33 = vld [vmem:[#allocation25 + $0x644] ss:$16 sps:$4 sm:$0xff]  }
 0xc17   :  { %13782 = vmatpush1.bf16.msra.mxu1 %v16965_v0  ;;  %13272 = vmatprep.subr.bf16.mxu0 %v16966_v1  ;;  %v17004_v0 = vld [vmem:[#allocation25 + $0x640] ss:$16 sps:$4 sm:$0xff]   ;;  %v17007_v1 = vld [vmem:[#allocation25 + $0x648] ss:$16 sps:$4 sm:$0xff]  }
 0xc18   :  { %13784 = vmatprep.subr.bf16.mxu1 %v16969_v13  ;;  %v17008_v13 = vld [vmem:[#allocation25 + $0x664] ss:$16 sps:$4 sm:$0xff]  }
 0xc1a   :  { %13274 = vmatpush1.bf16.msra.mxu0 %v16968_v23  ;;  %v17011_v23 = vld [vmem:[#allocation25 + $0x66c] ss:$16 sps:$4 sm:$0xff]  }
 0xc1b   :  { %13786 = vmatpush1.bf16.msra.mxu1 %v16971_v31  ;;  %13276 = vmatprep.subr.bf16.mxu0 %v16972_v57  ;;  %v17010_v31 = vld [vmem:[#allocation25 + $0x660] ss:$16 sps:$4 sm:$0xff]   ;;  %v17013_v57 = vld [vmem:[#allocation25 + $0x668] ss:$16 sps:$4 sm:$0xff]  }
 0xc1c   :  { %13788 = vmatprep.subr.bf16.mxu1 %v16975_v6  ;;  %v17014_v6 = vld [vmem:[#allocation25 + $0x684] ss:$16 sps:$4 sm:$0xff]  }
 0xc1e   :  { %13278 = vmatpush1.bf16.msra.mxu0 %v16974_v7  ;;  %v17017_v7 = vld [vmem:[#allocation25 + $0x68c] ss:$16 sps:$4 sm:$0xff]  }
 0xc1f   :  { %13790 = vmatpush1.bf16.msra.mxu1 %v16977_v28  ;;  %13280 = vmatprep.subr.bf16.mxu0 %v16978_v58  ;;  %v17016_v28 = vld [vmem:[#allocation25 + $0x680] ss:$16 sps:$4 sm:$0xff]   ;;  %v17019_v58 = vld [vmem:[#allocation25 + $0x688] ss:$16 sps:$4 sm:$0xff]  }
 0xc20   :  { %13792 = vmatprep.subr.bf16.mxu1 %v16981_v46  ;;  %v17020_v46 = vld [vmem:[#allocation25 + $0x6a4] ss:$16 sps:$4 sm:$0xff]  }
 0xc22   :  { %13282 = vmatpush1.bf16.msra.mxu0 %v16980_v53 }
 0xc23   :  { %13794 = vmatpush1.bf16.msra.mxu1 %v16983_v17  ;;  %13284 = vmatprep.subr.bf16.mxu0 %v16984_v8 }
 0xc24   :  { %13796 = vmatprep.subr.bf16.mxu1 %v16987_v38 }
 0xc26   :  { %13286 = vmatpush1.bf16.msra.mxu0 %v16986_v16  ;;  %v17022_v16 = vld [vmem:[#allocation25 + $0x6a0] ss:$16 sps:$4 sm:$0xff]  }
 0xc27   :  { %13798 = vmatpush1.bf16.msra.mxu1 %v16989_v50  ;;  %13288 = vmatprep.subr.bf16.mxu0 %v16990_v22  ;;  %v17026_v50 = vld [vmem:[#allocation25 + $0x6c4] ss:$16 sps:$4 sm:$0xff]  }
 0xc28   :  { %13800 = vmatprep.subr.bf16.mxu1 %v16993_v60 }
 0xc29   :  { %9576 = vmatmul.mubr.f32.vlgmr.msra.gmra.mrb[48].mxu0 %v9307_v2 }
 0xc2a   :  { %10192 = vmatmul.mubr.f32.vlgmr.msra.gmra.mrb[48].mxu1 %v9307_v2  ;;  %9581 = vmatprep.mubr.f32.mxu0 %v9324_v10 }
 0xc2b   :  { %13290 = vmatpush1.bf16.msra.mxu0 %v16992_v14  ;;  %10197 = vmatprep.mubr.f32.mxu1 %v9324_v10  ;;  %v17028_v14 = vld [vmem:[#allocation25 + $0x6c0] ss:$16 sps:$4 sm:$0xff]   ;;  %v17032_v10 = vld [vmem:[#allocation25 + $0x6e4] ss:$16 sps:$4 sm:$0xff]  }
 0xc2c   :  { %13802 = vmatpush1.bf16.msra.mxu1 %v16995_v48  ;;  %13292 = vmatprep.subr.bf16.mxu0 %v16996_v43  ;;  %v17035_v48 = vld [vmem:[#allocation25 + $0x6ec] ss:$16 sps:$4 sm:$0xff]   ;;  %v17034_v43 = vld [vmem:[#allocation25 + $0x6e0] ss:$16 sps:$4 sm:$0xff]  }
 0xc2d   :  { %9582 = vmatmul.mubr.f32.gmra.mrb[50].mxu0 %v9323_v40  ;;  %13804 = vmatprep.subr.bf16.mxu1 %v16999_v39  ;;  %v17037_v39 = vld [vmem:[#allocation25 + $0x6e8] ss:$16 sps:$4 sm:$0xff]  }
 0xc2e   :  { %10198 = vmatmul.mubr.f32.gmra.mrb[50].mxu1 %v9323_v40  ;;  %9652 = vmatprep.mubr.f32.mxu0 %v9310_v55  ;;  %v17038_v40 = vld [vmem:[#allocation25 + $0x704] ss:$16 sps:$4 sm:$0xff]  }
 0xc2f   :  { %13294 = vmatpush1.bf16.msra.mxu0 %v16998_v61  ;;  %10268 = vmatprep.mubr.f32.mxu1 %v9310_v55  ;;  %v17041_v61 = vld [vmem:[#allocation25 + $0x70c] ss:$16 sps:$4 sm:$0xff]   ;;  %v17040_v55 = vld [vmem:[#allocation25 + $0x700] ss:$16 sps:$4 sm:$0xff]  }
 0xc30   :  { %13806 = vmatpush1.bf16.msra.mxu1 %v17001_v51  ;;  %13296 = vmatprep.subr.bf16.mxu0 %v17002_v33  ;;  %v17043_v51 = vld [vmem:[#allocation25 + $0x708] ss:$16 sps:$4 sm:$0xff]   ;;  %v17044_v33 = vld [vmem:[#allocation25 + $0x724] ss:$16 sps:$4 sm:$0xff]  }
 0xc31   :  { %13808 = vmatprep.subr.bf16.mxu1 %v17005_v49  ;;  %v17047_v49 = vld [vmem:[#allocation25 + $0x72c] ss:$16 sps:$4 sm:$0xff]  }
 0xc33   :  { %13298 = vmatpush1.bf16.msra.mxu0 %v17004_v0  ;;  %v17046_v0 = vld [vmem:[#allocation25 + $0x720] ss:$16 sps:$4 sm:$0xff]  }
 0xc34   :  { %13810 = vmatpush1.bf16.msra.mxu1 %v17007_v1  ;;  %13300 = vmatprep.subr.bf16.mxu0 %v17008_v13  ;;  %v17049_v1 = vld [vmem:[#allocation25 + $0x728] ss:$16 sps:$4 sm:$0xff]   ;;  %v17050_v13 = vld [vmem:[#allocation25 + $0x744] ss:$16 sps:$4 sm:$0xff]  }
 0xc35   :  { %13812 = vmatprep.subr.bf16.mxu1 %v17011_v23  ;;  %v17053_v23 = vld [vmem:[#allocation25 + $0x74c] ss:$16 sps:$4 sm:$0xff]  }
 0xc37   :  { %13302 = vmatpush1.bf16.msra.mxu0 %v17010_v31  ;;  %v17052_v31 = vld [vmem:[#allocation25 + $0x740] ss:$16 sps:$4 sm:$0xff]  }
 0xc38   :  { %13814 = vmatpush1.bf16.msra.mxu1 %v17013_v57  ;;  %13304 = vmatprep.subr.bf16.mxu0 %v17014_v6  ;;  %v17055_v57 = vld [vmem:[#allocation25 + $0x748] ss:$16 sps:$4 sm:$0xff]   ;;  %v17056_v6 = vld [vmem:[#allocation25 + $0x764] ss:$16 sps:$4 sm:$0xff]  }
 0xc39   :  { %13816 = vmatprep.subr.bf16.mxu1 %v17017_v7  ;;  %v19077_v53 = vpop.f32.mrb[44].mxu0  ;;  %v17059_v7 = vld [vmem:[#allocation25 + $0x76c] ss:$16 sps:$4 sm:$0xff]  }
 0xc3a   :  { %v19079_v17 = vpop.f32.mrb[44].mxu1  ;;  %v19081_v8 = vpop.f32.mrb[45].mxu0 }
 0xc3b   :  { %13306 = vmatpush1.bf16.msra.mxu0 %v17016_v28  ;;  %v19083_v38 = vpop.f32.mrb[45].mxu1  ;;  %v17058_v28 = vld [vmem:[#allocation25 + $0x760] ss:$16 sps:$4 sm:$0xff]  }
 0xc3c   :  { %13818 = vmatpush1.bf16.msra.mxu1 %v17019_v58  ;;  %13308 = vmatprep.subr.bf16.mxu0 %v17020_v46  ;;  %v17061_v58 = vld [vmem:[#allocation25 + $0x768] ss:$16 sps:$4 sm:$0xff]   ;;  %v17062_v46 = vld [vmem:[#allocation25 + $0x784] ss:$16 sps:$4 sm:$0xff]  }
 0xc3d   :  { %13820 = vmatprep.subr.bf16.mxu1 %v17023_v12  ;;  %v19085_v22 = vpop.f32.mrb[46].mxu0  ;;  %v17065_v12 = vld [vmem:[#allocation25 + $0x78c] ss:$16 sps:$4 sm:$0xff]  }
 0xc3e   :  { %v19087_v60 = vpop.f32.mrb[46].mxu1  ;;  %v19089_v2 = vpop.f32.mrb[47].mxu0 }
 0xc3f   :  { %13310 = vmatpush1.bf16.msra.mxu0 %v17022_v16  ;;  %v19091_v25 = vpop.f32.mrb[47].mxu1  ;;  %v17064_v16 = vld [vmem:[#allocation25 + $0x780] ss:$16 sps:$4 sm:$0xff]  }
 0xc40   :  { %13822 = vmatpush1.bf16.msra.mxu1 %v17025_v24  ;;  %13312 = vmatprep.subr.bf16.mxu0 %v17026_v50  ;;  %v17067_v24 = vld [vmem:[#allocation25 + $0x788] ss:$16 sps:$4 sm:$0xff]   ;;  %v17068_v50 = vld [vmem:[#allocation25 + $0x7a4] ss:$16 sps:$4 sm:$0xff]  }
 0xc41   :  { %13824 = vmatprep.subr.bf16.mxu1 %v17029_v52  ;;  %v17071_v52 = vld [vmem:[#allocation25 + $0x7ac] ss:$16 sps:$4 sm:$0xff]  }
 0xc43   :  { %13314 = vmatpush1.bf16.msra.mxu0 %v17028_v14  ;;  %v17070_v14 = vld [vmem:[#allocation25 + $0x7a0] ss:$16 sps:$4 sm:$0xff]  }
 0xc44   :  { %13826 = vmatpush1.bf16.msra.mxu1 %v17031_v5  ;;  %13316 = vmatprep.subr.bf16.mxu0 %v17032_v10  ;;  %v8017_v5 = vsub.s32 6, %v18397_v37  ;;  %v17073_v10 = vld [vmem:[#allocation25 + $0x7a8] ss:$16 sps:$4 sm:$0xff]  }
 0xc45   :  { %13828 = vmatprep.subr.bf16.mxu1 %v17035_v48  ;;  %v17074_v48 = vld [vmem:[#allocation25 + $0x7c4] ss:$16 sps:$4 sm:$0xff]  }
 0xc47   :  { %13318 = vmatpush1.bf16.msra.mxu0 %v17034_v43  ;;  %v17077_v43 = vld [vmem:[#allocation25 + $0x7cc] ss:$16 sps:$4 sm:$0xff]  }
 0xc48   :  { %13830 = vmatpush1.bf16.msra.mxu1 %v17037_v39  ;;  %13320 = vmatprep.subr.bf16.mxu0 %v17038_v40  ;;  %v17076_v39 = vld [vmem:[#allocation25 + $0x7c0] ss:$16 sps:$4 sm:$0xff]  }
 0xc49   :  { %13832 = vmatprep.subr.bf16.mxu1 %v17041_v61  ;;  %v17561_v40 = vld [vmem:[#allocation23] sm:$0xff] }
 0xc4a   :  { %v8018_v61 = vrot.slane %v17561_v40, %v8017_v5  ;;  %v17109_v40 = vld [vmem:[#allocation25 + $0x868] ss:$16 sps:$4 sm:$0xff]  }
 0xc4b   :  { %13322 = vmatpush1.bf16.msra.mxu0 %v17040_v55  ;;  %v17079_v55 = vld [vmem:[#allocation25 + $0x7c8] ss:$16 sps:$4 sm:$0xff]  }
 0xc4c   :  { %13834 = vmatpush1.bf16.msra.mxu1 %v17043_v51  ;;  %13324 = vmatprep.subr.bf16.mxu0 %v17044_v33  ;;  %v17080_v51 = vld [vmem:[#allocation25 + $0x7e4] ss:$16 sps:$4 sm:$0xff]   ;;  %v17083_v33 = vld [vmem:[#allocation25 + $0x7ec] ss:$16 sps:$4 sm:$0xff]  }
 0xc4d   :  { %13836 = vmatprep.subr.bf16.mxu1 %v17047_v49  ;;  %v19096_v49 = vld [vmem:[#allocation23 + $0x8] sm:$0xff] }
 0xc4f   :  { %13326 = vmatpush1.bf16.msra.mxu0 %v17046_v0  ;;  %v17082_v0 = vld [vmem:[#allocation25 + $0x7e0] ss:$16 sps:$4 sm:$0xff]  }
 0xc50   :  { %13838 = vmatpush1.bf16.msra.mxu1 %v17049_v1  ;;  %13328 = vmatprep.subr.bf16.mxu0 %v17050_v13  ;;  %v14163_v1 = vadd.f32 %v18991_v56, %v8018_v61  ;;  %v17085_v13 = vld [vmem:[#allocation25 + $0x7e8] ss:$16 sps:$4 sm:$0xff]   ;;  %v17088_v56 = vld [vmem:[#allocation25 + $0x800] ss:$16 sps:$4 sm:$0xff]  }
 0xc51   :  { %13840 = vmatprep.subr.bf16.mxu1 %v17053_v23  ;;  %v17086_v23 = vld [vmem:[#allocation25 + $0x804] ss:$16 sps:$4 sm:$0xff]  }
 0xc53   :  { %13330 = vmatpush1.bf16.msra.mxu0 %v17052_v31  ;;  %v14166_v31 = vadd.f32 %v19003_v4, %v19070_v21  ;;  %v17092_v4 = vld [vmem:[#allocation25 + $0x824] ss:$16 sps:$4 sm:$0xff]   ;;  %v17095_v21 = vld [vmem:[#allocation25 + $0x82c] ss:$16 sps:$4 sm:$0xff]  }
 0xc54   :  { %13842 = vmatpush1.bf16.msra.mxu1 %v17055_v57  ;;  %13332 = vmatprep.subr.bf16.mxu0 %v17056_v6  ;;  %v19103_v57 = vrot.slane %v19096_v49, %v18406_v45  ;;  %v17089_v6 = vld [vmem:[#allocation25 + $0x80c] ss:$16 sps:$4 sm:$0xff]  }
 0xc55   :  { %13844 = vmatprep.subr.bf16.mxu1 %v17059_v7  ;;  %v9309_v7 = vmax.f32 %v14163_v1, 0.0  ;;  %v17119_v1 = vld [vmem:[#allocation25 + $0x8ac] ss:$16 sps:$4 sm:$0xff]  }
 0xc57   :  { %13334 = vmatpush1.bf16.msra.mxu0 %v17058_v28  ;;  %v14165_v28 = vadd.f32 %v18999_v34, %v8018_v61  ;;  %v17097_v34 = vld [vmem:[#allocation25 + $0x828] ss:$16 sps:$4 sm:$0xff]   ;;  %v17110_v61 = vld [vmem:[#allocation25 + $0x884] ss:$16 sps:$4 sm:$0xff]  }
 0xc58   :  { %13846 = vmatpush1.bf16.msra.mxu1 %v17061_v58  ;;  %13336 = vmatprep.subr.bf16.mxu0 %v17062_v46  ;;  %v9326_v58 = vmax.f32 %v14166_v31, 0.0  ;;  %v14168_v46 = vadd.f32 %v19035_v18, %v19103_v57  ;;  %v17100_v18 = vld [vmem:[#allocation25 + $0x840] ss:$16 sps:$4 sm:$0xff]   ;;  %v17122_v31 = vld [vmem:[#allocation25 + $0x8c4] ss:$16 sps:$4 sm:$0xff]  }
 0xc59   :  { %13848 = vmatprep.subr.bf16.mxu1 %v17065_v12  ;;  %v17091_v12 = vld [vmem:[#allocation25 + $0x808] ss:$16 sps:$4 sm:$0xff]  }
 0xc5b   :  { %13338 = vmatpush1.bf16.msra.mxu0 %v17064_v16  ;;  %v9325_v16 = vmax.f32 %v14165_v28, 0.0  ;;  %v17127_v28 = vld [vmem:[#allocation25 + $0x8c8] ss:$16 sps:$4 sm:$0xff]  }
 0xc5c   :  { %13850 = vmatpush1.bf16.msra.mxu1 %v17067_v24  ;;  %13340 = vmatprep.subr.bf16.mxu0 %v17068_v50  ;;  %v17094_v24 = vld [vmem:[#allocation25 + $0x820] ss:$16 sps:$4 sm:$0xff]   ;;  %v9312_v50 = vmax.f32 %v14168_v46, 0.0 }
 0xc5d   :  { %13852 = vmatprep.subr.bf16.mxu1 %v17071_v52  ;;  %v17098_v52 = vld [vmem:[#allocation25 + $0x844] ss:$16 sps:$4 sm:$0xff]   ;;  %v17130_v46 = vld [vmem:[#allocation25 + $0x8e0] ss:$16 sps:$4 sm:$0xff]  }
 0xc5f   :  { %13342 = vmatpush1.bf16.msra.mxu0 %v17070_v14  ;;  %v17101_v14 = vld [vmem:[#allocation25 + $0x84c] ss:$16 sps:$4 sm:$0xff]  }
 0xc60   :  { %13854 = vmatpush1.bf16.msra.mxu1 %v17073_v10  ;;  %13344 = vmatprep.subr.bf16.mxu0 %v17074_v48  ;;  %v17103_v10 = vld [vmem:[#allocation25 + $0x848] ss:$16 sps:$4 sm:$0xff]   ;;  %v17104_v48 = vld [vmem:[#allocation25 + $0x864] ss:$16 sps:$4 sm:$0xff]  }
 0xc61   :  { %13856 = vmatprep.subr.bf16.mxu1 %v17077_v43  ;;  %v17107_v43 = vld [vmem:[#allocation25 + $0x86c] ss:$16 sps:$4 sm:$0xff]  }
 0xc63   :  { %13346 = vmatpush1.bf16.msra.mxu0 %v17076_v39  ;;  %v17106_v39 = vld [vmem:[#allocation25 + $0x860] ss:$16 sps:$4 sm:$0xff]  }
 0xc64   :  { %13858 = vmatpush1.bf16.msra.mxu1 %v17079_v55  ;;  %13348 = vmatprep.subr.bf16.mxu0 %v17080_v51  ;;  %v17113_v55 = vld [vmem:[#allocation25 + $0x88c] ss:$16 sps:$4 sm:$0xff]   ;;  %v17112_v51 = vld [vmem:[#allocation25 + $0x880] ss:$16 sps:$4 sm:$0xff]  }
 0xc65   :  { %13860 = vmatprep.subr.bf16.mxu1 %v17083_v33  ;;  %v17115_v33 = vld [vmem:[#allocation25 + $0x888] ss:$16 sps:$4 sm:$0xff]  }
 0xc67   :  { %13350 = vmatpush1.bf16.msra.mxu0 %v17082_v0  ;;  %v17116_v0 = vld [vmem:[#allocation25 + $0x8a4] ss:$16 sps:$4 sm:$0xff]  }
 0xc68   :  { %13862 = vmatpush1.bf16.msra.mxu1 %v17085_v13  ;;  %13352 = vmatprep.subr.bf16.mxu0 %v17086_v23  ;;  %v17118_v13 = vld [vmem:[#allocation25 + $0x8a0] ss:$16 sps:$4 sm:$0xff]   ;;  %v17121_v23 = vld [vmem:[#allocation25 + $0x8a8] ss:$16 sps:$4 sm:$0xff]  }
 0xc69   :  { %13864 = vmatprep.subr.bf16.mxu1 %v17089_v6  ;;  %v17125_v6 = vld [vmem:[#allocation25 + $0x8cc] ss:$16 sps:$4 sm:$0xff]  }
 0xc6a   :  { %9653 = vmatmul.mubr.f32.vlgmr.msra.gmra.mrb[48].mxu0 %v9309_v7 }
 0xc6b   :  { %10269 = vmatmul.mubr.f32.vlgmr.msra.gmra.mrb[48].mxu1 %v9309_v7  ;;  %9658 = vmatprep.mubr.f32.mxu0 %v9326_v58  ;;  %v17124_v7 = vld [vmem:[#allocation25 + $0x8c0] ss:$16 sps:$4 sm:$0xff]  }
 0xc6c   :  { %13354 = vmatpush1.bf16.msra.mxu0 %v17088_v56  ;;  %10274 = vmatprep.mubr.f32.mxu1 %v9326_v58  ;;  %v17128_v56 = vld [vmem:[#allocation25 + $0x8e4] ss:$16 sps:$4 sm:$0xff]   ;;  %v17131_v58 = vld [vmem:[#allocation25 + $0x8ec] ss:$16 sps:$4 sm:$0xff]  }
 0xc6d   :  { %13866 = vmatpush1.bf16.msra.mxu1 %v17091_v12  ;;  %13356 = vmatprep.subr.bf16.mxu0 %v17092_v4  ;;  %v17133_v12 = vld [vmem:[#allocation25 + $0x8e8] ss:$16 sps:$4 sm:$0xff]   ;;  %v17134_v4 = vld [vmem:[#allocation25 + $0x904] ss:$16 sps:$4 sm:$0xff]  }
 0xc6e   :  { %9659 = vmatmul.mubr.f32.gmra.mrb[50].mxu0 %v9325_v16  ;;  %13868 = vmatprep.subr.bf16.mxu1 %v17095_v21  ;;  %v17137_v21 = vld [vmem:[#allocation25 + $0x90c] ss:$16 sps:$4 sm:$0xff]  }
 0xc6f   :  { %10275 = vmatmul.mubr.f32.gmra.mrb[50].mxu1 %v9325_v16  ;;  %9729 = vmatprep.mubr.f32.mxu0 %v9312_v50  ;;  %v17136_v16 = vld [vmem:[#allocation25 + $0x900] ss:$16 sps:$4 sm:$0xff]  }
 0xc70   :  { %13358 = vmatpush1.bf16.msra.mxu0 %v17094_v24  ;;  %10345 = vmatprep.mubr.f32.mxu1 %v9312_v50  ;;  %v17139_v24 = vld [vmem:[#allocation25 + $0x908] ss:$16 sps:$4 sm:$0xff]   ;;  %v17140_v50 = vld [vmem:[#allocation25 + $0x924] ss:$16 sps:$4 sm:$0xff]  }
 0xc71   :  { %13870 = vmatpush1.bf16.msra.mxu1 %v17097_v34  ;;  %13360 = vmatprep.subr.bf16.mxu0 %v17098_v52  ;;  %v17143_v34 = vld [vmem:[#allocation25 + $0x92c] ss:$16 sps:$4 sm:$0xff]   ;;  %v17142_v52 = vld [vmem:[#allocation25 + $0x920] ss:$16 sps:$4 sm:$0xff]  }
 0xc72   :  { %13872 = vmatprep.subr.bf16.mxu1 %v17101_v14  ;;  %v17145_v14 = vld [vmem:[#allocation25 + $0x928] ss:$16 sps:$4 sm:$0xff]  }
 0xc74   :  { %13362 = vmatpush1.bf16.msra.mxu0 %v17100_v18  ;;  %v17146_v18 = vld [vmem:[#allocation25 + $0x944] ss:$16 sps:$4 sm:$0xff]  }
 0xc75   :  { %13874 = vmatpush1.bf16.msra.mxu1 %v17103_v10  ;;  %13364 = vmatprep.subr.bf16.mxu0 %v17104_v48  ;;  %v17149_v10 = vld [vmem:[#allocation25 + $0x94c] ss:$16 sps:$4 sm:$0xff]   ;;  %v17148_v48 = vld [vmem:[#allocation25 + $0x940] ss:$16 sps:$4 sm:$0xff]  }
 0xc76   :  { %13876 = vmatprep.subr.bf16.mxu1 %v17107_v43  ;;  %v17151_v43 = vld [vmem:[#allocation25 + $0x948] ss:$16 sps:$4 sm:$0xff]  }
 0xc78   :  { %13366 = vmatpush1.bf16.msra.mxu0 %v17106_v39  ;;  %v17152_v39 = vld [vmem:[#allocation25 + $0x964] ss:$16 sps:$4 sm:$0xff]  }
 0xc79   :  { %13878 = vmatpush1.bf16.msra.mxu1 %v17109_v40  ;;  %13368 = vmatprep.subr.bf16.mxu0 %v17110_v61  ;;  %v17155_v40 = vld [vmem:[#allocation25 + $0x96c] ss:$16 sps:$4 sm:$0xff]   ;;  %v17154_v61 = vld [vmem:[#allocation25 + $0x960] ss:$16 sps:$4 sm:$0xff]  }
 0xc7a   :  { %13880 = vmatprep.subr.bf16.mxu1 %v17113_v55  ;;  %v17157_v55 = vld [vmem:[#allocation25 + $0x968] ss:$16 sps:$4 sm:$0xff]  }
 0xc7c   :  { %13370 = vmatpush1.bf16.msra.mxu0 %v17112_v51  ;;  %v17158_v51 = vld [vmem:[#allocation25 + $0x984] ss:$16 sps:$4 sm:$0xff]  }
 0xc7d   :  { %13882 = vmatpush1.bf16.msra.mxu1 %v17115_v33  ;;  %13372 = vmatprep.subr.bf16.mxu0 %v17116_v0  ;;  %v17161_v33 = vld [vmem:[#allocation25 + $0x98c] ss:$16 sps:$4 sm:$0xff]   ;;  %v17160_v0 = vld [vmem:[#allocation25 + $0x980] ss:$16 sps:$4 sm:$0xff]  }
 0xc7e   :  { %13884 = vmatprep.subr.bf16.mxu1 %v17119_v1  ;;  %v17163_v1 = vld [vmem:[#allocation25 + $0x988] ss:$16 sps:$4 sm:$0xff]  }
 0xc80   :  { %13374 = vmatpush1.bf16.msra.mxu0 %v17118_v13  ;;  %v17164_v13 = vld [vmem:[#allocation25 + $0x9a4] ss:$16 sps:$4 sm:$0xff]  }
 0xc81   :  { %13886 = vmatpush1.bf16.msra.mxu1 %v17121_v23  ;;  %13376 = vmatprep.subr.bf16.mxu0 %v17122_v31  ;;  %v17167_v23 = vld [vmem:[#allocation25 + $0x9ac] ss:$16 sps:$4 sm:$0xff]   ;;  %v17166_v31 = vld [vmem:[#allocation25 + $0x9a0] ss:$16 sps:$4 sm:$0xff]  }
 0xc82   :  { %13888 = vmatprep.subr.bf16.mxu1 %v17125_v6  ;;  %v17169_v6 = vld [vmem:[#allocation25 + $0x9a8] ss:$16 sps:$4 sm:$0xff]  }
 0xc84   :  { %13378 = vmatpush1.bf16.msra.mxu0 %v17124_v7  ;;  %v17170_v7 = vld [vmem:[#allocation25 + $0x9c4] ss:$16 sps:$4 sm:$0xff]  }
 0xc85   :  { %13890 = vmatpush1.bf16.msra.mxu1 %v17127_v28  ;;  %13380 = vmatprep.subr.bf16.mxu0 %v17128_v56  ;;  %v17173_v28 = vld [vmem:[#allocation25 + $0x9cc] ss:$16 sps:$4 sm:$0xff]   ;;  %v17172_v56 = vld [vmem:[#allocation25 + $0x9c0] ss:$16 sps:$4 sm:$0xff]  }
 0xc86   :  { %13892 = vmatprep.subr.bf16.mxu1 %v17131_v58  ;;  %v8026_v58 = vrot.slane %v19096_v49, %v18400_v42 }
 0xc88   :  { %13382 = vmatpush1.bf16.msra.mxu0 %v17130_v46  ;;  %v17175_v46 = vld [vmem:[#allocation25 + $0x9c8] ss:$16 sps:$4 sm:$0xff]  }
 0xc89   :  { %13894 = vmatpush1.bf16.msra.mxu1 %v17133_v12  ;;  %13384 = vmatprep.subr.bf16.mxu0 %v17134_v4  ;;  %v17176_v12 = vld [vmem:[#allocation25 + $0x9e4] ss:$16 sps:$4 sm:$0xff]   ;;  %v17179_v4 = vld [vmem:[#allocation25 + $0x9ec] ss:$16 sps:$4 sm:$0xff]  }
 0xc8a   :  { %13896 = vmatprep.subr.bf16.mxu1 %v17137_v21  ;;  %v17178_v21 = vld [vmem:[#allocation25 + $0x9e0] ss:$16 sps:$4 sm:$0xff]  }
 0xc8c   :  { %13386 = vmatpush1.bf16.msra.mxu0 %v17136_v16  ;;  %v14167_v16 = vadd.f32 %v19031_v19, %v8026_v58  ;;  %v17184_v19 = vld [vmem:[#allocation25 + $0xa00] ss:$16 sps:$4 sm:$0xff]  }
 0xc8d   :  { %13898 = vmatpush1.bf16.msra.mxu1 %v17139_v24  ;;  %13388 = vmatprep.subr.bf16.mxu0 %v17140_v50  ;;  %v17181_v24 = vld [vmem:[#allocation25 + $0x9e8] ss:$16 sps:$4 sm:$0xff]   ;;  %v17182_v50 = vld [vmem:[#allocation25 + $0xa04] ss:$16 sps:$4 sm:$0xff]  }
 0xc8e   :  { %13900 = vmatprep.subr.bf16.mxu1 %v17143_v34  ;;  %v19113_v34 = vrot.slane %v19096_v49, %v18409_v47 }
 0xc90   :  { %13390 = vmatpush1.bf16.msra.mxu0 %v17142_v52  ;;  %v14170_v52 = vadd.f32 %v19043_v11, %v19103_v57  ;;  %v17190_v57 = vld [vmem:[#allocation25 + $0xa20] ss:$16 sps:$4 sm:$0xff]  }
 0xc91   :  { %13902 = vmatpush1.bf16.msra.mxu1 %v17145_v14  ;;  %13392 = vmatprep.subr.bf16.mxu0 %v17146_v18  ;;  %v17185_v14 = vld [vmem:[#allocation25 + $0xa0c] ss:$16 sps:$4 sm:$0xff]   ;;  %v9311_v18 = vmax.f32 %v14167_v16, 0.0 }
 0xc92   :  { %13904 = vmatprep.subr.bf16.mxu1 %v17149_v10  ;;  %v14169_v10 = vadd.f32 %v19039_v62, %v8026_v58  ;;  %v17193_v62 = vld [vmem:[#allocation25 + $0xa28] ss:$16 sps:$4 sm:$0xff]   ;;  %v17212_v58 = vld [vmem:[#allocation25 + $0xaa4] ss:$16 sps:$4 sm:$0xff]   ;;  %v17221_v16 = vld [vmem:[#allocation25 + $0xacc] ss:$16 sps:$4 sm:$0xff]  }
 0xc94   :  { %13394 = vmatpush1.bf16.msra.mxu0 %v17148_v48  ;;  %v14172_v48 = vadd.f32 %v19037_v41, %v19113_v34  ;;  %v9327_v11 = vmax.f32 %v14169_v10, 0.0  ;;  %v17197_v41 = vld [vmem:[#allocation25 + $0xa4c] ss:$16 sps:$4 sm:$0xff]   ;;  %v17229_v10 = vld [vmem:[#allocation25 + $0xae8] ss:$16 sps:$4 sm:$0xff]  }
 0xc95   :  { %13906 = vmatpush1.bf16.msra.mxu1 %v17151_v43  ;;  %13396 = vmatprep.subr.bf16.mxu0 %v17152_v39  ;;  %v9328_v43 = vmax.f32 %v14170_v52, 0.0  ;;  %v17187_v39 = vld [vmem:[#allocation25 + $0xa08] ss:$16 sps:$4 sm:$0xff]   ;;  %v17224_v52 = vld [vmem:[#allocation25 + $0xae4] ss:$16 sps:$4 sm:$0xff]  }
 0xc96   :  { %13908 = vmatprep.subr.bf16.mxu1 %v17155_v40  ;;  %v17188_v40 = vld [vmem:[#allocation25 + $0xa24] ss:$16 sps:$4 sm:$0xff]  }
 0xc98   :  { %13398 = vmatpush1.bf16.msra.mxu0 %v17154_v61  ;;  %v17191_v61 = vld [vmem:[#allocation25 + $0xa2c] ss:$16 sps:$4 sm:$0xff]  }
 0xc99   :  { %13910 = vmatpush1.bf16.msra.mxu1 %v17157_v55  ;;  %13400 = vmatprep.subr.bf16.mxu0 %v17158_v51  ;;  %v9314_v55 = vmax.f32 %v14172_v48, 0.0  ;;  %v17194_v51 = vld [vmem:[#allocation25 + $0xa44] ss:$16 sps:$4 sm:$0xff]   ;;  %v17233_v48 = vld [vmem:[#allocation25 + $0xb0c] ss:$16 sps:$4 sm:$0xff]  }
 0xc9a   :  { %13912 = vmatprep.subr.bf16.mxu1 %v17161_v33  ;;  %v17196_v33 = vld [vmem:[#allocation25 + $0xa40] ss:$16 sps:$4 sm:$0xff]  }
 0xc9c   :  { %13402 = vmatpush1.bf16.msra.mxu0 %v17160_v0  ;;  %v17199_v0 = vld [vmem:[#allocation25 + $0xa48] ss:$16 sps:$4 sm:$0xff]  }
 0xc9d   :  { %13914 = vmatpush1.bf16.msra.mxu1 %v17163_v1  ;;  %13404 = vmatprep.subr.bf16.mxu0 %v17164_v13  ;;  %v17200_v1 = vld [vmem:[#allocation25 + $0xa64] ss:$16 sps:$4 sm:$0xff]   ;;  %v17203_v13 = vld [vmem:[#allocation25 + $0xa6c] ss:$16 sps:$4 sm:$0xff]  }
 0xc9e   :  { %13916 = vmatprep.subr.bf16.mxu1 %v17167_v23  ;;  %v17202_v23 = vld [vmem:[#allocation25 + $0xa60] ss:$16 sps:$4 sm:$0xff]  }
 0xca0   :  { %13406 = vmatpush1.bf16.msra.mxu0 %v17166_v31  ;;  %v17205_v31 = vld [vmem:[#allocation25 + $0xa68] ss:$16 sps:$4 sm:$0xff]  }
 0xca1   :  { %13918 = vmatpush1.bf16.msra.mxu1 %v17169_v6  ;;  %13408 = vmatprep.subr.bf16.mxu0 %v17170_v7  ;;  %v17206_v6 = vld [vmem:[#allocation25 + $0xa84] ss:$16 sps:$4 sm:$0xff]   ;;  %v17209_v7 = vld [vmem:[#allocation25 + $0xa8c] ss:$16 sps:$4 sm:$0xff]  }
 0xca2   :  { %13920 = vmatprep.subr.bf16.mxu1 %v17173_v28  ;;  %v17208_v28 = vld [vmem:[#allocation25 + $0xa80] ss:$16 sps:$4 sm:$0xff]  }
 0xca4   :  { %13410 = vmatpush1.bf16.msra.mxu0 %v17172_v56  ;;  %v17211_v56 = vld [vmem:[#allocation25 + $0xa88] ss:$16 sps:$4 sm:$0xff]  }
 0xca5   :  { %13922 = vmatpush1.bf16.msra.mxu1 %v17175_v46  ;;  %13412 = vmatprep.subr.bf16.mxu0 %v17176_v12  ;;  %v17215_v46 = vld [vmem:[#allocation25 + $0xaac] ss:$16 sps:$4 sm:$0xff]   ;;  %v17214_v12 = vld [vmem:[#allocation25 + $0xaa0] ss:$16 sps:$4 sm:$0xff]  }
 0xca6   :  { %13924 = vmatprep.subr.bf16.mxu1 %v17179_v4  ;;  %v17217_v4 = vld [vmem:[#allocation25 + $0xaa8] ss:$16 sps:$4 sm:$0xff]  }
 0xca8   :  { %13414 = vmatpush1.bf16.msra.mxu0 %v17178_v21  ;;  %v17218_v21 = vld [vmem:[#allocation25 + $0xac4] ss:$16 sps:$4 sm:$0xff]  }
 0xca9   :  { %13926 = vmatpush1.bf16.msra.mxu1 %v17181_v24  ;;  %13416 = vmatprep.subr.bf16.mxu0 %v17182_v50  ;;  %v17220_v24 = vld [vmem:[#allocation25 + $0xac0] ss:$16 sps:$4 sm:$0xff]   ;;  %v17223_v50 = vld [vmem:[#allocation25 + $0xac8] ss:$16 sps:$4 sm:$0xff]  }
 0xcaa   :  { %13928 = vmatprep.subr.bf16.mxu1 %v17185_v14  ;;  %v17227_v14 = vld [vmem:[#allocation25 + $0xaec] ss:$16 sps:$4 sm:$0xff]  }
 0xcab   :  { %9730 = vmatmul.mubr.f32.vlgmr.msra.gmra.mrb[48].mxu0 %v9311_v18 }
 0xcac   :  { %10346 = vmatmul.mubr.f32.vlgmr.msra.gmra.mrb[48].mxu1 %v9311_v18  ;;  %9735 = vmatprep.mubr.f32.mxu0 %v9328_v43  ;;  %v17226_v18 = vld [vmem:[#allocation25 + $0xae0] ss:$16 sps:$4 sm:$0xff]  }
 0xcad   :  { %13418 = vmatpush1.bf16.msra.mxu0 %v17184_v19  ;;  %10351 = vmatprep.mubr.f32.mxu1 %v9328_v43  ;;  %v17230_v19 = vld [vmem:[#allocation25 + $0xb04] ss:$16 sps:$4 sm:$0xff]   ;;  %v17232_v43 = vld [vmem:[#allocation25 + $0xb00] ss:$16 sps:$4 sm:$0xff]  }
 0xcae   :  { %13930 = vmatpush1.bf16.msra.mxu1 %v17187_v39  ;;  %13420 = vmatprep.subr.bf16.mxu0 %v17188_v40  ;;  %v17235_v39 = vld [vmem:[#allocation25 + $0xb08] ss:$16 sps:$4 sm:$0xff]   ;;  %v17236_v40 = vld [vmem:[#allocation25 + $0xb24] ss:$16 sps:$4 sm:$0xff]  }
 0xcaf   :  { %9736 = vmatmul.mubr.f32.gmra.mrb[50].mxu0 %v9327_v11  ;;  %13932 = vmatprep.subr.bf16.mxu1 %v17191_v61  ;;  %v17239_v61 = vld [vmem:[#allocation25 + $0xb2c] ss:$16 sps:$4 sm:$0xff]  }
 0xcb0   :  { %10352 = vmatmul.mubr.f32.gmra.mrb[50].mxu1 %v9327_v11  ;;  %9806 = vmatprep.mubr.f32.mxu0 %v9314_v55  ;;  %v17238_v11 = vld [vmem:[#allocation25 + $0xb20] ss:$16 sps:$4 sm:$0xff]  }
 0xcb1   :  { %13422 = vmatpush1.bf16.msra.mxu0 %v17190_v57  ;;  %10422 = vmatprep.mubr.f32.mxu1 %v9314_v55  ;;  %v17241_v57 = vld [vmem:[#allocation25 + $0xb28] ss:$16 sps:$4 sm:$0xff]   ;;  %v17242_v55 = vld [vmem:[#allocation25 + $0xb44] ss:$16 sps:$4 sm:$0xff]  }
 0xcb2   :  { %13934 = vmatpush1.bf16.msra.mxu1 %v17193_v62  ;;  %13424 = vmatprep.subr.bf16.mxu0 %v17194_v51  ;;  %v17245_v62 = vld [vmem:[#allocation25 + $0xb4c] ss:$16 sps:$4 sm:$0xff]   ;;  %v17244_v51 = vld [vmem:[#allocation25 + $0xb40] ss:$16 sps:$4 sm:$0xff]  }
 0xcb3   :  { %13936 = vmatprep.subr.bf16.mxu1 %v17197_v41  ;;  %v17247_v41 = vld [vmem:[#allocation25 + $0xb48] ss:$16 sps:$4 sm:$0xff]  }
 0xcb5   :  { %13426 = vmatpush1.bf16.msra.mxu0 %v17196_v33  ;;  %v17248_v33 = vld [vmem:[#allocation25 + $0xb64] ss:$16 sps:$4 sm:$0xff]  }
 0xcb6   :  { %13938 = vmatpush1.bf16.msra.mxu1 %v17199_v0  ;;  %13428 = vmatprep.subr.bf16.mxu0 %v17200_v1  ;;  %v17251_v0 = vld [vmem:[#allocation25 + $0xb6c] ss:$16 sps:$4 sm:$0xff]   ;;  %v17250_v1 = vld [vmem:[#allocation25 + $0xb60] ss:$16 sps:$4 sm:$0xff]  }
 0xcb7   :  { %13940 = vmatprep.subr.bf16.mxu1 %v17203_v13  ;;  %v17253_v13 = vld [vmem:[#allocation25 + $0xb68] ss:$16 sps:$4 sm:$0xff]  }
 0xcb9   :  { %13430 = vmatpush1.bf16.msra.mxu0 %v17202_v23  ;;  %v17254_v23 = vld [vmem:[#allocation25 + $0xb84] ss:$16 sps:$4 sm:$0xff]  }
 0xcba   :  { %13942 = vmatpush1.bf16.msra.mxu1 %v17205_v31  ;;  %13432 = vmatprep.subr.bf16.mxu0 %v17206_v6  ;;  %v17257_v31 = vld [vmem:[#allocation25 + $0xb8c] ss:$16 sps:$4 sm:$0xff]   ;;  %v17256_v6 = vld [vmem:[#allocation25 + $0xb80] ss:$16 sps:$4 sm:$0xff]  }
 0xcbb   :  { %13944 = vmatprep.subr.bf16.mxu1 %v17209_v7  ;;  %v17259_v7 = vld [vmem:[#allocation25 + $0xb88] ss:$16 sps:$4 sm:$0xff]  }
 0xcbd   :  { %13434 = vmatpush1.bf16.msra.mxu0 %v17208_v28  ;;  %v17260_v28 = vld [vmem:[#allocation25 + $0xba4] ss:$16 sps:$4 sm:$0xff]  }
 0xcbe   :  { %13946 = vmatpush1.bf16.msra.mxu1 %v17211_v56  ;;  %13436 = vmatprep.subr.bf16.mxu0 %v17212_v58  ;;  %v17263_v56 = vld [vmem:[#allocation25 + $0xbac] ss:$16 sps:$4 sm:$0xff]   ;;  %v17262_v58 = vld [vmem:[#allocation25 + $0xba0] ss:$16 sps:$4 sm:$0xff]  }
 0xcbf   :  { %13948 = vmatprep.subr.bf16.mxu1 %v17215_v46  ;;  %v17265_v46 = vld [vmem:[#allocation25 + $0xba8] ss:$16 sps:$4 sm:$0xff]  }
 0xcc1   :  { %13438 = vmatpush1.bf16.msra.mxu0 %v17214_v12  ;;  %v17266_v12 = vld [vmem:[#allocation25 + $0xbc4] ss:$16 sps:$4 sm:$0xff]  }
 0xcc2   :  { %13950 = vmatpush1.bf16.msra.mxu1 %v17217_v4  ;;  %13440 = vmatprep.subr.bf16.mxu0 %v17218_v21  ;;  %v17269_v4 = vld [vmem:[#allocation25 + $0xbcc] ss:$16 sps:$4 sm:$0xff]   ;;  %v17268_v21 = vld [vmem:[#allocation25 + $0xbc0] ss:$16 sps:$4 sm:$0xff]  }
 0xcc3   :  { %13952 = vmatprep.subr.bf16.mxu1 %v17221_v16  ;;  %v8034_v16 = vrot.slane %v19096_v49, %v18403_v44 }
 0xcc5   :  { %13442 = vmatpush1.bf16.msra.mxu0 %v17220_v24  ;;  %v17271_v24 = vld [vmem:[#allocation25 + $0xbc8] ss:$16 sps:$4 sm:$0xff]  }
 0xcc6   :  { %13954 = vmatpush1.bf16.msra.mxu1 %v17223_v50  ;;  %13444 = vmatprep.subr.bf16.mxu0 %v17224_v52  ;;  %v17272_v50 = vld [vmem:[#allocation25 + $0xbe4] ss:$16 sps:$4 sm:$0xff]   ;;  %v17275_v52 = vld [vmem:[#allocation25 + $0xbec] ss:$16 sps:$4 sm:$0xff]  }
 0xcc7   :  { %13956 = vmatprep.subr.bf16.mxu1 %v17227_v14  ;;  %v17274_v14 = vld [vmem:[#allocation25 + $0xbe0] ss:$16 sps:$4 sm:$0xff]  }
 0xcc9   :  { %13446 = vmatpush1.bf16.msra.mxu0 %v17226_v18  ;;  %v14171_v18 = vadd.f32 %v19033_v9, %v8034_v16  ;;  %v17280_v9 = vld [vmem:[#allocation25 + $0xc00] ss:$16 sps:$4 sm:$0xff]  }
 0xcca   :  { %13958 = vmatpush1.bf16.msra.mxu1 %v17229_v10  ;;  %13448 = vmatprep.subr.bf16.mxu0 %v17230_v19  ;;  %v17277_v10 = vld [vmem:[#allocation25 + $0xbe8] ss:$16 sps:$4 sm:$0xff]   ;;  %v17278_v19 = vld [vmem:[#allocation25 + $0xc04] ss:$16 sps:$4 sm:$0xff]  }
 0xccb   :  { %13960 = vmatprep.subr.bf16.mxu1 %v17233_v48  ;;  %v14174_v48 = vadd.f32 %v19045_v35, %v19113_v34  ;;  %v17283_v35 = vld [vmem:[#allocation25 + $0xc08] ss:$16 sps:$4 sm:$0xff]   ;;  %v17284_v34 = vld [vmem:[#allocation25 + $0xc24] ss:$16 sps:$4 sm:$0xff]  }
 0xccd   :  { %13450 = vmatpush1.bf16.msra.mxu0 %v17232_v43  ;;  %v19128_v43 = vrot.slane %v19096_v49, %v8013_v63 }
 0xcce   :  { %13962 = vmatpush1.bf16.msra.mxu1 %v17235_v39  ;;  %13452 = vmatprep.subr.bf16.mxu0 %v17236_v40  ;;  %v17281_v39 = vld [vmem:[#allocation25 + $0xc0c] ss:$16 sps:$4 sm:$0xff]   ;;  %v9313_v40 = vmax.f32 %v14171_v18, 0.0  ;;  %v17322_v18 = vld [vmem:[#allocation25 + $0xce0] ss:$16 sps:$4 sm:$0xff]  }
 0xccf   :  { %13964 = vmatprep.subr.bf16.mxu1 %v17239_v61  ;;  %v14173_v61 = vadd.f32 %v19041_v3, %v8034_v16  ;;  %v17289_v3 = vld [vmem:[#allocation25 + $0xc28] ss:$16 sps:$4 sm:$0xff]   ;;  %v17317_v16 = vld [vmem:[#allocation25 + $0xccc] ss:$16 sps:$4 sm:$0xff]  }
 0xcd1   :  { %13454 = vmatpush1.bf16.msra.mxu0 %v17238_v11  ;;  %v9330_v11 = vmax.f32 %v14174_v48, 0.0  ;;  %v9329_v63 = vmax.f32 %v14173_v61, 0.0  ;;  %v17329_v48 = vld [vmem:[#allocation25 + $0xd0c] ss:$16 sps:$4 sm:$0xff]   ;;  %v17332_v61 = vld [vmem:[#allocation25 + $0xd24] ss:$16 sps:$4 sm:$0xff]  }
 0xcd2   :  { %13966 = vmatpush1.bf16.msra.mxu1 %v17241_v57  ;;  %13456 = vmatprep.subr.bf16.mxu0 %v17242_v55  ;;  %v14176_v57 = vadd.f32 %v19081_v8, %v19128_v43  ;;  %v17287_v55 = vld [vmem:[#allocation25 + $0xc2c] ss:$16 sps:$4 sm:$0xff]   ;;  %v17292_v8 = vld [vmem:[#allocation25 + $0xc40] ss:$16 sps:$4 sm:$0xff]  }
 0xcd3   :  { %13968 = vmatprep.subr.bf16.mxu1 %v17245_v62  ;;  %v17286_v62 = vld [vmem:[#allocation25 + $0xc20] ss:$16 sps:$4 sm:$0xff]  }
 0xcd5   :  { %13458 = vmatpush1.bf16.msra.mxu0 %v17244_v51  ;;  %v9316_v51 = vmax.f32 %v14176_v57, 0.0  ;;  %v17337_v57 = vld [vmem:[#allocation25 + $0xd28] ss:$16 sps:$4 sm:$0xff]  }
 0xcd6   :  { %13970 = vmatpush1.bf16.msra.mxu1 %v17247_v41  ;;  %13460 = vmatprep.subr.bf16.mxu0 %v17248_v33  ;;  %v17290_v41 = vld [vmem:[#allocation25 + $0xc44] ss:$16 sps:$4 sm:$0xff]   ;;  %v17293_v33 = vld [vmem:[#allocation25 + $0xc4c] ss:$16 sps:$4 sm:$0xff]  }
 0xcd7   :  { %13972 = vmatprep.subr.bf16.mxu1 %v17251_v0  ;;  %v17295_v0 = vld [vmem:[#allocation25 + $0xc48] ss:$16 sps:$4 sm:$0xff]  }
 0xcd9   :  { %13462 = vmatpush1.bf16.msra.mxu0 %v17250_v1  ;;  %v17296_v1 = vld [vmem:[#allocation25 + $0xc64] ss:$16 sps:$4 sm:$0xff]  }
 0xcda   :  { %13974 = vmatpush1.bf16.msra.mxu1 %v17253_v13  ;;  %13464 = vmatprep.subr.bf16.mxu0 %v17254_v23  ;;  %v17299_v13 = vld [vmem:[#allocation25 + $0xc6c] ss:$16 sps:$4 sm:$0xff]   ;;  %v17298_v23 = vld [vmem:[#allocation25 + $0xc60] ss:$16 sps:$4 sm:$0xff]  }
 0xcdb   :  { %13976 = vmatprep.subr.bf16.mxu1 %v17257_v31  ;;  %v17301_v31 = vld [vmem:[#allocation25 + $0xc68] ss:$16 sps:$4 sm:$0xff]  }
 0xcdd   :  { %13466 = vmatpush1.bf16.msra.mxu0 %v17256_v6  ;;  %v17302_v6 = vld [vmem:[#allocation25 + $0xc84] ss:$16 sps:$4 sm:$0xff]  }
 0xcde   :  { %13978 = vmatpush1.bf16.msra.mxu1 %v17259_v7  ;;  %13468 = vmatprep.subr.bf16.mxu0 %v17260_v28  ;;  %v17305_v7 = vld [vmem:[#allocation25 + $0xc8c] ss:$16 sps:$4 sm:$0xff]   ;;  %v17304_v28 = vld [vmem:[#allocation25 + $0xc80] ss:$16 sps:$4 sm:$0xff]  }
 0xcdf   :  { %13980 = vmatprep.subr.bf16.mxu1 %v17263_v56  ;;  %v17307_v56 = vld [vmem:[#allocation25 + $0xc88] ss:$16 sps:$4 sm:$0xff]  }
 0xce1   :  { %13470 = vmatpush1.bf16.msra.mxu0 %v17262_v58  ;;  %v17308_v58 = vld [vmem:[#allocation25 + $0xca4] ss:$16 sps:$4 sm:$0xff]  }
 0xce2   :  { %13982 = vmatpush1.bf16.msra.mxu1 %v17265_v46  ;;  %13472 = vmatprep.subr.bf16.mxu0 %v17266_v12  ;;  %v17311_v46 = vld [vmem:[#allocation25 + $0xcac] ss:$16 sps:$4 sm:$0xff]   ;;  %v17310_v12 = vld [vmem:[#allocation25 + $0xca0] ss:$16 sps:$4 sm:$0xff]  }
 0xce3   :  { %13984 = vmatprep.subr.bf16.mxu1 %v17269_v4  ;;  %v17313_v4 = vld [vmem:[#allocation25 + $0xca8] ss:$16 sps:$4 sm:$0xff]  }
 0xce5   :  { %13474 = vmatpush1.bf16.msra.mxu0 %v17268_v21  ;;  %v17314_v21 = vld [vmem:[#allocation25 + $0xcc4] ss:$16 sps:$4 sm:$0xff]  }
 0xce6   :  { %13986 = vmatpush1.bf16.msra.mxu1 %v17271_v24  ;;  %13476 = vmatprep.subr.bf16.mxu0 %v17272_v50  ;;  %v17316_v24 = vld [vmem:[#allocation25 + $0xcc0] ss:$16 sps:$4 sm:$0xff]   ;;  %v17319_v50 = vld [vmem:[#allocation25 + $0xcc8] ss:$16 sps:$4 sm:$0xff]  }
 0xce7   :  { %13988 = vmatprep.subr.bf16.mxu1 %v17275_v52  ;;  %v17320_v52 = vld [vmem:[#allocation25 + $0xce4] ss:$16 sps:$4 sm:$0xff]  }
 0xce9   :  { %13478 = vmatpush1.bf16.msra.mxu0 %v17274_v14  ;;  %v17323_v14 = vld [vmem:[#allocation25 + $0xcec] ss:$16 sps:$4 sm:$0xff]  }
 0xcea   :  { %13990 = vmatpush1.bf16.msra.mxu1 %v17277_v10  ;;  %13480 = vmatprep.subr.bf16.mxu0 %v17278_v19  ;;  %v17325_v10 = vld [vmem:[#allocation25 + $0xce8] ss:$16 sps:$4 sm:$0xff]   ;;  %v17326_v19 = vld [vmem:[#allocation25 + $0xd04] ss:$16 sps:$4 sm:$0xff]  }
 0xceb   :  { %13992 = vmatprep.subr.bf16.mxu1 %v17281_v39  ;;  %v17328_v39 = vld [vmem:[#allocation25 + $0xd00] ss:$16 sps:$4 sm:$0xff]  }
 0xcec   :  { %9807 = vmatmul.mubr.f32.vlgmr.msra.gmra.mrb[48].mxu0 %v9313_v40 }
 0xced   :  { %10423 = vmatmul.mubr.f32.vlgmr.msra.gmra.mrb[48].mxu1 %v9313_v40  ;;  %9812 = vmatprep.mubr.f32.mxu0 %v9330_v11  ;;  %v17331_v40 = vld [vmem:[#allocation25 + $0xd08] ss:$16 sps:$4 sm:$0xff]  }
 0xcee   :  { %13482 = vmatpush1.bf16.msra.mxu0 %v17280_v9  ;;  %10428 = vmatprep.mubr.f32.mxu1 %v9330_v11  ;;  %v17335_v9 = vld [vmem:[#allocation25 + $0xd2c] ss:$16 sps:$4 sm:$0xff]   ;;  %v17334_v11 = vld [vmem:[#allocation25 + $0xd20] ss:$16 sps:$4 sm:$0xff]  }
 0xcef   :  { %13994 = vmatpush1.bf16.msra.mxu1 %v17283_v35  ;;  %13484 = vmatprep.subr.bf16.mxu0 %v17284_v34  ;;  %v17338_v35 = vld [vmem:[#allocation25 + $0xd44] ss:$16 sps:$4 sm:$0xff]   ;;  %v17341_v34 = vld [vmem:[#allocation25 + $0xd4c] ss:$16 sps:$4 sm:$0xff]  }
 0xcf0   :  { %9813 = vmatmul.mubr.f32.gmra.mrb[50].mxu0 %v9329_v63  ;;  %13996 = vmatprep.subr.bf16.mxu1 %v17287_v55  ;;  %v17340_v55 = vld [vmem:[#allocation25 + $0xd40] ss:$16 sps:$4 sm:$0xff]  }
 0xcf1   :  { %10429 = vmatmul.mubr.f32.gmra.mrb[50].mxu1 %v9329_v63  ;;  %9883 = vmatprep.mubr.f32.mxu0 %v9316_v51  ;;  %v17343_v63 = vld [vmem:[#allocation25 + $0xd48] ss:$16 sps:$4 sm:$0xff]  }
 0xcf2   :  { %13486 = vmatpush1.bf16.msra.mxu0 %v17286_v62  ;;  %10499 = vmatprep.mubr.f32.mxu1 %v9316_v51  ;;  %v17344_v62 = vld [vmem:[#allocation25 + $0xd64] ss:$16 sps:$4 sm:$0xff]   ;;  %v17347_v51 = vld [vmem:[#allocation25 + $0xd6c] ss:$16 sps:$4 sm:$0xff]  }
 0xcf3   :  { %13998 = vmatpush1.bf16.msra.mxu1 %v17289_v3  ;;  %13488 = vmatprep.subr.bf16.mxu0 %v17290_v41  ;;  %v17346_v3 = vld [vmem:[#allocation25 + $0xd60] ss:$16 sps:$4 sm:$0xff]   ;;  %v17349_v41 = vld [vmem:[#allocation25 + $0xd68] ss:$16 sps:$4 sm:$0xff]  }
 0xcf4   :  { %14000 = vmatprep.subr.bf16.mxu1 %v17293_v33  ;;  %v17350_v33 = vld [vmem:[#allocation25 + $0xd84] ss:$16 sps:$4 sm:$0xff]  }
 0xcf6   :  { %13490 = vmatpush1.bf16.msra.mxu0 %v17292_v8  ;;  %v17353_v8 = vld [vmem:[#allocation25 + $0xd8c] ss:$16 sps:$4 sm:$0xff]  }
 0xcf7   :  { %14002 = vmatpush1.bf16.msra.mxu1 %v17295_v0  ;;  %13492 = vmatprep.subr.bf16.mxu0 %v17296_v1  ;;  %v17352_v0 = vld [vmem:[#allocation25 + $0xd80] ss:$16 sps:$4 sm:$0xff]   ;;  %v17355_v1 = vld [vmem:[#allocation25 + $0xd88] ss:$16 sps:$4 sm:$0xff]  }
 0xcf8   :  { %14004 = vmatprep.subr.bf16.mxu1 %v17299_v13  ;;  %v17356_v13 = vld [vmem:[#allocation25 + $0xda4] ss:$16 sps:$4 sm:$0xff]  }
 0xcfa   :  { %13494 = vmatpush1.bf16.msra.mxu0 %v17298_v23  ;;  %v17359_v23 = vld [vmem:[#allocation25 + $0xdac] ss:$16 sps:$4 sm:$0xff]  }
 0xcfb   :  { %14006 = vmatpush1.bf16.msra.mxu1 %v17301_v31  ;;  %13496 = vmatprep.subr.bf16.mxu0 %v17302_v6  ;;  %v17358_v31 = vld [vmem:[#allocation25 + $0xda0] ss:$16 sps:$4 sm:$0xff]   ;;  %v17361_v6 = vld [vmem:[#allocation25 + $0xda8] ss:$16 sps:$4 sm:$0xff]  }
 0xcfc   :  { %14008 = vmatprep.subr.bf16.mxu1 %v17305_v7  ;;  %v17362_v7 = vld [vmem:[#allocation25 + $0xdc4] ss:$16 sps:$4 sm:$0xff]  }
 0xcfe   :  { %13498 = vmatpush1.bf16.msra.mxu0 %v17304_v28  ;;  %v17365_v28 = vld [vmem:[#allocation25 + $0xdcc] ss:$16 sps:$4 sm:$0xff]  }
 0xcff   :  { %14010 = vmatpush1.bf16.msra.mxu1 %v17307_v56  ;;  %13500 = vmatprep.subr.bf16.mxu0 %v17308_v58  ;;  %v17364_v56 = vld [vmem:[#allocation25 + $0xdc0] ss:$16 sps:$4 sm:$0xff]   ;;  %v8042_v58 = vrot.slane %v19096_v49, %v8009_v29  ;;  %v14178_v29 = vadd.f32 %v19089_v2, %v19128_v43 }
 0xd00   :  { %14012 = vmatprep.subr.bf16.mxu1 %v17311_v46  ;;  %v17367_v46 = vld [vmem:[#allocation25 + $0xdc8] ss:$16 sps:$4 sm:$0xff]   ;;  %v17382_v43 = vld [vmem:[#allocation25 + $0xe20] ss:$16 sps:$4 sm:$0xff]  }
 0xd02   :  { %13502 = vmatpush1.bf16.msra.mxu0 %v17310_v12  ;;  %v17368_v12 = vld [vmem:[#allocation25 + $0xde4] ss:$16 sps:$4 sm:$0xff]  }
 0xd03   :  { %14014 = vmatpush1.bf16.msra.mxu1 %v17313_v4  ;;  %13504 = vmatprep.subr.bf16.mxu0 %v17314_v21  ;;  %v17371_v4 = vld [vmem:[#allocation25 + $0xdec] ss:$16 sps:$4 sm:$0xff]   ;;  %v17370_v21 = vld [vmem:[#allocation25 + $0xde0] ss:$16 sps:$4 sm:$0xff]  }
 0xd04   :  { %14016 = vmatprep.subr.bf16.mxu1 %v17317_v16  ;;  %v14175_v16 = vadd.f32 %v19077_v53, %v8042_v58  ;;  %v17376_v53 = vld [vmem:[#allocation25 + $0xe00] ss:$16 sps:$4 sm:$0xff]  }
 0xd06   :  { %13506 = vmatpush1.bf16.msra.mxu0 %v17316_v24  ;;  %v17373_v24 = vld [vmem:[#allocation25 + $0xde8] ss:$16 sps:$4 sm:$0xff]  }
 0xd07   :  { %14018 = vmatpush1.bf16.msra.mxu1 %v17319_v50  ;;  %13508 = vmatprep.subr.bf16.mxu0 %v17320_v52  ;;  %v17374_v50 = vld [vmem:[#allocation25 + $0xe04] ss:$16 sps:$4 sm:$0xff]   ;;  %v19140_v52 = vrot.slane %v19096_v49, %v8021_v36  ;;  %v17383_v49 = vld [vmem:[#allocation25 + $0xe2c] ss:$16 sps:$4 sm:$0xff]  }
 0xd08   :  { %14020 = vmatprep.subr.bf16.mxu1 %v17323_v14  ;;  %v17377_v14 = vld [vmem:[#allocation25 + $0xe0c] ss:$16 sps:$4 sm:$0xff]   ;;  %v17380_v36 = vld [vmem:[#allocation25 + $0xe24] ss:$16 sps:$4 sm:$0xff]  }
 0xd0a   :  { %13510 = vmatpush1.bf16.msra.mxu0 %v17322_v18  ;;  %v9315_v18 = vmax.f32 %v14175_v16, 0.0  ;;  %v17431_v16 = vld [vmem:[#allocation25 + $0xf2c] ss:$16 sps:$4 sm:$0xff]  }
 0xd0b   :  { %14022 = vmatpush1.bf16.msra.mxu1 %v17325_v10  ;;  %13512 = vmatprep.subr.bf16.mxu0 %v17326_v19  ;;  %v14177_v10 = vadd.f32 %v19085_v22, %v8042_v58  ;;  %v14180_v19 = vadd.f32 %v19083_v38, %v19140_v52  ;;  %v17385_v22 = vld [vmem:[#allocation25 + $0xe28] ss:$16 sps:$4 sm:$0xff]   ;;  %v17389_v38 = vld [vmem:[#allocation25 + $0xe4c] ss:$16 sps:$4 sm:$0xff]   ;;  %v17422_v58 = vld [vmem:[#allocation25 + $0xf04] ss:$16 sps:$4 sm:$0xff]  }
 0xd0c   :  { %14024 = vmatprep.subr.bf16.mxu1 %v17329_v48  ;;  %v9332_v48 = vmax.f32 %v14178_v29, 0.0  ;;  %v17434_v29 = vld [vmem:[#allocation25 + $0xf44] ss:$16 sps:$4 sm:$0xff]  }
 0xd0d   :  { %v9331_v2 = vmax.f32 %v14177_v10, 0.0  ;;  %v17439_v10 = vld [vmem:[#allocation25 + $0xf48] ss:$16 sps:$4 sm:$0xff]  }
 0xd0e   :  { %13514 = vmatpush1.bf16.msra.mxu0 %v17328_v39  ;;  %v17379_v39 = vld [vmem:[#allocation25 + $0xe08] ss:$16 sps:$4 sm:$0xff]  }
 0xd0f   :  { %14026 = vmatpush1.bf16.msra.mxu1 %v17331_v40  ;;  %13516 = vmatprep.subr.bf16.mxu0 %v17332_v61  ;;  %v9318_v40 = vmax.f32 %v14180_v19, 0.0  ;;  %v17386_v61 = vld [vmem:[#allocation25 + $0xe44] ss:$16 sps:$4 sm:$0xff]   ;;  %v17443_v19 = vld [vmem:[#allocation25 + $0xf6c] ss:$16 sps:$4 sm:$0xff]  }
 0xd10   :  { %14028 = vmatprep.subr.bf16.mxu1 %v17335_v9  ;;  %v17388_v9 = vld [vmem:[#allocation25 + $0xe40] ss:$16 sps:$4 sm:$0xff]  }
 0xd12   :  { %13518 = vmatpush1.bf16.msra.mxu0 %v17334_v11  ;;  %v17391_v11 = vld [vmem:[#allocation25 + $0xe48] ss:$16 sps:$4 sm:$0xff]  }
 0xd13   :  { %14030 = vmatpush1.bf16.msra.mxu1 %v17337_v57  ;;  %13520 = vmatprep.subr.bf16.mxu0 %v17338_v35  ;;  %v17392_v57 = vld [vmem:[#allocation25 + $0xe64] ss:$16 sps:$4 sm:$0xff]   ;;  %v17395_v35 = vld [vmem:[#allocation25 + $0xe6c] ss:$16 sps:$4 sm:$0xff]  }
 0xd14   :  { %14032 = vmatprep.subr.bf16.mxu1 %v17341_v34  ;;  %v17394_v34 = vld [vmem:[#allocation25 + $0xe60] ss:$16 sps:$4 sm:$0xff]  }
 0xd16   :  { %13522 = vmatpush1.bf16.msra.mxu0 %v17340_v55  ;;  %v17397_v55 = vld [vmem:[#allocation25 + $0xe68] ss:$16 sps:$4 sm:$0xff]  }
 0xd17   :  { %14034 = vmatpush1.bf16.msra.mxu1 %v17343_v63  ;;  %13524 = vmatprep.subr.bf16.mxu0 %v17344_v62  ;;  %v17398_v63 = vld [vmem:[#allocation25 + $0xe84] ss:$16 sps:$4 sm:$0xff]   ;;  %v17401_v62 = vld [vmem:[#allocation25 + $0xe8c] ss:$16 sps:$4 sm:$0xff]  }
 0xd18   :  { %14036 = vmatprep.subr.bf16.mxu1 %v17347_v51  ;;  %v17400_v51 = vld [vmem:[#allocation25 + $0xe80] ss:$16 sps:$4 sm:$0xff]  }
 0xd1a   :  { %13526 = vmatpush1.bf16.msra.mxu0 %v17346_v3  ;;  %v17403_v3 = vld [vmem:[#allocation25 + $0xe88] ss:$16 sps:$4 sm:$0xff]  }
 0xd1b   :  { %14038 = vmatpush1.bf16.msra.mxu1 %v17349_v41  ;;  %13528 = vmatprep.subr.bf16.mxu0 %v17350_v33  ;;  %v17404_v41 = vld [vmem:[#allocation25 + $0xea4] ss:$16 sps:$4 sm:$0xff]   ;;  %v17407_v33 = vld [vmem:[#allocation25 + $0xeac] ss:$16 sps:$4 sm:$0xff]  }
 0xd1c   :  { %14040 = vmatprep.subr.bf16.mxu1 %v17353_v8  ;;  %v17406_v8 = vld [vmem:[#allocation25 + $0xea0] ss:$16 sps:$4 sm:$0xff]  }
 0xd1e   :  { %13530 = vmatpush1.bf16.msra.mxu0 %v17352_v0  ;;  %v17409_v0 = vld [vmem:[#allocation25 + $0xea8] ss:$16 sps:$4 sm:$0xff]  }
 0xd1f   :  { %14042 = vmatpush1.bf16.msra.mxu1 %v17355_v1  ;;  %13532 = vmatprep.subr.bf16.mxu0 %v17356_v13  ;;  %v17410_v1 = vld [vmem:[#allocation25 + $0xec4] ss:$16 sps:$4 sm:$0xff]   ;;  %v17413_v13 = vld [vmem:[#allocation25 + $0xecc] ss:$16 sps:$4 sm:$0xff]  }
 0xd20   :  { %14044 = vmatprep.subr.bf16.mxu1 %v17359_v23  ;;  %v17412_v23 = vld [vmem:[#allocation25 + $0xec0] ss:$16 sps:$4 sm:$0xff]  }
 0xd22   :  { %13534 = vmatpush1.bf16.msra.mxu0 %v17358_v31  ;;  %v17415_v31 = vld [vmem:[#allocation25 + $0xec8] ss:$16 sps:$4 sm:$0xff]  }
 0xd23   :  { %14046 = vmatpush1.bf16.msra.mxu1 %v17361_v6  ;;  %13536 = vmatprep.subr.bf16.mxu0 %v17362_v7  ;;  %v17416_v6 = vld [vmem:[#allocation25 + $0xee4] ss:$16 sps:$4 sm:$0xff]   ;;  %v17419_v7 = vld [vmem:[#allocation25 + $0xeec] ss:$16 sps:$4 sm:$0xff]  }
 0xd24   :  { %14048 = vmatprep.subr.bf16.mxu1 %v17365_v28  ;;  %v17418_v28 = vld [vmem:[#allocation25 + $0xee0] ss:$16 sps:$4 sm:$0xff]  }
 0xd26   :  { %13538 = vmatpush1.bf16.msra.mxu0 %v17364_v56  ;;  %v17421_v56 = vld [vmem:[#allocation25 + $0xee8] ss:$16 sps:$4 sm:$0xff]  }
 0xd27   :  { %14050 = vmatpush1.bf16.msra.mxu1 %v17367_v46  ;;  %13540 = vmatprep.subr.bf16.mxu0 %v17368_v12  ;;  %v17425_v46 = vld [vmem:[#allocation25 + $0xf0c] ss:$16 sps:$4 sm:$0xff]   ;;  %v17424_v12 = vld [vmem:[#allocation25 + $0xf00] ss:$16 sps:$4 sm:$0xff]  }
 0xd28   :  { %14052 = vmatprep.subr.bf16.mxu1 %v17371_v4  ;;  %v17427_v4 = vld [vmem:[#allocation25 + $0xf08] ss:$16 sps:$4 sm:$0xff]  }
 0xd2a   :  { %13542 = vmatpush1.bf16.msra.mxu0 %v17370_v21  ;;  %v17428_v21 = vld [vmem:[#allocation25 + $0xf24] ss:$16 sps:$4 sm:$0xff]  }
 0xd2b   :  { %14054 = vmatpush1.bf16.msra.mxu1 %v17373_v24  ;;  %13544 = vmatprep.subr.bf16.mxu0 %v17374_v50  ;;  %v17430_v24 = vld [vmem:[#allocation25 + $0xf20] ss:$16 sps:$4 sm:$0xff]   ;;  %v17433_v50 = vld [vmem:[#allocation25 + $0xf28] ss:$16 sps:$4 sm:$0xff]  }
 0xd2c   :  { %14056 = vmatprep.subr.bf16.mxu1 %v17377_v14  ;;  %v17437_v14 = vld [vmem:[#allocation25 + $0xf4c] ss:$16 sps:$4 sm:$0xff]  }
 0xd2d   :  { %9884 = vmatmul.mubr.f32.vlgmr.msra.gmra.mrb[48].mxu0 %v9315_v18 }
 0xd2e   :  { %10500 = vmatmul.mubr.f32.vlgmr.msra.gmra.mrb[48].mxu1 %v9315_v18  ;;  %9889 = vmatprep.mubr.f32.mxu0 %v9332_v48  ;;  %v17436_v18 = vld [vmem:[#allocation25 + $0xf40] ss:$16 sps:$4 sm:$0xff]  }
 0xd2f   :  { %13546 = vmatpush1.bf16.msra.mxu0 %v17376_v53  ;;  %10505 = vmatprep.mubr.f32.mxu1 %v9332_v48  ;;  %v17440_v53 = vld [vmem:[#allocation25 + $0xf64] ss:$16 sps:$4 sm:$0xff]   ;;  %v17442_v48 = vld [vmem:[#allocation25 + $0xf60] ss:$16 sps:$4 sm:$0xff]  }
 0xd30   :  { %14058 = vmatpush1.bf16.msra.mxu1 %v17379_v39  ;;  %13548 = vmatprep.subr.bf16.mxu0 %v17380_v36  ;;  %v17445_v39 = vld [vmem:[#allocation25 + $0xf68] ss:$16 sps:$4 sm:$0xff]   ;;  %v17446_v36 = vld [vmem:[#allocation25 + $0xf84] ss:$16 sps:$4 sm:$0xff]  }
 0xd31   :  { %9890 = vmatmul.mubr.f32.gmra.mrb[50].mxu0 %v9331_v2  ;;  %14060 = vmatprep.subr.bf16.mxu1 %v17383_v49  ;;  %v17449_v49 = vld [vmem:[#allocation25 + $0xf8c] ss:$16 sps:$4 sm:$0xff]  }
 0xd32   :  { %10506 = vmatmul.mubr.f32.gmra.mrb[50].mxu1 %v9331_v2  ;;  %9960 = vmatprep.mubr.f32.mxu0 %v9318_v40  ;;  %v17448_v2 = vld [vmem:[#allocation25 + $0xf80] ss:$16 sps:$4 sm:$0xff]  }
 0xd33   :  { %13550 = vmatpush1.bf16.msra.mxu0 %v17382_v43  ;;  %10576 = vmatprep.mubr.f32.mxu1 %v9318_v40  ;;  %v17451_v43 = vld [vmem:[#allocation25 + $0xf88] ss:$16 sps:$4 sm:$0xff]   ;;  %v17452_v40 = vld [vmem:[#allocation25 + $0xfa4] ss:$16 sps:$4 sm:$0xff]  }
 0xd34   :  { %14062 = vmatpush1.bf16.msra.mxu1 %v17385_v22  ;;  %13552 = vmatprep.subr.bf16.mxu0 %v17386_v61  ;;  %v17455_v22 = vld [vmem:[#allocation25 + $0xfac] ss:$16 sps:$4 sm:$0xff]   ;;  %v17454_v61 = vld [vmem:[#allocation25 + $0xfa0] ss:$16 sps:$4 sm:$0xff]  }
 0xd35   :  { %14064 = vmatprep.subr.bf16.mxu1 %v17389_v38  ;;  %v17457_v38 = vld [vmem:[#allocation25 + $0xfa8] ss:$16 sps:$4 sm:$0xff]  }
 0xd37   :  { %13554 = vmatpush1.bf16.msra.mxu0 %v17388_v9  ;;  %v17458_v9 = vld [vmem:[#allocation25 + $0xfc4] ss:$16 sps:$4 sm:$0xff]  }
 0xd38   :  { %14066 = vmatpush1.bf16.msra.mxu1 %v17391_v11  ;;  %13556 = vmatprep.subr.bf16.mxu0 %v17392_v57  ;;  %v17461_v11 = vld [vmem:[#allocation25 + $0xfcc] ss:$16 sps:$4 sm:$0xff]   ;;  %v17460_v57 = vld [vmem:[#allocation25 + $0xfc0] ss:$16 sps:$4 sm:$0xff]  }
 0xd39   :  { %14068 = vmatprep.subr.bf16.mxu1 %v17395_v35  ;;  %v17562_v35 = vld [vmem:[#allocation23 + $0x8] sm:$0xff] }
 0xd3b   :  { %13558 = vmatpush1.bf16.msra.mxu0 %v17394_v34  ;;  %v8050_v34 = vrot.slane %v17562_v35, %v8017_v5 }
 0xd3c   :  { %14070 = vmatpush1.bf16.msra.mxu1 %v17397_v55  ;;  %13560 = vmatprep.subr.bf16.mxu0 %v17398_v63  ;;  %v17463_v55 = vld [vmem:[#allocation25 + $0xfc8] ss:$16 sps:$4 sm:$0xff]   ;;  %v17464_v63 = vld [vmem:[#allocation25 + $0xfe4] ss:$16 sps:$4 sm:$0xff]  }
 0xd3d   :  { %14072 = vmatprep.subr.bf16.mxu1 %v17401_v62  ;;  %v17467_v62 = vld [vmem:[#allocation25 + $0xfec] ss:$16 sps:$4 sm:$0xff]   ;;  %v14181_v5 = vadd.f32 %v19087_v60, %v8050_v34 }
 0xd3f   :  { %13562 = vmatpush1.bf16.msra.mxu0 %v17400_v51  ;;  %v17466_v51 = vld [vmem:[#allocation25 + $0xfe0] ss:$16 sps:$4 sm:$0xff]  }
 0xd40   :  { %14074 = vmatpush1.bf16.msra.mxu1 %v17403_v3  ;;  %13564 = vmatprep.subr.bf16.mxu0 %v17404_v41  ;;  %v14179_v3 = vadd.f32 %v19079_v17, %v8050_v34  ;;  %v17469_v41 = vld [vmem:[#allocation25 + $0xfe8] ss:$16 sps:$4 sm:$0xff]   ;;  %v9335_v17 = vld [vmem:[#allocation26] sm:$0xf] }
 0xd41   :  { %14076 = vmatprep.subr.bf16.mxu1 %v17407_v33  ;;  %v14182_v33 = vadd.f32 %v19091_v25, %v19140_v52  ;;  %v9344_v25 = vrot.slane %v9335_v17, %v18406_v45 }
 0xd42   :  { %v9317_v37 = vmax.f32 %v14179_v3, 0.0 }
 0xd43   :  { %13566 = vmatpush1.bf16.msra.mxu0 %v17406_v8  ;;  %v9334_v8 = vmax.f32 %v14182_v33, 0.0 }
 0xd44   :  { %14078 = vmatpush1.bf16.msra.mxu1 %v17409_v0  ;;  %13568 = vmatprep.subr.bf16.mxu0 %v17410_v1  ;;  %v9333_v0 = vmax.f32 %v14181_v5, 0.0  ;;  %v9340_v1 = vrot.slane %v9335_v17, %v18400_v42 }
 0xd45   :  { %14080 = vmatprep.subr.bf16.mxu1 %v17413_v13  ;;  %v9348_v13 = vrot.slane %v9335_v17, %v18403_v44 }
 0xd47   :  { %13570 = vmatpush1.bf16.msra.mxu0 %v17412_v23  ;;  %v9352_v23 = vrot.slane %v9335_v17, %v18409_v47 }
 0xd48   :  { %14082 = vmatpush1.bf16.msra.mxu1 %v17415_v31  ;;  %13572 = vmatprep.subr.bf16.mxu0 %v17416_v6 }
 0xd49   :  { %14084 = vmatprep.subr.bf16.mxu1 %v17419_v7 }
 0xd4b   :  { %13574 = vmatpush1.bf16.msra.mxu0 %v17418_v28 }
 0xd4c   :  { %14086 = vmatpush1.bf16.msra.mxu1 %v17421_v56  ;;  %13576 = vmatprep.subr.bf16.mxu0 %v17422_v58 }
 0xd4d   :  { %14088 = vmatprep.subr.bf16.mxu1 %v17425_v46 }
 0xd4f   :  { %13578 = vmatpush1.bf16.msra.mxu0 %v17424_v12 }
 0xd50   :  { %14090 = vmatpush1.bf16.msra.mxu1 %v17427_v4  ;;  %13580 = vmatprep.subr.bf16.mxu0 %v17428_v21 }
 0xd51   :  { %14092 = vmatprep.subr.bf16.mxu1 %v17431_v16 }
 0xd53   :  { %13582 = vmatpush1.bf16.msra.mxu0 %v17430_v24 }
 0xd54   :  { %14094 = vmatpush1.bf16.msra.mxu1 %v17433_v50  ;;  %13584 = vmatprep.subr.bf16.mxu0 %v17434_v29 }
 0xd55   :  { %14096 = vmatprep.subr.bf16.mxu1 %v17437_v14 }
 0xd57   :  { %13586 = vmatpush1.bf16.msra.mxu0 %v17436_v18 }
 0xd58   :  { %14098 = vmatpush1.bf16.msra.mxu1 %v17439_v10  ;;  %13588 = vmatprep.subr.bf16.mxu0 %v17440_v53 }
 0xd59   :  { %14100 = vmatprep.subr.bf16.mxu1 %v17443_v19 }
 0xd5b   :  { %13590 = vmatpush1.bf16.msra.mxu0 %v17442_v48 }
 0xd5c   :  { %14102 = vmatpush1.bf16.msra.mxu1 %v17445_v39  ;;  %13592 = vmatprep.subr.bf16.mxu0 %v17446_v36 }
 0xd5d   :  { %14104 = vmatprep.subr.bf16.mxu1 %v17449_v49 }
 0xd5f   :  { %13594 = vmatpush1.bf16.msra.mxu0 %v17448_v2 }
 0xd60   :  { %14106 = vmatpush1.bf16.msra.mxu1 %v17451_v43  ;;  %13596 = vmatprep.subr.bf16.mxu0 %v17452_v40 }
 0xd61   :  { %14108 = vmatprep.subr.bf16.mxu1 %v17455_v22 }
 0xd63   :  { %13598 = vmatpush1.bf16.msra.mxu0 %v17454_v61 }
 0xd64   :  { %14110 = vmatpush1.bf16.msra.mxu1 %v17457_v38  ;;  %13600 = vmatprep.subr.bf16.mxu0 %v17458_v9 }
 0xd65   :  { %14112 = vmatprep.subr.bf16.mxu1 %v17461_v11 }
 0xd67   :  { %13602 = vmatpush1.bf16.msra.mxu0 %v17460_v57 }
 0xd68   :  { %14114 = vmatpush1.bf16.msra.mxu1 %v17463_v55  ;;  %13604 = vmatprep.subr.bf16.mxu0 %v17464_v63 }
 0xd69   :  { %14116 = vmatprep.subr.bf16.mxu1 %v17467_v62 }
 0xd6b   :  { %13606 = vmatpush1.bf16.msra.mxu0 %v17466_v51 }
 0xd6c   :  { %14118 = vmatpush1.bf16.msra.mxu1 %v17469_v41 }
 0xd6e   :  { %9961 = vmatmul.mubr.f32.vlgmr.msra.gmra.mrb[48].mxu0 %v9317_v37 }
 0xd6f   :  { %10577 = vmatmul.mubr.f32.vlgmr.msra.gmra.mrb[48].mxu1 %v9317_v37  ;;  %9966 = vmatprep.mubr.f32.mxu0 %v9334_v8 }
 0xd70   :  { %10582 = vmatprep.mubr.f32.mxu1 %v9334_v8 }
 0xd72   :  { %9967 = vmatmul.mubr.f32.gmra.mrb[50].mxu0 %v9333_v0 }
 0xd73   :  { %10583 = vmatmul.mubr.f32.gmra.mrb[50].mxu1 %v9333_v0 }
 0xe41   :  { %v9962_v52 = vpop.f32.mrb[48].mxu0 }
 0xe42   :  { %v14183_v60 = vadd.f32 %v9962_v52, %v9340_v1  ;;  %v10578_v31 = vpop.f32.mrb[48].mxu1  ;;  %v9964_v6 = vpop.f32.mrb[49].mxu0 }
 0xe43   :  { %v14187_v7 = vadd.f32 %v10578_v31, %v9348_v13  ;;  %v14184_v28 = vadd.f32 %v9964_v6, %v9344_v25  ;;  %v10580_v56 = vpop.f32.mrb[49].mxu1  ;;  %v10597_v31 = vld [vmem:[#allocation28] sm:$0xf]  ;;  %v10598_v6 = vld [vmem:[#allocation29] sm:$0xf] }
 0xe44   :  { %v10589_v58 = vadd.f32 %v14183_v60, %v18886_v30  ;;  %v14188_v12 = vadd.f32 %v10580_v56, %v9352_v23  ;;  %v10663_v56 = vrot.slane %v10597_v31, %v18403_v44 }
 0xe45   :  { %v10590_v46 = vadd.f32 %v14184_v28, %v18884_v20  ;;  %v9968_v4 = vpop.f32.mrb[50].mxu0  ;;  %v10591_v50 = vadd.f32 %v14187_v7, %v18892_v27  ;;  %v10655_v7 = vrot.slane %v10597_v31, %v18400_v42  ;;  %v10659_v28 = vrot.slane %v10597_v31, %v18406_v45 }
 0xe46   :  { %v14185_v21 = vadd.f32 %v9968_v4, %v9340_v1  ;;  %v10584_v16 = vpop.f32.mrb[50].mxu1  ;;  %v9970_v24 = vpop.f32.mrb[51].mxu0  ;;  %v10592_v19 = vadd.f32 %v14188_v12, %v18915_v32 }
 0xe47   :  { %v10599_v29 = vadd.f32 %v10590_v46, %v10589_v58  ;;  %v14189_v14 = vadd.f32 %v10584_v16, %v9348_v13  ;;  %v14186_v18 = vadd.f32 %v9970_v24, %v9344_v25  ;;  %v10586_v10 = vpop.f32.mrb[51].mxu1  ;;  %v10684_v24 = vrot.slane %v10598_v6, %v18400_v42 }
 0xe48   :  { %v10593_v53 = vadd.f32 %v14185_v21, %v18906_v59  ;;  %v14190_v30 = vadd.f32 %v10586_v10, %v9352_v23 }
 0xe49   :  { %v10594_v48 = vadd.f32 %v14186_v18, %v18904_v54  ;;  %v10600_v39 = vadd.f32 %v10599_v29, %v10591_v50  ;;  %v10595_v20 = vadd.f32 %v14189_v14, %v18908_v15  ;;  %v10692_v29 = vrot.slane %v10598_v6, %v18403_v44 }
 0xe4a   :  { %v10596_v2 = vadd.f32 %v14190_v30, %v18923_v26  ;;  %v10696_v14 = vrot.slane %v10598_v6, %v18409_v47 }
 0xe4b   :  { %v10604_v36 = vadd.f32 %v10594_v48, %v10593_v53  ;;  %v10601_v49 = vadd.f32 %v10600_v39, %v10592_v19 }
 0xe4d   :  { %10602 = vadd.xlane.f32.xlu1 %v10601_v49  ;;  %v10605_v27 = vadd.f32 %v10604_v36, %v10595_v20 }
 0xe4f   :  { %v10606_v43 = vadd.f32 %v10605_v27, %v10596_v2 }
 0xe51   :  { %10607 = vadd.xlane.f32.xlu0 %v10606_v43 }
 0xeda   :  { %v10603_v40 = vpop.xlane.xlu1 %10602 }
 0xedb   :  { %v10609_v22 = vmul.f32 0.001953125, %v10603_v40 }
 0xedd   :  { %v10611_v61 = vsub.f32 %v10589_v58, %v10609_v22  ;;  %v10612_v59 = vsub.f32 %v10590_v46, %v10609_v22  ;;  %v10613_v38 = vsub.f32 %v10591_v50, %v10609_v22  ;;  %v10614_v9 = vsub.f32 %v10592_v19, %v10609_v22 }
 0xede   :  { %v10608_v32 = vpop.xlane.xlu0 %10607  ;;  %v10667_v58 = vrot.slane %v10597_v31, %v18409_v47  ;;  %v10688_v50 = vrot.slane %v10598_v6, %v18406_v45 }
 0xedf   :  { %v10610_v54 = vmul.f32 0.001953125, %v10608_v32  ;;  %v10619_v11 = vmul.f32 %v10611_v61, %v10611_v61  ;;  %v10620_v57 = vmul.f32 %v10612_v59, %v10612_v59  ;;  %v10621_v35 = vmul.f32 %v10613_v38, %v10613_v38 }
 0xee0   :  { %v10622_v26 = vmul.f32 %v10614_v9, %v10614_v9 }
 0xee1   :  { %v10615_v15 = vsub.f32 %v10593_v53, %v10610_v54  ;;  %v10616_v34 = vsub.f32 %v10594_v48, %v10610_v54  ;;  %v10627_v55 = vadd.f32 %v10620_v57, %v10619_v11  ;;  %v10617_v63 = vsub.f32 %v10595_v20, %v10610_v54 }
 0xee2   :  { %v10618_v51 = vsub.f32 %v10596_v2, %v10610_v54 }
 0xee3   :  { %v10628_v62 = vadd.f32 %v10627_v55, %v10621_v35  ;;  %v10623_v3 = vmul.f32 %v10615_v15, %v10615_v15  ;;  %v10624_v41 = vmul.f32 %v10616_v34, %v10616_v34  ;;  %v10625_v37 = vmul.f32 %v10617_v63, %v10617_v63 }
 0xee4   :  { %v10626_v8 = vmul.f32 %v10618_v51, %v10618_v51 }
 0xee5   :  { %v10629_v33 = vadd.f32 %v10628_v62, %v10622_v26  ;;  %v10632_v5 = vadd.f32 %v10624_v41, %v10623_v3 }
 0xee7   :  { %10630 = vadd.xlane.f32.xlu1 %v10629_v33  ;;  %v10633_v0 = vadd.f32 %v10632_v5, %v10625_v37 }
 0xee9   :  { %v10634_v17 = vadd.f32 %v10633_v0, %v10626_v8 }
 0xeeb   :  { %10635 = vadd.xlane.f32.xlu0 %v10634_v17 }
 0xf74   :  { %v10631_v1 = vpop.xlane.xlu1 %10630 }
 0xf75   :  { %v10637_v13 = vmul.f32 0.001953125, %v10631_v1 }
 0xf77   :  { %v10639_v25 = vadd.f32 1e-05, %v10637_v13 }
 0xf78   :  { %v10636_v52 = vpop.xlane.xlu0 %10635 }
 0xf79   :  { %17538 = vrsqrt.f32 %v10639_v25  ;;  %v10638_v23 = vmul.f32 0.001953125, %v10636_v52 }
 0xf7b   :  { %v10640_v60 = vadd.f32 1e-05, %v10638_v23 }
 0xf7d   :  { %17540 = vrsqrt.f32 %v10640_v60 }
 0xf83   :  { %v17539_v46 = vpop.eup %17538 }
 0xf84   :  { %v10643_v12 = vmul.f32 %v17539_v46, %v10611_v61  ;;  %v10644_v4 = vmul.f32 %v17539_v46, %v10612_v59  ;;  %v10645_v21 = vmul.f32 %v17539_v46, %v10613_v38  ;;  %v10646_v16 = vmul.f32 %v17539_v46, %v10614_v9 }
 0xf86   :  { %v10672_v18 = vmul.f32 %v10655_v7, %v10643_v12  ;;  %v10673_v10 = vmul.f32 %v10659_v28, %v10644_v4  ;;  %v10674_v53 = vmul.f32 %v10663_v56, %v10645_v21  ;;  %v10675_v19 = vmul.f32 %v10667_v58, %v10646_v16 }
 0xf87   :  { %v17541_v48 = vpop.eup %17540 }
 0xf88   :  { %v10647_v30 = vmul.f32 %v17541_v48, %v10615_v15  ;;  %v10648_v39 = vmul.f32 %v17541_v48, %v10616_v34  ;;  %v10649_v20 = vmul.f32 %v17541_v48, %v10617_v63  ;;  %v10650_v36 = vmul.f32 %v17541_v48, %v10618_v51 }
 0xf89   :  { %v10701_v49 = vadd.f32 %v10684_v24, %v10672_v18  ;;  %v10702_v2 = vadd.f32 %v10688_v50, %v10673_v10  ;;  %v10703_v27 = vadd.f32 %v10692_v29, %v10674_v53  ;;  %v10704_v43 = vadd.f32 %v10696_v14, %v10675_v19 }
 0xf8a   :  { %v10676_v42 = vmul.f32 %v10655_v7, %v10647_v30  ;;  %v10677_v45 = vmul.f32 %v10659_v28, %v10648_v39  ;;  %v10678_v44 = vmul.f32 %v10663_v56, %v10649_v20  ;;  %v10679_v40 = vmul.f32 %v10667_v58, %v10650_v36 }
 0xf8b   :  { %10709 = vst [vmem:[#allocation31] sm:$0xff] %v10701_v49  ;;  %10710 = vst [vmem:[#allocation31 + $0x8] sm:$0xff] %v10702_v2 }
 0xf8c   :  { %10711 = vst [vmem:[#allocation31 + $0x10] sm:$0xff] %v10703_v27  ;;  %10712 = vst [vmem:[#allocation31 + $0x18] sm:$0xff] %v10704_v43  ;;  %v10705_v47 = vadd.f32 %v10684_v24, %v10676_v42  ;;  %v10706_v22 = vadd.f32 %v10688_v50, %v10677_v45  ;;  %v10707_v61 = vadd.f32 %v10692_v29, %v10678_v44 }
 0xf8d   :  { %v10708_v59 = vadd.f32 %v10696_v14, %v10679_v40 }
 0xf8e   :  { %10713 = vst [vmem:[#allocation31 + $0x20] sm:$0xff] %v10705_v47  ;;  %10714 = vst [vmem:[#allocation31 + $0x28] sm:$0xff] %v10706_v22 }
 0xf8f   :  { %10715 = vst [vmem:[#allocation31 + $0x30] sm:$0xff] %v10707_v61  ;;  %10716 = vst [vmem:[#allocation31 + $0x38] sm:$0xff] %v10708_v59 }
 0xf90   :  { %17970 = shalt.err (!%p17967_p8)
}
 0xf91   :  { %s19223_s27 = sld [smem:[#allocation47_spill]] }
 0xf97   :  { %s17971_s30 = scalar_lea.hbm %s19223_s27, 1024 }
 0xf98   :  { %p17972_p9 = scmp.ne.s32.totalorder %s19223_s27, %s17971_s30  ;;  %p17975_p10 = scmp.lt.u32.totalorder %s17971_s30, %s19223_s27 }
 0xf9a   :  { %p17977_p11 = pnand %p17975_p10, %p17972_p9 }
 0xf9c   :  { %17980 = shalt.err (!%p17977_p11)
}
 0xf9d   :  { %10728 = dma.vmem_to_hbm [thread:$0]  %s10723_s23, 1024, %s19223_s27, [#allocation4], %s18014_s15, %s18014_s15, %s18015_s24  }
 0xf9e   :  { %18001 = dma.done.wait [#allocation4], 1024  }
 0xf9f   :  { %18002 = vsyncadd [#allocation4], 4294966272 }
 0xfa0   :  { %10732 = vsyncpa [#allocation3], 1 }
 0xfa1   :  { %10733 = vsyncpa [#allocation6], 1 }
 0xfa2   :  { %10734 = vsyncpa [#allocation9], 1 }
 0xfa3   :  { %10735 = vsyncpa [#allocation12], 1 }
 0xfa4   :  { %10736 = vsyncpa [#allocation15], 1 }
 0xfa5   :  { %10737 = vsyncpa [#allocation18], 1 }
 0xfa6   :  { %10738 = vsyncpa [#allocation21], 1 }
 0xfa7   :  { %10739 = vsyncpa [#allocation24], 1 }
 0xfa8   :  { %10740 = vsyncpa [#allocation27], 1 }
 0xfa9   :  { %10741 = vsyncpa [#allocation30], 1 }
 0xfaa   :  { %10742 = vsyncpa [#allocation4], 1 }

</bundles_post_ra>
